<compile_context>
chip_gen: v5e
topology: v5e:2x2
jax: 0.10.0
libtpu: 0.0.40
codegen_flags: <defaults>
</compile_context>

<pallas_src>
import functools

import jax
import jax.numpy as jnp
from jax.experimental import pallas as pl
from jax.experimental.pallas import tpu as pltpu

EPS = 1e-5  # nn.BatchNorm2d default eps


# ---------------------------------------------------------------------------
# Kernels
# ---------------------------------------------------------------------------
def _conv_bn_relu_kernel(p_ref, w1_ref, g1_ref, be1_ref,
                         w2_ref, g2_ref, be2_ref, o_ref):
    """conv1(4x4 as im2col matmul)+BN+ReLU + conv2(1x1 matmul)+BN+ReLU.

    Training-mode BatchNorm (biased variance over all N*H_out*W_out rows).
    Conv biases are omitted: they cancel exactly in (h - mean(h)).
    One-pass stats: mean = sum/R, var = max(sumsq/R - mean^2, 0), then a
    single fused multiply-add (scale, shift) per activation element.
    """
    rows = p_ref.shape[0]
    inv_r = 1.0 / rows

    # conv1: (R,16) @ (16,64)
    h1 = jnp.dot(p_ref[...], w1_ref[...], preferred_element_type=jnp.float32)
    s1 = jnp.sum(h1, axis=0, keepdims=True)
    q1 = jnp.sum(h1 * h1, axis=0, keepdims=True)
    m1 = s1 * inv_r
    v1 = jnp.maximum(q1 * inv_r - m1 * m1, 0.0)
    scale1 = g1_ref[...] * jax.lax.rsqrt(v1 + EPS)
    shift1 = be1_ref[...] - m1 * scale1
    a1 = jnp.maximum(h1 * scale1 + shift1, 0.0)

    # conv2 (1x1): (R,64) @ (64,16)
    h2 = jnp.dot(a1, w2_ref[...], preferred_element_type=jnp.float32)
    s2 = jnp.sum(h2, axis=0, keepdims=True)
    q2 = jnp.sum(h2 * h2, axis=0, keepdims=True)
    m2 = s2 * inv_r
    v2 = jnp.maximum(q2 * inv_r - m2 * m2, 0.0)
    scale2 = g2_ref[...] * jax.lax.rsqrt(v2 + EPS)
    shift2 = be2_ref[...] - m2 * scale2
    o_ref[...] = jnp.maximum(h2 * scale2 + shift2, 0.0)


def _fc_kernel(z_ref, w1_ref, b1_ref, w2_ref, b2_ref, o_ref):
    """Linear(1584,1024)+ReLU+Linear(1024,512), bf16 operands, f32 accumulate."""
    z = z_ref[...].astype(jnp.bfloat16)
    h = jnp.dot(z, w1_ref[...], preferred_element_type=jnp.float32) + b1_ref[...]
    h = jnp.maximum(h, 0.0).astype(jnp.bfloat16)
    o_ref[...] = jnp.dot(h, w2_ref[...],
                         preferred_element_type=jnp.float32) + b2_ref[...]


# ---------------------------------------------------------------------------
# pallas_call wrappers
# ---------------------------------------------------------------------------
def _full_block(shape):
    return pl.BlockSpec(shape, lambda i: tuple(0 for _ in shape))


def pallas_conv_stage(patches, w1m, g1, be1, w2m, g2, be2):
    # Whole batch in one grid step: training-mode BN stats must span all rows.
    inputs = (patches, w1m, g1, be1, w2m, g2, be2)
    rows = patches.shape[0]
    cout = w2m.shape[1]
    return pl.pallas_call(
        _conv_bn_relu_kernel,
        grid=(1,),
        in_specs=[_full_block(a.shape) for a in inputs],
        out_specs=_full_block((rows, cout)),
        out_shape=jax.ShapeDtypeStruct((rows, cout), jnp.float32),
        compiler_params=pltpu.CompilerParams(
            dimension_semantics=("arbitrary",),
            vmem_limit_bytes=32 * 1024 * 1024,
        ),
    )(*inputs)


def pallas_fc_stage(z, wf1, bf1, wf2, bf2, *, max_tile_m=256):
    n, d_in = z.shape
    d_h = wf1.shape[1]
    d_out = wf2.shape[1]
    tm = n if n <= max_tile_m else max_tile_m
    grid = (pl.cdiv(n, tm),)
    return pl.pallas_call(
        _fc_kernel,
        grid=grid,
        in_specs=[
            pl.BlockSpec((tm, d_in), lambda i: (i, 0)),     # activations: tiled rows
            pl.BlockSpec((d_in, d_h), lambda i: (0, 0)),    # Wf1 (bf16): resident
            pl.BlockSpec((1, d_h), lambda i: (0, 0)),
            pl.BlockSpec((d_h, d_out), lambda i: (0, 0)),   # Wf2 (bf16): resident
            pl.BlockSpec((1, d_out), lambda i: (0, 0)),
        ],
        out_specs=pl.BlockSpec((tm, d_out), lambda i: (i, 0)),
        out_shape=jax.ShapeDtypeStruct((n, d_out), jnp.float32),
        compiler_params=pltpu.CompilerParams(
            dimension_semantics=("parallel",),   # rows shard across v7x TCs
            vmem_limit_bytes=32 * 1024 * 1024,
        ),
    )(z, wf1, bf1, wf2, bf2)


# ---------------------------------------------------------------------------
# Parameter preparation (run ONCE, outside jit): matmul-ready / permuted / bf16
# ---------------------------------------------------------------------------
def prepare_params(params):
    KH, KW = 4, 4
    w1m = params["W1"].reshape(64, KH * KW).T            # (16, 64)
    w2m = params["W2"].reshape(16, 64).T                 # (64, 16)
    # Torch flatten of (N,16,1,99) indexes rows of Wf1 by c*99+w; our conv
    # output reshapes to columns w*16+c.  Permute Wf1 rows so the flatten is
    # a plain contiguous reshape (no transpose between the two kernels).
    wf1p = (params["Wf1"].reshape(16, 99, 1024)
            .transpose(1, 0, 2).reshape(16 * 99, 1024))
    return {
        "W1m": w1m,
        "g1": params["g1"].reshape(1, -1),
        "be1": params["be1"].reshape(1, -1),
        "W2m": w2m,
        "g2": params["g2"].reshape(1, -1),
        "be2": params["be2"].reshape(1, -1),
        "Wf1": wf1p.astype(jnp.bfloat16),                 # halve FC weight stream
        "bf1": params["bf1"].reshape(1, -1),
        "Wf2": params["Wf2"].astype(jnp.bfloat16),
        "bf2": params["bf2"].reshape(1, -1),
    }


# ---------------------------------------------------------------------------
# Full forward (im2col glue in JAX, hot path in Pallas)
# ---------------------------------------------------------------------------
@functools.partial(jax.jit, static_argnames=())
def x4_def_pretrain_forward(x, pparams):
    N, _, H, W = x.shape            # (N, 1, 4, 99)
    KH, KW = 4, 4

    # ConstantPad2d((kw//2, kw//2 - 1, 0, 0)) = pad width left 2, right 1
    xp = jnp.pad(x, ((0, 0), (0, 0), (0, 0), (2, 1)))        # (N,1,4,102)
    w_out = xp.shape[-1] - KW + 1                            # 99

    # im2col: rows ordered (n, w), patch flattened (kh, kw) to match
    # torch Conv2d weight.reshape(out, in*kh*kw)
    idx = jnp.arange(w_out)[:, None] + jnp.arange(KW)[None, :]     # (99, 4)
    patches = xp[:, 0, :, :][:, :, idx]                            # (N,4,99,4)=(n,kh,w,kw)
    patches = jnp.transpose(patches, (0, 2, 1, 3)).reshape(N * w_out, KH * KW)

    a2 = pallas_conv_stage(
        patches, pparams["W1m"],
        pparams["g1"], pparams["be1"],
        pparams["W2m"], pparams["g2"], pparams["be2"],
    )                                                              # (N*99, 16)

    # Flatten: contiguous reshape only (channel-major order is absorbed into
    # the pre-permuted Wf1 rows) — no XLA transpose.
    z = a2.reshape(N, w_out * 16)                                  # (N, 1584)

    out = pallas_fc_stage(z, pparams["Wf1"], pparams["bf1"],
                          pparams["Wf2"], pparams["bf2"])          # (N, 512)
    return out


# ---------------------------------------------------------------------------
# Deterministic parameter construction (synthetic, matches __init__ shapes)
# ---------------------------------------------------------------------------
def make_params(key):
    ks = jax.random.split(key, 8)
    params = {
        # x4_def_conv_block(1, 64, (4,4))
        "W1": jax.random.normal(ks[0], (64, 1, 4, 4), jnp.float32) * 0.1,
        "b1": jax.random.normal(ks[1], (64,), jnp.float32) * 0.01,  # cancels under BN
        "g1": jnp.ones((64,), jnp.float32),
        "be1": jnp.zeros((64,), jnp.float32),
        # x4_def_conv_block(64, 16, (1,1))
        "W2": jax.random.normal(ks[2], (16, 64, 1, 1), jnp.float32) * 0.1,
        "b2": jax.random.normal(ks[3], (16,), jnp.float32) * 0.01,  # cancels under BN
        "g2": jnp.ones((16,), jnp.float32),
        "be2": jnp.zeros((16,), jnp.float32),
        # x4_def_fc_block(n_in=1584, layer_widths=[1024, 512])  (dropout=False)
        "Wf1": jax.random.normal(ks[4], (1584, 1024), jnp.float32) * 0.02,
        "bf1": jax.random.normal(ks[5], (1024,), jnp.float32) * 0.01,
        "Wf2": jax.random.normal(ks[6], (1024, 512), jnp.float32) * 0.02,
        "bf2": jax.random.normal(ks[7], (512,), jnp.float32) * 0.01,
    }
    return params


if __name__ == "__main__":
    key = jax.random.PRNGKey(0)
    pkey, xkey = jax.random.split(key)
    params = make_params(pkey)
    pparams = prepare_params(params)   # one-time: permute/pack/bf16-cast weights

    # Input shape implied by n_in=1584: (N, 1, 4, 99). Batch kept small.
    x = jax.random.normal(xkey, (2, 1, 4, 99), jnp.float32)

    out = x4_def_pretrain_forward(x, pparams)
    out = jax.block_until_ready(out)
    assert out.shape == (2, 512), out.shape
    assert jnp.isfinite(out).all()
    print("KERNEL_OK")
</pallas_src>

<mosaic_0001>
module attributes {stable_mosaic.version = 11 : i64} {
  func.func @_conv_bn_relu_kernel(%arg0: i32, %arg1: memref<198x16xf32, #tpu.memory_space<vmem>>, %arg2: memref<16x64xf32, #tpu.memory_space<vmem>>, %arg3: memref<1x64xf32, #tpu.memory_space<vmem>>, %arg4: memref<1x64xf32, #tpu.memory_space<vmem>>, %arg5: memref<64x16xf32, #tpu.memory_space<vmem>>, %arg6: memref<1x16xf32, #tpu.memory_space<vmem>>, %arg7: memref<1x16xf32, #tpu.memory_space<vmem>>, %arg8: memref<198x16xf32, #tpu.memory_space<vmem>>) attributes {dimension_semantics = [#tpu.dimension_semantics<arbitrary>], iteration_bounds = array<i64: 1>, scalar_prefetch = 0 : i64, scratch_operands = 0 : i64, tpu.core_type = #tpu.core_type<tc>, window_params = [{pipeline_mode = #tpu.pipeline_mode<synchronous>, transform_indices = @transform_0, window_bounds = array<i64: 198, 16>}, {pipeline_mode = #tpu.pipeline_mode<synchronous>, transform_indices = @transform_1, window_bounds = array<i64: 16, 64>}, {pipeline_mode = #tpu.pipeline_mode<synchronous>, transform_indices = @transform_2, window_bounds = array<i64: 1, 64>}, {pipeline_mode = #tpu.pipeline_mode<synchronous>, transform_indices = @transform_3, window_bounds = array<i64: 1, 64>}, {pipeline_mode = #tpu.pipeline_mode<synchronous>, transform_indices = @transform_4, window_bounds = array<i64: 64, 16>}, {pipeline_mode = #tpu.pipeline_mode<synchronous>, transform_indices = @transform_5, window_bounds = array<i64: 1, 16>}, {pipeline_mode = #tpu.pipeline_mode<synchronous>, transform_indices = @transform_6, window_bounds = array<i64: 1, 16>}, {pipeline_mode = #tpu.pipeline_mode<synchronous>, transform_indices = @transform_7, window_bounds = array<i64: 198, 16>}]} {
    %c0 = arith.constant 0 : index
    %c0_0 = arith.constant 0 : index
    %0 = vector.load %arg1[%c0, %c0_0] : memref<198x16xf32, #tpu.memory_space<vmem>>, vector<198x16xf32>
    %c0_1 = arith.constant 0 : index
    %c0_2 = arith.constant 0 : index
    %1 = vector.load %arg2[%c0_1, %c0_2] : memref<16x64xf32, #tpu.memory_space<vmem>>, vector<16x64xf32>
    %cst = arith.constant dense<0.000000e+00> : vector<198x64xf32>
    %2 = tpu.matmul %0, %1, %cst {dimension_numbers = #tpu.dot_dimension_numbers<[1], [0], [0], [1], [0, 0, 1, 1], [], []>} : vector<198x16xf32>, vector<16x64xf32>, vector<198x64xf32> -> vector<198x64xf32>
    %cst_3 = arith.constant dense<0.000000e+00> : vector<64xf32>
    %3 = vector.multi_reduction <add>, %2, %cst_3 [0] : vector<198x64xf32> to vector<64xf32>
    %4 = vector.shape_cast %3 : vector<64xf32> to vector<1x64xf32>
    %5 = arith.mulf %2, %2 : vector<198x64xf32>
    %cst_4 = arith.constant dense<0.000000e+00> : vector<64xf32>
    %6 = vector.multi_reduction <add>, %5, %cst_4 [0] : vector<198x64xf32> to vector<64xf32>
    %7 = vector.shape_cast %6 : vector<64xf32> to vector<1x64xf32>
    %cst_5 = arith.constant 0.00505050505 : f32
    %8 = vector.broadcast %cst_5 : f32 to vector<1x64xf32>
    %9 = arith.mulf %4, %8 : vector<1x64xf32>
    %cst_6 = arith.constant 0.00505050505 : f32
    %10 = vector.broadcast %cst_6 : f32 to vector<1x64xf32>
    %11 = arith.mulf %7, %10 : vector<1x64xf32>
    %12 = arith.mulf %9, %9 : vector<1x64xf32>
    %13 = arith.subf %11, %12 : vector<1x64xf32>
    %cst_7 = arith.constant 0.000000e+00 : f32
    %14 = vector.broadcast %cst_7 : f32 to vector<1x64xf32>
    %15 = arith.maximumf %13, %14 : vector<1x64xf32>
    %c0_8 = arith.constant 0 : index
    %c0_9 = arith.constant 0 : index
    %16 = vector.load %arg3[%c0_8, %c0_9] : memref<1x64xf32, #tpu.memory_space<vmem>>, vector<1x64xf32>
    %cst_10 = arith.constant 9.99999974E-6 : f32
    %17 = vector.broadcast %cst_10 : f32 to vector<1x64xf32>
    %18 = arith.addf %15, %17 : vector<1x64xf32>
    %19 = math.rsqrt %18 : vector<1x64xf32>
    %20 = arith.mulf %16, %19 : vector<1x64xf32>
    %c0_11 = arith.constant 0 : index
    %c0_12 = arith.constant 0 : index
    %21 = vector.load %arg4[%c0_11, %c0_12] : memref<1x64xf32, #tpu.memory_space<vmem>>, vector<1x64xf32>
    %22 = arith.mulf %9, %20 : vector<1x64xf32>
    %23 = arith.subf %21, %22 : vector<1x64xf32>
    %24 = vector.broadcast %20 : vector<1x64xf32> to vector<198x64xf32>
    %25 = arith.mulf %2, %24 : vector<198x64xf32>
    %26 = vector.broadcast %23 : vector<1x64xf32> to vector<198x64xf32>
    %27 = arith.addf %25, %26 : vector<198x64xf32>
    %cst_13 = arith.constant 0.000000e+00 : f32
    %28 = vector.broadcast %cst_13 : f32 to vector<198x64xf32>
    %29 = arith.maximumf %27, %28 : vector<198x64xf32>
    %c0_14 = arith.constant 0 : index
    %c0_15 = arith.constant 0 : index
    %30 = vector.load %arg5[%c0_14, %c0_15] : memref<64x16xf32, #tpu.memory_space<vmem>>, vector<64x16xf32>
    %cst_16 = arith.constant dense<0.000000e+00> : vector<198x16xf32>
    %31 = tpu.matmul %29, %30, %cst_16 {dimension_numbers = #tpu.dot_dimension_numbers<[1], [0], [0], [1], [0, 0, 1, 1], [], []>} : vector<198x64xf32>, vector<64x16xf32>, vector<198x16xf32> -> vector<198x16xf32>
    %cst_17 = arith.constant dense<0.000000e+00> : vector<16xf32>
    %32 = vector.multi_reduction <add>, %31, %cst_17 [0] : vector<198x16xf32> to vector<16xf32>
    %33 = vector.shape_cast %32 : vector<16xf32> to vector<1x16xf32>
    %34 = arith.mulf %31, %31 : vector<198x16xf32>
    %cst_18 = arith.constant dense<0.000000e+00> : vector<16xf32>
    %35 = vector.multi_reduction <add>, %34, %cst_18 [0] : vector<198x16xf32> to vector<16xf32>
    %36 = vector.shape_cast %35 : vector<16xf32> to vector<1x16xf32>
    %cst_19 = arith.constant 0.00505050505 : f32
    %37 = vector.broadcast %cst_19 : f32 to vector<1x16xf32>
    %38 = arith.mulf %33, %37 : vector<1x16xf32>
    %cst_20 = arith.constant 0.00505050505 : f32
    %39 = vector.broadcast %cst_20 : f32 to vector<1x16xf32>
    %40 = arith.mulf %36, %39 : vector<1x16xf32>
    %41 = arith.mulf %38, %38 : vector<1x16xf32>
    %42 = arith.subf %40, %41 : vector<1x16xf32>
    %cst_21 = arith.constant 0.000000e+00 : f32
    %43 = vector.broadcast %cst_21 : f32 to vector<1x16xf32>
    %44 = arith.maximumf %42, %43 : vector<1x16xf32>
    %c0_22 = arith.constant 0 : index
    %c0_23 = arith.constant 0 : index
    %45 = vector.load %arg6[%c0_22, %c0_23] : memref<1x16xf32, #tpu.memory_space<vmem>>, vector<1x16xf32>
    %cst_24 = arith.constant 9.99999974E-6 : f32
    %46 = vector.broadcast %cst_24 : f32 to vector<1x16xf32>
    %47 = arith.addf %44, %46 : vector<1x16xf32>
    %48 = math.rsqrt %47 : vector<1x16xf32>
    %49 = arith.mulf %45, %48 : vector<1x16xf32>
    %c0_25 = arith.constant 0 : index
    %c0_26 = arith.constant 0 : index
    %50 = vector.load %arg7[%c0_25, %c0_26] : memref<1x16xf32, #tpu.memory_space<vmem>>, vector<1x16xf32>
    %51 = arith.mulf %38, %49 : vector<1x16xf32>
    %52 = arith.subf %50, %51 : vector<1x16xf32>
    %53 = vector.broadcast %49 : vector<1x16xf32> to vector<198x16xf32>
    %54 = arith.mulf %31, %53 : vector<198x16xf32>
    %55 = vector.broadcast %52 : vector<1x16xf32> to vector<198x16xf32>
    %56 = arith.addf %54, %55 : vector<198x16xf32>
    %cst_27 = arith.constant 0.000000e+00 : f32
    %57 = vector.broadcast %cst_27 : f32 to vector<198x16xf32>
    %58 = arith.maximumf %56, %57 : vector<198x16xf32>
    %c0_28 = arith.constant 0 : index
    %c0_29 = arith.constant 0 : index
    %59 = vector.load %arg8[%c0_28, %c0_29] : memref<198x16xf32, #tpu.memory_space<vmem>>, vector<198x16xf32>
    tpu.vector_store %arg8[%c0_28, %c0_29], %58 {strides = array<i32>} : memref<198x16xf32, #tpu.memory_space<vmem>>, vector<198x16xf32>,
    return
  }
  func.func @transform_0(%arg0: i32) -> (i32, i32) {
    %c0_i32 = arith.constant 0 : i32
    %c0_i32_0 = arith.constant 0 : i32
    %c0_i32_1 = arith.constant 0 : i32
    return %c0_i32, %c0_i32_0 : i32, i32
  }
  func.func @transform_1(%arg0: i32) -> (i32, i32) {
    %c0_i32 = arith.constant 0 : i32
    %c0_i32_0 = arith.constant 0 : i32
    %c0_i32_1 = arith.constant 0 : i32
    return %c0_i32, %c0_i32_0 : i32, i32
  }
  func.func @transform_2(%arg0: i32) -> (i32, i32) {
    %c0_i32 = arith.constant 0 : i32
    %c0_i32_0 = arith.constant 0 : i32
    %c0_i32_1 = arith.constant 0 : i32
    return %c0_i32, %c0_i32_0 : i32, i32
  }
  func.func @transform_3(%arg0: i32) -> (i32, i32) {
    %c0_i32 = arith.constant 0 : i32
    %c0_i32_0 = arith.constant 0 : i32
    %c0_i32_1 = arith.constant 0 : i32
    return %c0_i32, %c0_i32_0 : i32, i32
  }
  func.func @transform_4(%arg0: i32) -> (i32, i32) {
    %c0_i32 = arith.constant 0 : i32
    %c0_i32_0 = arith.constant 0 : i32
    %c0_i32_1 = arith.constant 0 : i32
    return %c0_i32, %c0_i32_0 : i32, i32
  }
  func.func @transform_5(%arg0: i32) -> (i32, i32) {
    %c0_i32 = arith.constant 0 : i32
    %c0_i32_0 = arith.constant 0 : i32
    %c0_i32_1 = arith.constant 0 : i32
    return %c0_i32, %c0_i32_0 : i32, i32
  }
  func.func @transform_6(%arg0: i32) -> (i32, i32) {
    %c0_i32 = arith.constant 0 : i32
    %c0_i32_0 = arith.constant 0 : i32
    %c0_i32_1 = arith.constant 0 : i32
    return %c0_i32, %c0_i32_0 : i32, i32
  }
  func.func @transform_7(%arg0: i32) -> (i32, i32) {
    %c0_i32 = arith.constant 0 : i32
    %c0_i32_0 = arith.constant 0 : i32
    %c0_i32_1 = arith.constant 0 : i32
    return %c0_i32, %c0_i32_0 : i32, i32
  }
}

module attributes {stable_mosaic.version = 11 : i64} {
  func.func @_fc_kernel(%arg0: i32, %arg1: memref<2x1584xf32, #tpu.memory_space<vmem>>, %arg2: memref<1584x1024xbf16, #tpu.memory_space<vmem>>, %arg3: memref<1x1024xf32, #tpu.memory_space<vmem>>, %arg4: memref<1024x512xbf16, #tpu.memory_space<vmem>>, %arg5: memref<1x512xf32, #tpu.memory_space<vmem>>, %arg6: memref<2x512xf32, #tpu.memory_space<vmem>>) attributes {dimension_semantics = [#tpu.dimension_semantics<parallel>], iteration_bounds = array<i64: 1>, scalar_prefetch = 0 : i64, scratch_operands = 0 : i64, tpu.core_type = #tpu.core_type<tc>, window_params = [{transform_indices = @transform_0, window_bounds = array<i64: 2, 1584>}, {pipeline_mode = #tpu.pipeline_mode<synchronous>, transform_indices = @transform_1, window_bounds = array<i64: 1584, 1024>}, {pipeline_mode = #tpu.pipeline_mode<synchronous>, transform_indices = @transform_2, window_bounds = array<i64: 1, 1024>}, {pipeline_mode = #tpu.pipeline_mode<synchronous>, transform_indices = @transform_3, window_bounds = array<i64: 1024, 512>}, {pipeline_mode = #tpu.pipeline_mode<synchronous>, transform_indices = @transform_4, window_bounds = array<i64: 1, 512>}, {transform_indices = @transform_5, window_bounds = array<i64: 2, 512>}]} {
    %c0 = arith.constant 0 : index
    %c0_0 = arith.constant 0 : index
    %0 = vector.load %arg1[%c0, %c0_0] : memref<2x1584xf32, #tpu.memory_space<vmem>>, vector<2x1584xf32>
    %1 = arith.truncf %0 : vector<2x1584xf32> to vector<2x1584xbf16>
    %c0_1 = arith.constant 0 : index
    %c0_2 = arith.constant 0 : index
    %2 = vector.load %arg2[%c0_1, %c0_2] : memref<1584x1024xbf16, #tpu.memory_space<vmem>>, vector<1584x1024xbf16>
    %cst = arith.constant dense<0.000000e+00> : vector<2x1024xf32>
    %3 = tpu.matmul %1, %2, %cst {dimension_numbers = #tpu.dot_dimension_numbers<[1], [0], [0], [1], [0, 0, 1, 1], [], []>} : vector<2x1584xbf16>, vector<1584x1024xbf16>, vector<2x1024xf32> -> vector<2x1024xf32>
    %c0_3 = arith.constant 0 : index
    %c0_4 = arith.constant 0 : index
    %4 = vector.load %arg3[%c0_3, %c0_4] : memref<1x1024xf32, #tpu.memory_space<vmem>>, vector<1x1024xf32>
    %5 = vector.broadcast %4 : vector<1x1024xf32> to vector<2x1024xf32>
    %6 = arith.addf %3, %5 : vector<2x1024xf32>
    %cst_5 = arith.constant 0.000000e+00 : f32
    %7 = vector.broadcast %cst_5 : f32 to vector<2x1024xf32>
    %8 = arith.maximumf %6, %7 : vector<2x1024xf32>
    %9 = arith.truncf %8 : vector<2x1024xf32> to vector<2x1024xbf16>
    %c0_6 = arith.constant 0 : index
    %c0_7 = arith.constant 0 : index
    %10 = vector.load %arg4[%c0_6, %c0_7] : memref<1024x512xbf16, #tpu.memory_space<vmem>>, vector<1024x512xbf16>
    %cst_8 = arith.constant dense<0.000000e+00> : vector<2x512xf32>
    %11 = tpu.matmul %9, %10, %cst_8 {dimension_numbers = #tpu.dot_dimension_numbers<[1], [0], [0], [1], [0, 0, 1, 1], [], []>} : vector<2x1024xbf16>, vector<1024x512xbf16>, vector<2x512xf32> -> vector<2x512xf32>
    %c0_9 = arith.constant 0 : index
    %c0_10 = arith.constant 0 : index
    %12 = vector.load %arg5[%c0_9, %c0_10] : memref<1x512xf32, #tpu.memory_space<vmem>>, vector<1x512xf32>
    %13 = vector.broadcast %12 : vector<1x512xf32> to vector<2x512xf32>
    %14 = arith.addf %11, %13 : vector<2x512xf32>
    %c0_11 = arith.constant 0 : index
    %c0_12 = arith.constant 0 : index
    %15 = vector.load %arg6[%c0_11, %c0_12] : memref<2x512xf32, #tpu.memory_space<vmem>>, vector<2x512xf32>
    tpu.vector_store %arg6[%c0_11, %c0_12], %14 {strides = array<i32>} : memref<2x512xf32, #tpu.memory_space<vmem>>, vector<2x512xf32>,
    return
  }
  func.func @transform_0(%arg0: i32) -> (i32, i32) {
    %c0_i32 = arith.constant 0 : i32
    %c0_i32_0 = arith.constant 0 : i32
    return %arg0, %c0_i32 : i32, i32
  }
  func.func @transform_1(%arg0: i32) -> (i32, i32) {
    %c0_i32 = arith.constant 0 : i32
    %c0_i32_0 = arith.constant 0 : i32
    %c0_i32_1 = arith.constant 0 : i32
    return %c0_i32, %c0_i32_0 : i32, i32
  }
  func.func @transform_2(%arg0: i32) -> (i32, i32) {
    %c0_i32 = arith.constant 0 : i32
    %c0_i32_0 = arith.constant 0 : i32
    %c0_i32_1 = arith.constant 0 : i32
    return %c0_i32, %c0_i32_0 : i32, i32
  }
  func.func @transform_3(%arg0: i32) -> (i32, i32) {
    %c0_i32 = arith.constant 0 : i32
    %c0_i32_0 = arith.constant 0 : i32
    %c0_i32_1 = arith.constant 0 : i32
    return %c0_i32, %c0_i32_0 : i32, i32
  }
  func.func @transform_4(%arg0: i32) -> (i32, i32) {
    %c0_i32 = arith.constant 0 : i32
    %c0_i32_0 = arith.constant 0 : i32
    %c0_i32_1 = arith.constant 0 : i32
    return %c0_i32, %c0_i32_0 : i32, i32
  }
  func.func @transform_5(%arg0: i32) -> (i32, i32) {
    %c0_i32 = arith.constant 0 : i32
    %c0_i32_0 = arith.constant 0 : i32
    return %arg0, %c0_i32 : i32, i32
  }
}

</mosaic_0001>

<bundles_post_ra>
// kernel: x4_def_pretrain_forward.2
= control target key start
LH: loop header
LB: loop body
LE: loop exit
PB: predicated region body
PF: predicated region fallthrough
CT: control target
= control target key end

     0   :  { %12 = vsyncpa [#allocation3], 0  ;;  %s2012_s0 = inlined_call_operand.vmem [shape: f32[198,16], index: 0, kind: input, shape index: {}]   ;;  %s2013_s1 = inlined_call_operand.hbm [shape: f32[16,64], index: 1, kind: input, shape index: {}]   ;;  %s2014_s2 = inlined_call_operand.hbm [shape: f32[1,64], index: 2, kind: input, shape index: {}]   ;;  %s2015_s3 = inlined_call_operand.hbm [shape: f32[1,64], index: 3, kind: input, shape index: {}]   ;;  %s2016_s4 = inlined_call_operand.vmem [shape: f32[64,16], index: 4, kind: input, shape index: {}]   ;;  %s2017_s5 = inlined_call_operand.hbm [shape: f32[1,16], index: 5, kind: input, shape index: {}]   ;;  %s2018_s6 = inlined_call_operand.hbm [shape: f32[1,16], index: 6, kind: input, shape index: {}]   ;;  %s2019_s7 = inlined_call_operand.vmem [shape: f32[198,16], index: 7, kind: output, shape index: {}]  }
   0x1   :  { %13 = vsyncpa [#allocation5], 0  ;;  %s35_s26 = sshll.u32 %s2014_s2, 4  ;;  %s36_s26 = int_to_ptr.hbm [resolvable:$true] %s35_s26 }
   0x2   :  { %14 = vsyncpa [#allocation8], 0  ;;  %s1180_s27 = smov [#allocation4]   ;;  %s59_s8 = sshll.u32 %s2017_s5, 4  ;;  %s60_s8 = int_to_ptr.hbm [resolvable:$true] %s59_s8 }
   0x3   :  { %s37_s28 = sshll.u32 %s1180_s27, 4  ;;  %s1181_s9 = smov [#allocation7]   ;;  %s38_s28 = int_to_ptr.vmem [resolvable:$true] %s37_s28 }
   0x4   :  { %40 = dma.hbm_to_vmem [thread:$0]  %s36_s26, 16, %s38_s28, [#allocation5]  }
   0x5   :  { %s61_s10 = sshll.u32 %s1181_s9, 4  ;;  %s21_s13 = sshll.u32 %s2013_s1, 4  ;;  %s62_s10 = int_to_ptr.vmem [resolvable:$true] %s61_s10  ;;  %s22_s13 = int_to_ptr.hbm [resolvable:$true] %s21_s13 }
   0x6   :  { %64 = dma.hbm_to_vmem [thread:$0]  %s60_s8, 16, %s62_s10, [#allocation8]  }
   0x7   :  { %s1182_s2 = smov [#allocation2]   ;;  %s46_s17 = sshll.u32 %s2015_s3, 4  ;;  %s47_s17 = int_to_ptr.hbm [resolvable:$true] %s46_s17 }
   0x8   :  { %s23_s14 = sshll.u32 %s1182_s2, 4  ;;  %s1183_s18 = smov 128   ;;  %s24_s14 = int_to_ptr.vmem [resolvable:$true] %s23_s14 }
   0x9   :  { %s1184_s5 = smov 8   ;;  %s1185_s19 = smov [#allocation6]  }
   0xa   :  { %29 = dma.hbm_to_vmem [thread:$0]  %s22_s13, 256, %s24_s14, [#allocation3], %s1183_s18, %s1183_s18, %s1184_s5  }
   0xb   :  { %s48_s20 = sshll.u32 %s1185_s19, 4  ;;  %s70_s1 = sshll.u32 %s2018_s6, 4  ;;  %s49_s20 = int_to_ptr.vmem [resolvable:$true] %s48_s20  ;;  %s71_s1 = int_to_ptr.hbm [resolvable:$true] %s70_s1 }
   0xc   :  { %51 = dma.hbm_to_vmem [thread:$0]  %s47_s17, 16, %s49_s20, [#allocation5]  }
   0xd   :  { %s1186_s23 = smov [#allocation9]  }
   0xe   :  { %s72_s24 = sshll.u32 %s1186_s23, 4  ;;  %s73_s24 = int_to_ptr.vmem [resolvable:$true] %s72_s24 }
   0xf   :  { %75 = dma.hbm_to_vmem [thread:$0]  %s71_s1, 16, %s73_s24, [#allocation8]  }
  0x10   :  { %1174 = dma.done.wait [#allocation3], 256  }
  0x11   :  { %1175 = vsyncadd [#allocation3], 4294967040 }
  0x12   :  { %1176 = dma.done.wait [#allocation5], 32  }
  0x13   :  { %1177 = vsyncadd [#allocation5], 4294967264 }
  0x14   :  { %1178 = dma.done.wait [#allocation8], 32  }
  0x15   :  { %1179 = vsyncadd [#allocation8], 4294967264  ;;  %v122_v0 = vld [vmem:[#allocation2 + $0x8] sm:$0xff]  ;;  %v121_v1 = vld [vmem:[#allocation2] sm:$0xff]  ;;  %vm123_vm0 = vcmask 130048   ;;  %vm291_vm1 = vcmask 523264  }
  0x16   :  { %213 = vmatpush.msra.mxu0 %v122_v0  ;;  %v96_v2 = vld [vmem:[%s2012_s0] sm:$0xff]  ;;  %1025 = vmatpush.msra.mxu3 %v122_v0  ;;  %v97_v3 = vld [vmem:[%s2012_s0 + $0x8] sm:$0xff]  ;;  %v110_v4 = vld [vmem:[%s2012_s0 + $0x70] sm:$0xff]  ;;  %vm339_vm2 = vcmask 521216   ;;  %vm752_vm6 = vcmask 128000  }
  0x17   :  { %v98_v5 = vld [vmem:[%s2012_s0 + $0x10] sm:$0xff]  ;;  %v111_v6 = vld [vmem:[%s2012_s0 + $0x78] sm:$0xff]  ;;  %v112_v8 = vld [vmem:[%s2012_s0 + $0x80] sm:$0xff] }
  0x18   :  { %214 = vmatpush.msra.mxu0 %v121_v1  ;;  %1026 = vmatpush.msra.mxu3 %v121_v1  ;;  %v99_v7 = vld [vmem:[%s2012_s0 + $0x18] sm:$0xff]  ;;  %v100_v9 = vld [vmem:[%s2012_s0 + $0x20] sm:$0xff]  ;;  %v113_v10 = vld [vmem:[%s2012_s0 + $0x88] sm:$0xff] }
  0x19   :  { %975 = vmatmul.msk.f32.vlgmr.msra.gmra.mxu0 %vm123_vm0, %v96_v2  ;;  %989 = vmatmul.msk.f32.vlgmr.msra.gmra.mxu3 %vm123_vm0, %v110_v4  ;;  %v101_v11 = vld [vmem:[%s2012_s0 + $0x28] sm:$0xff]  ;;  %v114_v12 = vld [vmem:[%s2012_s0 + $0x90] sm:$0xff]  ;;  %v115_v14 = vld [vmem:[%s2012_s0 + $0x98] sm:$0xff] }
  0x1a   :  { %v102_v13 = vld [vmem:[%s2012_s0 + $0x30] sm:$0xff]  ;;  %v103_v15 = vld [vmem:[%s2012_s0 + $0x38] sm:$0xff]  ;;  %v116_v16 = vld [vmem:[%s2012_s0 + $0xa0] sm:$0xff] }
  0x1b   :  { %v104_v17 = vld [vmem:[%s2012_s0 + $0x40] sm:$0xff]  ;;  %v117_v18 = vld [vmem:[%s2012_s0 + $0xa8] sm:$0xff]  ;;  %v118_v20 = vld [vmem:[%s2012_s0 + $0xb0] sm:$0xff] }
  0x1c   :  { %v105_v19 = vld [vmem:[%s2012_s0 + $0x48] sm:$0xff]  ;;  %v106_v21 = vld [vmem:[%s2012_s0 + $0x50] sm:$0xff]  ;;  %v119_v22 = vld [vmem:[%s2012_s0 + $0xb8] sm:$0xff] }
  0x1d   :  { %v107_v23 = vld [vmem:[%s2012_s0 + $0x58] sm:$0xff]  ;;  %v120_v24 = vld [vmem:[%s2012_s0 + $0xc0] sm:$0x3f]  ;;  %v109_v26 = vld [vmem:[%s2012_s0 + $0x68] sm:$0xff] }
  0x1e   :  { %v108_v25 = vld [vmem:[%s2012_s0 + $0x60] sm:$0xff] }
  0x21   :  { %976 = vmatmul.msk.f32.gmra.mxu0 %vm123_vm0, %v97_v3  ;;  %990 = vmatmul.msk.f32.gmra.mxu3 %vm123_vm0, %v111_v6 }
  0x29   :  { %977 = vmatmul.msk.f32.gmra.mxu0 %vm123_vm0, %v98_v5  ;;  %991 = vmatmul.msk.f32.gmra.mxu3 %vm123_vm0, %v112_v8 }
  0x31   :  { %978 = vmatmul.msk.f32.gmra.mxu0 %vm123_vm0, %v99_v7  ;;  %992 = vmatmul.msk.f32.gmra.mxu3 %vm123_vm0, %v113_v10 }
  0x39   :  { %979 = vmatmul.msk.f32.gmra.mxu0 %vm123_vm0, %v100_v9  ;;  %993 = vmatmul.msk.f32.gmra.mxu3 %vm123_vm0, %v114_v12 }
  0x41   :  { %980 = vmatmul.msk.f32.gmra.mxu0 %vm123_vm0, %v101_v11  ;;  %994 = vmatmul.msk.f32.gmra.mxu3 %vm123_vm0, %v115_v14 }
  0x49   :  { %981 = vmatmul.msk.f32.gmra.mxu0 %vm123_vm0, %v102_v13  ;;  %995 = vmatmul.msk.f32.gmra.mxu3 %vm123_vm0, %v116_v16 }
  0x51   :  { %982 = vmatmul.msk.f32.gmra.mxu0 %vm123_vm0, %v103_v15  ;;  %996 = vmatmul.msk.f32.gmra.mxu3 %vm123_vm0, %v117_v18 }
  0x59   :  { %983 = vmatmul.msk.f32.gmra.mxu0 %vm123_vm0, %v104_v17  ;;  %997 = vmatmul.msk.f32.gmra.mxu3 %vm123_vm0, %v118_v20 }
  0x61   :  { %984 = vmatmul.msk.f32.gmra.mxu0 %vm123_vm0, %v105_v19  ;;  %998 = vmatmul.msk.f32.gmra.mxu3 %vm123_vm0, %v119_v22 }
  0x69   :  { %985 = vmatmul.msk.f32.gmra.mxu0 %vm123_vm0, %v106_v21  ;;  %999 = vmatmul.msk.f32.gmra.mxu3 %vm123_vm0, %v120_v24 }
  0x71   :  { %986 = vmatmul.msk.f32.gmra.mxu0 %vm123_vm0, %v107_v23 }
  0x79   :  { %987 = vmatmul.msk.f32.gmra.mxu0 %vm123_vm0, %v108_v25 }
  0x81   :  { %988 = vmatmul.msk.f32.gmra.mxu0 %vm123_vm0, %v109_v26 }
  0x96   :  { %v1342_v27 = vpop.f32.mrf.mxu0 }
  0x97   :  { %v348_v44 = vmul.f32 %v1342_v27, %v1342_v27  ;;  %v292_v49 = vsel %vm291_vm1, %v1342_v27, 0.0 }
  0x99   :  { %v373_v54 = vsel %vm291_vm1, %v348_v44, 0.0 }
  0x9c   :  { %v1348_v30 = vpop.f32.mrf.mxu3 }
  0x9e   :  { %v1344_v28 = vpop.f32.mrf.mxu0 }
  0x9f   :  { %v349_v43 = vmul.f32 %v1344_v28, %v1344_v28  ;;  %v293_v45 = vsel %vm291_vm1, %v1344_v28, 0.0 }
  0xa0   :  { %v294_v53 = vadd.f32 %v293_v45, %v292_v49 }
  0xa1   :  { %v374_v50 = vsel %vm291_vm1, %v349_v43, 0.0 }
  0xa2   :  { %v375_v58 = vadd.f32 %v374_v50, %v373_v54 }
  0xa4   :  { %v1352_v32 = vpop.f32.mrf.mxu3 }
  0xa6   :  { %v1346_v29 = vpop.f32.mrf.mxu0 }
  0xa7   :  { %v350_v46 = vmul.f32 %v1346_v29, %v1346_v29  ;;  %v295_v51 = vsel %vm291_vm1, %v1346_v29, 0.0 }
  0xa8   :  { %v296_v59 = vadd.f32 %v295_v51, %v294_v53 }
  0xa9   :  { %v376_v55 = vsel %vm291_vm1, %v350_v46, 0.0 }
  0xaa   :  { %v377_v63 = vadd.f32 %v376_v55, %v375_v58 }
  0xac   :  { %v1358_v35 = vpop.f32.mrf.mxu3 }
  0xae   :  { %v1350_v31 = vpop.f32.mrf.mxu0 }
  0xaf   :  { %v351_v52 = vmul.f32 %v1350_v31, %v1350_v31  ;;  %v297_v56 = vsel %vm291_vm1, %v1350_v31, 0.0 }
  0xb0   :  { %v298_v0 = vadd.f32 %v297_v56, %v296_v59 }
  0xb1   :  { %v378_v60 = vsel %vm291_vm1, %v351_v52, 0.0 }
  0xb2   :  { %v379_v4 = vadd.f32 %v378_v60, %v377_v63 }
  0xb4   :  { %v1362_v37 = vpop.f32.mrf.mxu3 }
  0xb6   :  { %v1354_v33 = vpop.f32.mrf.mxu0 }
  0xb7   :  { %v352_v57 = vmul.f32 %v1354_v33, %v1354_v33  ;;  %v299_v61 = vsel %vm291_vm1, %v1354_v33, 0.0 }
  0xb8   :  { %v300_v5 = vadd.f32 %v299_v61, %v298_v0 }
  0xb9   :  { %v380_v1 = vsel %vm291_vm1, %v352_v57, 0.0 }
  0xba   :  { %v381_v10 = vadd.f32 %v380_v1, %v379_v4 }
  0xbc   :  { %v1366_v39 = vpop.f32.mrf.mxu3 }
  0xbe   :  { %v1356_v34 = vpop.f32.mrf.mxu0 }
  0xbf   :  { %v353_v62 = vmul.f32 %v1356_v34, %v1356_v34  ;;  %v301_v2 = vsel %vm291_vm1, %v1356_v34, 0.0 }
  0xc0   :  { %v302_v11 = vadd.f32 %v301_v2, %v300_v5  ;;  %v362_v2 = vmul.f32 %v1348_v30, %v1348_v30 }
  0xc1   :  { %v382_v7 = vsel %vm291_vm1, %v353_v62, 0.0 }
  0xc2   :  { %v383_v16 = vadd.f32 %v382_v7, %v381_v10 }
  0xc4   :  { %v1370_v41 = vpop.f32.mrf.mxu3 }
  0xc6   :  { %v1360_v36 = vpop.f32.mrf.mxu0 }
  0xc7   :  { %v354_v3 = vmul.f32 %v1360_v36, %v1360_v36  ;;  %v303_v8 = vsel %vm291_vm1, %v1360_v36, 0.0 }
  0xc8   :  { %v304_v17 = vadd.f32 %v303_v8, %v302_v11  ;;  %v319_v8 = vsel %vm291_vm1, %v1348_v30, 0.0 }
  0xc9   :  { %v384_v13 = vsel %vm291_vm1, %v354_v3, 0.0 }
  0xca   :  { %v385_v21 = vadd.f32 %v384_v13, %v383_v16  ;;  %v364_v16 = vmul.f32 %v1358_v35, %v1358_v35 }
  0xcc   :  { %v1384_v48 = vpop.f32.mrf.mxu3 }
  0xce   :  { %v1364_v38 = vpop.f32.mrf.mxu0 }
  0xcf   :  { %v355_v9 = vmul.f32 %v1364_v38, %v1364_v38  ;;  %v305_v14 = vsel %vm291_vm1, %v1364_v38, 0.0 }
  0xd0   :  { %v306_v22 = vadd.f32 %v305_v14, %v304_v17  ;;  %v400_v14 = vsel %vm291_vm1, %v362_v2, 0.0 }
  0xd1   :  { %v386_v18 = vsel %vm291_vm1, %v355_v9, 0.0  ;;  %v363_v9 = vmul.f32 %v1352_v32, %v1352_v32 }
  0xd2   :  { %v387_v26 = vadd.f32 %v386_v18, %v385_v21  ;;  %v323_v21 = vsel %vm291_vm1, %v1358_v35, 0.0 }
  0xd4   :  { %v1416_v12 = vpop.f32.mrf.mxu3 }
  0xd6   :  { %v1368_v40 = vpop.f32.mrf.mxu0 }
  0xd7   :  { %v356_v15 = vmul.f32 %v1368_v40, %v1368_v40  ;;  %v307_v19 = vsel %vm291_vm1, %v1368_v40, 0.0 }
  0xd8   :  { %v308_v43 = vadd.f32 %v307_v19, %v306_v22  ;;  %v365_v22 = vmul.f32 %v1362_v37, %v1362_v37 }
  0xd9   :  { %v388_v23 = vsel %vm291_vm1, %v356_v15, 0.0  ;;  %v321_v15 = vsel %vm291_vm1, %v1352_v32, 0.0 }
  0xda   :  { %v389_v50 = vadd.f32 %v388_v23, %v387_v26  ;;  %v325_v26 = vsel %vm291_vm1, %v1362_v37, 0.0 }
  0xdc   :  { %v1445_v57 = vpop.f32.mrf.mxu3 }
  0xde   :  { %v1372_v42 = vpop.f32.mrf.mxu0 }
  0xdf   :  { %v357_v20 = vmul.f32 %v1372_v42, %v1372_v42  ;;  %v309_v24 = vsel %vm291_vm1, %v1372_v42, 0.0 }
  0xe0   :  { %v310_v51 = vadd.f32 %v309_v24, %v308_v43  ;;  %v366_v43 = vmul.f32 %v1366_v39, %v1366_v39 }
  0xe1   :  { %v390_v45 = vsel %vm291_vm1, %v357_v20, 0.0  ;;  %v402_v20 = vsel %vm291_vm1, %v363_v9, 0.0 }
  0xe2   :  { %v391_v55 = vadd.f32 %v390_v45, %v389_v50  ;;  %v327_v50 = vsel %vm291_vm1, %v1366_v39, 0.0 }
  0xe4   :  { %v1469_v19 = vpop.f32.mrf.mxu3 }
  0xe6   :  { %v1382_v47 = vpop.f32.mrf.mxu0 }
  0xe7   :  { %v358_v25 = vmul.f32 %v1382_v47, %v1382_v47  ;;  %v311_v46 = vsel %vm291_vm1, %v1382_v47, 0.0 }
  0xe8   :  { %v312_v56 = vadd.f32 %v311_v46, %v310_v51  ;;  %v367_v51 = vmul.f32 %v1370_v41, %v1370_v41 }
  0xe9   :  { %v392_v52 = vsel %vm291_vm1, %v358_v25, 0.0  ;;  %v404_v25 = vsel %vm291_vm1, %v364_v16, 0.0 }
  0xea   :  { %v393_v60 = vadd.f32 %v392_v52, %v391_v55  ;;  %v329_v55 = vsel %vm291_vm1, %v1370_v41, 0.0 }
  0xec   :  { %v1496_v2 = vpop.f32.mrf.mxu3 }
  0xee   :  { %v1409_v6 = vpop.f32.mrf.mxu0 }
  0xef   :  { %v359_v49 = vmul.f32 %v1409_v6, %v1409_v6  ;;  %v313_v53 = vsel %vm291_vm1, %v1409_v6, 0.0 }
  0xf0   :  { %v314_v61 = vadd.f32 %v313_v53, %v312_v56  ;;  %v368_v56 = vmul.f32 %v1384_v48, %v1384_v48 }
  0xf1   :  { %v394_v58 = vsel %vm291_vm1, %v359_v49, 0.0  ;;  %v406_v49 = vsel %vm291_vm1, %v365_v22, 0.0 }
  0xf2   :  { %v395_v63 = vadd.f32 %v394_v58, %v393_v60  ;;  %v410_v60 = vsel %vm291_vm1, %v367_v51, 0.0  ;;  %v537_v51 = vld [vmem:[%s2016_s4 + $0x38] sm:$0xff] }
  0xf3   :  { %621 = vmatpush.msra.mxu1 %v537_v51  ;;  %1027 = vmatpush.msra.mxu2 %v537_v51 }
  0xf4   :  { %1028 = vmatpush.msrb.mxu3 %v537_v51 }
  0xf6   :  { %v1433_v44 = vpop.f32.mrf.mxu0 }
  0xf7   :  { %v360_v54 = vmul.f32 %v1433_v44, %v1433_v44  ;;  %v315_v59 = vsel %vm291_vm1, %v1433_v44, 0.0 }
  0xf8   :  { %v316_v0 = vadd.f32 %v315_v59, %v314_v61  ;;  %v331_v61 = vsel %vm291_vm1, %v1384_v48, 0.0 }
  0xf9   :  { %v396_v62 = vsel %vm291_vm1, %v360_v54, 0.0  ;;  %v408_v54 = vsel %vm291_vm1, %v366_v43, 0.0 }
  0xfa   :  { %v397_v5 = vadd.f32 %v396_v62, %v395_v63  ;;  %v369_v62 = vmul.f32 %v1416_v12, %v1416_v12 }
  0xfc   :  { %v414_v9 = vsel %vm291_vm1, %v369_v62, 0.0 }
  0xfe   :  { %v1451_v1 = vpop.f32.mrf.mxu0 }
  0xff   :  { %v317_v3 = vsel %vm291_vm1, %v1451_v1, 0.0  ;;  %v361_v4 = vmul.f32 %v1451_v1, %v1451_v1 }
 0x100   :  { %v318_v7 = vadd.f32 %v317_v3, %v316_v0  ;;  %v412_v3 = vsel %vm291_vm1, %v368_v56, 0.0 }
 0x101   :  { %v398_v10 = vsel %vm291_vm1, %v361_v4, 0.0  ;;  %v333_v4 = vsel %vm291_vm1, %v1416_v12, 0.0 }
 0x102   :  { %v320_v11 = vadd.f32 %v319_v8, %v318_v7  ;;  %v399_v13 = vadd.f32 %v398_v10, %v397_v5  ;;  %v370_v5 = vmul.f32 %v1445_v57, %v1445_v57  ;;  %v335_v10 = vsel %vm291_vm1, %v1445_v57, 0.0 }
 0x104   :  { %v322_v17 = vadd.f32 %v321_v15, %v320_v11  ;;  %v401_v18 = vadd.f32 %v400_v14, %v399_v13  ;;  %v371_v11 = vmul.f32 %v1469_v19, %v1469_v19  ;;  %v372_v13 = vmul.f32 %v1496_v2, %v1496_v2 }
 0x105   :  { %v416_v16 = vsel %vm291_vm1, %v370_v5, 0.0  ;;  %v532_v5 = vld [vmem:[%s2016_s4 + $0x10] sm:$0xff] }
 0x106   :  { %v324_v23 = vadd.f32 %v323_v21, %v322_v17  ;;  %v403_v24 = vadd.f32 %v402_v20, %v401_v18  ;;  %v337_v17 = vsel %vm291_vm1, %v1469_v19, 0.0  ;;  %v340_v18 = vsel %vm339_vm2, %v1496_v2, 0.0 }
 0x107   :  { %v418_v22 = vsel %vm291_vm1, %v371_v11, 0.0 }
 0x108   :  { %v326_v45 = vadd.f32 %v325_v26, %v324_v23  ;;  %v405_v46 = vadd.f32 %v404_v25, %v403_v24  ;;  %v420_v23 = vsel %vm339_vm2, %v372_v13, 0.0 }
 0x10a   :  { %v407_v52 = vadd.f32 %v406_v49, %v405_v46  ;;  %v328_v53 = vadd.f32 %v327_v50, %v326_v45 }
 0x10c   :  { %v330_v58 = vadd.f32 %v329_v55, %v328_v53  ;;  %v409_v59 = vadd.f32 %v408_v54, %v407_v52  ;;  %v536_v54 = vld [vmem:[%s2016_s4 + $0x30] sm:$0xff] }
 0x10d   :  { %622 = vmatpush.msra.mxu1 %v536_v54  ;;  %1029 = vmatpush.msra.mxu2 %v536_v54 }
 0x10e   :  { %v332_v63 = vadd.f32 %v331_v61, %v330_v58  ;;  %v411_v0 = vadd.f32 %v410_v60, %v409_v59  ;;  %1030 = vmatpush.msrb.mxu3 %v536_v54  ;;  %v535_v58 = vld [vmem:[%s2016_s4 + $0x28] sm:$0xff]  ;;  %v534_v61 = vld [vmem:[%s2016_s4 + $0x20] sm:$0xff] }
 0x10f   :  { %623 = vmatpush.msra.mxu1 %v535_v58  ;;  %1031 = vmatpush.msra.mxu2 %v535_v58 }
 0x110   :  { %v334_v7 = vadd.f32 %v333_v4, %v332_v63  ;;  %v413_v8 = vadd.f32 %v412_v3, %v411_v0  ;;  %1032 = vmatpush.msrb.mxu3 %v535_v58  ;;  %v533_v0 = vld [vmem:[%s2016_s4 + $0x18] sm:$0xff] }
 0x111   :  { %624 = vmatpush.msra.mxu1 %v534_v61  ;;  %1033 = vmatpush.msra.mxu2 %v534_v61 }
 0x112   :  { %v336_v14 = vadd.f32 %v335_v10, %v334_v7  ;;  %v415_v15 = vadd.f32 %v414_v9, %v413_v8  ;;  %1034 = vmatpush.msrb.mxu3 %v534_v61  ;;  %v531_v8 = vld [vmem:[%s2016_s4 + $0x8] sm:$0xff]  ;;  %v530_v10 = vld [vmem:[%s2016_s4] sm:$0xff] }
 0x113   :  { %625 = vmatpush.msra.mxu1 %v533_v0  ;;  %1035 = vmatpush.msra.mxu2 %v533_v0 }
 0x114   :  { %v417_v20 = vadd.f32 %v416_v16, %v415_v15  ;;  %v338_v21 = vadd.f32 %v337_v17, %v336_v14  ;;  %1036 = vmatpush.msrb.mxu3 %v533_v0 }
 0x115   :  { %626 = vmatpush.msra.mxu1 %v532_v5  ;;  %1037 = vmatpush.msra.mxu2 %v532_v5 }
 0x116   :  { %v419_v24 = vadd.f32 %v418_v22, %v417_v20  ;;  %v341_v25 = vadd.f32 %v340_v18, %v338_v21  ;;  %1038 = vmatpush.msrb.mxu3 %v532_v5  ;;  %v433_v18 = vld [vmem:[#allocation4] sm:$0x1] }
 0x117   :  { %627 = vmatpush.msra.mxu1 %v531_v8  ;;  %1039 = vmatpush.msra.mxu2 %v531_v8 }
 0x118   :  { %v342_v26 = vrot.slane %v341_v25, 4  ;;  %v421_v43 = vadd.f32 %v420_v23, %v419_v24  ;;  %1040 = vmatpush.msrb.mxu3 %v531_v8  ;;  %v446_v23 = vld [vmem:[#allocation6] sm:$0x1] }
 0x119   :  { %628 = vmatpush.msra.mxu1 %v530_v10  ;;  %1041 = vmatpush.msra.mxu2 %v530_v10 }
 0x11a   :  { %v343_v45 = vadd.f32 %v342_v26, %v341_v25  ;;  %v422_v46 = vrot.slane %v421_v43, 4  ;;  %1042 = vmatpush.msrb.mxu3 %v530_v10 }
 0x11c   :  { %v344_v49 = vrot.slane %v343_v45, 2  ;;  %v423_v50 = vadd.f32 %v422_v46, %v421_v43 }
 0x11e   :  { %v345_v52 = vadd.f32 %v344_v49, %v343_v45  ;;  %v424_v53 = vrot.slane %v423_v50, 2 }
 0x120   :  { %v346_v55 = vrot.slane %v345_v52, 1  ;;  %v425_v56 = vadd.f32 %v424_v53, %v423_v50 }
 0x122   :  { %v347_v59 = vadd.f32 %v346_v55, %v345_v52  ;;  %v426_v60 = vrot.slane %v425_v56, 1 }
 0x124   :  { %v427_v62 = vadd.f32 %v426_v60, %v425_v56  ;;  %v428_v63 = vmul.f32 0.005050505, %v347_v59 }
 0x126   :  { %v429_v3 = vmul.f32 0.005050505, %v427_v62  ;;  %v430_v4 = vmul.f32 %v428_v63, %v428_v63 }
 0x128   :  { %v431_v7 = vsub.f32 %v429_v3, %v430_v4 }
 0x12a   :  { %v432_v9 = vmax.f32 %v431_v7, 0.0 }
 0x12c   :  { %v434_v11 = vadd.f32 1e-05, %v432_v9 }
 0x12e   :  { %1050 = vrsqrt.f32 %v434_v11  ;;  %vm441_vm4 = vweird.f32 %v434_v11 }
 0x134   :  { %v1051_v13 = vpop.eup %1050 }
 0x135   :  { %v436_v14 = vmul.f32 %v1051_v13, %v434_v11  ;;  %vm442_vm3 = vweird.f32 %v1051_v13 }
 0x136   :  { %vm443_vm5 = vmor %vm441_vm4, %vm442_vm3 }
 0x137   :  { %v437_v15 = vmul.f32 %v1051_v13, %v436_v14 }
 0x139   :  { %v438_v16 = vmul.f32 0.5, %v437_v15 }
 0x13b   :  { %v439_v17 = vsub.f32 1.5, %v438_v16 }
 0x13d   :  { %v440_v20 = vmul.f32 %v1051_v13, %v439_v17 }
 0x13f   :  { %v444_v21 = vsel %vm443_vm5, %v1051_v13, %v440_v20 }
 0x140   :  { %v445_v22 = vmul.f32 %v444_v21, %v433_v18 }
 0x142   :  { %v447_v24 = vmul.f32 %v445_v22, %v428_v63  ;;  %v1539_v25 = vperm.slane %v445_v22, 0 }
 0x144   :  { %v448_v26 = vsub.f32 %v446_v23, %v447_v24  ;;  %v476_v43 = vmul.f32 %v1539_v25, %v1496_v2  ;;  %v452_v46 = vmul.f32 %v1539_v25, %v1342_v27  ;;  %v464_v49 = vmul.f32 %v1539_v25, %v1433_v44 }
 0x145   :  { %v453_v2 = vmul.f32 %v1539_v25, %v1344_v28  ;;  %v465_v27 = vmul.f32 %v1539_v25, %v1451_v1  ;;  %v460_v58 = vmul.f32 %v1539_v25, %v1368_v40  ;;  %v472_v59 = vmul.f32 %v1539_v25, %v1384_v48 }
 0x146   :  { %v1543_v45 = vperm.slane %v448_v26, 0  ;;  %v461_v60 = vmul.f32 %v1539_v25, %v1372_v42  ;;  %v473_v28 = vmul.f32 %v1539_v25, %v1416_v12  ;;  %v462_v1 = vmul.f32 %v1539_v25, %v1382_v47 }
 0x147   :  { %v474_v47 = vmul.f32 %v1539_v25, %v1445_v57  ;;  %v454_v12 = vmul.f32 %v1539_v25, %v1346_v29  ;;  %v466_v3 = vmul.f32 %v1539_v25, %v1348_v30  ;;  %v463_v4 = vmul.f32 %v1539_v25, %v1409_v6 }
 0x148   :  { %v504_v50 = vadd.f32 %v1543_v45, %v476_v43  ;;  %v480_v51 = vadd.f32 %v1543_v45, %v452_v46  ;;  %v492_v52 = vadd.f32 %v1543_v45, %v464_v49  ;;  %v481_v44 = vadd.f32 %v1543_v45, %v453_v2 }
 0x149   :  { %v493_v56 = vadd.f32 %v1543_v45, %v465_v27  ;;  %v1572_v63 = vadd.f32 %v1543_v45, %v460_v58  ;;  %v1575_v0 = vadd.f32 %v1543_v45, %v472_v59  ;;  %v1578_v40 = vadd.f32 %v1543_v45, %v461_v60 }
 0x14a   :  { %v529_v53 = vmax.f32 %v504_v50, 0.0  ;;  %v505_v54 = vmax.f32 %v480_v51, 0.0  ;;  %v517_v55 = vmax.f32 %v492_v52, 0.0  ;;  %v506_v61 = vmax.f32 %v481_v44, 0.0 }
 0x14b   :  { %v518_v62 = vmax.f32 %v493_v56, 0.0  ;;  %v1581_v48 = vadd.f32 %v1543_v45, %v473_v28  ;;  %v1584_v42 = vadd.f32 %v1543_v45, %v462_v1  ;;  %v502_v5 = vadd.f32 %v1543_v45, %v474_v47 }
 0x14c   :  { %1000 = vmatmul.msk.f32.vlgmr.msra.gmra.mxu1 %vm291_vm1, %v505_v54  ;;  %1012 = vmatmul.msk.f32.vlgmr.msra.gmra.mxu2 %vm291_vm1, %v517_v55  ;;  %v482_v7 = vadd.f32 %v1543_v45, %v454_v12  ;;  %v494_v8 = vadd.f32 %v1543_v45, %v466_v3  ;;  %v491_v57 = vadd.f32 %v1543_v45, %v463_v4  ;;  %v513_v54 = vmax.f32 %v1572_v63, 0.0 }
 0x14d   :  { %1024 = vmatmul.msk.f32.vlgmr.msrb.gmra.mxu3 %vm291_vm1, %v529_v53  ;;  %v475_v9 = vmul.f32 %v1539_v25, %v1469_v19  ;;  %v455_v30 = vmul.f32 %v1539_v25, %v1350_v31  ;;  %v467_v6 = vmul.f32 %v1539_v25, %v1352_v32  ;;  %v456_v16 = vmul.f32 %v1539_v25, %v1354_v33 }
 0x14e   :  { %v507_v29 = vmax.f32 %v482_v7, 0.0  ;;  %v519_v11 = vmax.f32 %v494_v8, 0.0  ;;  %v468_v17 = vmul.f32 %v1539_v25, %v1358_v35  ;;  %v457_v21 = vmul.f32 %v1539_v25, %v1356_v34 }
 0x14f   :  { %v503_v10 = vadd.f32 %v1543_v45, %v475_v9  ;;  %v483_v13 = vadd.f32 %v1543_v45, %v455_v30  ;;  %v495_v14 = vadd.f32 %v1543_v45, %v467_v6  ;;  %v484_v31 = vadd.f32 %v1543_v45, %v456_v16 }
 0x150   :  { %v496_v32 = vadd.f32 %v1543_v45, %v468_v17  ;;  %v469_v22 = vmul.f32 %v1539_v25, %v1362_v37  ;;  %v485_v33 = vadd.f32 %v1543_v45, %v457_v21  ;;  %v458_v26 = vmul.f32 %v1539_v25, %v1360_v36 }
 0x151   :  { %v508_v15 = vmax.f32 %v483_v13, 0.0  ;;  %v520_v19 = vmax.f32 %v495_v14, 0.0  ;;  %v509_v18 = vmax.f32 %v484_v31, 0.0  ;;  %v470_v43 = vmul.f32 %v1539_v25, %v1366_v39 }
 0x152   :  { %v521_v20 = vmax.f32 %v496_v32, 0.0  ;;  %v497_v35 = vadd.f32 %v1543_v45, %v469_v22  ;;  %v510_v23 = vmax.f32 %v485_v33, 0.0  ;;  %v486_v34 = vadd.f32 %v1543_v45, %v458_v26 }
 0x153   :  { %v498_v37 = vadd.f32 %v1543_v45, %v470_v43  ;;  %v459_v50 = vmul.f32 %v1539_v25, %v1364_v38  ;;  %v471_v51 = vmul.f32 %v1539_v25, %v1370_v41  ;;  %v525_v55 = vmax.f32 %v1575_v0, 0.0 }
 0x154   :  { %1001 = vmatmul.msk.f32.gmra.mxu1 %vm291_vm1, %v506_v61  ;;  %1013 = vmatmul.msk.f32.gmra.mxu2 %vm291_vm1, %v518_v62  ;;  %v522_v24 = vmax.f32 %v497_v35, 0.0  ;;  %v511_v46 = vmax.f32 %v486_v34, 0.0  ;;  %v514_v38 = vmax.f32 %v1578_v40, 0.0  ;;  %v526_v41 = vmax.f32 %v1581_v48, 0.0 }
 0x155   :  { %v523_v49 = vmax.f32 %v498_v37, 0.0  ;;  %v487_v36 = vadd.f32 %v1543_v45, %v459_v50  ;;  %v499_v39 = vadd.f32 %v1543_v45, %v471_v51  ;;  %v515_v25 = vmax.f32 %v1584_v42, 0.0 }
 0x156   :  { %v527_v45 = vmax.f32 %v502_v5, 0.0  ;;  %v516_v2 = vmax.f32 %v491_v57, 0.0  ;;  %v528_v27 = vmax.f32 %v503_v10, 0.0 }
 0x157   :  { %v512_v52 = vmax.f32 %v487_v36, 0.0  ;;  %v524_v53 = vmax.f32 %v499_v39, 0.0 }
 0x15c   :  { %1002 = vmatmul.msk.f32.gmra.mxu1 %vm291_vm1, %v507_v29  ;;  %1014 = vmatmul.msk.f32.gmra.mxu2 %vm291_vm1, %v519_v11 }
 0x164   :  { %1003 = vmatmul.msk.f32.gmra.mxu1 %vm291_vm1, %v508_v15  ;;  %1015 = vmatmul.msk.f32.gmra.mxu2 %vm291_vm1, %v520_v19 }
 0x16c   :  { %1004 = vmatmul.msk.f32.gmra.mxu1 %vm291_vm1, %v509_v18  ;;  %1016 = vmatmul.msk.f32.gmra.mxu2 %vm291_vm1, %v521_v20 }
 0x174   :  { %1005 = vmatmul.msk.f32.gmra.mxu1 %vm291_vm1, %v510_v23  ;;  %1017 = vmatmul.msk.f32.gmra.mxu2 %vm291_vm1, %v522_v24 }
 0x17c   :  { %1006 = vmatmul.msk.f32.gmra.mxu1 %vm291_vm1, %v511_v46  ;;  %1018 = vmatmul.msk.f32.gmra.mxu2 %vm291_vm1, %v523_v49 }
 0x184   :  { %1007 = vmatmul.msk.f32.gmra.mxu1 %vm291_vm1, %v512_v52  ;;  %1019 = vmatmul.msk.f32.gmra.mxu2 %vm291_vm1, %v524_v53 }
 0x18c   :  { %1008 = vmatmul.msk.f32.gmra.mxu1 %vm291_vm1, %v513_v54  ;;  %1020 = vmatmul.msk.f32.gmra.mxu2 %vm291_vm1, %v525_v55 }
 0x194   :  { %1009 = vmatmul.msk.f32.gmra.mxu1 %vm291_vm1, %v514_v38  ;;  %1021 = vmatmul.msk.f32.gmra.mxu2 %vm291_vm1, %v526_v41 }
 0x19c   :  { %1010 = vmatmul.msk.f32.gmra.mxu1 %vm291_vm1, %v515_v25  ;;  %1022 = vmatmul.msk.f32.gmra.mxu2 %vm291_vm1, %v527_v45 }
 0x1a4   :  { %1011 = vmatmul.msk.f32.gmra.mxu1 %vm291_vm1, %v516_v2  ;;  %1023 = vmatmul.msk.f32.gmra.mxu2 %vm291_vm1, %v528_v27 }
 0x1c9   :  { %v1658_v44 = vpop.f32.mrf.mxu1 }
 0x1ca   :  { %v761_v4 = vmul.f32 %v1658_v44, %v1658_v44  ;;  %v705_v57 = vsel %vm123_vm0, %v1658_v44, 0.0 }
 0x1cc   :  { %v786_v30 = vsel %vm123_vm0, %v761_v4, 0.0 }
 0x1cf   :  { %v1660_v56 = vpop.f32.mrf.mxu2 }
 0x1d1   :  { %v1662_v58 = vpop.f32.mrf.mxu1 }
 0x1d2   :  { %v762_v3 = vmul.f32 %v1662_v58, %v1662_v58  ;;  %v706_v5 = vsel %vm123_vm0, %v1662_v58, 0.0 }
 0x1d3   :  { %v707_v11 = vadd.f32 %v706_v5, %v705_v57 }
 0x1d4   :  { %v787_v9 = vsel %vm123_vm0, %v762_v3, 0.0 }
 0x1d5   :  { %v788_v15 = vadd.f32 %v787_v9, %v786_v30 }
 0x1d7   :  { %v1664_v59 = vpop.f32.mrf.mxu2 }
 0x1d9   :  { %v1666_v60 = vpop.f32.mrf.mxu1 }
 0x1da   :  { %v763_v7 = vmul.f32 %v1666_v60, %v1666_v60  ;;  %v708_v10 = vsel %vm123_vm0, %v1666_v60, 0.0 }
 0x1db   :  { %v709_v19 = vadd.f32 %v708_v10, %v707_v11 }
 0x1dc   :  { %v789_v6 = vsel %vm123_vm0, %v763_v7, 0.0 }
 0x1dd   :  { %v790_v18 = vadd.f32 %v789_v6, %v788_v15  ;;  %v773_v6 = vmul.f32 %v1660_v56, %v1660_v56 }
 0x1df   :  { %v1668_v28 = vpop.f32.mrf.mxu2 }
 0x1e1   :  { %v1670_v1 = vpop.f32.mrf.mxu1 }
 0x1e2   :  { %v764_v29 = vmul.f32 %v1670_v1, %v1670_v1  ;;  %v710_v13 = vsel %vm123_vm0, %v1670_v1, 0.0 }
 0x1e3   :  { %v711_v20 = vadd.f32 %v710_v13, %v709_v19 }
 0x1e4   :  { %v791_v17 = vsel %vm123_vm0, %v764_v29, 0.0 }
 0x1e5   :  { %v792_v35 = vadd.f32 %v791_v17, %v790_v18  ;;  %v728_v17 = vsel %vm123_vm0, %v1660_v56, 0.0 }
 0x1e7   :  { %v1672_v61 = vpop.f32.mrf.mxu2 }
 0x1e9   :  { %v1674_v62 = vpop.f32.mrf.mxu1 }
 0x1ea   :  { %v765_v14 = vmul.f32 %v1674_v62, %v1674_v62  ;;  %v712_v31 = vsel %vm123_vm0, %v1674_v62, 0.0 }
 0x1eb   :  { %v713_v23 = vadd.f32 %v712_v31, %v711_v20  ;;  %v774_v31 = vmul.f32 %v1664_v59, %v1664_v59 }
 0x1ec   :  { %v793_v21 = vsel %vm123_vm0, %v765_v14, 0.0 }
 0x1ed   :  { %v794_v34 = vadd.f32 %v793_v21, %v792_v35  ;;  %v809_v21 = vsel %vm123_vm0, %v773_v6, 0.0 }
 0x1ef   :  { %v1676_v63 = vpop.f32.mrf.mxu2 }
 0x1f1   :  { %v1678_v0 = vpop.f32.mrf.mxu1 }
 0x1f2   :  { %v766_v32 = vmul.f32 %v1678_v0, %v1678_v0  ;;  %v714_v22 = vsel %vm123_vm0, %v1678_v0, 0.0 }
 0x1f3   :  { %v715_v37 = vadd.f32 %v714_v22, %v713_v23  ;;  %v730_v22 = vsel %vm123_vm0, %v1664_v59, 0.0 }
 0x1f4   :  { %v795_v24 = vsel %vm123_vm0, %v766_v32, 0.0 }
 0x1f5   :  { %v796_v36 = vadd.f32 %v795_v24, %v794_v34  ;;  %v811_v24 = vsel %vm123_vm0, %v774_v31, 0.0 }
 0x1f7   :  { %v1680_v40 = vpop.f32.mrf.mxu2 }
 0x1f9   :  { %v1682_v48 = vpop.f32.mrf.mxu1 }
 0x1fa   :  { %v767_v33 = vmul.f32 %v1682_v48, %v1682_v48  ;;  %v716_v26 = vsel %vm123_vm0, %v1682_v48, 0.0 }
 0x1fb   :  { %v717_v39 = vadd.f32 %v716_v26, %v715_v37  ;;  %v732_v26 = vsel %vm123_vm0, %v1668_v28, 0.0 }
 0x1fc   :  { %v797_v49 = vsel %vm123_vm0, %v767_v33, 0.0  ;;  %v775_v33 = vmul.f32 %v1668_v28, %v1668_v28 }
 0x1fd   :  { %v798_v38 = vadd.f32 %v797_v49, %v796_v36 }
 0x1fe   :  { %v813_v49 = vsel %vm123_vm0, %v775_v33, 0.0 }
 0x1ff   :  { %v1686_v47 = vpop.f32.mrf.mxu2 }
 0x201   :  { %v1684_v42 = vpop.f32.mrf.mxu1 }
 0x202   :  { %v768_v43 = vmul.f32 %v1684_v42, %v1684_v42  ;;  %v718_v50 = vsel %vm123_vm0, %v1684_v42, 0.0 }
 0x203   :  { %v719_v41 = vadd.f32 %v718_v50, %v717_v39  ;;  %v734_v50 = vsel %vm123_vm0, %v1672_v61, 0.0 }
 0x204   :  { %v799_v53 = vsel %vm123_vm0, %v768_v43, 0.0  ;;  %v776_v43 = vmul.f32 %v1672_v61, %v1672_v61 }
 0x205   :  { %v800_v27 = vadd.f32 %v799_v53, %v798_v38  ;;  %v778_v38 = vmul.f32 %v1680_v40, %v1680_v40 }
 0x207   :  { %v1698_v8 = vpop.f32.mrf.mxu2 }
 0x208   :  { %v742_v6 = vsel %vm123_vm0, %v1698_v8, 0.0 }
 0x209   :  { %v1688_v12 = vpop.f32.mrf.mxu1 }
 0x20a   :  { %v769_v51 = vmul.f32 %v1688_v12, %v1688_v12  ;;  %v720_v54 = vsel %vm123_vm0, %v1688_v12, 0.0 }
 0x20b   :  { %v721_v3 = vadd.f32 %v720_v54, %v719_v41  ;;  %v815_v54 = vsel %vm123_vm0, %v776_v43, 0.0 }
 0x20c   :  { %v801_v25 = vsel %vm123_vm0, %v769_v51, 0.0  ;;  %v777_v51 = vmul.f32 %v1676_v63, %v1676_v63 }
 0x20d   :  { %v802_v7 = vadd.f32 %v801_v25, %v800_v27  ;;  %v779_v27 = vmul.f32 %v1686_v47, %v1686_v47 }
 0x20f   :  { %v1730_v46 = vpop.f32.mrf.mxu2 }
 0x211   :  { %v1713_v16 = vpop.f32.mrf.mxu1 }
 0x212   :  { %v770_v55 = vmul.f32 %v1713_v16, %v1713_v16  ;;  %v722_v45 = vsel %vm123_vm0, %v1713_v16, 0.0 }
 0x213   :  { %v723_v57 = vadd.f32 %v722_v45, %v721_v3  ;;  %v817_v45 = vsel %vm123_vm0, %v777_v51, 0.0 }
 0x214   :  { %v803_v4 = vsel %vm123_vm0, %v770_v55, 0.0  ;;  %v736_v55 = vsel %vm123_vm0, %v1676_v63, 0.0 }
 0x215   :  { %v804_v10 = vadd.f32 %v803_v4, %v802_v7  ;;  %v740_v7 = vsel %vm123_vm0, %v1686_v47, 0.0 }
 0x217   :  { %v1753_v29 = vpop.f32.mrf.mxu2 }
 0x218   :  { %v782_v31 = vmul.f32 %v1753_v29, %v1753_v29 }
 0x219   :  { %v1737_v52 = vpop.f32.mrf.mxu1 }
 0x21a   :  { %v771_v2 = vmul.f32 %v1737_v52, %v1737_v52  ;;  %v724_v5 = vsel %vm123_vm0, %v1737_v52, 0.0 }
 0x21b   :  { %v725_v11 = vadd.f32 %v724_v5, %v723_v57  ;;  %v819_v5 = vsel %vm123_vm0, %v778_v38, 0.0  ;;  %v780_v57 = vmul.f32 %v1698_v8, %v1698_v8 }
 0x21c   :  { %v805_v9 = vsel %vm123_vm0, %v771_v2, 0.0  ;;  %v738_v2 = vsel %vm123_vm0, %v1680_v40, 0.0 }
 0x21d   :  { %v806_v15 = vadd.f32 %v805_v9, %v804_v10 }
 0x21f   :  { %v1783_v36 = vpop.f32.mrf.mxu2 }
 0x220   :  { %v783_v33 = vmul.f32 %v1783_v36, %v1783_v36  ;;  %v748_v43 = vsel %vm123_vm0, %v1783_v36, 0.0 }
 0x221   :  { %v1755_v30 = vpop.f32.mrf.mxu1 }
 0x222   :  { %v726_v13 = vsel %vm123_vm0, %v1755_v30, 0.0  ;;  %v772_v14 = vmul.f32 %v1755_v30, %v1755_v30  ;;  %v829_v51 = vsel %vm123_vm0, %v783_v33, 0.0 }
 0x223   :  { %v727_v19 = vadd.f32 %v726_v13, %v725_v11  ;;  %v821_v11 = vsel %vm123_vm0, %v779_v27, 0.0  ;;  %v781_v13 = vmul.f32 %v1730_v46, %v1730_v46 }
 0x224   :  { %v807_v32 = vsel %vm123_vm0, %v772_v14, 0.0 }
 0x225   :  { %v729_v18 = vadd.f32 %v728_v17, %v727_v19  ;;  %v808_v20 = vadd.f32 %v807_v32, %v806_v15  ;;  %v823_v19 = vsel %vm123_vm0, %v780_v57, 0.0  ;;  %v744_v17 = vsel %vm123_vm0, %v1730_v46, 0.0 }
 0x227   :  { %v731_v35 = vadd.f32 %v730_v22, %v729_v18  ;;  %v810_v23 = vadd.f32 %v809_v21, %v808_v20  ;;  %v1810_v32 = vpop.f32.mrf.mxu2  ;;  %v825_v21 = vsel %vm123_vm0, %v781_v13, 0.0  ;;  %v746_v22 = vsel %vm123_vm0, %v1753_v29, 0.0 }
 0x229   :  { %v733_v34 = vadd.f32 %v732_v26, %v731_v35  ;;  %v812_v37 = vadd.f32 %v811_v24, %v810_v23  ;;  %v1817_v35 = vpop.f32.mrf.mxu3  ;;  %v827_v26 = vsel %vm123_vm0, %v782_v31, 0.0 }
 0x22b   :  { %v735_v39 = vadd.f32 %v734_v50, %v733_v34  ;;  %v814_v53 = vadd.f32 %v813_v49, %v812_v37  ;;  %v784_v34 = vmul.f32 %v1810_v32, %v1810_v32  ;;  %v785_v50 = vmul.f32 %v1817_v35, %v1817_v35 }
 0x22d   :  { %v737_v41 = vadd.f32 %v736_v55, %v735_v39  ;;  %v816_v25 = vadd.f32 %v815_v54, %v814_v53  ;;  %v750_v39 = vsel %vm123_vm0, %v1810_v32, 0.0  ;;  %v753_v55 = vsel %vm752_vm6, %v1817_v35, 0.0 }
 0x22e   :  { %v831_v38 = vsel %vm123_vm0, %v784_v34, 0.0 }
 0x22f   :  { %v818_v3 = vadd.f32 %v817_v45, %v816_v25  ;;  %v739_v4 = vadd.f32 %v738_v2, %v737_v41  ;;  %v833_v45 = vsel %vm752_vm6, %v785_v50, 0.0  ;;  %v859_v50 = vld [vmem:[#allocation9] sm:$0x1] }
 0x231   :  { %v741_v9 = vadd.f32 %v740_v7, %v739_v4  ;;  %v820_v10 = vadd.f32 %v819_v5, %v818_v3 }
 0x233   :  { %v743_v14 = vadd.f32 %v742_v6, %v741_v9  ;;  %v822_v15 = vadd.f32 %v821_v11, %v820_v10 }
 0x235   :  { %v745_v18 = vadd.f32 %v744_v17, %v743_v14  ;;  %v824_v20 = vadd.f32 %v823_v19, %v822_v15 }
 0x237   :  { %v747_v23 = vadd.f32 %v746_v22, %v745_v18  ;;  %v826_v24 = vadd.f32 %v825_v21, %v824_v20 }
 0x239   :  { %v749_v37 = vadd.f32 %v748_v43, %v747_v23  ;;  %v828_v49 = vadd.f32 %v827_v26, %v826_v24  ;;  %v846_v26 = vld [vmem:[#allocation7] sm:$0x1] }
 0x23b   :  { %v751_v53 = vadd.f32 %v750_v39, %v749_v37  ;;  %v830_v54 = vadd.f32 %v829_v51, %v828_v49 }
 0x23d   :  { %v754_v41 = vadd.f32 %v753_v55, %v751_v53  ;;  %v832_v25 = vadd.f32 %v831_v38, %v830_v54 }
 0x23f   :  { %v755_v2 = vrot.slane %v754_v41, 4  ;;  %v834_v27 = vadd.f32 %v833_v45, %v832_v25 }
 0x241   :  { %v756_v3 = vadd.f32 %v755_v2, %v754_v41  ;;  %v835_v4 = vrot.slane %v834_v27, 4 }
 0x243   :  { %v757_v5 = vrot.slane %v756_v3, 2  ;;  %v836_v7 = vadd.f32 %v835_v4, %v834_v27 }
 0x245   :  { %v758_v57 = vadd.f32 %v757_v5, %v756_v3  ;;  %v837_v9 = vrot.slane %v836_v7, 2 }
 0x247   :  { %v759_v10 = vrot.slane %v758_v57, 1  ;;  %v838_v11 = vadd.f32 %v837_v9, %v836_v7 }
 0x249   :  { %v760_v6 = vadd.f32 %v759_v10, %v758_v57  ;;  %v839_v13 = vrot.slane %v838_v11, 1 }
 0x24b   :  { %v840_v14 = vadd.f32 %v839_v13, %v838_v11  ;;  %v841_v15 = vmul.f32 0.005050505, %v760_v6 }
 0x24d   :  { %v842_v19 = vmul.f32 0.005050505, %v840_v14  ;;  %v843_v17 = vmul.f32 %v841_v15, %v841_v15 }
 0x24f   :  { %v844_v31 = vsub.f32 %v842_v19, %v843_v17 }
 0x251   :  { %v845_v18 = vmax.f32 %v844_v31, 0.0 }
 0x253   :  { %v847_v20 = vadd.f32 1e-05, %v845_v18 }
 0x255   :  { %1052 = vrsqrt.f32 %v847_v20  ;;  %vm854_vm8 = vweird.f32 %v847_v20 }
 0x25b   :  { %v1053_v21 = vpop.eup %1052 }
 0x25c   :  { %v849_v22 = vmul.f32 %v1053_v21, %v847_v20  ;;  %vm855_vm7 = vweird.f32 %v1053_v21 }
 0x25d   :  { %vm856_vm9 = vmor %vm854_vm8, %vm855_vm7 }
 0x25e   :  { %v850_v33 = vmul.f32 %v1053_v21, %v849_v22 }
 0x260   :  { %v851_v23 = vmul.f32 0.5, %v850_v33 }
 0x262   :  { %v852_v24 = vsub.f32 1.5, %v851_v23 }
 0x264   :  { %v853_v43 = vmul.f32 %v1053_v21, %v852_v24 }
 0x266   :  { %v857_v34 = vsel %vm856_vm9, %v1053_v21, %v853_v43 }
 0x267   :  { %v858_v37 = vmul.f32 %v857_v34, %v846_v26 }
 0x269   :  { %v860_v49 = vmul.f32 %v858_v37, %v841_v15  ;;  %v1833_v39 = vperm.slane %v858_v37, 0 }
 0x26b   :  { %v861_v51 = vsub.f32 %v859_v50, %v860_v49  ;;  %v865_v54 = vmul.f32 %v1833_v39, %v1658_v44  ;;  %v866_v55 = vmul.f32 %v1833_v39, %v1662_v58  ;;  %v867_v38 = vmul.f32 %v1833_v39, %v1666_v60 }
 0x26c   :  { %v868_v41 = vmul.f32 %v1833_v39, %v1670_v1  ;;  %v869_v25 = vmul.f32 %v1833_v39, %v1674_v62  ;;  %v870_v44 = vmul.f32 %v1833_v39, %v1678_v0  ;;  %v871_v60 = vmul.f32 %v1833_v39, %v1682_v48 }
 0x26d   :  { %v1835_v53 = vperm.slane %v861_v51, 0  ;;  %v872_v1 = vmul.f32 %v1833_v39, %v1684_v42  ;;  %v873_v62 = vmul.f32 %v1833_v39, %v1688_v12  ;;  %v874_v9 = vmul.f32 %v1833_v39, %v1713_v16 }
 0x26e   :  { %v875_v11 = vmul.f32 %v1833_v39, %v1737_v52  ;;  %v876_v12 = vmul.f32 %v1833_v39, %v1755_v30  ;;  %v877_v52 = vmul.f32 %v1833_v39, %v1660_v56  ;;  %v878_v30 = vmul.f32 %v1833_v39, %v1664_v59 }
 0x26f   :  { %v893_v45 = vadd.f32 %v1835_v53, %v865_v54  ;;  %v894_v2 = vadd.f32 %v1835_v53, %v866_v55  ;;  %v895_v27 = vadd.f32 %v1835_v53, %v867_v38  ;;  %v896_v58 = vadd.f32 %v1835_v53, %v868_v41 }
 0x270   :  { %v897_v3 = vadd.f32 %v1835_v53, %v869_v25  ;;  %v898_v4 = vadd.f32 %v1835_v53, %v870_v44  ;;  %v899_v5 = vadd.f32 %v1835_v53, %v871_v60  ;;  %v900_v48 = vadd.f32 %v1835_v53, %v872_v1 }
 0x271   :  { %v918_v7 = vmax.f32 %v893_v45, 0.0  ;;  %v919_v57 = vmax.f32 %v894_v2, 0.0  ;;  %v920_v0 = vmax.f32 %v895_v27, 0.0  ;;  %v921_v10 = vmax.f32 %v896_v58, 0.0 }
 0x272   :  { %v901_v42 = vadd.f32 %v1835_v53, %v873_v62  ;;  %v922_v6 = vmax.f32 %v897_v3, 0.0  ;;  %v902_v13 = vadd.f32 %v1835_v53, %v874_v9  ;;  %v923_v16 = vmax.f32 %v898_v4, 0.0 }
 0x273   :  { %943 = vst.msk [vmem:[%s2019_s7] sm:$0xff] %vm123_vm0, %v918_v7  ;;  %v903_v14 = vadd.f32 %v1835_v53, %v875_v11  ;;  %v924_v15 = vmax.f32 %v899_v5, 0.0  ;;  %v904_v19 = vadd.f32 %v1835_v53, %v876_v12  ;;  %v925_v17 = vmax.f32 %v900_v48, 0.0 }
 0x274   :  { %944 = vst.msk [vmem:[%s2019_s7 + $0x8] sm:$0xff] %vm123_vm0, %v919_v57  ;;  %v879_v56 = vmul.f32 %v1833_v39, %v1668_v28  ;;  %v905_v31 = vadd.f32 %v1835_v53, %v877_v52  ;;  %v926_v18 = vmax.f32 %v901_v42, 0.0  ;;  %v880_v59 = vmul.f32 %v1833_v39, %v1672_v61 }
 0x275   :  { %945 = vst.msk [vmem:[%s2019_s7 + $0x10] sm:$0xff] %vm123_vm0, %v920_v0  ;;  %v906_v20 = vadd.f32 %v1835_v53, %v878_v30  ;;  %v927_v21 = vmax.f32 %v902_v13, 0.0  ;;  %v881_v28 = vmul.f32 %v1833_v39, %v1676_v63  ;;  %v928_v33 = vmax.f32 %v903_v14, 0.0 }
 0x276   :  { %946 = vst.msk [vmem:[%s2019_s7 + $0x18] sm:$0xff] %vm123_vm0, %v921_v10  ;;  %v907_v22 = vadd.f32 %v1835_v53, %v879_v56  ;;  %v882_v61 = vmul.f32 %v1833_v39, %v1680_v40  ;;  %v908_v23 = vadd.f32 %v1835_v53, %v880_v59  ;;  %v929_v24 = vmax.f32 %v904_v19, 0.0 }
 0x277   :  { %947 = vst.msk [vmem:[%s2019_s7 + $0x20] sm:$0xff] %vm123_vm0, %v922_v6  ;;  %v883_v63 = vmul.f32 %v1833_v39, %v1686_v47  ;;  %v909_v26 = vadd.f32 %v1835_v53, %v881_v28  ;;  %v930_v43 = vmax.f32 %v905_v31, 0.0  ;;  %v884_v40 = vmul.f32 %v1833_v39, %v1698_v8 }
 0x278   :  { %948 = vst.msk [vmem:[%s2019_s7 + $0x28] sm:$0xff] %vm123_vm0, %v923_v16  ;;  %v910_v34 = vadd.f32 %v1835_v53, %v882_v61  ;;  %v931_v37 = vmax.f32 %v906_v20, 0.0  ;;  %v885_v47 = vmul.f32 %v1833_v39, %v1730_v46  ;;  %v932_v50 = vmax.f32 %v907_v22, 0.0 }
 0x279   :  { %949 = vst.msk [vmem:[%s2019_s7 + $0x30] sm:$0xff] %vm123_vm0, %v924_v15  ;;  %v911_v49 = vadd.f32 %v1835_v53, %v883_v63  ;;  %v886_v8 = vmul.f32 %v1833_v39, %v1753_v29  ;;  %v912_v51 = vadd.f32 %v1835_v53, %v884_v40  ;;  %v933_v54 = vmax.f32 %v908_v23, 0.0 }
 0x27a   :  { %950 = vst.msk [vmem:[%s2019_s7 + $0x38] sm:$0xff] %vm123_vm0, %v925_v17  ;;  %v887_v46 = vmul.f32 %v1833_v39, %v1783_v36  ;;  %v913_v55 = vadd.f32 %v1835_v53, %v885_v47  ;;  %v934_v38 = vmax.f32 %v909_v26, 0.0  ;;  %v888_v29 = vmul.f32 %v1833_v39, %v1810_v32 }
 0x27b   :  { %951 = vst.msk [vmem:[%s2019_s7 + $0x40] sm:$0xff] %vm123_vm0, %v926_v18  ;;  %v914_v41 = vadd.f32 %v1835_v53, %v886_v8  ;;  %v935_v25 = vmax.f32 %v910_v34, 0.0  ;;  %v889_v36 = vmul.f32 %v1833_v39, %v1817_v35  ;;  %v936_v2 = vmax.f32 %v911_v49, 0.0 }
 0x27c   :  { %952 = vst.msk [vmem:[%s2019_s7 + $0x48] sm:$0xff] %vm123_vm0, %v927_v21  ;;  %v915_v45 = vadd.f32 %v1835_v53, %v887_v46  ;;  %v916_v32 = vadd.f32 %v1835_v53, %v888_v29  ;;  %v937_v27 = vmax.f32 %v912_v51, 0.0  ;;  %v938_v58 = vmax.f32 %v913_v55, 0.0 }
 0x27d   :  { %953 = vst.msk [vmem:[%s2019_s7 + $0x50] sm:$0xff] %vm123_vm0, %v928_v33  ;;  %v917_v44 = vadd.f32 %v1835_v53, %v889_v36  ;;  %v939_v35 = vmax.f32 %v914_v41, 0.0 }
 0x27e   :  { %954 = vst.msk [vmem:[%s2019_s7 + $0x58] sm:$0xff] %vm123_vm0, %v929_v24  ;;  %v940_v39 = vmax.f32 %v915_v45, 0.0  ;;  %v941_v60 = vmax.f32 %v916_v32, 0.0 }
 0x27f   :  { %955 = vst.msk [vmem:[%s2019_s7 + $0x60] sm:$0xff] %vm123_vm0, %v930_v43  ;;  %v942_v53 = vmax.f32 %v917_v44, 0.0 }
 0x280   :  { %956 = vst.msk [vmem:[%s2019_s7 + $0x68] sm:$0xff] %vm123_vm0, %v931_v37 }
 0x281   :  { %957 = vst.msk [vmem:[%s2019_s7 + $0x70] sm:$0xff] %vm123_vm0, %v932_v50 }
 0x282   :  { %958 = vst.msk [vmem:[%s2019_s7 + $0x78] sm:$0xff] %vm123_vm0, %v933_v54 }
 0x283   :  { %959 = vst.msk [vmem:[%s2019_s7 + $0x80] sm:$0xff] %vm123_vm0, %v934_v38 }
 0x284   :  { %960 = vst.msk [vmem:[%s2019_s7 + $0x88] sm:$0xff] %vm123_vm0, %v935_v25 }
 0x285   :  { %961 = vst.msk [vmem:[%s2019_s7 + $0x90] sm:$0xff] %vm123_vm0, %v936_v2 }
 0x286   :  { %962 = vst.msk [vmem:[%s2019_s7 + $0x98] sm:$0xff] %vm123_vm0, %v937_v27 }
 0x287   :  { %963 = vst.msk [vmem:[%s2019_s7 + $0xa0] sm:$0xff] %vm123_vm0, %v938_v58 }
 0x288   :  { %964 = vst.msk [vmem:[%s2019_s7 + $0xa8] sm:$0xff] %vm123_vm0, %v939_v35 }
 0x289   :  { %965 = vst.msk [vmem:[%s2019_s7 + $0xb0] sm:$0xff] %vm123_vm0, %v940_v39 }
 0x28a   :  { %966 = vst.msk [vmem:[%s2019_s7 + $0xb8] sm:$0xff] %vm123_vm0, %v941_v60 }
 0x28b   :  { %967 = vst.msk [vmem:[%s2019_s7 + $0xc0] sm:$0x3f] %vm752_vm6, %v942_v53 }
 0x28c   :  { %972 = vsyncpa [#allocation3], 1 }
 0x28d   :  { %973 = vsyncpa [#allocation5], 1 }
 0x28e   :  { %974 = vsyncpa [#allocation8], 1 }

// kernel: x4_def_pretrain_forward.3
= control target key start
LH: loop header
LB: loop body
LE: loop exit
PB: predicated region body
PF: predicated region fallthrough
CT: control target
= control target key end

     0   :  { %10 = vsyncpa [#allocation3], 0  ;;  %s14050_s0 = inlined_call_operand.vmem [shape: f32[2,1584], index: 0, kind: input, shape index: {}]   ;;  %s14051_s1 = inlined_call_operand.hbm [shape: bf16[1584,1024], index: 1, kind: input, shape index: {}]   ;;  %s14052_s2 = inlined_call_operand.hbm [shape: f32[1,1024], index: 2, kind: input, shape index: {}]   ;;  %s14053_s3 = inlined_call_operand.hbm [shape: bf16[1024,512], index: 3, kind: input, shape index: {}]   ;;  %s14054_s4 = inlined_call_operand.hbm [shape: f32[1,512], index: 4, kind: input, shape index: {}]   ;;  %s14055_s5 = inlined_call_operand.hbm [shape: f32[2,512], index: 5, kind: output, shape index: {}]  }
   0x1   :  { %11 = vsyncpa [#allocation6], 0 }
   0x2   :  { %12 = vsyncpa [#allocation9], 0  ;;  %s34_s20 = sshll.u32 %s14052_s2, 4  ;;  %s35_s20 = int_to_ptr.hbm [resolvable:$true] %s34_s20 }
   0x3   :  { %13 = vsyncpa [#allocation4], 0  ;;  %s13659_s21 = smov [#allocation5]   ;;  %s20_s25 = sshll.u32 %s14051_s1, 4  ;;  %s21_s25 = int_to_ptr.hbm [resolvable:$true] %s20_s25 }
   0x4   :  { %s36_s22 = sshll.u32 %s13659_s21, 4  ;;  %s13660_s26 = smov [#allocation2]   ;;  %s37_s22 = int_to_ptr.vmem [resolvable:$true] %s36_s22 }
   0x5   :  { %39 = dma.hbm_to_vmem [thread:$0]  %s35_s20, 128, %s37_s22, [#allocation6]  }
   0x6   :  { %s22_s27 = sshll.u32 %s13660_s26, 4  ;;  %s13661_s28 = smov 512   ;;  %s23_s27 = int_to_ptr.vmem [resolvable:$true] %s22_s27 }
   0x7   :  { %s13662_s29 = smov 32   ;;  %s44_s2 = sshll.u32 %s14053_s3, 4  ;;  %s45_s2 = int_to_ptr.hbm [resolvable:$true] %s44_s2 }
   0x8   :  { %28 = dma.hbm_to_vmem [thread:$0]  %s21_s25, 101376, %s23_s27, [#allocation3], %s13661_s28, %s13661_s28, %s13662_s29  }
   0x9   :  { %s13663_s7 = smov [#allocation7]   ;;  %s58_s1 = sshll.u32 %s14054_s4, 4  ;;  %s59_s1 = int_to_ptr.hbm [resolvable:$true] %s58_s1 }
   0xa   :  { %s46_s8 = sshll.u32 %s13663_s7, 4  ;;  %s13664_s11 = smov 256   ;;  %s47_s8 = int_to_ptr.vmem [resolvable:$true] %s46_s8 }
   0xb   :  { %s13665_s12 = smov 16   ;;  %s13666_s13 = smov [#allocation8]  }
   0xc   :  { %52 = dma.hbm_to_vmem [thread:$0]  %s45_s2, 32768, %s47_s8, [#allocation6], %s13664_s11, %s13664_s11, %s13665_s12  }
   0xd   :  { %s60_s14 = sshll.u32 %s13666_s13, 4  ;;  %s61_s14 = int_to_ptr.vmem [resolvable:$true] %s60_s14 }
   0xe   :  { %63 = dma.hbm_to_vmem [thread:$0]  %s59_s1, 64, %s61_s14, [#allocation9]  }
   0xf   :  { %13651 = dma.done.wait [#allocation3], 101376  }
  0x10   :  { %13652 = vsyncadd [#allocation3], 4294865920 }
  0x11   :  { %13653 = dma.done.wait [#allocation6], 32896  }
  0x12   :  { %13654 = vsyncadd [#allocation6], 4294934400 }
  0x13   :  { %13655 = dma.done.wait [#allocation9], 64  }
  0x14   :  { %13656 = vsyncadd [#allocation9], 4294967232  ;;  %v8497_v0 = vld [vmem:[#allocation2 + $0x1c0] sm:$0xf]  ;;  %vm4903_vm0 = vcmask 392192   ;;  %vm8244_vm1 = vcmask 1041408  }
  0x15   :  { %v12531_v1 = vld [vmem:[#allocation2 + $0x1dc] sm:$0xf0]  ;;  %vm8246_vm2 = vcmask 1045508   ;;  %s8259_s24 = sshll.u32 %s14055_s5, 4  ;;  %vm8248_vm3 = vcmask 1043456   ;;  %s8260_s24 = int_to_ptr.hbm [resolvable:$true] %s8259_s24 }
  0x16   :  { %v8753_v2 = vld [vmem:[#allocation2 + $0x3c0] sm:$0xf]  ;;  %v8498_v3 = vor.u32 %v12531_v1, %v8497_v0 }
  0x17   :  { %v12595_v4 = vld [vmem:[#allocation2 + $0x3dc] sm:$0xf0] }
  0x18   :  { %v9009_v5 = vld [vmem:[#allocation2 + $0x5c0] sm:$0xf]  ;;  %v8754_v7 = vor.u32 %v12595_v4, %v8753_v2  ;;  %4907 = vmatpush.bf16.msra.mxu0 %v8498_v3 }
  0x19   :  { %v12659_v6 = vld [vmem:[#allocation2 + $0x5dc] sm:$0xf0] }
  0x1a   :  { %v9010_v8 = vor.u32 %v12659_v6, %v9009_v5  ;;  %v9265_v9 = vld [vmem:[#allocation2 + $0x7c0] sm:$0xf]  ;;  %4920 = vmatpush.bf16.msra.mxu1 %v8754_v7 }
  0x1b   :  { %v12723_v10 = vld [vmem:[#allocation2 + $0x7dc] sm:$0xf0] }
  0x1c   :  { %v8465_v11 = vld [vmem:[#allocation2 + $0x180] sm:$0xf]  ;;  %v9266_v12 = vor.u32 %v12723_v10, %v9265_v9  ;;  %4933 = vmatpush.bf16.msra.mxu2 %v9010_v8 }
  0x1d   :  { %v12523_v13 = vld [vmem:[#allocation2 + $0x19c] sm:$0xf0] }
  0x1e   :  { %v8721_v14 = vld [vmem:[#allocation2 + $0x380] sm:$0xf]  ;;  %v8466_v16 = vor.u32 %v12523_v13, %v8465_v11  ;;  %4946 = vmatpush.bf16.msra.mxu3 %v9266_v12 }
  0x1f   :  { %v12587_v15 = vld [vmem:[#allocation2 + $0x39c] sm:$0xf0] }
  0x20   :  { %v8722_v17 = vor.u32 %v12587_v15, %v8721_v14  ;;  %v8977_v18 = vld [vmem:[#allocation2 + $0x580] sm:$0xf]  ;;  %4908 = vmatpush.bf16.msra.mxu0 %v8466_v16 }
  0x21   :  { %v12651_v19 = vld [vmem:[#allocation2 + $0x59c] sm:$0xf0] }
  0x22   :  { %v9233_v20 = vld [vmem:[#allocation2 + $0x780] sm:$0xf]  ;;  %v8978_v21 = vor.u32 %v12651_v19, %v8977_v18  ;;  %4921 = vmatpush.bf16.msra.mxu1 %v8722_v17 }
  0x23   :  { %v12715_v22 = vld [vmem:[#allocation2 + $0x79c] sm:$0xf0] }
  0x24   :  { %v8433_v23 = vld [vmem:[#allocation2 + $0x140] sm:$0xf]  ;;  %v9234_v25 = vor.u32 %v12715_v22, %v9233_v20  ;;  %4934 = vmatpush.bf16.msra.mxu2 %v8978_v21 }
  0x25   :  { %v12515_v24 = vld [vmem:[#allocation2 + $0x15c] sm:$0xf0] }
  0x26   :  { %v8689_v26 = vld [vmem:[#allocation2 + $0x340] sm:$0xf]  ;;  %v8434_v29 = vor.u32 %v12515_v24, %v8433_v23  ;;  %4947 = vmatpush.bf16.msra.mxu3 %v9234_v25 }
  0x27   :  { %v12579_v27 = vld [vmem:[#allocation2 + $0x35c] sm:$0xf0] }
  0x28   :  { %v8945_v28 = vld [vmem:[#allocation2 + $0x540] sm:$0xf]  ;;  %v8690_v33 = vor.u32 %v12579_v27, %v8689_v26  ;;  %4909 = vmatpush.bf16.msra.mxu0 %v8434_v29 }
  0x29   :  { %v12643_v30 = vld [vmem:[#allocation2 + $0x55c] sm:$0xf0] }
  0x2a   :  { %v9201_v31 = vld [vmem:[#allocation2 + $0x740] sm:$0xf]  ;;  %v8946_v34 = vor.u32 %v12643_v30, %v8945_v28  ;;  %4922 = vmatpush.bf16.msra.mxu1 %v8690_v33 }
  0x2b   :  { %v12707_v32 = vld [vmem:[#allocation2 + $0x75c] sm:$0xf0] }
  0x2c   :  { %v8401_v35 = vld [vmem:[#allocation2 + $0x100] sm:$0xf]  ;;  %v9202_v38 = vor.u32 %v12707_v32, %v9201_v31  ;;  %4935 = vmatpush.bf16.msra.mxu2 %v8946_v34 }
  0x2d   :  { %v12507_v36 = vld [vmem:[#allocation2 + $0x11c] sm:$0xf0] }
  0x2e   :  { %v8657_v37 = vld [vmem:[#allocation2 + $0x300] sm:$0xf]  ;;  %v8402_v44 = vor.u32 %v12507_v36, %v8401_v35  ;;  %4948 = vmatpush.bf16.msra.mxu3 %v9202_v38 }
  0x2f   :  { %v12571_v39 = vld [vmem:[#allocation2 + $0x31c] sm:$0xf0] }
  0x30   :  { %v8913_v40 = vld [vmem:[#allocation2 + $0x500] sm:$0xf]  ;;  %v8658_v45 = vor.u32 %v12571_v39, %v8657_v37  ;;  %4910 = vmatpush.bf16.msra.mxu0 %v8402_v44 }
  0x31   :  { %v12635_v41 = vld [vmem:[#allocation2 + $0x51c] sm:$0xf0] }
  0x32   :  { %v9169_v42 = vld [vmem:[#allocation2 + $0x700] sm:$0xf]  ;;  %v8914_v46 = vor.u32 %v12635_v41, %v8913_v40  ;;  %4923 = vmatpush.bf16.msra.mxu1 %v8658_v45 }
  0x33   :  { %v12699_v43 = vld [vmem:[#allocation2 + $0x71c] sm:$0xf0] }
  0x34   :  { %v8369_v47 = vld [vmem:[#allocation2 + $0xc0] sm:$0xf]  ;;  %v9170_v50 = vor.u32 %v12699_v43, %v9169_v42  ;;  %4936 = vmatpush.bf16.msra.mxu2 %v8914_v46 }
  0x35   :  { %v12499_v48 = vld [vmem:[#allocation2 + $0xdc] sm:$0xf0] }
  0x36   :  { %v8625_v49 = vld [vmem:[#allocation2 + $0x2c0] sm:$0xf]  ;;  %v8370_v56 = vor.u32 %v12499_v48, %v8369_v47  ;;  %4949 = vmatpush.bf16.msra.mxu3 %v9170_v50 }
  0x37   :  { %v12563_v51 = vld [vmem:[#allocation2 + $0x2dc] sm:$0xf0] }
  0x38   :  { %v8881_v52 = vld [vmem:[#allocation2 + $0x4c0] sm:$0xf]  ;;  %v8626_v57 = vor.u32 %v12563_v51, %v8625_v49  ;;  %4911 = vmatpush.bf16.msra.mxu0 %v8370_v56 }
  0x39   :  { %v12627_v53 = vld [vmem:[#allocation2 + $0x4dc] sm:$0xf0] }
  0x3a   :  { %v9137_v54 = vld [vmem:[#allocation2 + $0x6c0] sm:$0xf]  ;;  %v8882_v58 = vor.u32 %v12627_v53, %v8881_v52  ;;  %4924 = vmatpush.bf16.msra.mxu1 %v8626_v57 }
  0x3b   :  { %v12691_v55 = vld [vmem:[#allocation2 + $0x6dc] sm:$0xf0] }
  0x3c   :  { %v8337_v59 = vld [vmem:[#allocation2 + $0x80] sm:$0xf]  ;;  %v9138_v62 = vor.u32 %v12691_v55, %v9137_v54  ;;  %4937 = vmatpush.bf16.msra.mxu2 %v8882_v58 }
  0x3d   :  { %v12491_v60 = vld [vmem:[#allocation2 + $0x9c] sm:$0xf0] }
  0x3e   :  { %v8593_v61 = vld [vmem:[#allocation2 + $0x280] sm:$0xf]  ;;  %v8338_v4 = vor.u32 %v12491_v60, %v8337_v59  ;;  %4950 = vmatpush.bf16.msra.mxu3 %v9138_v62  ;;  %v81_v59 = vld [vmem:[%s14050_s0] sm:$0xff] }
  0x3f   :  { %v12555_v63 = vld [vmem:[#allocation2 + $0x29c] sm:$0xf0]  ;;  %89 = vst [vmem:[#allocation1] ss:$4 sm:$0xff] %v81_v59 }
  0x40   :  { %v8849_v0 = vld [vmem:[#allocation2 + $0x480] sm:$0xf]  ;;  %v8594_v5 = vor.u32 %v12555_v63, %v8593_v61  ;;  %4912 = vmatpush.bf16.msra.mxu0 %v8338_v4 }
  0x41   :  { %v12619_v1 = vld [vmem:[#allocation2 + $0x49c] sm:$0xf0] }
  0x42   :  { %v9105_v2 = vld [vmem:[#allocation2 + $0x680] sm:$0xf]  ;;  %v8850_v6 = vor.u32 %v12619_v1, %v8849_v0  ;;  %4925 = vmatpush.bf16.msra.mxu1 %v8594_v5 }
  0x43   :  { %v12683_v3 = vld [vmem:[#allocation2 + $0x69c] sm:$0xf0] }
  0x44   :  { %v8305_v7 = vld [vmem:[#allocation2 + $0x40] sm:$0xf]  ;;  %v9106_v10 = vor.u32 %v12683_v3, %v9105_v2  ;;  %4938 = vmatpush.bf16.msra.mxu2 %v8850_v6 }
  0x45   :  { %v12483_v8 = vld [vmem:[#allocation2 + $0x5c] sm:$0xf0] }
  0x46   :  { %v8561_v9 = vld [vmem:[#allocation2 + $0x240] sm:$0xf]  ;;  %v8306_v16 = vor.u32 %v12483_v8, %v8305_v7  ;;  %4951 = vmatpush.bf16.msra.mxu3 %v9106_v10 }
  0x47   :  { %v12547_v11 = vld [vmem:[#allocation2 + $0x25c] sm:$0xf0] }
  0x48   :  { %v8817_v12 = vld [vmem:[#allocation2 + $0x440] sm:$0xf]  ;;  %v8562_v19 = vor.u32 %v12547_v11, %v8561_v9  ;;  %4913 = vmatpush.bf16.msra.mxu0 %v8306_v16 }
  0x49   :  { %v12611_v13 = vld [vmem:[#allocation2 + $0x45c] sm:$0xf0] }
  0x4a   :  { %v9073_v14 = vld [vmem:[#allocation2 + $0x640] sm:$0xf]  ;;  %v8818_v20 = vor.u32 %v12611_v13, %v8817_v12  ;;  %4926 = vmatpush.bf16.msra.mxu1 %v8562_v19 }
  0x4b   :  { %v12675_v15 = vld [vmem:[#allocation2 + $0x65c] sm:$0xf0] }
  0x4c   :  { %v8273_v17 = vld [vmem:[#allocation2] sm:$0xf]  ;;  %v9074_v24 = vor.u32 %v12675_v15, %v9073_v14  ;;  %4939 = vmatpush.bf16.msra.mxu2 %v8818_v20  ;;  %v83_v20 = vld [vmem:[%s14050_s0 + $0x10] sm:$0xff] }
  0x4d   :  { %v12475_v18 = vld [vmem:[#allocation2 + $0x1c] sm:$0xf0] }
  0x4e   :  { %v8529_v21 = vld [vmem:[#allocation2 + $0x200] sm:$0xf]  ;;  %v8274_v31 = vor.u32 %v12475_v18, %v8273_v17  ;;  %4952 = vmatpush.bf16.msra.mxu3 %v9074_v24  ;;  %v92_v24 = vld.sshfl [vmem:[#allocation1] sm:$0xff pattern:$0x73625140] }
  0x4f   :  { %v12539_v22 = vld [vmem:[#allocation2 + $0x21c] sm:$0xf0] }
  0x50   :  { %v8785_v23 = vld [vmem:[#allocation2 + $0x400] sm:$0xf]  ;;  %v8530_v35 = vor.u32 %v12539_v22, %v8529_v21  ;;  %4914 = vmatpush.bf16.msra.mxu0 %v8274_v31 }
  0x51   :  { %v12603_v25 = vld [vmem:[#allocation2 + $0x41c] sm:$0xf0] }
  0x52   :  { %v9041_v26 = vld [vmem:[#allocation2 + $0x600] sm:$0xf]  ;;  %v8786_v36 = vor.u32 %v12603_v25, %v8785_v23  ;;  %4927 = vmatpush.bf16.msra.mxu1 %v8530_v35  ;;  %v94_v23 = vld.sshfl [vmem:[#allocation1 + $0x10] sm:$0xff pattern:$0x73625140] }
  0x53   :  { %v12667_v27 = vld [vmem:[#allocation2 + $0x61c] sm:$0xf0] }
  0x54   :  { %v9521_v28 = vld [vmem:[#allocation2 + $0x9c0] sm:$0xf]  ;;  %v9042_v39 = vor.u32 %v12667_v27, %v9041_v26  ;;  %4940 = vmatpush.bf16.msra.mxu2 %v8786_v36  ;;  %v13716_v26 = vpack.c.bf16 %v94_v23, %v94_v23  ;;  %v13718_v27 = vpack.c.bf16 %v92_v24, %v92_v24 }
  0x55   :  { %v12787_v29 = vld [vmem:[#allocation2 + $0x9dc] sm:$0xf0] }
  0x56   :  { %v9777_v30 = vld [vmem:[#allocation2 + $0xbc0] sm:$0xf]  ;;  %v9522_v40 = vor.u32 %v12787_v29, %v9521_v28  ;;  %4953 = vmatpush.bf16.msra.mxu3 %v9042_v39  ;;  %v95_v28 = vld.sshfl [vmem:[#allocation1 + $0x18] sm:$0xff pattern:$0x73625140]  ;;  %4915 = vmatmul.bf16.vlgmr.msra.gmra.mxu0 %v13718_v27 }
  0x57   :  { %v12851_v32 = vld [vmem:[#allocation2 + $0xbdc] sm:$0xf0]  ;;  %4941 = vmatmul.bf16.vlgmr.msra.gmra.mxu2 %v13716_v26 }
  0x58   :  { %v10033_v33 = vld [vmem:[#allocation2 + $0xdc0] sm:$0xf]  ;;  %v9778_v41 = vor.u32 %v12851_v32, %v9777_v30  ;;  %4959 = vmatpush.bf16.msrb.mxu0 %v9522_v40  ;;  %v13720_v32 = vpack.c.bf16 %v95_v28, %v95_v28 }
  0x59   :  { %v12915_v34 = vld [vmem:[#allocation2 + $0xddc] sm:$0xf0] }
  0x5a   :  { %v10289_v37 = vld [vmem:[#allocation2 + $0xfc0] sm:$0xf]  ;;  %v10034_v42 = vor.u32 %v12915_v34, %v10033_v33  ;;  %4972 = vmatpush.bf16.msrb.mxu1 %v9778_v41  ;;  %4954 = vmatmul.bf16.vlgmr.msra.gmra.mxu3 %v13720_v32 }
  0x5b   :  { %v12979_v38 = vld [vmem:[#allocation2 + $0xfdc] sm:$0xf0] }
  0x5c   :  { %v9489_v43 = vld [vmem:[#allocation2 + $0x980] sm:$0xf]  ;;  %v10290_v46 = vor.u32 %v12979_v38, %v10289_v37  ;;  %4985 = vmatpush.bf16.msrb.mxu2 %v10034_v42 }
  0x5d   :  { %v12779_v44 = vld [vmem:[#allocation2 + $0x99c] sm:$0xf0] }
  0x5e   :  { %v9745_v45 = vld [vmem:[#allocation2 + $0xb80] sm:$0xf]  ;;  %v9490_v52 = vor.u32 %v12779_v44, %v9489_v43  ;;  %4998 = vmatpush.bf16.msrb.mxu3 %v10290_v46 }
  0x5f   :  { %v12843_v47 = vld [vmem:[#allocation2 + $0xb9c] sm:$0xf0] }
  0x60   :  { %v10001_v48 = vld [vmem:[#allocation2 + $0xd80] sm:$0xf]  ;;  %v9746_v55 = vor.u32 %v12843_v47, %v9745_v45  ;;  %4960 = vmatpush.bf16.msrb.mxu0 %v9490_v52 }
  0x61   :  { %v12907_v49 = vld [vmem:[#allocation2 + $0xd9c] sm:$0xf0] }
  0x62   :  { %v10257_v50 = vld [vmem:[#allocation2 + $0xf80] sm:$0xf]  ;;  %v10002_v56 = vor.u32 %v12907_v49, %v10001_v48  ;;  %4973 = vmatpush.bf16.msrb.mxu1 %v9746_v55 }
  0x63   :  { %v12971_v51 = vld [vmem:[#allocation2 + $0xf9c] sm:$0xf0] }
  0x64   :  { %v9457_v53 = vld [vmem:[#allocation2 + $0x940] sm:$0xf]  ;;  %v10258_v60 = vor.u32 %v12971_v51, %v10257_v50  ;;  %4986 = vmatpush.bf16.msrb.mxu2 %v10002_v56 }
  0x65   :  { %v12771_v54 = vld [vmem:[#allocation2 + $0x95c] sm:$0xf0] }
  0x66   :  { %v9713_v57 = vld [vmem:[#allocation2 + $0xb40] sm:$0xf]  ;;  %v9458_v1 = vor.u32 %v12771_v54, %v9457_v53  ;;  %4999 = vmatpush.bf16.msrb.mxu3 %v10258_v60 }
  0x67   :  { %v12835_v58 = vld [vmem:[#allocation2 + $0xb5c] sm:$0xf0] }
  0x68   :  { %v9969_v61 = vld [vmem:[#allocation2 + $0xd40] sm:$0xf]  ;;  %v9714_v3 = vor.u32 %v12835_v58, %v9713_v57  ;;  %4961 = vmatpush.bf16.msrb.mxu0 %v9458_v1 }
  0x69   :  { %v12899_v62 = vld [vmem:[#allocation2 + $0xd5c] sm:$0xf0] }
  0x6a   :  { %v10225_v63 = vld [vmem:[#allocation2 + $0xf40] sm:$0xf]  ;;  %v9970_v4 = vor.u32 %v12899_v62, %v9969_v61  ;;  %4974 = vmatpush.bf16.msrb.mxu1 %v9714_v3 }
  0x6b   :  { %v12963_v0 = vld [vmem:[#allocation2 + $0xf5c] sm:$0xf0] }
  0x6c   :  { %v9425_v2 = vld [vmem:[#allocation2 + $0x900] sm:$0xf]  ;;  %v10226_v8 = vor.u32 %v12963_v0, %v10225_v63  ;;  %4987 = vmatpush.bf16.msrb.mxu2 %v9970_v4 }
  0x6d   :  { %v12763_v5 = vld [vmem:[#allocation2 + $0x91c] sm:$0xf0] }
  0x6e   :  { %v9681_v6 = vld [vmem:[#allocation2 + $0xb00] sm:$0xf]  ;;  %v9426_v15 = vor.u32 %v12763_v5, %v9425_v2  ;;  %5000 = vmatpush.bf16.msrb.mxu3 %v10226_v8 }
  0x6f   :  { %v12827_v7 = vld [vmem:[#allocation2 + $0xb1c] sm:$0xf0] }
  0x70   :  { %v9937_v9 = vld [vmem:[#allocation2 + $0xd00] sm:$0xf]  ;;  %v9682_v21 = vor.u32 %v12827_v7, %v9681_v6  ;;  %4962 = vmatpush.bf16.msrb.mxu0 %v9426_v15 }
  0x71   :  { %v12891_v10 = vld [vmem:[#allocation2 + $0xd1c] sm:$0xf0] }
  0x72   :  { %v10193_v11 = vld [vmem:[#allocation2 + $0xf00] sm:$0xf]  ;;  %v9938_v22 = vor.u32 %v12891_v10, %v9937_v9  ;;  %4975 = vmatpush.bf16.msrb.mxu1 %v9682_v21 }
  0x73   :  { %v12955_v12 = vld [vmem:[#allocation2 + $0xf1c] sm:$0xf0] }
  0x74   :  { %v9393_v13 = vld [vmem:[#allocation2 + $0x8c0] sm:$0xf]  ;;  %v10194_v25 = vor.u32 %v12955_v12, %v10193_v11  ;;  %4988 = vmatpush.bf16.msrb.mxu2 %v9938_v22 }
  0x75   :  { %v12755_v14 = vld [vmem:[#allocation2 + $0x8dc] sm:$0xf0] }
  0x76   :  { %v9649_v16 = vld [vmem:[#allocation2 + $0xac0] sm:$0xf]  ;;  %v9394_v34 = vor.u32 %v12755_v14, %v9393_v13  ;;  %5001 = vmatpush.bf16.msrb.mxu3 %v10194_v25 }
  0x77   :  { %v12819_v17 = vld [vmem:[#allocation2 + $0xadc] sm:$0xf0] }
  0x78   :  { %v9905_v18 = vld [vmem:[#allocation2 + $0xcc0] sm:$0xf]  ;;  %v9650_v35 = vor.u32 %v12819_v17, %v9649_v16  ;;  %4963 = vmatpush.bf16.msrb.mxu0 %v9394_v34 }
  0x79   :  { %v12883_v19 = vld [vmem:[#allocation2 + $0xcdc] sm:$0xf0] }
  0x7a   :  { %v93_v29 = vld.sshfl [vmem:[#allocation1 + $0x8] sm:$0xff pattern:$0x73625140]  ;;  %v9906_v36 = vor.u32 %v12883_v19, %v9905_v18  ;;  %4976 = vmatpush.bf16.msrb.mxu1 %v9650_v35 }
  0x7b   :  { %v10161_v30 = vld [vmem:[#allocation2 + $0xec0] sm:$0xf]  ;;  %100 = vst [vmem:[#allocation1] ss:$4 sm:$0xff] %v83_v20  ;;  %v13722_v33 = vpack.c.bf16 %v93_v29, %v93_v29  ;;  %v84_v20 = vld [vmem:[%s14050_s0 + $0x18] sm:$0x3] }
  0x7c   :  { %v12947_v31 = vld [vmem:[#allocation2 + $0xedc] sm:$0xf0]  ;;  %4989 = vmatpush.bf16.msrb.mxu2 %v9906_v36 }
  0x7d   :  { %v9361_v37 = vld [vmem:[#allocation2 + $0x880] sm:$0xf]  ;;  %v10162_v40 = vor.u32 %v12947_v31, %v10161_v30  ;;  %4928 = vmatmul.bf16.vlgmr.msra.gmra.mxu1 %v13722_v33 }
  0x7e   :  { %v12747_v38 = vld [vmem:[#allocation2 + $0x89c] sm:$0xf0] }
  0x7f   :  { %v9617_v39 = vld [vmem:[#allocation2 + $0xa80] sm:$0xf]  ;;  %v9362_v46 = vor.u32 %v12747_v38, %v9361_v37  ;;  %5002 = vmatpush.bf16.msrb.mxu3 %v10162_v40 }
  0x80   :  { %v12811_v41 = vld [vmem:[#allocation2 + $0xa9c] sm:$0xf0] }
  0x81   :  { %v9873_v42 = vld [vmem:[#allocation2 + $0xc80] sm:$0xf]  ;;  %v9618_v49 = vor.u32 %v12811_v41, %v9617_v39  ;;  %4964 = vmatpush.bf16.msrb.mxu0 %v9362_v46 }
  0x82   :  { %v12875_v43 = vld [vmem:[#allocation2 + $0xc9c] sm:$0xf0] }
  0x83   :  { %v10129_v44 = vld [vmem:[#allocation2 + $0xe80] sm:$0xf]  ;;  %v9874_v50 = vor.u32 %v12875_v43, %v9873_v42  ;;  %4977 = vmatpush.bf16.msrb.mxu1 %v9618_v49 }
  0x84   :  { %v12939_v45 = vld [vmem:[#allocation2 + $0xe9c] sm:$0xf0] }
  0x85   :  { %v9329_v47 = vld [vmem:[#allocation2 + $0x840] sm:$0xf]  ;;  %v10130_v54 = vor.u32 %v12939_v45, %v10129_v44  ;;  %4990 = vmatpush.bf16.msrb.mxu2 %v9874_v50 }
  0x86   :  { %v12739_v48 = vld [vmem:[#allocation2 + $0x85c] sm:$0xf0] }
  0x87   :  { %v9585_v51 = vld [vmem:[#allocation2 + $0xa40] sm:$0xf]  ;;  %v9330_v60 = vor.u32 %v12739_v48, %v9329_v47  ;;  %5003 = vmatpush.bf16.msrb.mxu3 %v10130_v54 }
  0x88   :  { %v12803_v52 = vld [vmem:[#allocation2 + $0xa5c] sm:$0xf0] }
  0x89   :  { %v9841_v53 = vld [vmem:[#allocation2 + $0xc40] sm:$0xf]  ;;  %v9586_v0 = vor.u32 %v12803_v52, %v9585_v51  ;;  %4965 = vmatpush.bf16.msrb.mxu0 %v9330_v60 }
  0x8a   :  { %v12867_v55 = vld [vmem:[#allocation2 + $0xc5c] sm:$0xf0] }
  0x8b   :  { %v10097_v56 = vld [vmem:[#allocation2 + $0xe40] sm:$0xf]  ;;  %v9842_v1 = vor.u32 %v12867_v55, %v9841_v53  ;;  %4978 = vmatpush.bf16.msrb.mxu1 %v9586_v0 }
  0x8c   :  { %v82_v57 = vld [vmem:[%s14050_s0 + $0x8] sm:$0xff]  ;;  %s13667_s0 = smov [#allocation10]  }
  0x8d   :  { %v12931_v58 = vld [vmem:[#allocation2 + $0xe5c] sm:$0xf0]  ;;  %91 = vst [vmem:[#allocation1 + $0x20] ss:$4 sm:$0xff] %v82_v57  ;;  %4991 = vmatpush.bf16.msrb.mxu2 %v9842_v1  ;;  %s8257_s21 = sshll.u32 %s13667_s0, 4  ;;  %s8258_s21 = int_to_ptr.vmem [resolvable:$true] %s8257_s21 }
  0x8e   :  { %v9297_v59 = vld [vmem:[#allocation2 + $0x800] sm:$0xf]  ;;  %v10098_v5 = vor.u32 %v12931_v58, %v10097_v56 }
  0x8f   :  { %v12731_v61 = vld [vmem:[#allocation2 + $0x81c] sm:$0xf0] }
  0x90   :  { %v9553_v62 = vld [vmem:[#allocation2 + $0xa00] sm:$0xf]  ;;  %v9298_v12 = vor.u32 %v12731_v61, %v9297_v59  ;;  %5004 = vmatpush.bf16.msrb.mxu3 %v10098_v5 }
  0x91   :  { %v12795_v63 = vld [vmem:[#allocation2 + $0xa1c] sm:$0xf0] }
  0x92   :  { %v9809_v2 = vld [vmem:[#allocation2 + $0xc00] sm:$0xf]  ;;  %v9554_v16 = vor.u32 %v12795_v63, %v9553_v62  ;;  %4966 = vmatpush.bf16.msrb.mxu0 %v9298_v12 }
  0x93   :  { %v12859_v3 = vld [vmem:[#allocation2 + $0xc1c] sm:$0xf0] }
  0x94   :  { %v10065_v4 = vld [vmem:[#allocation2 + $0xe00] sm:$0xf]  ;;  %v9810_v17 = vor.u32 %v12859_v3, %v9809_v2  ;;  %v98_v25 = vld.sshfl [vmem:[#allocation1 + $0x30] sm:$0xff pattern:$0x73625140]  ;;  %4979 = vmatpush.bf16.msrb.mxu1 %v9554_v16 }
  0x95   :  { %v12923_v6 = vld [vmem:[#allocation2 + $0xe1c] sm:$0xf0]  ;;  %v96_v28 = vld.sshfl [vmem:[#allocation1 + $0x20] sm:$0xff pattern:$0x73625140]  ;;  %v13734_v38 = vpack.c.bf16 %v98_v25, %v98_v25 }
  0x96   :  { %v10545_v7 = vld [vmem:[#allocation2 + $0x11c0] sm:$0xf]  ;;  %v10066_v21 = vor.u32 %v12923_v6, %v10065_v4  ;;  %v99_v31 = vld.sshfl [vmem:[#allocation1 + $0x38] sm:$0xff pattern:$0x73625140]  ;;  %4992 = vmatpush.bf16.msrb.mxu2 %v9810_v17  ;;  %v13736_v41 = vpack.c.bf16 %v96_v28, %v96_v28 }
  0x97   :  { %v13043_v8 = vld [vmem:[#allocation2 + $0x11dc] sm:$0xf0]  ;;  %v13738_v42 = vpack.c.bf16 %v99_v31, %v99_v31 }
  0x98   :  { %v10801_v9 = vld [vmem:[#allocation2 + $0x13c0] sm:$0xf]  ;;  %v10546_v22 = vor.u32 %v13043_v8, %v10545_v7  ;;  %5005 = vmatpush.bf16.msrb.mxu3 %v10066_v21  ;;  %4967 = vmatmul.bf16.vlgmr.msrb.gmra.mxu0 %v13736_v41 }
  0x99   :  { %v13107_v10 = vld [vmem:[#allocation2 + $0x13dc] sm:$0xf0]  ;;  %4993 = vmatmul.bf16.vlgmr.msrb.gmra.mxu2 %v13734_v38 }
  0x9a   :  { %v11057_v11 = vld [vmem:[#allocation2 + $0x15c0] sm:$0xf]  ;;  %v10802_v29 = vor.u32 %v13107_v10, %v10801_v9  ;;  %5011 = vmatpush.bf16.msra.mxu0 %v10546_v22 }
  0x9b   :  { %v13171_v13 = vld [vmem:[#allocation2 + $0x15dc] sm:$0xf0]  ;;  %5006 = vmatmul.bf16.vlgmr.msrb.gmra.mxu3 %v13738_v42 }
  0x9c   :  { %v11313_v14 = vld [vmem:[#allocation2 + $0x17c0] sm:$0xf]  ;;  %v11058_v30 = vor.u32 %v13171_v13, %v11057_v11  ;;  %5024 = vmatpush.bf16.msra.mxu1 %v10802_v29 }
  0x9d   :  { %v13235_v15 = vld [vmem:[#allocation2 + $0x17dc] sm:$0xf0] }
  0x9e   :  { %v10513_v18 = vld [vmem:[#allocation2 + $0x1180] sm:$0xf]  ;;  %v11314_v35 = vor.u32 %v13235_v15, %v11313_v14  ;;  %5037 = vmatpush.bf16.msra.mxu2 %v11058_v30 }
  0x9f   :  { %v13035_v19 = vld [vmem:[#allocation2 + $0x119c] sm:$0xf0] }
  0xa0   :  { %v10769_v23 = vld [vmem:[#allocation2 + $0x1380] sm:$0xf]  ;;  %v10514_v43 = vor.u32 %v13035_v19, %v10513_v18  ;;  %5050 = vmatpush.bf16.msra.mxu3 %v11314_v35 }
  0xa1   :  { %v13099_v24 = vld [vmem:[#allocation2 + $0x139c] sm:$0xf0] }
  0xa2   :  { %v97_v34 = vld.sshfl [vmem:[#allocation1 + $0x28] sm:$0xff pattern:$0x73625140]  ;;  %v10770_v45 = vor.u32 %v13099_v24, %v10769_v23  ;;  %5012 = vmatpush.bf16.msra.mxu0 %v10514_v43 }
  0xa3   :  { %v11025_v36 = vld [vmem:[#allocation2 + $0x1580] sm:$0xf]  ;;  %101 = vst [vmem:[#allocation1 + $0x20] ss:$4 sm:$0xff] %v84_v20  ;;  %v13740_v44 = vpack.c.bf16 %v97_v34, %v97_v34 }
  0xa4   :  { %v13163_v37 = vld [vmem:[#allocation2 + $0x159c] sm:$0xf0]  ;;  %5025 = vmatpush.bf16.msra.mxu1 %v10770_v45 }
  0xa5   :  { %v11281_v39 = vld [vmem:[#allocation2 + $0x1780] sm:$0xf]  ;;  %v11026_v46 = vor.u32 %v13163_v37, %v11025_v36  ;;  %4980 = vmatmul.bf16.vlgmr.msrb.gmra.mxu1 %v13740_v44 }
  0xa6   :  { %v13227_v40 = vld [vmem:[#allocation2 + $0x179c] sm:$0xf0] }
  0xa7   :  { %v10481_v47 = vld [vmem:[#allocation2 + $0x1140] sm:$0xf]  ;;  %v11282_v50 = vor.u32 %v13227_v40, %v11281_v39  ;;  %5038 = vmatpush.bf16.msra.mxu2 %v11026_v46 }
  0xa8   :  { %v13027_v48 = vld [vmem:[#allocation2 + $0x115c] sm:$0xf0] }
  0xa9   :  { %v10737_v49 = vld [vmem:[#allocation2 + $0x1340] sm:$0xf]  ;;  %v10482_v56 = vor.u32 %v13027_v48, %v10481_v47  ;;  %5051 = vmatpush.bf16.msra.mxu3 %v11282_v50 }
  0xaa   :  { %v13091_v51 = vld [vmem:[#allocation2 + $0x135c] sm:$0xf0] }
  0xab   :  { %v10993_v52 = vld [vmem:[#allocation2 + $0x1540] sm:$0xf]  ;;  %v10738_v57 = vor.u32 %v13091_v51, %v10737_v49  ;;  %5013 = vmatpush.bf16.msra.mxu0 %v10482_v56 }
  0xac   :  { %v13155_v53 = vld [vmem:[#allocation2 + $0x155c] sm:$0xf0] }
  0xad   :  { %v11249_v54 = vld [vmem:[#allocation2 + $0x1740] sm:$0xf]  ;;  %v10994_v58 = vor.u32 %v13155_v53, %v10993_v52  ;;  %5026 = vmatpush.bf16.msra.mxu1 %v10738_v57 }
  0xae   :  { %v13219_v55 = vld [vmem:[#allocation2 + $0x175c] sm:$0xf0] }
  0xaf   :  { %v10449_v59 = vld [vmem:[#allocation2 + $0x1100] sm:$0xf]  ;;  %v11250_v62 = vor.u32 %v13219_v55, %v11249_v54  ;;  %5039 = vmatpush.bf16.msra.mxu2 %v10994_v58 }
  0xb0   :  { %v13019_v60 = vld [vmem:[#allocation2 + $0x111c] sm:$0xf0] }
  0xb1   :  { %v10705_v61 = vld [vmem:[#allocation2 + $0x1300] sm:$0xf]  ;;  %v10450_v4 = vor.u32 %v13019_v60, %v10449_v59  ;;  %5052 = vmatpush.bf16.msra.mxu3 %v11250_v62  ;;  %v12527_v62 = vld [vmem:[#allocation2 + $0x1c4] sm:$0xf] }
  0xb2   :  { %v13083_v63 = vld [vmem:[#allocation2 + $0x131c] sm:$0xf0] }
  0xb3   :  { %v10961_v0 = vld [vmem:[#allocation2 + $0x1500] sm:$0xf]  ;;  %v10706_v5 = vor.u32 %v13083_v63, %v10705_v61  ;;  %5014 = vmatpush.bf16.msra.mxu0 %v10450_v4  ;;  %v8499_v63 = vld [vmem:[#allocation2 + $0x1e0] sm:$0xf0] }
  0xb4   :  { %v13147_v1 = vld [vmem:[#allocation2 + $0x151c] sm:$0xf0]  ;;  %v9011_v4 = vld [vmem:[#allocation2 + $0x5e0] sm:$0xf0] }
  0xb5   :  { %v11217_v2 = vld [vmem:[#allocation2 + $0x1700] sm:$0xf]  ;;  %v10962_v6 = vor.u32 %v13147_v1, %v10961_v0  ;;  %5027 = vmatpush.bf16.msra.mxu1 %v10706_v5  ;;  %v12591_v0 = vld [vmem:[#allocation2 + $0x3c4] sm:$0xf] }
  0xb6   :  { %v13211_v3 = vld [vmem:[#allocation2 + $0x171c] sm:$0xf0] }
  0xb7   :  { %v10417_v7 = vld [vmem:[#allocation2 + $0x10c0] sm:$0xf]  ;;  %v11218_v10 = vor.u32 %v13211_v3, %v11217_v2  ;;  %5040 = vmatpush.bf16.msra.mxu2 %v10962_v6  ;;  %v8755_v2 = vld [vmem:[#allocation2 + $0x3e0] sm:$0xf0] }
  0xb8   :  { %v13011_v8 = vld [vmem:[#allocation2 + $0x10dc] sm:$0xf0]  ;;  %v12655_v3 = vld [vmem:[#allocation2 + $0x5c4] sm:$0xf] }
  0xb9   :  { %v10673_v9 = vld [vmem:[#allocation2 + $0x12c0] sm:$0xf]  ;;  %v10418_v16 = vor.u32 %v13011_v8, %v10417_v7  ;;  %5053 = vmatpush.bf16.msra.mxu3 %v11218_v10  ;;  %v102_v7 = vld.sshfl [vmem:[#allocation1] sm:$0xff pattern:$0x73625140] }
  0xba   :  { %v13075_v11 = vld [vmem:[#allocation2 + $0x12dc] sm:$0xf0]  ;;  %v104_v8 = vld.sshfl [vmem:[#allocation1 + $0x10] sm:$0xff pattern:$0x73625140] }
  0xbb   :  { %v10929_v12 = vld [vmem:[#allocation2 + $0x14c0] sm:$0xf]  ;;  %v10674_v17 = vor.u32 %v13075_v11, %v10673_v9  ;;  %5015 = vmatpush.bf16.msra.mxu0 %v10418_v16 }
  0xbc   :  { %v13139_v13 = vld [vmem:[#allocation2 + $0x14dc] sm:$0xf0] }
  0xbd   :  { %v11185_v14 = vld [vmem:[#allocation2 + $0x16c0] sm:$0xf]  ;;  %v10930_v18 = vor.u32 %v13139_v13, %v10929_v12  ;;  %5028 = vmatpush.bf16.msra.mxu1 %v10674_v17  ;;  %v105_v12 = vld.sshfl [vmem:[#allocation1 + $0x18] sm:$0xff pattern:$0x73625140]  ;;  %v8502_v13 = vor.u32 %v12527_v62, %v8499_v63 }
  0xbe   :  { %v13203_v15 = vld [vmem:[#allocation2 + $0x16dc] sm:$0xf0]  ;;  %v12519_v17 = vld [vmem:[#allocation2 + $0x184] sm:$0xf] }
  0xbf   :  { %v10385_v19 = vld [vmem:[#allocation2 + $0x1080] sm:$0xf]  ;;  %v11186_v22 = vor.u32 %v13203_v15, %v11185_v14  ;;  %5041 = vmatpush.bf16.msra.mxu2 %v10930_v18  ;;  %v8758_v14 = vor.u32 %v12591_v0, %v8755_v2  ;;  %v9014_v18 = vor.u32 %v12655_v3, %v9011_v4  ;;  %v9235_v62 = vld [vmem:[#allocation2 + $0x7a0] sm:$0xf0] }
  0xc0   :  { %v13003_v20 = vld [vmem:[#allocation2 + $0x109c] sm:$0xf0]  ;;  %v8371_v2 = vld [vmem:[#allocation2 + $0xe0] sm:$0xf0] }
  0xc1   :  { %v10641_v21 = vld [vmem:[#allocation2 + $0x1280] sm:$0xf]  ;;  %v10386_v30 = vor.u32 %v13003_v20, %v10385_v19  ;;  %5054 = vmatpush.bf16.msra.mxu3 %v11186_v22  ;;  %v13746_v19 = vpack.c.bf16 %v102_v7, %v102_v7  ;;  %v8467_v20 = vld [vmem:[#allocation2 + $0x1a0] sm:$0xf0] }
  0xc2   :  { %v13067_v23 = vld [vmem:[#allocation2 + $0x129c] sm:$0xf0]  ;;  %v8723_v22 = vld [vmem:[#allocation2 + $0x3a0] sm:$0xf0] }
  0xc3   :  { %v10897_v24 = vld [vmem:[#allocation2 + $0x1480] sm:$0xf]  ;;  %v10642_v31 = vor.u32 %v13067_v23, %v10641_v21  ;;  %5016 = vmatpush.bf16.msra.mxu0 %v10386_v30  ;;  %v12583_v21 = vld [vmem:[#allocation2 + $0x384] sm:$0xf]  ;;  %v13748_v23 = vpack.c.bf16 %v104_v8, %v104_v8 }
  0xc4   :  { %v13131_v25 = vld [vmem:[#allocation2 + $0x149c] sm:$0xf0]  ;;  %v12623_v7 = vld [vmem:[#allocation2 + $0x4c4] sm:$0xf] }
  0xc5   :  { %v11153_v28 = vld [vmem:[#allocation2 + $0x1680] sm:$0xf]  ;;  %v10898_v34 = vor.u32 %v13131_v25, %v10897_v24  ;;  %5029 = vmatpush.bf16.msra.mxu1 %v10642_v31  ;;  %v12647_v25 = vld [vmem:[#allocation2 + $0x584] sm:$0xf] }
  0xc6   :  { %v13195_v29 = vld [vmem:[#allocation2 + $0x169c] sm:$0xf0]  ;;  %v8883_v8 = vld [vmem:[#allocation2 + $0x4e0] sm:$0xf0] }
  0xc7   :  { %v10353_v35 = vld [vmem:[#allocation2 + $0x1040] sm:$0xf]  ;;  %v11154_v39 = vor.u32 %v13195_v29, %v11153_v28  ;;  %5042 = vmatpush.bf16.msra.mxu2 %v10898_v34  ;;  %v8979_v28 = vld [vmem:[#allocation2 + $0x5a0] sm:$0xf0]  ;;  %v13752_v29 = vpack.c.bf16 %v105_v12, %v105_v12  ;;  %v8470_v34 = vor.u32 %v12519_v17, %v8467_v20 }
  0xc8   :  { %v12995_v36 = vld [vmem:[#allocation2 + $0x105c] sm:$0xf0]  ;;  %v8595_v20 = vld [vmem:[#allocation2 + $0x2a0] sm:$0xf0] }
  0xc9   :  { %v10609_v37 = vld [vmem:[#allocation2 + $0x1240] sm:$0xf]  ;;  %v10354_v49 = vor.u32 %v12995_v36, %v10353_v35  ;;  %5055 = vmatpush.bf16.msra.mxu3 %v11154_v39  ;;  %v8726_v35 = vor.u32 %v12583_v21, %v8723_v22  ;;  %v8435_v39 = vld [vmem:[#allocation2 + $0x160] sm:$0xf0] }
  0xca   :  { %v13059_v40 = vld [vmem:[#allocation2 + $0x125c] sm:$0xf0]  ;;  %v12615_v21 = vld [vmem:[#allocation2 + $0x484] sm:$0xf] }
  0xcb   :  { %v10865_v43 = vld [vmem:[#allocation2 + $0x1440] sm:$0xf]  ;;  %v10610_v53 = vor.u32 %v13059_v40, %v10609_v37  ;;  %5017 = vmatpush.bf16.msra.mxu0 %v10354_v49  ;;  %v12511_v37 = vld [vmem:[#allocation2 + $0x144] sm:$0xf]  ;;  %v8982_v40 = vor.u32 %v12647_v25, %v8979_v28 }
  0xcc   :  { %v13123_v45 = vld [vmem:[#allocation2 + $0x145c] sm:$0xf0]  ;;  %v9267_v49 = vld [vmem:[#allocation2 + $0x7e0] sm:$0xf0] }
  0xcd   :  { %v11121_v46 = vld [vmem:[#allocation2 + $0x1640] sm:$0xf]  ;;  %v10866_v54 = vor.u32 %v13123_v45, %v10865_v43  ;;  %5030 = vmatpush.bf16.msra.mxu1 %v10610_v53  ;;  %v12575_v43 = vld [vmem:[#allocation2 + $0x344] sm:$0xf] }
  0xce   :  { %v13187_v47 = vld [vmem:[#allocation2 + $0x165c] sm:$0xf0]  ;;  %v8691_v45 = vld [vmem:[#allocation2 + $0x360] sm:$0xf0] }
  0xcf   :  { %v10321_v48 = vld [vmem:[#allocation2 + $0x1000] sm:$0xf]  ;;  %v11122_v58 = vor.u32 %v13187_v47, %v11121_v46  ;;  %5043 = vmatpush.bf16.msra.mxu2 %v10866_v54  ;;  %v12639_v46 = vld [vmem:[#allocation2 + $0x544] sm:$0xf] }
  0xd0   :  { %v12987_v50 = vld [vmem:[#allocation2 + $0x101c] sm:$0xf0]  ;;  %v8947_v47 = vld [vmem:[#allocation2 + $0x560] sm:$0xf0] }
  0xd1   :  { %v10577_v51 = vld [vmem:[#allocation2 + $0x1200] sm:$0xf]  ;;  %v10322_v1 = vor.u32 %v12987_v50, %v10321_v48  ;;  %5056 = vmatpush.bf16.msra.mxu3 %v11122_v58  ;;  %v12719_v48 = vld [vmem:[#allocation2 + $0x7c4] sm:$0xf] }
  0xd2   :  { %v13051_v52 = vld [vmem:[#allocation2 + $0x121c] sm:$0xf0]  ;;  %v12503_v53 = vld [vmem:[#allocation2 + $0x104] sm:$0xf] }
  0xd3   :  { %v10833_v55 = vld [vmem:[#allocation2 + $0x1400] sm:$0xf]  ;;  %v10578_v5 = vor.u32 %v13051_v52, %v10577_v51  ;;  %5018 = vmatpush.bf16.msra.mxu0 %v10322_v1  ;;  %v8438_v51 = vor.u32 %v12511_v37, %v8435_v39  ;;  %v8694_v52 = vor.u32 %v12575_v43, %v8691_v45  ;;  %v8403_v54 = vld [vmem:[#allocation2 + $0x120] sm:$0xf0] }
  0xd4   :  { %v13115_v56 = vld [vmem:[#allocation2 + $0x141c] sm:$0xf0]  ;;  %v8659_v58 = vld [vmem:[#allocation2 + $0x320] sm:$0xf0]  ;;  %v8406_v63 = vor.u32 %v12503_v53, %v8403_v54 }
  0xd5   :  { %v11089_v57 = vld [vmem:[#allocation2 + $0x1600] sm:$0xf]  ;;  %v10834_v6 = vor.u32 %v13115_v56, %v10833_v55  ;;  %5031 = vmatpush.bf16.msra.mxu1 %v10578_v5  ;;  %v8950_v55 = vor.u32 %v12639_v46, %v8947_v47  ;;  %v9270_v56 = vor.u32 %v12719_v48, %v9267_v49  ;;  %v12495_v1 = vld [vmem:[#allocation2 + $0xc4] sm:$0xf] }
  0xd6   :  { %v13179_v59 = vld [vmem:[#allocation2 + $0x161c] sm:$0xf0]  ;;  %5019 = vmatmul.bf16.vlgmr.msra.gmra.mxu0 %v13746_v19  ;;  %v12559_v5 = vld [vmem:[#allocation2 + $0x2c4] sm:$0xf]  ;;  %v8374_v12 = vor.u32 %v12495_v1, %v8371_v2 }
  0xd7   :  { %v11409_v60 = vld [vmem:[#allocation2 + $0x1880] sm:$0xf]  ;;  %v11090_v9 = vor.u32 %v13179_v59, %v11089_v57  ;;  %5044 = vmatpush.bf16.msra.mxu2 %v10834_v6  ;;  %v12567_v57 = vld [vmem:[#allocation2 + $0x304] sm:$0xf] }
  0xd8   :  { %v13259_v61 = vld [vmem:[#allocation2 + $0x189c] sm:$0xf0]  ;;  %v12631_v59 = vld [vmem:[#allocation2 + $0x504] sm:$0xf]  ;;  %v8662_v0 = vor.u32 %v12567_v57, %v8659_v58 }
  0xd9   :  { %v11410_v10 = vor.u32 %v13259_v61, %v11409_v60  ;;  %v103_v11 = vld.sshfl [vmem:[#allocation1 + $0x8] sm:$0xff pattern:$0x73625140]  ;;  %5057 = vmatpush.bf16.msra.mxu3 %v11090_v9  ;;  %5076 = vmatpush.bf16.msrb.mxu1 %v8502_v13 }
  0xda   :  { %v11377_v15 = vld [vmem:[#allocation2 + $0x1840] sm:$0xf]  ;;  %v13750_v24 = vpack.c.bf16 %v103_v11, %v103_v11  ;;  %5045 = vmatmul.bf16.vlgmr.msra.gmra.mxu2 %v13748_v23  ;;  %v8915_v60 = vld [vmem:[#allocation2 + $0x520] sm:$0xf0] }
  0xdb   :  { %v13251_v16 = vld [vmem:[#allocation2 + $0x185c] sm:$0xf0]  ;;  %5068 = vmatpush.bf16.msrb.mxu0 %v11410_v10  ;;  %5089 = vmatpush.bf16.msrb.mxu2 %v8758_v14  ;;  %v12711_v61 = vld [vmem:[#allocation2 + $0x784] sm:$0xf]  ;;  %v8918_v3 = vor.u32 %v12631_v59, %v8915_v60 }
  0xdc   :  { %v11378_v30 = vor.u32 %v13251_v16, %v11377_v15  ;;  %v11345_v31 = vld [vmem:[#allocation2 + $0x1800] sm:$0xf]  ;;  %5032 = vmatmul.bf16.vlgmr.msra.gmra.mxu1 %v13750_v24  ;;  %5058 = vmatmul.bf16.vlgmr.msra.gmra.mxu3 %v13752_v29  ;;  %v9238_v4 = vor.u32 %v12711_v61, %v9235_v62  ;;  %v8627_v6 = vld [vmem:[#allocation2 + $0x2e0] sm:$0xf0]  ;;  %v8886_v16 = vor.u32 %v12623_v7, %v8883_v8 }
  0xdd   :  { %v13243_v36 = vld [vmem:[#allocation2 + $0x181c] sm:$0xf0]  ;;  %5102 = vmatpush.bf16.msrb.mxu3 %v9014_v18  ;;  %5077 = vmatpush.bf16.msrb.mxu1 %v8470_v34  ;;  %v12703_v9 = vld [vmem:[#allocation2 + $0x744] sm:$0xf]  ;;  %v8630_v13 = vor.u32 %v12559_v5, %v8627_v6 }
  0xde   :  { %v11346_v50 = vor.u32 %v13243_v36, %v11345_v31  ;;  %v9203_v10 = vld [vmem:[#allocation2 + $0x760] sm:$0xf0]  ;;  %v106_v11 = vld.sshfl [vmem:[#allocation1 + $0x20] sm:$0xff pattern:$0x73625140] }
  0xdf   :  { %5069 = vmatpush.bf16.msrb.mxu0 %v11378_v30  ;;  %5090 = vmatpush.bf16.msrb.mxu2 %v8726_v35  ;;  %v12487_v14 = vld [vmem:[#allocation2 + $0x84] sm:$0xf]  ;;  %v9206_v17 = vor.u32 %v12703_v9, %v9203_v10  ;;  %v13758_v22 = vpack.c.bf16 %v106_v11, %v106_v11 }
  0xe0   :  { %v8339_v15 = vld [vmem:[#allocation2 + $0xa0] sm:$0xf0] }
  0xe1   :  { %5103 = vmatpush.bf16.msrb.mxu3 %v8982_v40  ;;  %5078 = vmatpush.bf16.msrb.mxu1 %v8438_v51  ;;  %v12551_v18 = vld [vmem:[#allocation2 + $0x284] sm:$0xf]  ;;  %v8342_v31 = vor.u32 %v12487_v14, %v8339_v15 }
  0xe2   :  { %v8851_v25 = vld [vmem:[#allocation2 + $0x4a0] sm:$0xf0]  ;;  %v8598_v34 = vor.u32 %v12551_v18, %v8595_v20 }
  0xe3   :  { %5070 = vmatpush.bf16.msrb.mxu0 %v11346_v50  ;;  %5091 = vmatpush.bf16.msrb.mxu2 %v8694_v52  ;;  %v12695_v28 = vld [vmem:[#allocation2 + $0x704] sm:$0xf]  ;;  %v8854_v37 = vor.u32 %v12615_v21, %v8851_v25 }
  0xe4   :  { %v9171_v30 = vld [vmem:[#allocation2 + $0x720] sm:$0xf0] }
  0xe5   :  { %5104 = vmatpush.bf16.msrb.mxu3 %v8950_v55  ;;  %5079 = vmatpush.bf16.msrb.mxu1 %v8406_v63  ;;  %v12479_v35 = vld [vmem:[#allocation2 + $0x44] sm:$0xf]  ;;  %v9174_v39 = vor.u32 %v12695_v28, %v9171_v30 }
  0xe6   :  { %v8307_v36 = vld [vmem:[#allocation2 + $0x60] sm:$0xf0]  ;;  %11439 = vmatmul.msk.bf16.vlgmr.msrb.gmra.mxu0 %vm4903_vm0, %v13758_v22 }
  0xe7   :  { %5115 = vmatpush.bf16.msra.mxu0 %v9270_v56  ;;  %5092 = vmatpush.bf16.msrb.mxu2 %v8662_v0  ;;  %v12543_v40 = vld [vmem:[#allocation2 + $0x244] sm:$0xf]  ;;  %v8310_v49 = vor.u32 %v12479_v35, %v8307_v36 }
  0xe8   :  { %v8563_v43 = vld [vmem:[#allocation2 + $0x260] sm:$0xf0] }
  0xe9   :  { %5105 = vmatpush.bf16.msrb.mxu3 %v8918_v3  ;;  %5080 = vmatpush.bf16.msrb.mxu1 %v8374_v12  ;;  %v12607_v45 = vld [vmem:[#allocation2 + $0x444] sm:$0xf]  ;;  %v8566_v50 = vor.u32 %v12543_v40, %v8563_v43 }
  0xea   :  { %v8819_v46 = vld [vmem:[#allocation2 + $0x460] sm:$0xf0] }
  0xeb   :  { %5116 = vmatpush.bf16.msra.mxu0 %v9238_v4  ;;  %5093 = vmatpush.bf16.msrb.mxu2 %v8630_v13  ;;  %v12687_v47 = vld [vmem:[#allocation2 + $0x6c4] sm:$0xf]  ;;  %v8822_v54 = vor.u32 %v12607_v45, %v8819_v46 }
  0xec   :  { %v9139_v48 = vld [vmem:[#allocation2 + $0x6e0] sm:$0xf0] }
  0xed   :  { %5106 = vmatpush.bf16.msrb.mxu3 %v8886_v16  ;;  %5081 = vmatpush.bf16.msrb.mxu1 %v8342_v31  ;;  %v12471_v51 = vld [vmem:[#allocation2 + $0x4] sm:$0xf]  ;;  %v9142_v55 = vor.u32 %v12687_v47, %v9139_v48 }
  0xee   :  { %v8275_v52 = vld [vmem:[#allocation2 + $0x20] sm:$0xf0] }
  0xef   :  { %5117 = vmatpush.bf16.msra.mxu0 %v9206_v17  ;;  %5094 = vmatpush.bf16.msrb.mxu2 %v8598_v34  ;;  %v12535_v53 = vld [vmem:[#allocation2 + $0x204] sm:$0xf]  ;;  %v8278_v1 = vor.u32 %v12471_v51, %v8275_v52 }
  0xf0   :  { %v8531_v56 = vld [vmem:[#allocation2 + $0x220] sm:$0xf0] }
  0xf1   :  { %5107 = vmatpush.bf16.msrb.mxu3 %v8854_v37  ;;  %v12599_v57 = vld [vmem:[#allocation2 + $0x404] sm:$0xf]  ;;  %5082 = vmatpush.bf16.msrb.mxu1 %v8310_v49  ;;  %v8534_v2 = vor.u32 %v12535_v53, %v8531_v56 }
  0xf2   :  { %v8787_v58 = vld [vmem:[#allocation2 + $0x420] sm:$0xf0] }
  0xf3   :  { %5118 = vmatpush.bf16.msra.mxu0 %v9174_v39  ;;  %v12679_v59 = vld [vmem:[#allocation2 + $0x684] sm:$0xf]  ;;  %5095 = vmatpush.bf16.msrb.mxu2 %v8566_v50  ;;  %v8790_v5 = vor.u32 %v12599_v57, %v8787_v58 }
  0xf4   :  { %v9107_v60 = vld [vmem:[#allocation2 + $0x6a0] sm:$0xf0] }
  0xf5   :  { %v12783_v61 = vld [vmem:[#allocation2 + $0x9c4] sm:$0xf]  ;;  %5108 = vmatpush.bf16.msrb.mxu3 %v8822_v54  ;;  %v9110_v6 = vor.u32 %v12679_v59, %v9107_v60  ;;  %5083 = vmatpush.bf16.msrb.mxu1 %v8278_v1 }
  0xf6   :  { %v9523_v62 = vld [vmem:[#allocation2 + $0x9e0] sm:$0xf0] }
  0xf7   :  { %v12847_v63 = vld [vmem:[#allocation2 + $0xbc4] sm:$0xf]  ;;  %5119 = vmatpush.bf16.msra.mxu0 %v9142_v55  ;;  %v9526_v7 = vor.u32 %v12783_v61, %v9523_v62  ;;  %5096 = vmatpush.bf16.msrb.mxu2 %v8534_v2 }
  0xf8   :  { %v9779_v0 = vld [vmem:[#allocation2 + $0xbe0] sm:$0xf0]  ;;  %5084 = vmatmul.bf16.vlgmr.msrb.gmra.mxu1 %v13718_v27 }
  0xf9   :  { %v12911_v3 = vld [vmem:[#allocation2 + $0xdc4] sm:$0xf]  ;;  %v9782_v8 = vor.u32 %v12847_v63, %v9779_v0  ;;  %5109 = vmatpush.bf16.msrb.mxu3 %v8790_v5  ;;  %5128 = vmatpush.bf16.msra.mxu1 %v9526_v7 }
  0xfa   :  { %v10035_v4 = vld [vmem:[#allocation2 + $0xde0] sm:$0xf0]  ;;  %5097 = vmatmul.bf16.vlgmr.msrb.gmra.mxu2 %v13722_v33 }
  0xfb   :  { %v12671_v9 = vld [vmem:[#allocation2 + $0x644] sm:$0xf]  ;;  %v10038_v12 = vor.u32 %v12911_v3, %v10035_v4  ;;  %5120 = vmatpush.bf16.msra.mxu0 %v9110_v6  ;;  %5141 = vmatpush.bf16.msra.mxu2 %v9782_v8 }
  0xfc   :  { %v9075_v10 = vld [vmem:[#allocation2 + $0x660] sm:$0xf0]  ;;  %5110 = vmatmul.bf16.vlgmr.msrb.gmra.mxu3 %v13716_v26 }
  0xfd   :  { %v12775_v11 = vld [vmem:[#allocation2 + $0x984] sm:$0xf]  ;;  %v9078_v18 = vor.u32 %v12671_v9, %v9075_v10  ;;  %5154 = vmatpush.bf16.msra.mxu3 %v10038_v12 }
  0xfe   :  { %v9491_v13 = vld [vmem:[#allocation2 + $0x9a0] sm:$0xf0] }
  0xff   :  { %v12839_v14 = vld [vmem:[#allocation2 + $0xb84] sm:$0xf]  ;;  %v9494_v21 = vor.u32 %v12775_v11, %v9491_v13  ;;  %5121 = vmatpush.bf16.msra.mxu0 %v9078_v18 }
 0x100   :  { %v9747_v15 = vld [vmem:[#allocation2 + $0xba0] sm:$0xf0] }
 0x101   :  { %v12903_v16 = vld [vmem:[#allocation2 + $0xd84] sm:$0xf]  ;;  %v9750_v25 = vor.u32 %v12839_v14, %v9747_v15  ;;  %5129 = vmatpush.bf16.msra.mxu1 %v9494_v21 }
 0x102   :  { %v10003_v17 = vld [vmem:[#allocation2 + $0xda0] sm:$0xf0] }
 0x103   :  { %v12663_v20 = vld [vmem:[#allocation2 + $0x604] sm:$0xf]  ;;  %v10006_v34 = vor.u32 %v12903_v16, %v10003_v17  ;;  %5142 = vmatpush.bf16.msra.mxu2 %v9750_v25 }
 0x104   :  { %v9043_v28 = vld [vmem:[#allocation2 + $0x620] sm:$0xf0] }
 0x105   :  { %v12767_v30 = vld [vmem:[#allocation2 + $0x944] sm:$0xf]  ;;  %v9046_v45 = vor.u32 %v12663_v20, %v9043_v28  ;;  %5155 = vmatpush.bf16.msra.mxu3 %v10006_v34 }
 0x106   :  { %v9459_v31 = vld [vmem:[#allocation2 + $0x960] sm:$0xf0] }
 0x107   :  { %v12831_v35 = vld [vmem:[#allocation2 + $0xb44] sm:$0xf]  ;;  %v9462_v46 = vor.u32 %v12767_v30, %v9459_v31  ;;  %5122 = vmatpush.bf16.msra.mxu0 %v9046_v45 }
 0x108   :  { %v9715_v36 = vld [vmem:[#allocation2 + $0xb60] sm:$0xf0] }
 0x109   :  { %v12895_v37 = vld [vmem:[#allocation2 + $0xd44] sm:$0xf]  ;;  %v9718_v47 = vor.u32 %v12831_v35, %v9715_v36  ;;  %5130 = vmatpush.bf16.msra.mxu1 %v9462_v46 }
 0x10a   :  { %v9971_v39 = vld [vmem:[#allocation2 + $0xd60] sm:$0xf0]  ;;  %5123 = vmatmul.bf16.vlgmr.msra.gmra.mxu0 %v13720_v32 }
 0x10b   :  { %v12975_v40 = vld [vmem:[#allocation2 + $0xfc4] sm:$0xf]  ;;  %v9974_v50 = vor.u32 %v12895_v37, %v9971_v39  ;;  %5143 = vmatpush.bf16.msra.mxu2 %v9718_v47 }
 0x10c   :  { %v10291_v43 = vld [vmem:[#allocation2 + $0xfe0] sm:$0xf0] }
 0x10d   :  { %v12759_v48 = vld [vmem:[#allocation2 + $0x904] sm:$0xf]  ;;  %v10294_v51 = vor.u32 %v12975_v40, %v10291_v43  ;;  %5156 = vmatpush.bf16.msra.mxu3 %v9974_v50 }
 0x10e   :  { %v9427_v49 = vld [vmem:[#allocation2 + $0x920] sm:$0xf0] }
 0x10f   :  { %v12823_v52 = vld [vmem:[#allocation2 + $0xb04] sm:$0xf]  ;;  %v9430_v58 = vor.u32 %v12759_v48, %v9427_v49  ;;  %5167 = vmatpush.bf16.msrb.mxu0 %v10294_v51 }
 0x110   :  { %v9683_v53 = vld [vmem:[#allocation2 + $0xb20] sm:$0xf0] }
 0x111   :  { %v12887_v54 = vld [vmem:[#allocation2 + $0xd04] sm:$0xf]  ;;  %v9686_v59 = vor.u32 %v12823_v52, %v9683_v53  ;;  %5131 = vmatpush.bf16.msra.mxu1 %v9430_v58 }
 0x112   :  { %v9939_v55 = vld [vmem:[#allocation2 + $0xd20] sm:$0xf0] }
 0x113   :  { %v12967_v56 = vld [vmem:[#allocation2 + $0xf84] sm:$0xf]  ;;  %v9942_v62 = vor.u32 %v12887_v54, %v9939_v55  ;;  %5144 = vmatpush.bf16.msra.mxu2 %v9686_v59 }
 0x114   :  { %v10259_v57 = vld [vmem:[#allocation2 + $0xfa0] sm:$0xf0] }
 0x115   :  { %v12751_v60 = vld [vmem:[#allocation2 + $0x8c4] sm:$0xf]  ;;  %v10262_v63 = vor.u32 %v12967_v56, %v10259_v57  ;;  %5157 = vmatpush.bf16.msra.mxu3 %v9942_v62 }
 0x116   :  { %v9395_v61 = vld [vmem:[#allocation2 + $0x8e0] sm:$0xf0] }
 0x117   :  { %v12815_v0 = vld [vmem:[#allocation2 + $0xac4] sm:$0xf]  ;;  %v9398_v6 = vor.u32 %v12751_v60, %v9395_v61  ;;  %5168 = vmatpush.bf16.msrb.mxu0 %v10262_v63 }
 0x118   :  { %v9651_v1 = vld [vmem:[#allocation2 + $0xae0] sm:$0xf0] }
 0x119   :  { %v12879_v2 = vld [vmem:[#allocation2 + $0xcc4] sm:$0xf]  ;;  %v9654_v7 = vor.u32 %v12815_v0, %v9651_v1  ;;  %5132 = vmatpush.bf16.msra.mxu1 %v9398_v6 }
 0x11a   :  { %v9907_v3 = vld [vmem:[#allocation2 + $0xce0] sm:$0xf0] }
 0x11b   :  { %v12959_v4 = vld [vmem:[#allocation2 + $0xf44] sm:$0xf]  ;;  %v9910_v10 = vor.u32 %v12879_v2, %v9907_v3  ;;  %5145 = vmatpush.bf16.msra.mxu2 %v9654_v7 }
 0x11c   :  { %v10227_v5 = vld [vmem:[#allocation2 + $0xf60] sm:$0xf0] }
 0x11d   :  { %v12743_v8 = vld [vmem:[#allocation2 + $0x884] sm:$0xf]  ;;  %v10230_v11 = vor.u32 %v12959_v4, %v10227_v5  ;;  %5158 = vmatpush.bf16.msra.mxu3 %v9910_v10 }
 0x11e   :  { %v9363_v9 = vld [vmem:[#allocation2 + $0x8a0] sm:$0xf0] }
 0x11f   :  { %v12807_v12 = vld [vmem:[#allocation2 + $0xa84] sm:$0xf]  ;;  %v9366_v18 = vor.u32 %v12743_v8, %v9363_v9  ;;  %5169 = vmatpush.bf16.msrb.mxu0 %v10230_v11 }
 0x120   :  { %v9619_v13 = vld [vmem:[#allocation2 + $0xaa0] sm:$0xf0] }
 0x121   :  { %v12871_v14 = vld [vmem:[#allocation2 + $0xc84] sm:$0xf]  ;;  %v9622_v20 = vor.u32 %v12807_v12, %v9619_v13  ;;  %5133 = vmatpush.bf16.msra.mxu1 %v9366_v18 }
 0x122   :  { %v9875_v15 = vld [vmem:[#allocation2 + $0xca0] sm:$0xf0] }
 0x123   :  { %v12951_v16 = vld [vmem:[#allocation2 + $0xf04] sm:$0xf]  ;;  %v9878_v28 = vor.u32 %v12871_v14, %v9875_v15  ;;  %5146 = vmatpush.bf16.msra.mxu2 %v9622_v20 }
 0x124   :  { %v10195_v17 = vld [vmem:[#allocation2 + $0xf20] sm:$0xf0] }
 0x125   :  { %v12735_v21 = vld [vmem:[#allocation2 + $0x844] sm:$0xf]  ;;  %v10198_v30 = vor.u32 %v12951_v16, %v10195_v17  ;;  %5159 = vmatpush.bf16.msra.mxu3 %v9878_v28 }
 0x126   :  { %v9331_v25 = vld [vmem:[#allocation2 + $0x860] sm:$0xf0] }
 0x127   :  { %v12799_v31 = vld [vmem:[#allocation2 + $0xa44] sm:$0xf]  ;;  %v9334_v40 = vor.u32 %v12735_v21, %v9331_v25  ;;  %5170 = vmatpush.bf16.msrb.mxu0 %v10198_v30 }
 0x128   :  { %v9587_v34 = vld [vmem:[#allocation2 + $0xa60] sm:$0xf0] }
 0x129   :  { %v12863_v35 = vld [vmem:[#allocation2 + $0xc44] sm:$0xf]  ;;  %v9590_v43 = vor.u32 %v12799_v31, %v9587_v34  ;;  %5134 = vmatpush.bf16.msra.mxu1 %v9334_v40 }
 0x12a   :  { %v9843_v36 = vld [vmem:[#allocation2 + $0xc60] sm:$0xf0] }
 0x12b   :  { %v12943_v37 = vld [vmem:[#allocation2 + $0xec4] sm:$0xf]  ;;  %v9846_v48 = vor.u32 %v12863_v35, %v9843_v36  ;;  %5147 = vmatpush.bf16.msra.mxu2 %v9590_v43 }
 0x12c   :  { %v10163_v39 = vld [vmem:[#allocation2 + $0xee0] sm:$0xf0] }
 0x12d   :  { %v12727_v45 = vld [vmem:[#allocation2 + $0x804] sm:$0xf]  ;;  %v10166_v49 = vor.u32 %v12943_v37, %v10163_v39  ;;  %5160 = vmatpush.bf16.msra.mxu3 %v9846_v48 }
 0x12e   :  { %v9299_v46 = vld [vmem:[#allocation2 + $0x820] sm:$0xf0] }
 0x12f   :  { %v12791_v47 = vld [vmem:[#allocation2 + $0xa04] sm:$0xf]  ;;  %v9302_v59 = vor.u32 %v12727_v45, %v9299_v46  ;;  %5171 = vmatpush.bf16.msrb.mxu0 %v10166_v49 }
 0x130   :  { %v9555_v50 = vld [vmem:[#allocation2 + $0xa20] sm:$0xf0] }
 0x131   :  { %v12855_v51 = vld [vmem:[#allocation2 + $0xc04] sm:$0xf]  ;;  %v9558_v60 = vor.u32 %v12791_v47, %v9555_v50  ;;  %5135 = vmatpush.bf16.msra.mxu1 %v9302_v59 }
 0x132   :  { %v9811_v52 = vld [vmem:[#allocation2 + $0xc20] sm:$0xf0] }
 0x133   :  { %v12935_v53 = vld [vmem:[#allocation2 + $0xe84] sm:$0xf]  ;;  %v9814_v63 = vor.u32 %v12855_v51, %v9811_v52  ;;  %5148 = vmatpush.bf16.msra.mxu2 %v9558_v60 }
 0x134   :  { %v10131_v54 = vld [vmem:[#allocation2 + $0xea0] sm:$0xf0]  ;;  %5136 = vmatmul.bf16.vlgmr.msra.gmra.mxu1 %v13736_v41 }
 0x135   :  { %v13039_v55 = vld [vmem:[#allocation2 + $0x11c4] sm:$0xf]  ;;  %v10134_v0 = vor.u32 %v12935_v53, %v10131_v54  ;;  %5161 = vmatpush.bf16.msra.mxu3 %v9814_v63 }
 0x136   :  { %v10547_v56 = vld [vmem:[#allocation2 + $0x11e0] sm:$0xf0]  ;;  %5149 = vmatmul.bf16.vlgmr.msra.gmra.mxu2 %v13740_v44 }
 0x137   :  { %v13103_v57 = vld [vmem:[#allocation2 + $0x13c4] sm:$0xf]  ;;  %v10550_v1 = vor.u32 %v13039_v55, %v10547_v56  ;;  %5172 = vmatpush.bf16.msrb.mxu0 %v10134_v0 }
 0x138   :  { %v10803_v58 = vld [vmem:[#allocation2 + $0x13e0] sm:$0xf0]  ;;  %5162 = vmatmul.bf16.vlgmr.msra.gmra.mxu3 %v13734_v38 }
 0x139   :  { %v13167_v61 = vld [vmem:[#allocation2 + $0x15c4] sm:$0xf]  ;;  %v10806_v2 = vor.u32 %v13103_v57, %v10803_v58  ;;  %5180 = vmatpush.bf16.msrb.mxu1 %v10550_v1 }
 0x13a   :  { %v11059_v62 = vld [vmem:[#allocation2 + $0x15e0] sm:$0xf0] }
 0x13b   :  { %v12927_v3 = vld [vmem:[#allocation2 + $0xe44] sm:$0xf]  ;;  %v11062_v6 = vor.u32 %v13167_v61, %v11059_v62  ;;  %5193 = vmatpush.bf16.msrb.mxu2 %v10806_v2 }
 0x13c   :  { %v10099_v4 = vld [vmem:[#allocation2 + $0xe60] sm:$0xf0] }
 0x13d   :  { %v13031_v5 = vld [vmem:[#allocation2 + $0x1184] sm:$0xf]  ;;  %v10102_v12 = vor.u32 %v12927_v3, %v10099_v4  ;;  %5206 = vmatpush.bf16.msrb.mxu3 %v11062_v6 }
 0x13e   :  { %v10515_v7 = vld [vmem:[#allocation2 + $0x11a0] sm:$0xf0] }
 0x13f   :  { %v13095_v8 = vld [vmem:[#allocation2 + $0x1384] sm:$0xf]  ;;  %v10518_v14 = vor.u32 %v13031_v5, %v10515_v7  ;;  %5173 = vmatpush.bf16.msrb.mxu0 %v10102_v12 }
 0x140   :  { %v10771_v9 = vld [vmem:[#allocation2 + $0x13a0] sm:$0xf0] }
 0x141   :  { %v13159_v10 = vld [vmem:[#allocation2 + $0x1584] sm:$0xf]  ;;  %v10774_v15 = vor.u32 %v13095_v8, %v10771_v9  ;;  %5181 = vmatpush.bf16.msrb.mxu1 %v10518_v14 }
 0x142   :  { %v11027_v11 = vld [vmem:[#allocation2 + $0x15a0] sm:$0xf0] }
 0x143   :  { %v12919_v13 = vld [vmem:[#allocation2 + $0xe04] sm:$0xf]  ;;  %v11030_v20 = vor.u32 %v13159_v10, %v11027_v11  ;;  %5194 = vmatpush.bf16.msrb.mxu2 %v10774_v15 }
 0x144   :  { %v10067_v16 = vld [vmem:[#allocation2 + $0xe20] sm:$0xf0] }
 0x145   :  { %v13023_v17 = vld [vmem:[#allocation2 + $0x1144] sm:$0xf]  ;;  %v10070_v35 = vor.u32 %v12919_v13, %v10067_v16  ;;  %5207 = vmatpush.bf16.msrb.mxu3 %v11030_v20 }
 0x146   :  { %v10483_v18 = vld [vmem:[#allocation2 + $0x1160] sm:$0xf0] }
 0x147   :  { %v13087_v21 = vld [vmem:[#allocation2 + $0x1344] sm:$0xf]  ;;  %v10486_v36 = vor.u32 %v13023_v17, %v10483_v18  ;;  %5174 = vmatpush.bf16.msrb.mxu0 %v10070_v35  ;;  %v4916_v35 = vpop.f32.mrf.mxu0 }
 0x148   :  { %v10739_v25 = vld [vmem:[#allocation2 + $0x1360] sm:$0xf0] }
 0x149   :  { %v13151_v28 = vld [vmem:[#allocation2 + $0x1544] sm:$0xf]  ;;  %v10742_v37 = vor.u32 %v13087_v21, %v10739_v25  ;;  %5182 = vmatpush.bf16.msrb.mxu1 %v10486_v36 }
 0x14a   :  { %v10995_v30 = vld [vmem:[#allocation2 + $0x1560] sm:$0xf0]  ;;  %5175 = vmatmul.bf16.vlgmr.msrb.gmra.mxu0 %v13738_v42 }
 0x14b   :  { %v13231_v31 = vld [vmem:[#allocation2 + $0x17c4] sm:$0xf]  ;;  %v10998_v43 = vor.u32 %v13151_v28, %v10995_v30  ;;  %5195 = vmatpush.bf16.msrb.mxu2 %v10742_v37  ;;  %v4929_v37 = vpop.f32.mrf.mxu1 }
 0x14c   :  { %v11315_v34 = vld [vmem:[#allocation2 + $0x17e0] sm:$0xf0] }
 0x14d   :  { %v13015_v39 = vld [vmem:[#allocation2 + $0x1104] sm:$0xf]  ;;  %v11318_v45 = vor.u32 %v13231_v31, %v11315_v34  ;;  %5208 = vmatpush.bf16.msrb.mxu3 %v10998_v43 }
 0x14e   :  { %v10451_v40 = vld [vmem:[#allocation2 + $0x1120] sm:$0xf0] }
 0x14f   :  { %v13079_v46 = vld [vmem:[#allocation2 + $0x1304] sm:$0xf]  ;;  %v10454_v52 = vor.u32 %v13015_v39, %v10451_v40  ;;  %5219 = vmatpush.bf16.msra.mxu0 %v11318_v45 }
 0x150   :  { %v10707_v47 = vld [vmem:[#allocation2 + $0x1320] sm:$0xf0] }
 0x151   :  { %v13143_v48 = vld [vmem:[#allocation2 + $0x1504] sm:$0xf]  ;;  %v10710_v53 = vor.u32 %v13079_v46, %v10707_v47  ;;  %5183 = vmatpush.bf16.msrb.mxu1 %v10454_v52 }
 0x152   :  { %v10963_v49 = vld [vmem:[#allocation2 + $0x1520] sm:$0xf0] }
 0x153   :  { %v13223_v50 = vld [vmem:[#allocation2 + $0x1784] sm:$0xf]  ;;  %v10966_v56 = vor.u32 %v13143_v48, %v10963_v49  ;;  %5196 = vmatpush.bf16.msrb.mxu2 %v10710_v53 }
 0x154   :  { %v11283_v51 = vld [vmem:[#allocation2 + $0x17a0] sm:$0xf0] }
 0x155   :  { %v13007_v54 = vld [vmem:[#allocation2 + $0x10c4] sm:$0xf]  ;;  %v11286_v57 = vor.u32 %v13223_v50, %v11283_v51  ;;  %5209 = vmatpush.bf16.msrb.mxu3 %v10966_v56  ;;  %v4942_v56 = vpop.f32.mrf.mxu2 }
 0x156   :  { %v10419_v55 = vld [vmem:[#allocation2 + $0x10e0] sm:$0xf0] }
 0x157   :  { %v13071_v58 = vld [vmem:[#allocation2 + $0x12c4] sm:$0xf]  ;;  %v10422_v0 = vor.u32 %v13007_v54, %v10419_v55  ;;  %5220 = vmatpush.bf16.msra.mxu0 %v11286_v57 }
 0x158   :  { %v10675_v59 = vld [vmem:[#allocation2 + $0x12e0] sm:$0xf0] }
 0x159   :  { %v13135_v60 = vld [vmem:[#allocation2 + $0x14c4] sm:$0xf]  ;;  %v10678_v1 = vor.u32 %v13071_v58, %v10675_v59  ;;  %5184 = vmatpush.bf16.msrb.mxu1 %v10422_v0  ;;  %v8505_v58 = vld [vmem:[#allocation2 + $0x1c8] sm:$0xf] }
 0x15a   :  { %v10931_v61 = vld [vmem:[#allocation2 + $0x14e0] sm:$0xf0]  ;;  %v12532_v59 = vld [vmem:[#allocation2 + $0x1e4] sm:$0xf0] }
 0x15b   :  { %v13215_v62 = vld [vmem:[#allocation2 + $0x1744] sm:$0xf]  ;;  %v10934_v5 = vor.u32 %v13135_v60, %v10931_v61  ;;  %5197 = vmatpush.bf16.msrb.mxu2 %v10678_v1  ;;  %v12596_v0 = vld [vmem:[#allocation2 + $0x3e4] sm:$0xf0] }
 0x15c   :  { %v11251_v63 = vld [vmem:[#allocation2 + $0x1760] sm:$0xf0] }
 0x15d   :  { %v12999_v2 = vld [vmem:[#allocation2 + $0x1084] sm:$0xf]  ;;  %v11254_v6 = vor.u32 %v13215_v62, %v11251_v63  ;;  %5210 = vmatpush.bf16.msrb.mxu3 %v10934_v5  ;;  %v8761_v63 = vld [vmem:[#allocation2 + $0x3c8] sm:$0xf] }
 0x15e   :  { %v10387_v3 = vld [vmem:[#allocation2 + $0x10a0] sm:$0xf0] }
 0x15f   :  { %v13770_v4 = vld [vmem:[#allocation5] sm:$0xff]  ;;  %v10390_v14 = vor.u32 %v12999_v2, %v10387_v3  ;;  %5221 = vmatpush.bf16.msra.mxu0 %v11254_v6  ;;  %v4955_v3 = vpop.f32.mrf.mxu3  ;;  %v8506_v6 = vor.u32 %v12532_v59, %v8505_v58  ;;  %v12572_v59 = vld [vmem:[#allocation2 + $0x324] sm:$0xf0] }
 0x160   :  { %v13063_v7 = vld [vmem:[#allocation2 + $0x1284] sm:$0xf]  ;;  %v927_v13 = vperm.slane %v13770_v4, 0 }
 0x161   :  { %v10643_v8 = vld [vmem:[#allocation2 + $0x12a0] sm:$0xf0]  ;;  %5185 = vmatpush.bf16.msrb.mxu1 %v10390_v14  ;;  %v8473_v14 = vld [vmem:[#allocation2 + $0x188] sm:$0xf] }
 0x162   :  { %v13127_v9 = vld [vmem:[#allocation2 + $0x1484] sm:$0xf]  ;;  %v10646_v15 = vor.u32 %v13063_v7, %v10643_v8  ;;  %v4917_v36 = vadd.f32 %v4916_v35, %v927_v13  ;;  %v4944_v35 = vpop.f32.mrf.mxu2 }
 0x163   :  { %v10899_v10 = vld [vmem:[#allocation2 + $0x14a0] sm:$0xf0] }
 0x164   :  { %v13207_v11 = vld [vmem:[#allocation2 + $0x1704] sm:$0xf]  ;;  %v10902_v18 = vor.u32 %v13127_v9, %v10899_v10  ;;  %5198 = vmatpush.bf16.msrb.mxu2 %v10646_v15  ;;  %v4930_v52 = vadd.f32 %v4929_v37, %v4917_v36  ;;  %v12524_v15 = vld [vmem:[#allocation2 + $0x1a4] sm:$0xf0] }
 0x165   :  { %v11219_v12 = vld [vmem:[#allocation2 + $0x1720] sm:$0xf0]  ;;  %v8441_v37 = vld [vmem:[#allocation2 + $0x148] sm:$0xf] }
 0x166   :  { %v12991_v16 = vld [vmem:[#allocation2 + $0x1044] sm:$0xf]  ;;  %v11222_v20 = vor.u32 %v13207_v11, %v11219_v12  ;;  %5211 = vmatpush.bf16.msrb.mxu3 %v10902_v18  ;;  %v4943_v60 = vadd.f32 %v4942_v56, %v4930_v52  ;;  %v4918_v11 = vpop.f32.mrf.mxu0  ;;  %v8762_v12 = vor.u32 %v12596_v0, %v8761_v63  ;;  %v12588_v18 = vld [vmem:[#allocation2 + $0x3a4] sm:$0xf0] }
 0x167   :  { %v10355_v17 = vld [vmem:[#allocation2 + $0x1060] sm:$0xf0]  ;;  %v12508_v56 = vld [vmem:[#allocation2 + $0x124] sm:$0xf0] }
 0x168   :  { %v13055_v21 = vld [vmem:[#allocation2 + $0x1244] sm:$0xf]  ;;  %v10358_v39 = vor.u32 %v12991_v16, %v10355_v17  ;;  %5222 = vmatpush.bf16.msra.mxu0 %v11222_v20  ;;  %v4956_v10 = vadd.f32 %v4955_v3, %v4943_v60  ;;  %v4931_v16 = vpop.f32.mrf.mxu1  ;;  %v8729_v17 = vld [vmem:[#allocation2 + $0x388] sm:$0xf] }
 0x169   :  { %v10611_v25 = vld [vmem:[#allocation2 + $0x1260] sm:$0xf0]  ;;  %v8730_v36 = vor.u32 %v12588_v18, %v8729_v17  ;;  %v8985_v60 = vld [vmem:[#allocation2 + $0x588] sm:$0xf] }
 0x16a   :  { %v13119_v28 = vld [vmem:[#allocation2 + $0x1444] sm:$0xf]  ;;  %v10614_v40 = vor.u32 %v13055_v21, %v10611_v25  ;;  %5186 = vmatpush.bf16.msrb.mxu1 %v10358_v39  ;;  %v12516_v39 = vld [vmem:[#allocation2 + $0x164] sm:$0xf0]  ;;  %v4994_v18 = vpop.f32.mrf.mxu2 }
 0x16b   :  { %v10867_v30 = vld [vmem:[#allocation2 + $0x1460] sm:$0xf0]  ;;  %v8442_v52 = vor.u32 %v12516_v39, %v8441_v37  ;;  %v12716_v63 = vld [vmem:[#allocation2 + $0x7a4] sm:$0xf0] }
 0x16c   :  { %v13199_v31 = vld [vmem:[#allocation2 + $0x16c4] sm:$0xf]  ;;  %v10870_v47 = vor.u32 %v13119_v28, %v10867_v30  ;;  %5199 = vmatpush.bf16.msrb.mxu2 %v10614_v40  ;;  %v8474_v28 = vor.u32 %v12524_v15, %v8473_v14  ;;  %v8697_v40 = vld [vmem:[#allocation2 + $0x348] sm:$0xf] }
 0x16d   :  { %v11187_v34 = vld [vmem:[#allocation2 + $0x16e0] sm:$0xf0]  ;;  %v12644_v14 = vld [vmem:[#allocation2 + $0x564] sm:$0xf0] }
 0x16e   :  { %v12983_v43 = vld [vmem:[#allocation2 + $0x1004] sm:$0xf]  ;;  %v11190_v48 = vor.u32 %v13199_v31, %v11187_v34  ;;  %5212 = vmatpush.bf16.msrb.mxu3 %v10870_v47  ;;  %v4968_v0 = vpop.f32.mrf.mxu0  ;;  %v9209_v16 = vld [vmem:[#allocation2 + $0x748] sm:$0xf] }
 0x16f   :  { %v10323_v45 = vld [vmem:[#allocation2 + $0x1020] sm:$0xf0]  ;;  %v12708_v17 = vld [vmem:[#allocation2 + $0x764] sm:$0xf0] }
 0x170   :  { %v13047_v46 = vld [vmem:[#allocation2 + $0x1204] sm:$0xf]  ;;  %v10326_v61 = vor.u32 %v12983_v43, %v10323_v45  ;;  %5223 = vmatpush.bf16.msra.mxu0 %v11190_v48  ;;  %v12580_v43 = vld [vmem:[#allocation2 + $0x364] sm:$0xf0]  ;;  %v4981_v3 = vpop.f32.mrf.mxu1  ;;  %v9210_v35 = vor.u32 %v12708_v17, %v9209_v16 }
 0x171   :  { %v10579_v49 = vld [vmem:[#allocation2 + $0x1220] sm:$0xf0]  ;;  %v9017_v45 = vld [vmem:[#allocation2 + $0x5c8] sm:$0xf] }
 0x172   :  { %v13111_v50 = vld [vmem:[#allocation2 + $0x1404] sm:$0xf]  ;;  %v10582_v62 = vor.u32 %v13047_v46, %v10579_v49  ;;  %5187 = vmatpush.bf16.msrb.mxu1 %v10326_v61  ;;  %v12660_v46 = vld [vmem:[#allocation2 + $0x5e4] sm:$0xf0] }
 0x173   :  { %v10835_v51 = vld [vmem:[#allocation2 + $0x1420] sm:$0xf0]  ;;  %v9273_v48 = vld [vmem:[#allocation2 + $0x7c8] sm:$0xf] }
 0x174   :  { %v13191_v53 = vld [vmem:[#allocation2 + $0x1684] sm:$0xf]  ;;  %v10838_v1 = vor.u32 %v13111_v50, %v10835_v51  ;;  %5200 = vmatpush.bf16.msrb.mxu2 %v10582_v62  ;;  %v12724_v49 = vld [vmem:[#allocation2 + $0x7e4] sm:$0xf0]  ;;  %v4957_v50 = vpop.f32.mrf.mxu3 }
 0x175   :  { %v11155_v54 = vld [vmem:[#allocation2 + $0x16a0] sm:$0xf0]  ;;  %5188 = vmatmul.bf16.vlgmr.msrb.gmra.mxu1 %v13746_v19  ;;  %v9274_v58 = vor.u32 %v12724_v49, %v9273_v48  ;;  %v12652_v61 = vld [vmem:[#allocation2 + $0x5a4] sm:$0xf0] }
 0x176   :  { %v13255_v55 = vld [vmem:[#allocation2 + $0x1884] sm:$0xf]  ;;  %v11158_v2 = vor.u32 %v13191_v53, %v11155_v54  ;;  %5213 = vmatpush.bf16.msrb.mxu3 %v10838_v1  ;;  %v8698_v53 = vor.u32 %v12580_v43, %v8697_v40  ;;  %v9018_v54 = vor.u32 %v12660_v46, %v9017_v45  ;;  %v9241_v62 = vld [vmem:[#allocation2 + $0x788] sm:$0xf]  ;;  %v4970_v46 = vpop.f32.mrf.mxu0 }
 0x177   :  { %v11411_v57 = vld [vmem:[#allocation2 + $0x18a0] sm:$0xf0]  ;;  %5201 = vmatmul.bf16.vlgmr.msrb.gmra.mxu2 %v13750_v24  ;;  %v9242_v11 = vor.u32 %v12716_v63, %v9241_v62  ;;  %v8921_v37 = vld [vmem:[#allocation2 + $0x508] sm:$0xf]  ;;  %v4996_v62 = vpop.f32.mrf.mxu2 }
 0x178   :  { %v11414_v5 = vor.u32 %v13255_v55, %v11411_v57  ;;  %v13183_v7 = vld [vmem:[#allocation2 + $0x1644] sm:$0xf]  ;;  %5224 = vmatpush.bf16.msra.mxu0 %v11158_v2  ;;  %5245 = vmatpush.bf16.msra.mxu2 %v8506_v6  ;;  %v8409_v55 = vld [vmem:[#allocation2 + $0x108] sm:$0xf]  ;;  %v4969_v2 = vadd.f32 %v4968_v0, %v4956_v10  ;;  %v8986_v6 = vor.u32 %v12652_v61, %v8985_v60  ;;  %v4983_v48 = vpop.f32.mrf.mxu1 }
 0x179   :  { %v11123_v8 = vld [vmem:[#allocation2 + $0x1660] sm:$0xf0]  ;;  %5214 = vmatmul.bf16.vlgmr.msrb.gmra.mxu3 %v13748_v23  ;;  %v8665_v57 = vld [vmem:[#allocation2 + $0x308] sm:$0xf]  ;;  %v8410_v1 = vor.u32 %v12508_v56, %v8409_v55 }
 0x17a   :  { %v13247_v9 = vld [vmem:[#allocation2 + $0x1844] sm:$0xf]  ;;  %v11126_v20 = vor.u32 %v13183_v7, %v11123_v8  ;;  %5237 = vmatpush.bf16.msra.mxu1 %v11414_v5  ;;  %5258 = vmatpush.bf16.msra.mxu3 %v8762_v12  ;;  %v8666_v5 = vor.u32 %v12572_v59, %v8665_v57  ;;  %v8377_v7 = vld [vmem:[#allocation2 + $0xc8] sm:$0xf]  ;;  %v4982_v15 = vadd.f32 %v4981_v3, %v4969_v2 }
 0x17b   :  { %v11379_v13 = vld [vmem:[#allocation2 + $0x1860] sm:$0xf0]  ;;  %v12500_v8 = vld [vmem:[#allocation2 + $0xe4] sm:$0xf0] }
 0x17c   :  { %v13175_v21 = vld [vmem:[#allocation2 + $0x1604] sm:$0xf]  ;;  %v11382_v25 = vor.u32 %v13247_v9, %v11379_v13  ;;  %5225 = vmatpush.bf16.msra.mxu0 %v11126_v20  ;;  %5246 = vmatpush.bf16.msra.mxu2 %v8474_v28  ;;  %v8633_v9 = vld [vmem:[#allocation2 + $0x2c8] sm:$0xf]  ;;  %v8378_v10 = vor.u32 %v12500_v8, %v8377_v7 }
 0x17d   :  { %v11091_v30 = vld [vmem:[#allocation2 + $0x1620] sm:$0xf0]  ;;  %v12564_v12 = vld [vmem:[#allocation2 + $0x2e4] sm:$0xf0] }
 0x17e   :  { %v13239_v31 = vld [vmem:[#allocation2 + $0x1804] sm:$0xf]  ;;  %v11094_v47 = vor.u32 %v13175_v21, %v11091_v30  ;;  %5238 = vmatpush.bf16.msra.mxu1 %v11382_v25  ;;  %5259 = vmatpush.bf16.msra.mxu3 %v8730_v36  ;;  %v8953_v13 = vld [vmem:[#allocation2 + $0x548] sm:$0xf]  ;;  %v8634_v20 = vor.u32 %v12564_v12, %v8633_v9 }
 0x17f   :  { %v11347_v34 = vld [vmem:[#allocation2 + $0x1820] sm:$0xf0]  ;;  %v8954_v21 = vor.u32 %v12644_v14, %v8953_v13  ;;  %v8345_v25 = vld [vmem:[#allocation2 + $0x88] sm:$0xf] }
 0x180   :  { %v11350_v51 = vor.u32 %v13239_v31, %v11347_v34  ;;  %5226 = vmatpush.bf16.msra.mxu0 %v11094_v47  ;;  %5247 = vmatpush.bf16.msra.mxu2 %v8442_v52  ;;  %v12492_v28 = vld [vmem:[#allocation2 + $0xa4] sm:$0xf0]  ;;  %v4995_v31 = vadd.f32 %v4994_v18, %v4982_v15  ;;  %v5007_v34 = vpop.f32.mrf.mxu3 }
 0x181   :  { %v8601_v30 = vld [vmem:[#allocation2 + $0x288] sm:$0xf]  ;;  %v8346_v47 = vor.u32 %v12492_v28, %v8345_v25 }
 0x182   :  { %5239 = vmatpush.bf16.msra.mxu1 %v11350_v51  ;;  %5260 = vmatpush.bf16.msra.mxu3 %v8698_v53  ;;  %v12556_v36 = vld [vmem:[#allocation2 + $0x2a4] sm:$0xf0]  ;;  %v13777_v45 = vadd.f32 %v5007_v34, %v4995_v31 }
 0x183   :  { %5227 = vmatmul.bf16.vlgmr.msra.gmra.mxu0 %v13752_v29  ;;  %v12636_v39 = vld [vmem:[#allocation2 + $0x524] sm:$0xf0]  ;;  %v8602_v49 = vor.u32 %v12556_v36, %v8601_v30 }
 0x184   :  { %5271 = vmatpush.bf16.msrb.mxu0 %v9018_v54  ;;  %5248 = vmatpush.bf16.msra.mxu2 %v8410_v1  ;;  %v9177_v40 = vld [vmem:[#allocation2 + $0x708] sm:$0xf]  ;;  %v8922_v50 = vor.u32 %v12636_v39, %v8921_v37 }
 0x185   :  { %v12700_v43 = vld [vmem:[#allocation2 + $0x724] sm:$0xf0]  ;;  %11440 = vmatmul.msk.bf16.vlgmr.msra.gmra.mxu1 %vm4903_vm0, %v13758_v22 }
 0x186   :  { %5284 = vmatpush.bf16.msrb.mxu1 %v9274_v58  ;;  %5261 = vmatpush.bf16.msra.mxu3 %v8666_v5  ;;  %v8313_v51 = vld [vmem:[#allocation2 + $0x48] sm:$0xf]  ;;  %v9178_v54 = vor.u32 %v12700_v43, %v9177_v40 }
 0x187   :  { %v12484_v52 = vld [vmem:[#allocation2 + $0x64] sm:$0xf0] }
 0x188   :  { %5272 = vmatpush.bf16.msrb.mxu0 %v8986_v6  ;;  %5249 = vmatpush.bf16.msra.mxu2 %v8378_v10  ;;  %v8569_v53 = vld [vmem:[#allocation2 + $0x248] sm:$0xf]  ;;  %v8314_v60 = vor.u32 %v12484_v52, %v8313_v51  ;;  %v5009_v5 = vpop.f32.mrf.mxu3 }
 0x189   :  { %v12548_v55 = vld [vmem:[#allocation2 + $0x264] sm:$0xf0]  ;;  %v5020_v5 = vpop.f32.mrf.mxu0 }
 0x18a   :  { %5285 = vmatpush.bf16.msrb.mxu1 %v9242_v11  ;;  %5262 = vmatpush.bf16.msra.mxu3 %v8634_v20  ;;  %v8889_v56 = vld [vmem:[#allocation2 + $0x4c8] sm:$0xf]  ;;  %v8570_v63 = vor.u32 %v12548_v55, %v8569_v53 }
 0x18b   :  { %v12628_v57 = vld [vmem:[#allocation2 + $0x4e4] sm:$0xf0] }
 0x18c   :  { %5273 = vmatpush.bf16.msrb.mxu0 %v8954_v21  ;;  %v9145_v58 = vld [vmem:[#allocation2 + $0x6c8] sm:$0xf]  ;;  %5250 = vmatpush.bf16.msra.mxu2 %v8346_v47  ;;  %v8890_v0 = vor.u32 %v12628_v57, %v8889_v56 }
 0x18d   :  { %v12692_v59 = vld [vmem:[#allocation2 + $0x6e4] sm:$0xf0] }
 0x18e   :  { %5286 = vmatpush.bf16.msrb.mxu1 %v9210_v35  ;;  %v8281_v61 = vld [vmem:[#allocation2 + $0x8] sm:$0xf]  ;;  %5263 = vmatpush.bf16.msra.mxu3 %v8602_v49  ;;  %v9146_v6 = vor.u32 %v12692_v59, %v9145_v58 }
 0x18f   :  { %v12476_v1 = vld [vmem:[#allocation2 + $0x24] sm:$0xf0] }
 0x190   :  { %5274 = vmatpush.bf16.msrb.mxu0 %v8922_v50  ;;  %v8537_v2 = vld [vmem:[#allocation2 + $0x208] sm:$0xf]  ;;  %5251 = vmatpush.bf16.msra.mxu2 %v8314_v60  ;;  %v8282_v14 = vor.u32 %v12476_v1, %v8281_v61 }
 0x191   :  { %v12540_v3 = vld [vmem:[#allocation2 + $0x224] sm:$0xf0] }
 0x192   :  { %5287 = vmatpush.bf16.msrb.mxu1 %v9178_v54  ;;  %v8857_v7 = vld [vmem:[#allocation2 + $0x488] sm:$0xf]  ;;  %5264 = vmatpush.bf16.msra.mxu3 %v8570_v63  ;;  %v8538_v17 = vor.u32 %v12540_v3, %v8537_v2 }
 0x193   :  { %v12620_v8 = vld [vmem:[#allocation2 + $0x4a4] sm:$0xf0] }
 0x194   :  { %v9113_v9 = vld [vmem:[#allocation2 + $0x688] sm:$0xf]  ;;  %5275 = vmatpush.bf16.msrb.mxu0 %v8890_v0  ;;  %v8858_v10 = vor.u32 %v12620_v8, %v8857_v7  ;;  %5252 = vmatpush.bf16.msra.mxu2 %v8282_v14 }
 0x195   :  { %v12684_v11 = vld [vmem:[#allocation2 + $0x6a4] sm:$0xf0] }
 0x196   :  { %v9529_v12 = vld [vmem:[#allocation2 + $0x9c8] sm:$0xf]  ;;  %5288 = vmatpush.bf16.msrb.mxu1 %v9146_v6  ;;  %v9114_v18 = vor.u32 %v12684_v11, %v9113_v9  ;;  %5265 = vmatpush.bf16.msra.mxu3 %v8538_v17  ;;  %v5021_v9 = vadd.f32 %v5020_v5, %v13777_v45  ;;  %v5033_v11 = vpop.f32.mrf.mxu1 }
 0x197   :  { %v12788_v13 = vld [vmem:[#allocation2 + $0x9e4] sm:$0xf0]  ;;  %5253 = vmatmul.bf16.vlgmr.msra.gmra.mxu2 %v13718_v27 }
 0x198   :  { %v9785_v15 = vld [vmem:[#allocation2 + $0xbc8] sm:$0xf]  ;;  %v9530_v20 = vor.u32 %v12788_v13, %v9529_v12  ;;  %5276 = vmatpush.bf16.msrb.mxu0 %v8858_v10 }
 0x199   :  { %v12852_v16 = vld [vmem:[#allocation2 + $0xbe4] sm:$0xf0]  ;;  %5266 = vmatmul.bf16.vlgmr.msra.gmra.mxu3 %v13722_v33 }
 0x19a   :  { %v8825_v21 = vld [vmem:[#allocation2 + $0x448] sm:$0xf]  ;;  %v9786_v30 = vor.u32 %v12852_v16, %v9785_v15  ;;  %5289 = vmatpush.bf16.msrb.mxu1 %v9114_v18  ;;  %5297 = vmatpush.bf16.msrb.mxu2 %v9530_v20  ;;  %v5034_v16 = vadd.f32 %v5033_v11, %v5021_v9 }
 0x19b   :  { %v12612_v25 = vld [vmem:[#allocation2 + $0x464] sm:$0xf0] }
 0x19c   :  { %v9081_v28 = vld [vmem:[#allocation2 + $0x648] sm:$0xf]  ;;  %v8826_v39 = vor.u32 %v12612_v25, %v8825_v21  ;;  %5310 = vmatpush.bf16.msrb.mxu3 %v9786_v30 }
 0x19d   :  { %v12676_v31 = vld [vmem:[#allocation2 + $0x664] sm:$0xf0] }
 0x19e   :  { %v9497_v34 = vld [vmem:[#allocation2 + $0x988] sm:$0xf]  ;;  %v9082_v43 = vor.u32 %v12676_v31, %v9081_v28  ;;  %5277 = vmatpush.bf16.msrb.mxu0 %v8826_v39 }
 0x19f   :  { %v12780_v35 = vld [vmem:[#allocation2 + $0x9a4] sm:$0xf0] }
 0x1a0   :  { %v9753_v36 = vld [vmem:[#allocation2 + $0xb88] sm:$0xf]  ;;  %v9498_v46 = vor.u32 %v12780_v35, %v9497_v34  ;;  %5290 = vmatpush.bf16.msrb.mxu1 %v9082_v43 }
 0x1a1   :  { %v12844_v37 = vld [vmem:[#allocation2 + $0xba4] sm:$0xf0] }
 0x1a2   :  { %v8793_v40 = vld [vmem:[#allocation2 + $0x408] sm:$0xf]  ;;  %v9754_v50 = vor.u32 %v12844_v37, %v9753_v36  ;;  %5298 = vmatpush.bf16.msrb.mxu2 %v9498_v46  ;;  %v5046_v36 = vpop.f32.mrf.mxu2 }
 0x1a3   :  { %v12604_v47 = vld [vmem:[#allocation2 + $0x424] sm:$0xf0]  ;;  %v5047_v46 = vadd.f32 %v5046_v36, %v5034_v16 }
 0x1a4   :  { %v9049_v48 = vld [vmem:[#allocation2 + $0x608] sm:$0xf]  ;;  %v8794_v57 = vor.u32 %v12604_v47, %v8793_v40  ;;  %5311 = vmatpush.bf16.msrb.mxu3 %v9754_v50 }
 0x1a5   :  { %v12668_v49 = vld [vmem:[#allocation2 + $0x624] sm:$0xf0] }
 0x1a6   :  { %v9465_v51 = vld [vmem:[#allocation2 + $0x948] sm:$0xf]  ;;  %v9050_v60 = vor.u32 %v12668_v49, %v9049_v48  ;;  %5278 = vmatpush.bf16.msrb.mxu0 %v8794_v57  ;;  %v5022_v48 = vpop.f32.mrf.mxu0  ;;  %v5059_v49 = vpop.f32.mrf.mxu3 }
 0x1a7   :  { %v12772_v52 = vld [vmem:[#allocation2 + $0x964] sm:$0xf0] }
 0x1a8   :  { %v9721_v53 = vld [vmem:[#allocation2 + $0xb48] sm:$0xf]  ;;  %v9466_v61 = vor.u32 %v12772_v52, %v9465_v51  ;;  %5291 = vmatpush.bf16.msrb.mxu1 %v9050_v60 }
 0x1a9   :  { %v12836_v54 = vld [vmem:[#allocation2 + $0xb64] sm:$0xf0]  ;;  %5279 = vmatmul.bf16.vlgmr.msrb.gmra.mxu0 %v13716_v26 }
 0x1aa   :  { %v10041_v55 = vld [vmem:[#allocation2 + $0xdc8] sm:$0xf]  ;;  %v9722_v62 = vor.u32 %v12836_v54, %v9721_v53  ;;  %5299 = vmatpush.bf16.msrb.mxu2 %v9466_v61 }
 0x1ab   :  { %v12916_v56 = vld [vmem:[#allocation2 + $0xde4] sm:$0xf0]  ;;  %5292 = vmatmul.bf16.vlgmr.msrb.gmra.mxu1 %v13720_v32 }
 0x1ac   :  { %v10297_v58 = vld [vmem:[#allocation2 + $0xfc8] sm:$0xf]  ;;  %v10042_v63 = vor.u32 %v12916_v56, %v10041_v55  ;;  %5312 = vmatpush.bf16.msrb.mxu3 %v9722_v62  ;;  %v5035_v55 = vpop.f32.mrf.mxu1  ;;  %v5060_v56 = vadd.f32 %v5059_v49, %v5047_v46 }
 0x1ad   :  { %v12980_v59 = vld [vmem:[#allocation2 + $0xfe4] sm:$0xf0] }
 0x1ae   :  { %v9433_v0 = vld [vmem:[#allocation2 + $0x908] sm:$0xf]  ;;  %v10298_v3 = vor.u32 %v12980_v59, %v10297_v58  ;;  %5323 = vmatpush.bf16.msra.mxu0 %v10042_v63 }
 0x1af   :  { %v12764_v1 = vld [vmem:[#allocation2 + $0x924] sm:$0xf0] }
 0x1b0   :  { %v9689_v2 = vld [vmem:[#allocation2 + $0xb08] sm:$0xf]  ;;  %v9434_v14 = vor.u32 %v12764_v1, %v9433_v0  ;;  %5336 = vmatpush.bf16.msra.mxu1 %v10298_v3 }
 0x1b1   :  { %v12828_v6 = vld [vmem:[#allocation2 + $0xb24] sm:$0xf0] }
 0x1b2   :  { %v10009_v7 = vld [vmem:[#allocation2 + $0xd88] sm:$0xf]  ;;  %v9690_v15 = vor.u32 %v12828_v6, %v9689_v2  ;;  %5300 = vmatpush.bf16.msrb.mxu2 %v9434_v14  ;;  %v5048_v14 = vpop.f32.mrf.mxu2 }
 0x1b3   :  { %v12908_v8 = vld [vmem:[#allocation2 + $0xda4] sm:$0xf0] }
 0x1b4   :  { %v10265_v12 = vld [vmem:[#allocation2 + $0xf88] sm:$0xf]  ;;  %v10010_v17 = vor.u32 %v12908_v8, %v10009_v7  ;;  %5313 = vmatpush.bf16.msrb.mxu3 %v9690_v15 }
 0x1b5   :  { %v12972_v13 = vld [vmem:[#allocation2 + $0xfa4] sm:$0xf0] }
 0x1b6   :  { %v9401_v10 = vld [vmem:[#allocation2 + $0x8c8] sm:$0xf]  ;;  %v10266_v21 = vor.u32 %v12972_v13, %v10265_v12  ;;  %5324 = vmatpush.bf16.msra.mxu0 %v10010_v17 }
 0x1b7   :  { %v12756_v18 = vld [vmem:[#allocation2 + $0x8e4] sm:$0xf0] }
 0x1b8   :  { %v9657_v20 = vld [vmem:[#allocation2 + $0xac8] sm:$0xf]  ;;  %v9402_v34 = vor.u32 %v12756_v18, %v9401_v10  ;;  %5337 = vmatpush.bf16.msra.mxu1 %v10266_v21  ;;  %v5061_v18 = vpop.f32.mrf.mxu3 }
 0x1b9   :  { %v12820_v25 = vld [vmem:[#allocation2 + $0xae4] sm:$0xf0] }
 0x1ba   :  { %v9977_v28 = vld [vmem:[#allocation2 + $0xd48] sm:$0xf]  ;;  %v9658_v35 = vor.u32 %v12820_v25, %v9657_v20  ;;  %5301 = vmatpush.bf16.msrb.mxu2 %v9402_v34  ;;  %v5072_v20 = vpop.f32.mrf.mxu0 }
 0x1bb   :  { %v12900_v30 = vld [vmem:[#allocation2 + $0xd64] sm:$0xf0] }
 0x1bc   :  { %v10233_v45 = vld [vmem:[#allocation2 + $0xf48] sm:$0xf]  ;;  %v9978_v37 = vor.u32 %v12900_v30, %v9977_v28  ;;  %5314 = vmatpush.bf16.msrb.mxu3 %v9658_v35  ;;  %v13786_v30 = vadd.f32 %v5072_v20, %v5060_v56 }
 0x1bd   :  { %v12964_v31 = vld [vmem:[#allocation2 + $0xf64] sm:$0xf0] }
 0x1be   :  { %v9369_v39 = vld [vmem:[#allocation2 + $0x888] sm:$0xf]  ;;  %v10234_v47 = vor.u32 %v12964_v31, %v10233_v45  ;;  %5325 = vmatpush.bf16.msra.mxu0 %v9978_v37 }
 0x1bf   :  { %v12748_v40 = vld [vmem:[#allocation2 + $0x8a4] sm:$0xf0] }
 0x1c0   :  { %v9625_v43 = vld [vmem:[#allocation2 + $0xa88] sm:$0xf]  ;;  %v9370_v57 = vor.u32 %v12748_v40, %v9369_v39  ;;  %5338 = vmatpush.bf16.msra.mxu1 %v10234_v47 }
 0x1c1   :  { %v12812_v50 = vld [vmem:[#allocation2 + $0xaa4] sm:$0xf0] }
 0x1c2   :  { %v9945_v51 = vld [vmem:[#allocation2 + $0xd08] sm:$0xf]  ;;  %v9626_v58 = vor.u32 %v12812_v50, %v9625_v43  ;;  %5302 = vmatpush.bf16.msrb.mxu2 %v9370_v57 }
 0x1c3   :  { %v12892_v52 = vld [vmem:[#allocation2 + $0xd24] sm:$0xf0] }
 0x1c4   :  { %v10201_v53 = vld [vmem:[#allocation2 + $0xf08] sm:$0xf]  ;;  %v9946_v59 = vor.u32 %v12892_v52, %v9945_v51  ;;  %5315 = vmatpush.bf16.msrb.mxu3 %v9626_v58 }
 0x1c5   :  { %v12956_v54 = vld [vmem:[#allocation2 + $0xf24] sm:$0xf0] }
 0x1c6   :  { %v9337_v60 = vld [vmem:[#allocation2 + $0x848] sm:$0xf]  ;;  %v10202_v63 = vor.u32 %v12956_v54, %v10201_v53  ;;  %5326 = vmatpush.bf16.msra.mxu0 %v9946_v59 }
 0x1c7   :  { %v12740_v61 = vld [vmem:[#allocation2 + $0x864] sm:$0xf0] }
 0x1c8   :  { %v9593_v62 = vld [vmem:[#allocation2 + $0xa48] sm:$0xf]  ;;  %v9338_v6 = vor.u32 %v12740_v61, %v9337_v60  ;;  %5339 = vmatpush.bf16.msra.mxu1 %v10202_v63 }
 0x1c9   :  { %v12804_v0 = vld [vmem:[#allocation2 + $0xa64] sm:$0xf0] }
 0x1ca   :  { %v9913_v1 = vld [vmem:[#allocation2 + $0xcc8] sm:$0xf]  ;;  %v9594_v8 = vor.u32 %v12804_v0, %v9593_v62  ;;  %5303 = vmatpush.bf16.msrb.mxu2 %v9338_v6  ;;  %v5074_v0 = vpop.f32.mrf.mxu0 }
 0x1cb   :  { %v12884_v2 = vld [vmem:[#allocation2 + $0xce4] sm:$0xf0] }
 0x1cc   :  { %v10169_v3 = vld [vmem:[#allocation2 + $0xec8] sm:$0xf]  ;;  %v9914_v9 = vor.u32 %v12884_v2, %v9913_v1  ;;  %5316 = vmatpush.bf16.msrb.mxu3 %v9594_v8 }
 0x1cd   :  { %v12948_v5 = vld [vmem:[#allocation2 + $0xee4] sm:$0xf0] }
 0x1ce   :  { %v9305_v7 = vld [vmem:[#allocation2 + $0x808] sm:$0xf]  ;;  %v10170_v15 = vor.u32 %v12948_v5, %v10169_v3  ;;  %5327 = vmatpush.bf16.msra.mxu0 %v9914_v9 }
 0x1cf   :  { %v12732_v11 = vld [vmem:[#allocation2 + $0x824] sm:$0xf0] }
 0x1d0   :  { %v9561_v12 = vld [vmem:[#allocation2 + $0xa08] sm:$0xf]  ;;  %v9306_v45 = vor.u32 %v12732_v11, %v9305_v7  ;;  %5340 = vmatpush.bf16.msra.mxu1 %v10170_v15 }
 0x1d1   :  { %v12796_v13 = vld [vmem:[#allocation2 + $0xa24] sm:$0xf0] }
 0x1d2   :  { %v9881_v16 = vld [vmem:[#allocation2 + $0xc88] sm:$0xf]  ;;  %v9562_v35 = vor.u32 %v12796_v13, %v9561_v12  ;;  %5304 = vmatpush.bf16.msrb.mxu2 %v9306_v45 }
 0x1d3   :  { %v12876_v17 = vld [vmem:[#allocation2 + $0xca4] sm:$0xf0] }
 0x1d4   :  { %v10137_v10 = vld [vmem:[#allocation2 + $0xe88] sm:$0xf]  ;;  %v9882_v36 = vor.u32 %v12876_v17, %v9881_v16  ;;  %5317 = vmatpush.bf16.msrb.mxu3 %v9562_v35  ;;  %v928_v16 = vperm.slane %v13770_v4, 1 }
 0x1d5   :  { %v12940_v21 = vld [vmem:[#allocation2 + $0xea4] sm:$0xf0]  ;;  %5305 = vmatmul.bf16.vlgmr.msrb.gmra.mxu2 %v13736_v41 }
 0x1d6   :  { %v10553_v25 = vld [vmem:[#allocation2 + $0x11c8] sm:$0xf]  ;;  %v10138_v37 = vor.u32 %v12940_v21, %v10137_v10  ;;  %5328 = vmatpush.bf16.msra.mxu0 %v9882_v36 }
 0x1d7   :  { %v13044_v28 = vld [vmem:[#allocation2 + $0x11e4] sm:$0xf0]  ;;  %5318 = vmatmul.bf16.vlgmr.msrb.gmra.mxu3 %v13740_v44 }
 0x1d8   :  { %v10809_v31 = vld [vmem:[#allocation2 + $0x13c8] sm:$0xf]  ;;  %v10554_v39 = vor.u32 %v13044_v28, %v10553_v25  ;;  %5341 = vmatpush.bf16.msra.mxu1 %v10138_v37  ;;  %v5085_v28 = vpop.f32.mrf.mxu1 }
 0x1d9   :  { %v13108_v34 = vld [vmem:[#allocation2 + $0x13e4] sm:$0xf0] }
 0x1da   :  { %v9849_v40 = vld [vmem:[#allocation2 + $0xc48] sm:$0xf]  ;;  %v10810_v47 = vor.u32 %v13108_v34, %v10809_v31  ;;  %5349 = vmatpush.bf16.msra.mxu2 %v10554_v39  ;;  %v5086_v39 = vadd.f32 %v5085_v28, %v928_v16 }
 0x1db   :  { %v12868_v43 = vld [vmem:[#allocation2 + $0xc64] sm:$0xf0] }
 0x1dc   :  { %v10105_v46 = vld [vmem:[#allocation2 + $0xe48] sm:$0xf]  ;;  %v9850_v53 = vor.u32 %v12868_v43, %v9849_v40  ;;  %5362 = vmatpush.bf16.msra.mxu3 %v10810_v47 }
 0x1dd   :  { %v12932_v48 = vld [vmem:[#allocation2 + $0xe64] sm:$0xf0] }
 0x1de   :  { %v10521_v49 = vld [vmem:[#allocation2 + $0x1188] sm:$0xf]  ;;  %v10106_v55 = vor.u32 %v12932_v48, %v10105_v46  ;;  %5329 = vmatpush.bf16.msra.mxu0 %v9850_v53 }
 0x1df   :  { %v13036_v50 = vld [vmem:[#allocation2 + $0x11a4] sm:$0xf0] }
 0x1e0   :  { %v10777_v51 = vld [vmem:[#allocation2 + $0x1388] sm:$0xf]  ;;  %v10522_v56 = vor.u32 %v13036_v50, %v10521_v49  ;;  %5342 = vmatpush.bf16.msra.mxu1 %v10106_v55  ;;  %v5098_v50 = vpop.f32.mrf.mxu2 }
 0x1e1   :  { %v13100_v52 = vld [vmem:[#allocation2 + $0x13a4] sm:$0xf0] }
 0x1e2   :  { %v9817_v54 = vld [vmem:[#allocation2 + $0xc08] sm:$0xf]  ;;  %v10778_v60 = vor.u32 %v13100_v52, %v10777_v51  ;;  %5350 = vmatpush.bf16.msra.mxu2 %v10522_v56  ;;  %v5099_v56 = vadd.f32 %v5098_v50, %v5086_v39 }
 0x1e3   :  { %v12860_v57 = vld [vmem:[#allocation2 + $0xc24] sm:$0xf0] }
 0x1e4   :  { %v10073_v58 = vld [vmem:[#allocation2 + $0xe08] sm:$0xf]  ;;  %v9818_v5 = vor.u32 %v12860_v57, %v9817_v54  ;;  %5363 = vmatpush.bf16.msra.mxu3 %v10778_v60  ;;  %v5111_v57 = vpop.f32.mrf.mxu3 }
 0x1e5   :  { %v12924_v59 = vld [vmem:[#allocation2 + $0xe24] sm:$0xf0]  ;;  %v5112_v0 = vadd.f32 %v5111_v57, %v5099_v56 }
 0x1e6   :  { %v10489_v61 = vld [vmem:[#allocation2 + $0x1148] sm:$0xf]  ;;  %v10074_v8 = vor.u32 %v12924_v59, %v10073_v58  ;;  %5330 = vmatpush.bf16.msra.mxu0 %v9818_v5 }
 0x1e7   :  { %v13028_v62 = vld [vmem:[#allocation2 + $0x1164] sm:$0xf0] }
 0x1e8   :  { %v10745_v63 = vld [vmem:[#allocation2 + $0x1348] sm:$0xf]  ;;  %v10490_v9 = vor.u32 %v13028_v62, %v10489_v61  ;;  %5343 = vmatpush.bf16.msra.mxu1 %v10074_v8 }
 0x1e9   :  { %v13092_v1 = vld [vmem:[#allocation2 + $0x1364] sm:$0xf0]  ;;  %5331 = vmatmul.bf16.vlgmr.msra.gmra.mxu0 %v13734_v38 }
 0x1ea   :  { %v11065_v2 = vld [vmem:[#allocation2 + $0x15c8] sm:$0xf]  ;;  %v10746_v12 = vor.u32 %v13092_v1, %v10745_v63  ;;  %5351 = vmatpush.bf16.msra.mxu2 %v10490_v9  ;;  %v5124_v1 = vpop.f32.mrf.mxu0 }
 0x1eb   :  { %v13172_v3 = vld [vmem:[#allocation2 + $0x15e4] sm:$0xf0]  ;;  %5344 = vmatmul.bf16.vlgmr.msra.gmra.mxu1 %v13738_v42 }
 0x1ec   :  { %v11321_v6 = vld [vmem:[#allocation2 + $0x17c8] sm:$0xf]  ;;  %v11066_v13 = vor.u32 %v13172_v3, %v11065_v2  ;;  %5364 = vmatpush.bf16.msra.mxu3 %v10746_v12  ;;  %v5087_v2 = vpop.f32.mrf.mxu1 }
 0x1ed   :  { %v13236_v7 = vld [vmem:[#allocation2 + $0x17e4] sm:$0xf0] }
 0x1ee   :  { %v10457_v11 = vld [vmem:[#allocation2 + $0x1108] sm:$0xf]  ;;  %v11322_v17 = vor.u32 %v13236_v7, %v11321_v6  ;;  %5375 = vmatpush.bf16.msrb.mxu0 %v11066_v13 }
 0x1ef   :  { %v13020_v14 = vld [vmem:[#allocation2 + $0x1124] sm:$0xf0] }
 0x1f0   :  { %v10713_v15 = vld [vmem:[#allocation2 + $0x1308] sm:$0xf]  ;;  %v10458_v45 = vor.u32 %v13020_v14, %v10457_v11  ;;  %5388 = vmatpush.bf16.msrb.mxu1 %v11322_v17  ;;  %v13793_v11 = vadd.f32 %v5124_v1, %v5112_v0 }
 0x1f1   :  { %v13084_v10 = vld [vmem:[#allocation2 + $0x1324] sm:$0xf0] }
 0x1f2   :  { %v11033_v18 = vld [vmem:[#allocation2 + $0x1588] sm:$0xf]  ;;  %v10714_v31 = vor.u32 %v13084_v10, %v10713_v15  ;;  %5352 = vmatpush.bf16.msra.mxu2 %v10458_v45 }
 0x1f3   :  { %v13164_v20 = vld [vmem:[#allocation2 + $0x15a4] sm:$0xf0] }
 0x1f4   :  { %v11289_v21 = vld [vmem:[#allocation2 + $0x1788] sm:$0xf]  ;;  %v11034_v34 = vor.u32 %v13164_v20, %v11033_v18  ;;  %5365 = vmatpush.bf16.msra.mxu3 %v10714_v31  ;;  %v5100_v20 = vpop.f32.mrf.mxu2 }
 0x1f5   :  { %v13228_v25 = vld [vmem:[#allocation2 + $0x17a4] sm:$0xf0]  ;;  %v9275_v20 = vld [vmem:[#allocation2 + $0x7e8] sm:$0xf0] }
 0x1f6   :  { %v10425_v35 = vld [vmem:[#allocation2 + $0x10c8] sm:$0xf]  ;;  %v11290_v4 = vor.u32 %v13228_v25, %v11289_v21  ;;  %5376 = vmatpush.bf16.msrb.mxu0 %v11034_v34  ;;  %v5113_v34 = vpop.f32.mrf.mxu3 }
 0x1f7   :  { %v13012_v36 = vld [vmem:[#allocation2 + $0x10e4] sm:$0xf0]  ;;  %v8411_v34 = vld [vmem:[#allocation2 + $0x128] sm:$0xf0] }
 0x1f8   :  { %v10681_v37 = vld [vmem:[#allocation2 + $0x12c8] sm:$0xf]  ;;  %v10426_v49 = vor.u32 %v13012_v36, %v10425_v35  ;;  %5389 = vmatpush.bf16.msrb.mxu1 %v11290_v4 }
 0x1f9   :  { %v13076_v40 = vld [vmem:[#allocation2 + $0x12e4] sm:$0xf0] }
 0x1fa   :  { %v11001_v43 = vld [vmem:[#allocation2 + $0x1548] sm:$0xf]  ;;  %v10682_v51 = vor.u32 %v13076_v40, %v10681_v37  ;;  %5353 = vmatpush.bf16.msra.mxu2 %v10426_v49  ;;  %v8507_v49 = vld [vmem:[#allocation2 + $0x1e8] sm:$0xf0] }
 0x1fb   :  { %v13156_v46 = vld [vmem:[#allocation2 + $0x1564] sm:$0xf0] }
 0x1fc   :  { %v11257_v47 = vld [vmem:[#allocation2 + $0x1748] sm:$0xf]  ;;  %v11002_v52 = vor.u32 %v13156_v46, %v11001_v43  ;;  %5366 = vmatpush.bf16.msra.mxu3 %v10682_v51  ;;  %v5126_v46 = vpop.f32.mrf.mxu0 }
 0x1fd   :  { %v13220_v48 = vld [vmem:[#allocation2 + $0x1764] sm:$0xf0]  ;;  %v9243_v46 = vld [vmem:[#allocation2 + $0x7a8] sm:$0xf0] }
 0x1fe   :  { %v10393_v53 = vld [vmem:[#allocation2 + $0x1088] sm:$0xf]  ;;  %v11258_v58 = vor.u32 %v13220_v48, %v11257_v47  ;;  %5377 = vmatpush.bf16.msrb.mxu0 %v11002_v52  ;;  %v12528_v48 = vld [vmem:[#allocation2 + $0x1cc] sm:$0xf] }
 0x1ff   :  { %v13004_v54 = vld [vmem:[#allocation2 + $0x10a4] sm:$0xf0]  ;;  %v8510_v57 = vor.u32 %v12528_v48, %v8507_v49 }
 0x200   :  { %v10649_v55 = vld [vmem:[#allocation2 + $0x1288] sm:$0xf]  ;;  %v10394_v3 = vor.u32 %v13004_v54, %v10393_v53  ;;  %5390 = vmatpush.bf16.msrb.mxu1 %v11258_v58 }
 0x201   :  { %v13068_v59 = vld [vmem:[#allocation2 + $0x12a4] sm:$0xf0] }
 0x202   :  { %v10969_v60 = vld [vmem:[#allocation2 + $0x1508] sm:$0xf]  ;;  %v10650_v5 = vor.u32 %v13068_v59, %v10649_v55  ;;  %5354 = vmatpush.bf16.msra.mxu2 %v10394_v3 }
 0x203   :  { %v13148_v61 = vld [vmem:[#allocation2 + $0x1524] sm:$0xf0] }
 0x204   :  { %v11225_v62 = vld [vmem:[#allocation2 + $0x1708] sm:$0xf]  ;;  %v10970_v6 = vor.u32 %v13148_v61, %v10969_v60  ;;  %5367 = vmatpush.bf16.msra.mxu3 %v10650_v5  ;;  %v12520_v61 = vld [vmem:[#allocation2 + $0x18c] sm:$0xf] }
 0x205   :  { %v13212_v63 = vld [vmem:[#allocation2 + $0x1724] sm:$0xf0] }
 0x206   :  { %v10361_v7 = vld [vmem:[#allocation2 + $0x1048] sm:$0xf]  ;;  %v11226_v12 = vor.u32 %v13212_v63, %v11225_v62  ;;  %5378 = vmatpush.bf16.msrb.mxu0 %v10970_v6  ;;  %v8475_v62 = vld [vmem:[#allocation2 + $0x1a8] sm:$0xf0] }
 0x207   :  { %v12996_v8 = vld [vmem:[#allocation2 + $0x1064] sm:$0xf0] }
 0x208   :  { %v10617_v9 = vld [vmem:[#allocation2 + $0x1248] sm:$0xf]  ;;  %v10362_v10 = vor.u32 %v12996_v8, %v10361_v7  ;;  %5391 = vmatpush.bf16.msrb.mxu1 %v11226_v12  ;;  %v8478_v8 = vor.u32 %v12520_v61, %v8475_v62  ;;  %v12512_v12 = vld [vmem:[#allocation2 + $0x14c] sm:$0xf] }
 0x209   :  { %v13060_v13 = vld [vmem:[#allocation2 + $0x1264] sm:$0xf0] }
 0x20a   :  { %v10937_v14 = vld [vmem:[#allocation2 + $0x14c8] sm:$0xf]  ;;  %v10618_v21 = vor.u32 %v13060_v13, %v10617_v9  ;;  %5355 = vmatpush.bf16.msra.mxu2 %v10362_v10  ;;  %v8443_v13 = vld [vmem:[#allocation2 + $0x168] sm:$0xf0] }
 0x20b   :  { %v13140_v15 = vld [vmem:[#allocation2 + $0x14e4] sm:$0xf0]  ;;  %v9019_v10 = vld [vmem:[#allocation2 + $0x5e8] sm:$0xf0] }
 0x20c   :  { %v11193_v16 = vld [vmem:[#allocation2 + $0x16c8] sm:$0xf]  ;;  %v10938_v25 = vor.u32 %v13140_v15, %v10937_v14  ;;  %5368 = vmatpush.bf16.msra.mxu3 %v10618_v21  ;;  %v12592_v14 = vld [vmem:[#allocation2 + $0x3cc] sm:$0xf] }
 0x20d   :  { %v13204_v17 = vld [vmem:[#allocation2 + $0x16e4] sm:$0xf0]  ;;  %v8763_v15 = vld [vmem:[#allocation2 + $0x3e8] sm:$0xf0] }
 0x20e   :  { %v10329_v18 = vld [vmem:[#allocation2 + $0x1008] sm:$0xf]  ;;  %v11194_v35 = vor.u32 %v13204_v17, %v11193_v16  ;;  %5379 = vmatpush.bf16.msrb.mxu0 %v10938_v25  ;;  %v12656_v16 = vld [vmem:[#allocation2 + $0x5cc] sm:$0xf] }
 0x20f   :  { %v12988_v28 = vld [vmem:[#allocation2 + $0x1024] sm:$0xf0] }
 0x210   :  { %v10585_v45 = vld [vmem:[#allocation2 + $0x1208] sm:$0xf]  ;;  %v10330_v47 = vor.u32 %v12988_v28, %v10329_v18  ;;  %5392 = vmatpush.bf16.msrb.mxu1 %v11194_v35  ;;  %v12720_v18 = vld [vmem:[#allocation2 + $0x7cc] sm:$0xf]  ;;  %v8446_v28 = vor.u32 %v12512_v12, %v8443_v13  ;;  %v9022_v35 = vor.u32 %v12656_v16, %v9019_v10 }
 0x211   :  { %v13052_v31 = vld [vmem:[#allocation2 + $0x1224] sm:$0xf0]  ;;  %v12696_v12 = vld [vmem:[#allocation2 + $0x70c] sm:$0xf] }
 0x212   :  { %v10905_v36 = vld [vmem:[#allocation2 + $0x1488] sm:$0xf]  ;;  %v10586_v50 = vor.u32 %v13052_v31, %v10585_v45  ;;  %5356 = vmatpush.bf16.msra.mxu2 %v10330_v47  ;;  %v8766_v45 = vor.u32 %v12592_v14, %v8763_v15  ;;  %v12504_v31 = vld [vmem:[#allocation2 + $0x10c] sm:$0xf]  ;;  %v5137_v47 = vpop.f32.mrf.mxu1  ;;  %v5176_v15 = vpop.f32.mrf.mxu0 }
 0x213   :  { %v13132_v37 = vld [vmem:[#allocation2 + $0x14a4] sm:$0xf0]  ;;  %v5138_v48 = vadd.f32 %v5137_v47, %v13793_v11  ;;  %v8414_v49 = vor.u32 %v12504_v31, %v8411_v34  ;;  %v9211_v11 = vld [vmem:[#allocation2 + $0x768] sm:$0xf0] }
 0x214   :  { %v11161_v39 = vld [vmem:[#allocation2 + $0x1688] sm:$0xf]  ;;  %v10906_v51 = vor.u32 %v13132_v37, %v10905_v36  ;;  %5369 = vmatpush.bf16.msra.mxu3 %v10586_v50  ;;  %v9278_v36 = vor.u32 %v12720_v18, %v9275_v20  ;;  %v12584_v37 = vld [vmem:[#allocation2 + $0x38c] sm:$0xf] }
 0x215   :  { %v13196_v4 = vld [vmem:[#allocation2 + $0x16a4] sm:$0xf0]  ;;  %5357 = vmatmul.bf16.vlgmr.msra.gmra.mxu2 %v13746_v19  ;;  %v9179_v13 = vld [vmem:[#allocation2 + $0x728] sm:$0xf0] }
 0x216   :  { %v11417_v40 = vld [vmem:[#allocation2 + $0x1888] sm:$0xf]  ;;  %v11162_v52 = vor.u32 %v13196_v4, %v11161_v39  ;;  %5380 = vmatpush.bf16.msrb.mxu0 %v10906_v51  ;;  %v8731_v39 = vld [vmem:[#allocation2 + $0x3a8] sm:$0xf0] }
 0x217   :  { %v13260_v43 = vld [vmem:[#allocation2 + $0x18a4] sm:$0xf0]  ;;  %5370 = vmatmul.bf16.vlgmr.msra.gmra.mxu3 %v13750_v24  ;;  %v12648_v4 = vld [vmem:[#allocation2 + $0x58c] sm:$0xf]  ;;  %v8734_v50 = vor.u32 %v12584_v37, %v8731_v39 }
 0x218   :  { %v11418_v53 = vor.u32 %v13260_v43, %v11417_v40  ;;  %v10873_v54 = vld [vmem:[#allocation2 + $0x1448] sm:$0xf]  ;;  %5393 = vmatpush.bf16.msrb.mxu1 %v11162_v52  ;;  %5414 = vmatpush.bf16.msrb.mxu3 %v8510_v57  ;;  %v8987_v40 = vld [vmem:[#allocation2 + $0x5a8] sm:$0xf0] }
 0x219   :  { %v13124_v55 = vld [vmem:[#allocation2 + $0x1464] sm:$0xf0]  ;;  %v12712_v43 = vld [vmem:[#allocation2 + $0x78c] sm:$0xf] }
 0x21a   :  { %v11129_v56 = vld [vmem:[#allocation2 + $0x1648] sm:$0xf]  ;;  %v10874_v63 = vor.u32 %v13124_v55, %v10873_v54  ;;  %5406 = vmatpush.bf16.msrb.mxu2 %v11418_v53  ;;  %v12496_v51 = vld [vmem:[#allocation2 + $0xcc] sm:$0xf]  ;;  %v8990_v53 = vor.u32 %v12648_v4, %v8987_v40  ;;  %v9246_v54 = vor.u32 %v12712_v43, %v9243_v46  ;;  %v5139_v16 = vpop.f32.mrf.mxu1 }
 0x21b   :  { %v13188_v58 = vld [vmem:[#allocation2 + $0x1664] sm:$0xf0]  ;;  %v8379_v52 = vld [vmem:[#allocation2 + $0xe8] sm:$0xf0] }
 0x21c   :  { %v11385_v59 = vld [vmem:[#allocation2 + $0x1848] sm:$0xf]  ;;  %v11130_v2 = vor.u32 %v13188_v58, %v11129_v56  ;;  %5381 = vmatpush.bf16.msrb.mxu0 %v10874_v63  ;;  %5415 = vmatpush.bf16.msrb.mxu3 %v8478_v8  ;;  %v12576_v55 = vld [vmem:[#allocation2 + $0x34c] sm:$0xf]  ;;  %v8382_v61 = vor.u32 %v12496_v51, %v8379_v52 }
 0x21d   :  { %v13252_v60 = vld [vmem:[#allocation2 + $0x1864] sm:$0xf0]  ;;  %v8699_v56 = vld [vmem:[#allocation2 + $0x368] sm:$0xf0] }
 0x21e   :  { %v10841_v0 = vld [vmem:[#allocation2 + $0x1408] sm:$0xf]  ;;  %v11386_v3 = vor.u32 %v13252_v60, %v11385_v59  ;;  %5394 = vmatpush.bf16.msrb.mxu1 %v11130_v2  ;;  %v12640_v57 = vld [vmem:[#allocation2 + $0x54c] sm:$0xf]  ;;  %v5150_v60 = vpop.f32.mrf.mxu2  ;;  %v8702_v62 = vor.u32 %v12576_v55, %v8699_v56  ;;  %v5163_v2 = vpop.f32.mrf.mxu3 }
 0x21f   :  { %v13116_v1 = vld [vmem:[#allocation2 + $0x1424] sm:$0xf0]  ;;  %v8955_v58 = vld [vmem:[#allocation2 + $0x568] sm:$0xf0]  ;;  %v5178_v56 = vpop.f32.mrf.mxu0 }
 0x220   :  { %v11097_v5 = vld [vmem:[#allocation2 + $0x1608] sm:$0xf]  ;;  %v10842_v17 = vor.u32 %v13116_v1, %v10841_v0  ;;  %5407 = vmatpush.bf16.msrb.mxu2 %v11386_v3  ;;  %5416 = vmatpush.bf16.msrb.mxu3 %v8446_v28  ;;  %v12704_v59 = vld [vmem:[#allocation2 + $0x74c] sm:$0xf]  ;;  %v5151_v1 = vadd.f32 %v5150_v60, %v5138_v48  ;;  %v8958_v3 = vor.u32 %v12640_v57, %v8955_v58 }
 0x221   :  { %v13180_v6 = vld [vmem:[#allocation2 + $0x1624] sm:$0xf0]  ;;  %v12488_v63 = vld [vmem:[#allocation2 + $0x8c] sm:$0xf]  ;;  %v9182_v28 = vor.u32 %v12696_v12, %v9179_v13 }
 0x222   :  { %v11353_v7 = vld [vmem:[#allocation2 + $0x1808] sm:$0xf]  ;;  %v11098_v21 = vor.u32 %v13180_v6, %v11097_v5  ;;  %5382 = vmatpush.bf16.msrb.mxu0 %v10842_v17  ;;  %v8347_v0 = vld [vmem:[#allocation2 + $0xa8] sm:$0xf0]  ;;  %v9214_v5 = vor.u32 %v12704_v59, %v9211_v11  ;;  %v5164_v14 = vadd.f32 %v5163_v2, %v5151_v1 }
 0x223   :  { %v13244_v9 = vld [vmem:[#allocation2 + $0x1824] sm:$0xf0]  ;;  %v12568_v6 = vld [vmem:[#allocation2 + $0x30c] sm:$0xf]  ;;  %v8350_v17 = vor.u32 %v12488_v63, %v8347_v0 }
 0x224   :  { %v11354_v25 = vor.u32 %v13244_v9, %v11353_v7  ;;  %5395 = vmatpush.bf16.msrb.mxu1 %v11098_v21  ;;  %5417 = vmatpush.bf16.msrb.mxu3 %v8414_v49  ;;  %v8667_v7 = vld [vmem:[#allocation2 + $0x328] sm:$0xf0]  ;;  %v13800_v21 = vadd.f32 %v5176_v15, %v5164_v14 }
 0x225   :  { %5383 = vmatmul.bf16.vlgmr.msrb.gmra.mxu0 %v13748_v23  ;;  %v12632_v8 = vld [vmem:[#allocation2 + $0x50c] sm:$0xf]  ;;  %v8670_v10 = vor.u32 %v12568_v6, %v8667_v7 }
 0x226   :  { %5408 = vmatpush.bf16.msrb.mxu2 %v11354_v25  ;;  %5427 = vmatpush.bf16.msra.mxu0 %v8766_v45  ;;  %v8923_v9 = vld [vmem:[#allocation2 + $0x528] sm:$0xf0]  ;;  %v5152_v39 = vpop.f32.mrf.mxu2  ;;  %v5165_v47 = vpop.f32.mrf.mxu3 }
 0x227   :  { %5396 = vmatmul.bf16.vlgmr.msrb.gmra.mxu1 %v13752_v29  ;;  %v12480_v18 = vld [vmem:[#allocation2 + $0x4c] sm:$0xf]  ;;  %v8926_v25 = vor.u32 %v12632_v8, %v8923_v9 }
 0x228   :  { %5440 = vmatpush.bf16.msra.mxu1 %v9022_v35  ;;  %5418 = vmatpush.bf16.msrb.mxu3 %v8382_v61  ;;  %v8315_v20 = vld [vmem:[#allocation2 + $0x68] sm:$0xf0] }
 0x229   :  { %v12560_v45 = vld [vmem:[#allocation2 + $0x2cc] sm:$0xf]  ;;  %11441 = vmatmul.msk.bf16.vlgmr.msrb.gmra.mxu2 %vm4903_vm0, %v13758_v22  ;;  %v8318_v4 = vor.u32 %v12480_v18, %v8315_v20 }
 0x22a   :  { %5453 = vmatpush.bf16.msra.mxu2 %v9278_v36  ;;  %5428 = vmatpush.bf16.msra.mxu0 %v8734_v50  ;;  %v8635_v31 = vld [vmem:[#allocation2 + $0x2e8] sm:$0xf0] }
 0x22b   :  { %v12624_v34 = vld [vmem:[#allocation2 + $0x4cc] sm:$0xf]  ;;  %v8638_v40 = vor.u32 %v12560_v45, %v8635_v31 }
 0x22c   :  { %5441 = vmatpush.bf16.msra.mxu1 %v8990_v53  ;;  %v8891_v35 = vld [vmem:[#allocation2 + $0x4e8] sm:$0xf0]  ;;  %5419 = vmatpush.bf16.msrb.mxu3 %v8350_v17 }
 0x22d   :  { %v12688_v36 = vld [vmem:[#allocation2 + $0x6cc] sm:$0xf]  ;;  %v8894_v48 = vor.u32 %v12624_v34, %v8891_v35 }
 0x22e   :  { %5454 = vmatpush.bf16.msra.mxu2 %v9246_v54  ;;  %5429 = vmatpush.bf16.msra.mxu0 %v8702_v62  ;;  %v9147_v37 = vld [vmem:[#allocation2 + $0x6e8] sm:$0xf0] }
 0x22f   :  { %v12472_v43 = vld [vmem:[#allocation2 + $0xc] sm:$0xf]  ;;  %v9150_v49 = vor.u32 %v12688_v36, %v9147_v37 }
 0x230   :  { %5442 = vmatpush.bf16.msra.mxu1 %v8958_v3  ;;  %v8283_v46 = vld [vmem:[#allocation2 + $0x28] sm:$0xf0]  ;;  %5420 = vmatpush.bf16.msrb.mxu3 %v8318_v4 }
 0x231   :  { %v12552_v50 = vld [vmem:[#allocation2 + $0x28c] sm:$0xf]  ;;  %v8286_v59 = vor.u32 %v12472_v43, %v8283_v46 }
 0x232   :  { %5455 = vmatpush.bf16.msra.mxu2 %v9214_v5  ;;  %5430 = vmatpush.bf16.msra.mxu0 %v8670_v10  ;;  %v8603_v51 = vld [vmem:[#allocation2 + $0x2a8] sm:$0xf0] }
 0x233   :  { %v12616_v52 = vld [vmem:[#allocation2 + $0x48c] sm:$0xf]  ;;  %v8606_v11 = vor.u32 %v12552_v50, %v8603_v51  ;;  %v5189_v50 = vpop.f32.mrf.mxu1 }
 0x234   :  { %5443 = vmatpush.bf16.msra.mxu1 %v8926_v25  ;;  %v8859_v53 = vld [vmem:[#allocation2 + $0x4a8] sm:$0xf0]  ;;  %5421 = vmatpush.bf16.msrb.mxu3 %v8286_v59 }
 0x235   :  { %v12680_v54 = vld [vmem:[#allocation2 + $0x68c] sm:$0xf]  ;;  %v8862_v60 = vor.u32 %v12616_v52, %v8859_v53 }
 0x236   :  { %5456 = vmatpush.bf16.msra.mxu2 %v9182_v28  ;;  %v9115_v55 = vld [vmem:[#allocation2 + $0x6a8] sm:$0xf0]  ;;  %5431 = vmatpush.bf16.msra.mxu0 %v8638_v40 }
 0x237   :  { %v12784_v57 = vld [vmem:[#allocation2 + $0x9cc] sm:$0xf]  ;;  %v9118_v61 = vor.u32 %v12680_v54, %v9115_v55  ;;  %5422 = vmatmul.bf16.vlgmr.msrb.gmra.mxu3 %v13718_v27  ;;  %v5190_v54 = vadd.f32 %v5189_v50, %v13800_v21 }
 0x238   :  { %v9531_v58 = vld [vmem:[#allocation2 + $0x9e8] sm:$0xf0]  ;;  %5444 = vmatpush.bf16.msra.mxu1 %v8894_v48 }
 0x239   :  { %v12544_v62 = vld [vmem:[#allocation2 + $0x24c] sm:$0xf]  ;;  %v9534_v1 = vor.u32 %v12784_v57, %v9531_v58 }
 0x23a   :  { %5457 = vmatpush.bf16.msra.mxu2 %v9150_v49  ;;  %v8571_v63 = vld [vmem:[#allocation2 + $0x268] sm:$0xf0]  ;;  %5432 = vmatpush.bf16.msra.mxu0 %v8606_v11 }
 0x23b   :  { %v12608_v0 = vld [vmem:[#allocation2 + $0x44c] sm:$0xf]  ;;  %v8574_v8 = vor.u32 %v12544_v62, %v8571_v63  ;;  %5466 = vmatpush.bf16.msra.mxu3 %v9534_v1 }
 0x23c   :  { %v8827_v2 = vld [vmem:[#allocation2 + $0x468] sm:$0xf0]  ;;  %5445 = vmatpush.bf16.msra.mxu1 %v8862_v60 }
 0x23d   :  { %v12672_v3 = vld [vmem:[#allocation2 + $0x64c] sm:$0xf]  ;;  %v8830_v13 = vor.u32 %v12608_v0, %v8827_v2 }
 0x23e   :  { %v9083_v5 = vld [vmem:[#allocation2 + $0x668] sm:$0xf0]  ;;  %5458 = vmatpush.bf16.msra.mxu2 %v9118_v61  ;;  %5433 = vmatpush.bf16.msra.mxu0 %v8574_v8  ;;  %v5215_v8 = vpop.f32.mrf.mxu3 }
 0x23f   :  { %v12776_v6 = vld [vmem:[#allocation2 + $0x98c] sm:$0xf]  ;;  %v9086_v14 = vor.u32 %v12672_v3, %v9083_v5 }
 0x240   :  { %v9499_v7 = vld [vmem:[#allocation2 + $0x9a8] sm:$0xf0]  ;;  %5446 = vmatpush.bf16.msra.mxu1 %v8830_v13 }
 0x241   :  { %v12536_v9 = vld [vmem:[#allocation2 + $0x20c] sm:$0xf]  ;;  %v9502_v10 = vor.u32 %v12776_v6, %v9499_v7  ;;  %v5202_v6 = vpop.f32.mrf.mxu2 }
 0x242   :  { %v8539_v12 = vld [vmem:[#allocation2 + $0x228] sm:$0xf0]  ;;  %5459 = vmatpush.bf16.msra.mxu2 %v9086_v14  ;;  %v5203_v13 = vadd.f32 %v5202_v6, %v5190_v54 }
 0x243   :  { %v12600_v15 = vld [vmem:[#allocation2 + $0x40c] sm:$0xf]  ;;  %v8542_v34 = vor.u32 %v12536_v9, %v8539_v12  ;;  %5467 = vmatpush.bf16.msra.mxu3 %v9502_v10 }
 0x244   :  { %v8795_v16 = vld [vmem:[#allocation2 + $0x428] sm:$0xf0] }
 0x245   :  { %v12664_v17 = vld [vmem:[#allocation2 + $0x60c] sm:$0xf]  ;;  %v8798_v39 = vor.u32 %v12600_v15, %v8795_v16  ;;  %5434 = vmatpush.bf16.msra.mxu0 %v8542_v34  ;;  %v5191_v16 = vpop.f32.mrf.mxu1 }
 0x246   :  { %v9051_v18 = vld [vmem:[#allocation2 + $0x628] sm:$0xf0] }
 0x247   :  { %v12768_v20 = vld [vmem:[#allocation2 + $0x94c] sm:$0xf]  ;;  %v9054_v4 = vor.u32 %v12664_v17, %v9051_v18  ;;  %5447 = vmatpush.bf16.msra.mxu1 %v8798_v39 }
 0x248   :  { %v9467_v25 = vld [vmem:[#allocation2 + $0x968] sm:$0xf0]  ;;  %5435 = vmatmul.bf16.vlgmr.msra.gmra.mxu0 %v13722_v33 }
 0x249   :  { %v12848_v28 = vld [vmem:[#allocation2 + $0xbcc] sm:$0xf]  ;;  %v9470_v40 = vor.u32 %v12768_v20, %v9467_v25  ;;  %5460 = vmatpush.bf16.msra.mxu2 %v9054_v4  ;;  %v5228_v20 = vpop.f32.mrf.mxu0 }
 0x24a   :  { %v9787_v45 = vld [vmem:[#allocation2 + $0xbe8] sm:$0xf0]  ;;  %5448 = vmatmul.bf16.vlgmr.msra.gmra.mxu1 %v13716_v26 }
 0x24b   :  { %v12912_v31 = vld [vmem:[#allocation2 + $0xdcc] sm:$0xf]  ;;  %v9790_v43 = vor.u32 %v12848_v28, %v9787_v45  ;;  %5468 = vmatpush.bf16.msra.mxu3 %v9470_v40 }
 0x24c   :  { %v10043_v35 = vld [vmem:[#allocation2 + $0xde8] sm:$0xf0]  ;;  %5461 = vmatmul.bf16.vlgmr.msra.gmra.mxu2 %v13720_v32 }
 0x24d   :  { %v12976_v36 = vld [vmem:[#allocation2 + $0xfcc] sm:$0xf]  ;;  %v10046_v48 = vor.u32 %v12912_v31, %v10043_v35  ;;  %5479 = vmatpush.bf16.msrb.mxu0 %v9790_v43  ;;  %v5216_v31 = vadd.f32 %v5215_v8, %v5203_v13 }
 0x24e   :  { %v10299_v37 = vld [vmem:[#allocation2 + $0xfe8] sm:$0xf0] }
 0x24f   :  { %v12760_v46 = vld [vmem:[#allocation2 + $0x90c] sm:$0xf]  ;;  %v10302_v49 = vor.u32 %v12976_v36, %v10299_v37  ;;  %5492 = vmatpush.bf16.msrb.mxu1 %v10046_v48  ;;  %v5229_v39 = vadd.f32 %v5228_v20, %v5216_v31 }
 0x250   :  { %v9435_v47 = vld [vmem:[#allocation2 + $0x928] sm:$0xf0] }
 0x251   :  { %v12840_v51 = vld [vmem:[#allocation2 + $0xb8c] sm:$0xf]  ;;  %v9438_v58 = vor.u32 %v12760_v46, %v9435_v47  ;;  %5505 = vmatpush.bf16.msrb.mxu2 %v10302_v49 }
 0x252   :  { %v9755_v52 = vld [vmem:[#allocation2 + $0xba8] sm:$0xf0] }
 0x253   :  { %v12904_v53 = vld [vmem:[#allocation2 + $0xd8c] sm:$0xf]  ;;  %v9758_v59 = vor.u32 %v12840_v51, %v9755_v52  ;;  %5469 = vmatpush.bf16.msra.mxu3 %v9438_v58 }
 0x254   :  { %v10011_v55 = vld [vmem:[#allocation2 + $0xda8] sm:$0xf0] }
 0x255   :  { %v12968_v56 = vld [vmem:[#allocation2 + $0xf8c] sm:$0xf]  ;;  %v10014_v61 = vor.u32 %v12904_v53, %v10011_v55  ;;  %5480 = vmatpush.bf16.msrb.mxu0 %v9758_v59  ;;  %v5217_v55 = vpop.f32.mrf.mxu3 }
 0x256   :  { %v10267_v57 = vld [vmem:[#allocation2 + $0xfa8] sm:$0xf0] }
 0x257   :  { %v12752_v11 = vld [vmem:[#allocation2 + $0x8cc] sm:$0xf]  ;;  %v10270_v62 = vor.u32 %v12968_v56, %v10267_v57  ;;  %5493 = vmatpush.bf16.msrb.mxu1 %v10014_v61  ;;  %v5204_v56 = vpop.f32.mrf.mxu2 }
 0x258   :  { %v9403_v60 = vld [vmem:[#allocation2 + $0x8e8] sm:$0xf0] }
 0x259   :  { %v12832_v63 = vld [vmem:[#allocation2 + $0xb4c] sm:$0xf]  ;;  %v9406_v5 = vor.u32 %v12752_v11, %v9403_v60  ;;  %5506 = vmatpush.bf16.msrb.mxu2 %v10270_v62 }
 0x25a   :  { %v9723_v0 = vld [vmem:[#allocation2 + $0xb68] sm:$0xf0] }
 0x25b   :  { %v12896_v1 = vld [vmem:[#allocation2 + $0xd4c] sm:$0xf]  ;;  %v9726_v7 = vor.u32 %v12832_v63, %v9723_v0  ;;  %5470 = vmatpush.bf16.msra.mxu3 %v9406_v5  ;;  %v5230_v0 = vpop.f32.mrf.mxu0 }
 0x25c   :  { %v9979_v2 = vld [vmem:[#allocation2 + $0xd68] sm:$0xf0] }
 0x25d   :  { %v12960_v21 = vld [vmem:[#allocation2 + $0xf4c] sm:$0xf]  ;;  %v9982_v14 = vor.u32 %v12896_v1, %v9979_v2  ;;  %5481 = vmatpush.bf16.msrb.mxu0 %v9726_v7  ;;  %v5241_v1 = vpop.f32.mrf.mxu1 }
 0x25e   :  { %v10235_v3 = vld [vmem:[#allocation2 + $0xf68] sm:$0xf0] }
 0x25f   :  { %v12744_v9 = vld [vmem:[#allocation2 + $0x88c] sm:$0xf]  ;;  %v10238_v15 = vor.u32 %v12960_v21, %v10235_v3  ;;  %5494 = vmatpush.bf16.msrb.mxu1 %v9982_v14  ;;  %v13809_v3 = vadd.f32 %v5241_v1, %v5229_v39 }
 0x260   :  { %v9371_v12 = vld [vmem:[#allocation2 + $0x8a8] sm:$0xf0] }
 0x261   :  { %v12824_v17 = vld [vmem:[#allocation2 + $0xb0c] sm:$0xf]  ;;  %v9374_v34 = vor.u32 %v12744_v9, %v9371_v12  ;;  %5507 = vmatpush.bf16.msrb.mxu2 %v10238_v15 }
 0x262   :  { %v9691_v10 = vld [vmem:[#allocation2 + $0xb28] sm:$0xf0] }
 0x263   :  { %v12888_v18 = vld [vmem:[#allocation2 + $0xd0c] sm:$0xf]  ;;  %v9694_v35 = vor.u32 %v12824_v17, %v9691_v10  ;;  %5471 = vmatpush.bf16.msra.mxu3 %v9374_v34 }
 0x264   :  { %v9947_v25 = vld [vmem:[#allocation2 + $0xd28] sm:$0xf0] }
 0x265   :  { %v12952_v28 = vld [vmem:[#allocation2 + $0xf0c] sm:$0xf]  ;;  %v9950_v4 = vor.u32 %v12888_v18, %v9947_v25  ;;  %5482 = vmatpush.bf16.msrb.mxu0 %v9694_v35 }
 0x266   :  { %v10203_v45 = vld [vmem:[#allocation2 + $0xf28] sm:$0xf0] }
 0x267   :  { %v12736_v36 = vld [vmem:[#allocation2 + $0x84c] sm:$0xf]  ;;  %v10206_v40 = vor.u32 %v12952_v28, %v10203_v45  ;;  %5495 = vmatpush.bf16.msrb.mxu1 %v9950_v4 }
 0x268   :  { %v9339_v37 = vld [vmem:[#allocation2 + $0x868] sm:$0xf0] }
 0x269   :  { %v12816_v43 = vld [vmem:[#allocation2 + $0xacc] sm:$0xf]  ;;  %v9342_v51 = vor.u32 %v12736_v36, %v9339_v37  ;;  %5508 = vmatpush.bf16.msrb.mxu2 %v10206_v40 }
 0x26a   :  { %v9659_v46 = vld [vmem:[#allocation2 + $0xae8] sm:$0xf0] }
 0x26b   :  { %v12880_v47 = vld [vmem:[#allocation2 + $0xccc] sm:$0xf]  ;;  %v9662_v52 = vor.u32 %v12816_v43, %v9659_v46  ;;  %5472 = vmatpush.bf16.msra.mxu3 %v9342_v51 }
 0x26c   :  { %v9915_v48 = vld [vmem:[#allocation2 + $0xce8] sm:$0xf0] }
 0x26d   :  { %v12944_v49 = vld [vmem:[#allocation2 + $0xecc] sm:$0xf]  ;;  %v9918_v57 = vor.u32 %v12880_v47, %v9915_v48  ;;  %5483 = vmatpush.bf16.msrb.mxu0 %v9662_v52  ;;  %v5243_v48 = vpop.f32.mrf.mxu1 }
 0x26e   :  { %v10171_v50 = vld [vmem:[#allocation2 + $0xee8] sm:$0xf0]  ;;  %v5280_v48 = vpop.f32.mrf.mxu0 }
 0x26f   :  { %v12728_v53 = vld [vmem:[#allocation2 + $0x80c] sm:$0xf]  ;;  %v10174_v58 = vor.u32 %v12944_v49, %v10171_v50  ;;  %5496 = vmatpush.bf16.msrb.mxu1 %v9918_v57 }
 0x270   :  { %v9307_v54 = vld [vmem:[#allocation2 + $0x828] sm:$0xf0] }
 0x271   :  { %v12808_v59 = vld [vmem:[#allocation2 + $0xa8c] sm:$0xf]  ;;  %v9310_v5 = vor.u32 %v12728_v53, %v9307_v54  ;;  %5509 = vmatpush.bf16.msrb.mxu2 %v10174_v58 }
 0x272   :  { %v9627_v11 = vld [vmem:[#allocation2 + $0xaa8] sm:$0xf0] }
 0x273   :  { %v12872_v60 = vld [vmem:[#allocation2 + $0xc8c] sm:$0xf]  ;;  %v9630_v6 = vor.u32 %v12808_v59, %v9627_v11  ;;  %5473 = vmatpush.bf16.msra.mxu3 %v9310_v5 }
 0x274   :  { %v9883_v61 = vld [vmem:[#allocation2 + $0xca8] sm:$0xf0] }
 0x275   :  { %v12936_v62 = vld [vmem:[#allocation2 + $0xe8c] sm:$0xf]  ;;  %v9886_v7 = vor.u32 %v12872_v60, %v9883_v61  ;;  %5484 = vmatpush.bf16.msrb.mxu0 %v9630_v6 }
 0x276   :  { %v10139_v63 = vld [vmem:[#allocation2 + $0xea8] sm:$0xf0]  ;;  %5474 = vmatmul.bf16.vlgmr.msra.gmra.mxu3 %v13736_v41 }
 0x277   :  { %v13040_v2 = vld [vmem:[#allocation2 + $0x11cc] sm:$0xf]  ;;  %v10142_v8 = vor.u32 %v12936_v62, %v10139_v63  ;;  %5497 = vmatpush.bf16.msrb.mxu1 %v9886_v7  ;;  %v13812_v7 = vld [vmem:[#allocation5] sm:$0xff] }
 0x278   :  { %v10555_v21 = vld [vmem:[#allocation2 + $0x11e8] sm:$0xf0] }
 0x279   :  { %v12800_v9 = vld [vmem:[#allocation2 + $0xa4c] sm:$0xf]  ;;  %v10558_v14 = vor.u32 %v13040_v2, %v10555_v21  ;;  %5510 = vmatpush.bf16.msrb.mxu2 %v10142_v8  ;;  %v929_v8 = vperm.slane %v13812_v7, 2 }
 0x27a   :  { %v9595_v12 = vld [vmem:[#allocation2 + $0xa68] sm:$0xf0] }
 0x27b   :  { %v12864_v13 = vld [vmem:[#allocation2 + $0xc4c] sm:$0xf]  ;;  %v9598_v20 = vor.u32 %v12800_v9, %v9595_v12  ;;  %5518 = vmatpush.bf16.msrb.mxu3 %v10558_v14 }
 0x27c   :  { %v9851_v15 = vld [vmem:[#allocation2 + $0xc68] sm:$0xf0] }
 0x27d   :  { %v12928_v16 = vld [vmem:[#allocation2 + $0xe4c] sm:$0xf]  ;;  %v9854_v45 = vor.u32 %v12864_v13, %v9851_v15  ;;  %5485 = vmatpush.bf16.msrb.mxu0 %v9598_v20 }
 0x27e   :  { %v10107_v17 = vld [vmem:[#allocation2 + $0xe68] sm:$0xf0] }
 0x27f   :  { %v13032_v10 = vld [vmem:[#allocation2 + $0x118c] sm:$0xf]  ;;  %v10110_v31 = vor.u32 %v12928_v16, %v10107_v17  ;;  %5498 = vmatpush.bf16.msrb.mxu1 %v9854_v45 }
 0x280   :  { %v10523_v18 = vld [vmem:[#allocation2 + $0x11a8] sm:$0xf0] }
 0x281   :  { %v12792_v25 = vld [vmem:[#allocation2 + $0xa0c] sm:$0xf]  ;;  %v10526_v37 = vor.u32 %v13032_v10, %v10523_v18  ;;  %5511 = vmatpush.bf16.msrb.mxu2 %v10110_v31  ;;  %v5254_v18 = vpop.f32.mrf.mxu2 }
 0x282   :  { %v9563_v28 = vld [vmem:[#allocation2 + $0xa28] sm:$0xf0]  ;;  %v5255_v31 = vadd.f32 %v5254_v18, %v929_v8 }
 0x283   :  { %v12856_v34 = vld [vmem:[#allocation2 + $0xc0c] sm:$0xf]  ;;  %v9566_v49 = vor.u32 %v12792_v25, %v9563_v28  ;;  %5519 = vmatpush.bf16.msrb.mxu3 %v10526_v37 }
 0x284   :  { %v9819_v35 = vld [vmem:[#allocation2 + $0xc28] sm:$0xf0] }
 0x285   :  { %v12920_v36 = vld [vmem:[#allocation2 + $0xe0c] sm:$0xf]  ;;  %v9822_v53 = vor.u32 %v12856_v34, %v9819_v35  ;;  %5486 = vmatpush.bf16.msrb.mxu0 %v9566_v49  ;;  %v5267_v34 = vpop.f32.mrf.mxu3  ;;  %v5293_v49 = vpop.f32.mrf.mxu1 }
 0x286   :  { %v10075_v39 = vld [vmem:[#allocation2 + $0xe28] sm:$0xf0] }
 0x287   :  { %v13024_v4 = vld [vmem:[#allocation2 + $0x114c] sm:$0xf]  ;;  %v10078_v54 = vor.u32 %v12920_v36, %v10075_v39  ;;  %5499 = vmatpush.bf16.msrb.mxu1 %v9822_v53 }
 0x288   :  { %v10491_v40 = vld [vmem:[#allocation2 + $0x1168] sm:$0xf0]  ;;  %5487 = vmatmul.bf16.vlgmr.msrb.gmra.mxu0 %v13740_v44 }
 0x289   :  { %v13104_v43 = vld [vmem:[#allocation2 + $0x13cc] sm:$0xf]  ;;  %v10494_v55 = vor.u32 %v13024_v4, %v10491_v40  ;;  %5512 = vmatpush.bf16.msrb.mxu2 %v10078_v54 }
 0x28a   :  { %v10811_v46 = vld [vmem:[#allocation2 + $0x13e8] sm:$0xf0]  ;;  %5500 = vmatmul.bf16.vlgmr.msrb.gmra.mxu1 %v13734_v38 }
 0x28b   :  { %v13168_v47 = vld [vmem:[#allocation2 + $0x15cc] sm:$0xf]  ;;  %v10814_v56 = vor.u32 %v13104_v43, %v10811_v46  ;;  %5520 = vmatpush.bf16.msrb.mxu3 %v10494_v55 }
 0x28c   :  { %v11067_v50 = vld [vmem:[#allocation2 + $0x15e8] sm:$0xf0]  ;;  %5513 = vmatmul.bf16.vlgmr.msrb.gmra.mxu2 %v13738_v42 }
 0x28d   :  { %v13232_v51 = vld [vmem:[#allocation2 + $0x17cc] sm:$0xf]  ;;  %v11070_v59 = vor.u32 %v13168_v47, %v11067_v50  ;;  %5531 = vmatpush.bf16.msra.mxu0 %v10814_v56  ;;  %v5268_v47 = vadd.f32 %v5267_v34, %v5255_v31 }
 0x28e   :  { %v11323_v52 = vld [vmem:[#allocation2 + $0x17e8] sm:$0xf0] }
 0x28f   :  { %v13016_v57 = vld [vmem:[#allocation2 + $0x110c] sm:$0xf]  ;;  %v11326_v11 = vor.u32 %v13232_v51, %v11323_v52  ;;  %5544 = vmatpush.bf16.msra.mxu1 %v11070_v59  ;;  %v5281_v54 = vadd.f32 %v5280_v48, %v5268_v47 }
 0x290   :  { %v10459_v58 = vld [vmem:[#allocation2 + $0x1128] sm:$0xf0] }
 0x291   :  { %v13096_v60 = vld [vmem:[#allocation2 + $0x138c] sm:$0xf]  ;;  %v10462_v2 = vor.u32 %v13016_v57, %v10459_v58  ;;  %5557 = vmatpush.bf16.msra.mxu2 %v11326_v11 }
 0x292   :  { %v10779_v61 = vld [vmem:[#allocation2 + $0x13a8] sm:$0xf0] }
 0x293   :  { %v13160_v62 = vld [vmem:[#allocation2 + $0x158c] sm:$0xf]  ;;  %v10782_v21 = vor.u32 %v13096_v60, %v10779_v61  ;;  %5521 = vmatpush.bf16.msrb.mxu3 %v10462_v2 }
 0x294   :  { %v11035_v63 = vld [vmem:[#allocation2 + $0x15a8] sm:$0xf0] }
 0x295   :  { %v13224_v0 = vld [vmem:[#allocation2 + $0x178c] sm:$0xf]  ;;  %v11038_v9 = vor.u32 %v13160_v62, %v11035_v63  ;;  %5532 = vmatpush.bf16.msra.mxu0 %v10782_v21  ;;  %v13818_v62 = vadd.f32 %v5293_v49, %v5281_v54  ;;  %v5256_v63 = vpop.f32.mrf.mxu2 }
 0x296   :  { %v11291_v1 = vld [vmem:[#allocation2 + $0x17a8] sm:$0xf0]  ;;  %v12597_v63 = vld [vmem:[#allocation2 + $0x3ec] sm:$0xf0] }
 0x297   :  { %v13008_v5 = vld [vmem:[#allocation2 + $0x10cc] sm:$0xf]  ;;  %v11294_v12 = vor.u32 %v13224_v0, %v11291_v1  ;;  %5545 = vmatpush.bf16.msra.mxu1 %v11038_v9 }
 0x298   :  { %v10427_v6 = vld [vmem:[#allocation2 + $0x10e8] sm:$0xf0] }
 0x299   :  { %v13088_v13 = vld [vmem:[#allocation2 + $0x134c] sm:$0xf]  ;;  %v10430_v20 = vor.u32 %v13008_v5, %v10427_v6  ;;  %5558 = vmatpush.bf16.msra.mxu2 %v11294_v12  ;;  %v5269_v5 = vpop.f32.mrf.mxu3 }
 0x29a   :  { %v10747_v14 = vld [vmem:[#allocation2 + $0x1368] sm:$0xf0]  ;;  %v9281_v5 = vld [vmem:[#allocation2 + $0x7d0] sm:$0xf] }
 0x29b   :  { %v13152_v15 = vld [vmem:[#allocation2 + $0x154c] sm:$0xf]  ;;  %v10750_v25 = vor.u32 %v13088_v13, %v10747_v14  ;;  %5522 = vmatpush.bf16.msrb.mxu3 %v10430_v20  ;;  %v5295_v20 = vpop.f32.mrf.mxu1 }
 0x29c   :  { %v11003_v16 = vld [vmem:[#allocation2 + $0x1568] sm:$0xf0]  ;;  %v12653_v20 = vld [vmem:[#allocation2 + $0x5ac] sm:$0xf0] }
 0x29d   :  { %v13216_v17 = vld [vmem:[#allocation2 + $0x174c] sm:$0xf]  ;;  %v11006_v35 = vor.u32 %v13152_v15, %v11003_v16  ;;  %5533 = vmatpush.bf16.msra.mxu0 %v10750_v25 }
 0x29e   :  { %v11259_v10 = vld [vmem:[#allocation2 + $0x1768] sm:$0xf0] }
 0x29f   :  { %v13000_v28 = vld [vmem:[#allocation2 + $0x108c] sm:$0xf]  ;;  %v11262_v36 = vor.u32 %v13216_v17, %v11259_v10  ;;  %5546 = vmatpush.bf16.msra.mxu1 %v11006_v35  ;;  %v5282_v17 = vpop.f32.mrf.mxu0 }
 0x2a0   :  { %v10395_v45 = vld [vmem:[#allocation2 + $0x10a8] sm:$0xf0] }
 0x2a1   :  { %v13080_v37 = vld [vmem:[#allocation2 + $0x130c] sm:$0xf]  ;;  %v10398_v50 = vor.u32 %v13000_v28, %v10395_v45  ;;  %5559 = vmatpush.bf16.msra.mxu2 %v11262_v36 }
 0x2a2   :  { %v10715_v39 = vld [vmem:[#allocation2 + $0x1328] sm:$0xf0] }
 0x2a3   :  { %v13144_v4 = vld [vmem:[#allocation2 + $0x150c] sm:$0xf]  ;;  %v10718_v51 = vor.u32 %v13080_v37, %v10715_v39  ;;  %5523 = vmatpush.bf16.msrb.mxu3 %v10398_v50 }
 0x2a4   :  { %v10971_v40 = vld [vmem:[#allocation2 + $0x1528] sm:$0xf0] }
 0x2a5   :  { %v13208_v43 = vld [vmem:[#allocation2 + $0x170c] sm:$0xf]  ;;  %v10974_v55 = vor.u32 %v13144_v4, %v10971_v40  ;;  %5534 = vmatpush.bf16.msra.mxu0 %v10718_v51 }
 0x2a6   :  { %v11227_v46 = vld [vmem:[#allocation2 + $0x1728] sm:$0xf0] }
 0x2a7   :  { %v12992_v52 = vld [vmem:[#allocation2 + $0x104c] sm:$0xf]  ;;  %v11230_v56 = vor.u32 %v13208_v43, %v11227_v46  ;;  %5547 = vmatpush.bf16.msra.mxu1 %v10974_v55 }
 0x2a8   :  { %v10363_v53 = vld [vmem:[#allocation2 + $0x1068] sm:$0xf0] }
 0x2a9   :  { %v13072_v57 = vld [vmem:[#allocation2 + $0x12cc] sm:$0xf]  ;;  %v10366_v0 = vor.u32 %v12992_v52, %v10363_v53  ;;  %5560 = vmatpush.bf16.msra.mxu2 %v11230_v56 }
 0x2aa   :  { %v10683_v58 = vld [vmem:[#allocation2 + $0x12e8] sm:$0xf0] }
 0x2ab   :  { %v13136_v59 = vld [vmem:[#allocation2 + $0x14cc] sm:$0xf]  ;;  %v10686_v1 = vor.u32 %v13072_v57, %v10683_v58  ;;  %5524 = vmatpush.bf16.msrb.mxu3 %v10366_v0  ;;  %v9025_v0 = vld [vmem:[#allocation2 + $0x5d0] sm:$0xf] }
 0x2ac   :  { %v10939_v11 = vld [vmem:[#allocation2 + $0x14e8] sm:$0xf0] }
 0x2ad   :  { %v13200_v60 = vld [vmem:[#allocation2 + $0x16cc] sm:$0xf]  ;;  %v10942_v6 = vor.u32 %v13136_v59, %v10939_v11  ;;  %5535 = vmatpush.bf16.msra.mxu0 %v10686_v1  ;;  %v8513_v59 = vld [vmem:[#allocation2 + $0x1d0] sm:$0xf] }
 0x2ae   :  { %v11195_v61 = vld [vmem:[#allocation2 + $0x16e8] sm:$0xf0]  ;;  %v12533_v11 = vld [vmem:[#allocation2 + $0x1ec] sm:$0xf0] }
 0x2af   :  { %v12984_v2 = vld [vmem:[#allocation2 + $0x100c] sm:$0xf]  ;;  %v11198_v8 = vor.u32 %v13200_v60, %v11195_v61  ;;  %5548 = vmatpush.bf16.msra.mxu1 %v10942_v6  ;;  %v8769_v60 = vld [vmem:[#allocation2 + $0x3d0] sm:$0xf] }
 0x2b0   :  { %v10331_v21 = vld [vmem:[#allocation2 + $0x1028] sm:$0xf0]  ;;  %v12661_v1 = vld [vmem:[#allocation2 + $0x5ec] sm:$0xf0] }
 0x2b1   :  { %v13064_v9 = vld [vmem:[#allocation2 + $0x128c] sm:$0xf]  ;;  %v10334_v25 = vor.u32 %v12984_v2, %v10331_v21  ;;  %5561 = vmatpush.bf16.msra.mxu2 %v11198_v8  ;;  %v12725_v6 = vld [vmem:[#allocation2 + $0x7ec] sm:$0xf0] }
 0x2b2   :  { %v10651_v12 = vld [vmem:[#allocation2 + $0x12a8] sm:$0xf0]  ;;  %v9282_v17 = vor.u32 %v12725_v6, %v9281_v5  ;;  %v8385_v6 = vld [vmem:[#allocation2 + $0xd0] sm:$0xf] }
 0x2b3   :  { %v13128_v13 = vld [vmem:[#allocation2 + $0x148c] sm:$0xf]  ;;  %v10654_v28 = vor.u32 %v13064_v9, %v10651_v12  ;;  %5525 = vmatpush.bf16.msrb.mxu3 %v10334_v25  ;;  %v8514_v9 = vor.u32 %v12533_v11, %v8513_v59  ;;  %v8770_v12 = vor.u32 %v12597_v63, %v8769_v60  ;;  %v9249_v25 = vld [vmem:[#allocation2 + $0x790] sm:$0xf] }
 0x2b4   :  { %v10907_v14 = vld [vmem:[#allocation2 + $0x14a8] sm:$0xf0]  ;;  %v8929_v59 = vld [vmem:[#allocation2 + $0x510] sm:$0xf] }
 0x2b5   :  { %v13192_v15 = vld [vmem:[#allocation2 + $0x168c] sm:$0xf]  ;;  %v10910_v45 = vor.u32 %v13128_v13, %v10907_v14  ;;  %5536 = vmatpush.bf16.msra.mxu0 %v10654_v28  ;;  %v9026_v13 = vor.u32 %v12661_v1, %v9025_v0  ;;  %v8481_v14 = vld [vmem:[#allocation2 + $0x190] sm:$0xf]  ;;  %v5345_v1 = vpop.f32.mrf.mxu1 }
 0x2b6   :  { %v11163_v16 = vld [vmem:[#allocation2 + $0x16a8] sm:$0xf0]  ;;  %5526 = vmatmul.bf16.vlgmr.msrb.gmra.mxu3 %v13746_v19  ;;  %v12717_v28 = vld [vmem:[#allocation2 + $0x7ac] sm:$0xf0] }
 0x2b7   :  { %v13256_v10 = vld [vmem:[#allocation2 + $0x188c] sm:$0xf]  ;;  %v11166_v31 = vor.u32 %v13192_v15, %v11163_v16  ;;  %5549 = vmatpush.bf16.msra.mxu1 %v10910_v45  ;;  %v12525_v15 = vld [vmem:[#allocation2 + $0x1ac] sm:$0xf0] }
 0x2b8   :  { %v11419_v18 = vld [vmem:[#allocation2 + $0x18a8] sm:$0xf0]  ;;  %v8737_v16 = vld [vmem:[#allocation2 + $0x390] sm:$0xf]  ;;  %v8482_v45 = vor.u32 %v12525_v15, %v8481_v14 }
 0x2b9   :  { %v13056_v34 = vld [vmem:[#allocation2 + $0x124c] sm:$0xf]  ;;  %v11422_v37 = vor.u32 %v13256_v10, %v11419_v18  ;;  %5562 = vmatpush.bf16.msra.mxu2 %v11166_v31  ;;  %v12589_v10 = vld [vmem:[#allocation2 + $0x3ac] sm:$0xf0] }
 0x2ba   :  { %v10619_v35 = vld [vmem:[#allocation2 + $0x1268] sm:$0xf0]  ;;  %v8993_v18 = vld [vmem:[#allocation2 + $0x590] sm:$0xf]  ;;  %v8738_v31 = vor.u32 %v12589_v10, %v8737_v16 }
 0x2bb   :  { %v13120_v36 = vld [vmem:[#allocation2 + $0x144c] sm:$0xf]  ;;  %v10622_v47 = vor.u32 %v13056_v34, %v10619_v35  ;;  %5575 = vmatpush.bf16.msra.mxu3 %v11422_v37  ;;  %v8994_v34 = vor.u32 %v12653_v20, %v8993_v18  ;;  %v8449_v35 = vld [vmem:[#allocation2 + $0x150] sm:$0xf] }
 0x2bc   :  { %v10875_v39 = vld [vmem:[#allocation2 + $0x1468] sm:$0xf0]  ;;  %v8705_v37 = vld [vmem:[#allocation2 + $0x350] sm:$0xf] }
 0x2bd   :  { %v13184_v4 = vld [vmem:[#allocation2 + $0x164c] sm:$0xf]  ;;  %v10878_v50 = vor.u32 %v13120_v36, %v10875_v39  ;;  %5537 = vmatpush.bf16.msra.mxu0 %v10622_v47  ;;  %v12517_v36 = vld [vmem:[#allocation2 + $0x16c] sm:$0xf0]  ;;  %v9250_v39 = vor.u32 %v12717_v28, %v9249_v25 }
 0x2be   :  { %v11131_v40 = vld [vmem:[#allocation2 + $0x1668] sm:$0xf0]  ;;  %v12709_v47 = vld [vmem:[#allocation2 + $0x76c] sm:$0xf0] }
 0x2bf   :  { %v13248_v43 = vld [vmem:[#allocation2 + $0x184c] sm:$0xf]  ;;  %v11134_v51 = vor.u32 %v13184_v4, %v11131_v40  ;;  %5550 = vmatpush.bf16.msra.mxu1 %v10878_v50  ;;  %v12581_v4 = vld [vmem:[#allocation2 + $0x36c] sm:$0xf0] }
 0x2c0   :  { %v11387_v46 = vld [vmem:[#allocation2 + $0x1868] sm:$0xf0]  ;;  %v8961_v40 = vld [vmem:[#allocation2 + $0x550] sm:$0xf] }
 0x2c1   :  { %v13048_v48 = vld [vmem:[#allocation2 + $0x120c] sm:$0xf]  ;;  %v11390_v55 = vor.u32 %v13248_v43, %v11387_v46  ;;  %5563 = vmatpush.bf16.msra.mxu2 %v11134_v51  ;;  %v12645_v43 = vld [vmem:[#allocation2 + $0x56c] sm:$0xf0]  ;;  %v5319_v51 = vpop.f32.mrf.mxu3 }
 0x2c2   :  { %v10587_v49 = vld [vmem:[#allocation2 + $0x1228] sm:$0xf0]  ;;  %v9217_v46 = vld [vmem:[#allocation2 + $0x750] sm:$0xf] }
 0x2c3   :  { %v13112_v52 = vld [vmem:[#allocation2 + $0x140c] sm:$0xf]  ;;  %v10590_v61 = vor.u32 %v13048_v48, %v10587_v49  ;;  %5576 = vmatpush.bf16.msra.mxu3 %v11390_v55  ;;  %v5306_v48 = vpop.f32.mrf.mxu2  ;;  %v8450_v49 = vor.u32 %v12517_v36, %v8449_v35  ;;  %v12509_v55 = vld [vmem:[#allocation2 + $0x12c] sm:$0xf0] }
 0x2c4   :  { %v10843_v53 = vld [vmem:[#allocation2 + $0x1428] sm:$0xf0]  ;;  %v5307_v50 = vadd.f32 %v5306_v48, %v13818_v62  ;;  %v12637_v11 = vld [vmem:[#allocation2 + $0x52c] sm:$0xf0] }
 0x2c5   :  { %v13176_v54 = vld [vmem:[#allocation2 + $0x160c] sm:$0xf]  ;;  %v10846_v2 = vor.u32 %v13112_v52, %v10843_v53  ;;  %5538 = vmatpush.bf16.msra.mxu0 %v10590_v61  ;;  %v8706_v52 = vor.u32 %v12581_v4, %v8705_v37  ;;  %v8962_v53 = vor.u32 %v12645_v43, %v8961_v40  ;;  %v5332_v61 = vpop.f32.mrf.mxu0  ;;  %v9185_v63 = vld [vmem:[#allocation2 + $0x710] sm:$0xf]  ;;  %v8930_v5 = vor.u32 %v12637_v11, %v8929_v59 }
 0x2c6   :  { %v11099_v56 = vld [vmem:[#allocation2 + $0x1628] sm:$0xf0]  ;;  %v5320_v60 = vadd.f32 %v5319_v51, %v5307_v50  ;;  %v12701_v0 = vld [vmem:[#allocation2 + $0x72c] sm:$0xf0] }
 0x2c7   :  { %v13240_v57 = vld [vmem:[#allocation2 + $0x180c] sm:$0xf]  ;;  %v11102_v21 = vor.u32 %v13176_v54, %v11099_v56  ;;  %5551 = vmatpush.bf16.msra.mxu1 %v10846_v2  ;;  %v8417_v54 = vld [vmem:[#allocation2 + $0x110] sm:$0xf] }
 0x2c8   :  { %v11355_v58 = vld [vmem:[#allocation2 + $0x1828] sm:$0xf0]  ;;  %5539 = vmatmul.bf16.vlgmr.msra.gmra.mxu0 %v13750_v24  ;;  %v8673_v56 = vld [vmem:[#allocation2 + $0x310] sm:$0xf]  ;;  %v8418_v62 = vor.u32 %v12509_v55, %v8417_v54  ;;  %v5333_v2 = vadd.f32 %v5332_v61, %v5320_v60 }
 0x2c9   :  { %v11358_v8 = vor.u32 %v13240_v57, %v11355_v58  ;;  %5564 = vmatpush.bf16.msra.mxu2 %v11102_v21  ;;  %5583 = vmatpush.bf16.msrb.mxu0 %v8514_v9  ;;  %v9218_v57 = vor.u32 %v12709_v47, %v9217_v46  ;;  %v12573_v58 = vld [vmem:[#allocation2 + $0x32c] sm:$0xf0]  ;;  %v5321_v25 = vpop.f32.mrf.mxu3  ;;  %v5347_v47 = vpop.f32.mrf.mxu1 }
 0x2ca   :  { %5552 = vmatmul.bf16.vlgmr.msra.gmra.mxu1 %v13748_v23  ;;  %v8674_v21 = vor.u32 %v12573_v58, %v8673_v56  ;;  %v8641_v9 = vld [vmem:[#allocation2 + $0x2d0] sm:$0xf]  ;;  %v13825_v16 = vadd.f32 %v5345_v1, %v5333_v2 }
 0x2cb   :  { %5577 = vmatpush.bf16.msra.mxu3 %v11358_v8  ;;  %5596 = vmatpush.bf16.msrb.mxu1 %v8770_v12  ;;  %v12501_v8 = vld [vmem:[#allocation2 + $0xec] sm:$0xf0]  ;;  %v9186_v12 = vor.u32 %v12701_v0, %v9185_v63  ;;  %v5308_v18 = vpop.f32.mrf.mxu2 }
 0x2cc   :  { %5565 = vmatmul.bf16.vlgmr.msra.gmra.mxu2 %v13752_v29  ;;  %v8897_v14 = vld [vmem:[#allocation2 + $0x4d0] sm:$0xf]  ;;  %v8386_v20 = vor.u32 %v12501_v8, %v8385_v6 }
 0x2cd   :  { %5609 = vmatpush.bf16.msrb.mxu2 %v9026_v13  ;;  %5584 = vmatpush.bf16.msrb.mxu0 %v8482_v45  ;;  %v12565_v13 = vld [vmem:[#allocation2 + $0x2ec] sm:$0xf0]  ;;  %v5334_v40 = vpop.f32.mrf.mxu0 }
 0x2ce   :  { %v12629_v15 = vld [vmem:[#allocation2 + $0x4ec] sm:$0xf0]  ;;  %11442 = vmatmul.msk.bf16.vlgmr.msra.gmra.mxu3 %vm4903_vm0, %v13758_v22  ;;  %v8642_v28 = vor.u32 %v12565_v13, %v8641_v9 }
 0x2cf   :  { %5622 = vmatpush.bf16.msrb.mxu3 %v9282_v17  ;;  %5597 = vmatpush.bf16.msrb.mxu1 %v8738_v31  ;;  %v9153_v17 = vld [vmem:[#allocation2 + $0x6d0] sm:$0xf]  ;;  %v8898_v45 = vor.u32 %v12629_v15, %v8897_v14 }
 0x2d0   :  { %v12693_v10 = vld [vmem:[#allocation2 + $0x6ec] sm:$0xf0] }
 0x2d1   :  { %5610 = vmatpush.bf16.msrb.mxu2 %v8994_v34  ;;  %5585 = vmatpush.bf16.msrb.mxu0 %v8450_v49  ;;  %v8353_v31 = vld [vmem:[#allocation2 + $0x90] sm:$0xf]  ;;  %v9154_v36 = vor.u32 %v12693_v10, %v9153_v17 }
 0x2d2   :  { %v12493_v34 = vld [vmem:[#allocation2 + $0xac] sm:$0xf0] }
 0x2d3   :  { %5623 = vmatpush.bf16.msrb.mxu3 %v9250_v39  ;;  %5598 = vmatpush.bf16.msrb.mxu1 %v8706_v52  ;;  %v8609_v35 = vld [vmem:[#allocation2 + $0x290] sm:$0xf]  ;;  %v8354_v48 = vor.u32 %v12493_v34, %v8353_v31 }
 0x2d4   :  { %v12557_v37 = vld [vmem:[#allocation2 + $0x2ac] sm:$0xf0] }
 0x2d5   :  { %5611 = vmatpush.bf16.msrb.mxu2 %v8962_v53  ;;  %5586 = vmatpush.bf16.msrb.mxu0 %v8418_v62  ;;  %v8865_v39 = vld [vmem:[#allocation2 + $0x490] sm:$0xf]  ;;  %v8610_v49 = vor.u32 %v12557_v37, %v8609_v35 }
 0x2d6   :  { %v12621_v4 = vld [vmem:[#allocation2 + $0x4ac] sm:$0xf0] }
 0x2d7   :  { %5624 = vmatpush.bf16.msrb.mxu3 %v9218_v57  ;;  %5599 = vmatpush.bf16.msrb.mxu1 %v8674_v21  ;;  %v9121_v43 = vld [vmem:[#allocation2 + $0x690] sm:$0xf]  ;;  %v8866_v50 = vor.u32 %v12621_v4, %v8865_v39 }
 0x2d8   :  { %v12685_v46 = vld [vmem:[#allocation2 + $0x6ac] sm:$0xf0] }
 0x2d9   :  { %5612 = vmatpush.bf16.msrb.mxu2 %v8930_v5  ;;  %5587 = vmatpush.bf16.msrb.mxu0 %v8386_v20  ;;  %v8321_v51 = vld [vmem:[#allocation2 + $0x50] sm:$0xf]  ;;  %v9122_v54 = vor.u32 %v12685_v46, %v9121_v43 }
 0x2da   :  { %v12485_v52 = vld [vmem:[#allocation2 + $0x6c] sm:$0xf0] }
 0x2db   :  { %5625 = vmatpush.bf16.msrb.mxu3 %v9186_v12  ;;  %5600 = vmatpush.bf16.msrb.mxu1 %v8642_v28  ;;  %v8577_v53 = vld [vmem:[#allocation2 + $0x250] sm:$0xf]  ;;  %v8322_v11 = vor.u32 %v12485_v52, %v8321_v51 }
 0x2dc   :  { %v12549_v55 = vld [vmem:[#allocation2 + $0x26c] sm:$0xf0] }
 0x2dd   :  { %5613 = vmatpush.bf16.msrb.mxu2 %v8898_v45  ;;  %v8833_v56 = vld [vmem:[#allocation2 + $0x450] sm:$0xf]  ;;  %5588 = vmatpush.bf16.msrb.mxu0 %v8354_v48  ;;  %v8578_v63 = vor.u32 %v12549_v55, %v8577_v53 }
 0x2de   :  { %v12613_v57 = vld [vmem:[#allocation2 + $0x46c] sm:$0xf0] }
 0x2df   :  { %5626 = vmatpush.bf16.msrb.mxu3 %v9154_v36  ;;  %v9089_v58 = vld [vmem:[#allocation2 + $0x650] sm:$0xf]  ;;  %5601 = vmatpush.bf16.msrb.mxu1 %v8610_v49  ;;  %v8834_v0 = vor.u32 %v12613_v57, %v8833_v56 }
 0x2e0   :  { %v12677_v59 = vld [vmem:[#allocation2 + $0x66c] sm:$0xf0] }
 0x2e1   :  { %v8289_v60 = vld [vmem:[#allocation2 + $0x10] sm:$0xf]  ;;  %5614 = vmatpush.bf16.msrb.mxu2 %v8866_v50  ;;  %v9090_v21 = vor.u32 %v12677_v59, %v9089_v58  ;;  %5589 = vmatpush.bf16.msrb.mxu0 %v8322_v11  ;;  %v5358_v59 = vpop.f32.mrf.mxu2 }
 0x2e2   :  { %v12477_v61 = vld [vmem:[#allocation2 + $0x2c] sm:$0xf0] }
 0x2e3   :  { %v8545_v1 = vld [vmem:[#allocation2 + $0x210] sm:$0xf]  ;;  %5627 = vmatpush.bf16.msrb.mxu3 %v9122_v54  ;;  %v8290_v14 = vor.u32 %v12477_v61, %v8289_v60  ;;  %5602 = vmatpush.bf16.msrb.mxu1 %v8578_v63  ;;  %v5359_v61 = vadd.f32 %v5358_v59, %v13825_v16 }
 0x2e4   :  { %v12541_v62 = vld [vmem:[#allocation2 + $0x22c] sm:$0xf0] }
 0x2e5   :  { %v8801_v2 = vld [vmem:[#allocation2 + $0x410] sm:$0xf]  ;;  %5615 = vmatpush.bf16.msrb.mxu2 %v8834_v0  ;;  %v8546_v18 = vor.u32 %v12541_v62, %v8545_v1  ;;  %5590 = vmatpush.bf16.msrb.mxu0 %v8290_v14  ;;  %v5371_v0 = vpop.f32.mrf.mxu3  ;;  %v5384_v14 = vpop.f32.mrf.mxu0 }
 0x2e6   :  { %v12605_v5 = vld [vmem:[#allocation2 + $0x42c] sm:$0xf0] }
 0x2e7   :  { %v9057_v6 = vld [vmem:[#allocation2 + $0x610] sm:$0xf]  ;;  %v8802_v20 = vor.u32 %v12605_v5, %v8801_v2  ;;  %5628 = vmatpush.bf16.msrb.mxu3 %v9090_v21  ;;  %5603 = vmatpush.bf16.msrb.mxu1 %v8546_v18 }
 0x2e8   :  { %v12669_v8 = vld [vmem:[#allocation2 + $0x62c] sm:$0xf0]  ;;  %5591 = vmatmul.bf16.vlgmr.msrb.gmra.mxu0 %v13718_v27 }
 0x2e9   :  { %v9537_v9 = vld [vmem:[#allocation2 + $0x9d0] sm:$0xf]  ;;  %v9058_v45 = vor.u32 %v12669_v8, %v9057_v6  ;;  %5616 = vmatpush.bf16.msrb.mxu2 %v8802_v20  ;;  %v5372_v8 = vadd.f32 %v5371_v0, %v5359_v61 }
 0x2ea   :  { %v12789_v12 = vld [vmem:[#allocation2 + $0x9ec] sm:$0xf0]  ;;  %5604 = vmatmul.bf16.vlgmr.msrb.gmra.mxu1 %v13722_v33 }
 0x2eb   :  { %v9793_v13 = vld [vmem:[#allocation2 + $0xbd0] sm:$0xf]  ;;  %v9538_v31 = vor.u32 %v12789_v12, %v9537_v9  ;;  %5629 = vmatpush.bf16.msrb.mxu3 %v9058_v45 }
 0x2ec   :  { %v12853_v15 = vld [vmem:[#allocation2 + $0xbec] sm:$0xf0]  ;;  %5617 = vmatmul.bf16.vlgmr.msrb.gmra.mxu2 %v13716_v26 }
 0x2ed   :  { %v10049_v17 = vld [vmem:[#allocation2 + $0xdd0] sm:$0xf]  ;;  %v9794_v34 = vor.u32 %v12853_v15, %v9793_v13  ;;  %5635 = vmatpush.bf16.msra.mxu0 %v9538_v31  ;;  %v5386_v59 = vpop.f32.mrf.mxu0 }
 0x2ee   :  { %v12917_v10 = vld [vmem:[#allocation2 + $0xdec] sm:$0xf0]  ;;  %5630 = vmatmul.bf16.vlgmr.msrb.gmra.mxu3 %v13720_v32 }
 0x2ef   :  { %v10305_v25 = vld [vmem:[#allocation2 + $0xfd0] sm:$0xf]  ;;  %v10050_v35 = vor.u32 %v12917_v10, %v10049_v17  ;;  %5648 = vmatpush.bf16.msra.mxu1 %v9794_v34  ;;  %v5397_v17 = vpop.f32.mrf.mxu1  ;;  %v5385_v10 = vadd.f32 %v5384_v14, %v5372_v8 }
 0x2f0   :  { %v12981_v28 = vld [vmem:[#allocation2 + $0xfec] sm:$0xf0] }
 0x2f1   :  { %v9505_v36 = vld [vmem:[#allocation2 + $0x990] sm:$0xf]  ;;  %v10306_v4 = vor.u32 %v12981_v28, %v10305_v25  ;;  %5661 = vmatpush.bf16.msra.mxu2 %v10050_v35  ;;  %v5398_v35 = vadd.f32 %v5397_v17, %v5385_v10 }
 0x2f2   :  { %v12781_v37 = vld [vmem:[#allocation2 + $0x9ac] sm:$0xf0] }
 0x2f3   :  { %v9761_v39 = vld [vmem:[#allocation2 + $0xb90] sm:$0xf]  ;;  %v9506_v49 = vor.u32 %v12781_v37, %v9505_v36  ;;  %5674 = vmatpush.bf16.msra.mxu3 %v10306_v4  ;;  %v5360_v4 = vpop.f32.mrf.mxu2 }
 0x2f4   :  { %v12845_v40 = vld [vmem:[#allocation2 + $0xbac] sm:$0xf0] }
 0x2f5   :  { %v10017_v43 = vld [vmem:[#allocation2 + $0xd90] sm:$0xf]  ;;  %v9762_v50 = vor.u32 %v12845_v40, %v9761_v39  ;;  %5636 = vmatpush.bf16.msra.mxu0 %v9506_v49 }
 0x2f6   :  { %v12909_v46 = vld [vmem:[#allocation2 + $0xdac] sm:$0xf0] }
 0x2f7   :  { %v10273_v47 = vld [vmem:[#allocation2 + $0xf90] sm:$0xf]  ;;  %v10018_v51 = vor.u32 %v12909_v46, %v10017_v43  ;;  %5649 = vmatpush.bf16.msra.mxu1 %v9762_v50 }
 0x2f8   :  { %v12973_v48 = vld [vmem:[#allocation2 + $0xfac] sm:$0xf0] }
 0x2f9   :  { %v9473_v52 = vld [vmem:[#allocation2 + $0x950] sm:$0xf]  ;;  %v10274_v55 = vor.u32 %v12973_v48, %v10273_v47  ;;  %5662 = vmatpush.bf16.msra.mxu2 %v10018_v51  ;;  %v5373_v47 = vpop.f32.mrf.mxu3 }
 0x2fa   :  { %v12773_v53 = vld [vmem:[#allocation2 + $0x96c] sm:$0xf0] }
 0x2fb   :  { %v9729_v54 = vld [vmem:[#allocation2 + $0xb50] sm:$0xf]  ;;  %v9474_v63 = vor.u32 %v12773_v53, %v9473_v52  ;;  %5675 = vmatpush.bf16.msra.mxu3 %v10274_v55 }
 0x2fc   :  { %v12837_v56 = vld [vmem:[#allocation2 + $0xb6c] sm:$0xf0] }
 0x2fd   :  { %v9985_v57 = vld [vmem:[#allocation2 + $0xd50] sm:$0xf]  ;;  %v9730_v1 = vor.u32 %v12837_v56, %v9729_v54  ;;  %5637 = vmatpush.bf16.msra.mxu0 %v9474_v63 }
 0x2fe   :  { %v12901_v58 = vld [vmem:[#allocation2 + $0xd6c] sm:$0xf0] }
 0x2ff   :  { %v10241_v11 = vld [vmem:[#allocation2 + $0xf50] sm:$0xf]  ;;  %v9986_v62 = vor.u32 %v12901_v58, %v9985_v57  ;;  %5650 = vmatpush.bf16.msra.mxu1 %v9730_v1 }
 0x300   :  { %v12965_v60 = vld [vmem:[#allocation2 + $0xf6c] sm:$0xf0] }
 0x301   :  { %v9441_v2 = vld [vmem:[#allocation2 + $0x910] sm:$0xf]  ;;  %v10242_v6 = vor.u32 %v12965_v60, %v10241_v11  ;;  %5663 = vmatpush.bf16.msra.mxu2 %v9986_v62  ;;  %v5399_v11 = vpop.f32.mrf.mxu1 }
 0x302   :  { %v12765_v21 = vld [vmem:[#allocation2 + $0x92c] sm:$0xf0] }
 0x303   :  { %v9697_v5 = vld [vmem:[#allocation2 + $0xb10] sm:$0xf]  ;;  %v9442_v18 = vor.u32 %v12765_v21, %v9441_v2  ;;  %5676 = vmatpush.bf16.msra.mxu3 %v10242_v6 }
 0x304   :  { %v12829_v9 = vld [vmem:[#allocation2 + $0xb2c] sm:$0xf0] }
 0x305   :  { %v9953_v12 = vld [vmem:[#allocation2 + $0xd10] sm:$0xf]  ;;  %v9698_v20 = vor.u32 %v12829_v9, %v9697_v5  ;;  %5638 = vmatpush.bf16.msra.mxu0 %v9442_v18 }
 0x306   :  { %v12893_v13 = vld [vmem:[#allocation2 + $0xd2c] sm:$0xf0] }
 0x307   :  { %v10209_v15 = vld [vmem:[#allocation2 + $0xf10] sm:$0xf]  ;;  %v9954_v25 = vor.u32 %v12893_v13, %v9953_v12  ;;  %5651 = vmatpush.bf16.msra.mxu1 %v9698_v20 }
 0x308   :  { %v12957_v16 = vld [vmem:[#allocation2 + $0xf2c] sm:$0xf0] }
 0x309   :  { %v9409_v28 = vld [vmem:[#allocation2 + $0x8d0] sm:$0xf]  ;;  %v10210_v34 = vor.u32 %v12957_v16, %v10209_v15  ;;  %5664 = vmatpush.bf16.msra.mxu2 %v9954_v25  ;;  %v5410_v15 = vpop.f32.mrf.mxu2 }
 0x30a   :  { %v12757_v45 = vld [vmem:[#allocation2 + $0x8ec] sm:$0xf0]  ;;  %v13834_v25 = vadd.f32 %v5410_v15, %v5398_v35 }
 0x30b   :  { %v9665_v31 = vld [vmem:[#allocation2 + $0xad0] sm:$0xf]  ;;  %v9410_v46 = vor.u32 %v12757_v45, %v9409_v28  ;;  %5677 = vmatpush.bf16.msra.mxu3 %v10210_v34 }
 0x30c   :  { %v12821_v36 = vld [vmem:[#allocation2 + $0xaec] sm:$0xf0] }
 0x30d   :  { %v9921_v37 = vld [vmem:[#allocation2 + $0xcd0] sm:$0xf]  ;;  %v9666_v48 = vor.u32 %v12821_v36, %v9665_v31  ;;  %5639 = vmatpush.bf16.msra.mxu0 %v9410_v46 }
 0x30e   :  { %v12885_v39 = vld [vmem:[#allocation2 + $0xcec] sm:$0xf0] }
 0x30f   :  { %v10177_v40 = vld [vmem:[#allocation2 + $0xed0] sm:$0xf]  ;;  %v9922_v49 = vor.u32 %v12885_v39, %v9921_v37  ;;  %5652 = vmatpush.bf16.msra.mxu1 %v9666_v48 }
 0x310   :  { %v12949_v43 = vld [vmem:[#allocation2 + $0xeec] sm:$0xf0] }
 0x311   :  { %v9377_v50 = vld [vmem:[#allocation2 + $0x890] sm:$0xf]  ;;  %v10178_v53 = vor.u32 %v12949_v43, %v10177_v40  ;;  %5665 = vmatpush.bf16.msra.mxu2 %v9922_v49 }
 0x312   :  { %v12749_v51 = vld [vmem:[#allocation2 + $0x8ac] sm:$0xf0] }
 0x313   :  { %v9633_v52 = vld [vmem:[#allocation2 + $0xa90] sm:$0xf]  ;;  %v9378_v60 = vor.u32 %v12749_v51, %v9377_v50  ;;  %5678 = vmatpush.bf16.msra.mxu3 %v10178_v53 }
 0x314   :  { %v12813_v54 = vld [vmem:[#allocation2 + $0xaac] sm:$0xf0] }
 0x315   :  { %v9889_v55 = vld [vmem:[#allocation2 + $0xc90] sm:$0xf]  ;;  %v9634_v61 = vor.u32 %v12813_v54, %v9633_v52  ;;  %5640 = vmatpush.bf16.msra.mxu0 %v9378_v60 }
 0x316   :  { %v12877_v56 = vld [vmem:[#allocation2 + $0xcac] sm:$0xf0] }
 0x317   :  { %v10145_v57 = vld [vmem:[#allocation2 + $0xe90] sm:$0xf]  ;;  %v9890_v63 = vor.u32 %v12877_v56, %v9889_v55  ;;  %5653 = vmatpush.bf16.msra.mxu1 %v9634_v61 }
 0x318   :  { %v12941_v58 = vld [vmem:[#allocation2 + $0xeac] sm:$0xf0] }
 0x319   :  { %v9345_v0 = vld [vmem:[#allocation2 + $0x850] sm:$0xf]  ;;  %v10146_v2 = vor.u32 %v12941_v58, %v10145_v57  ;;  %5666 = vmatpush.bf16.msra.mxu2 %v9890_v63  ;;  %v5412_v63 = vpop.f32.mrf.mxu2 }
 0x31a   :  { %v12741_v1 = vld [vmem:[#allocation2 + $0x86c] sm:$0xf0] }
 0x31b   :  { %v9601_v62 = vld [vmem:[#allocation2 + $0xa50] sm:$0xf]  ;;  %v9346_v12 = vor.u32 %v12741_v1, %v9345_v0  ;;  %5679 = vmatpush.bf16.msra.mxu3 %v10146_v2 }
 0x31c   :  { %v12805_v21 = vld [vmem:[#allocation2 + $0xa6c] sm:$0xf0] }
 0x31d   :  { %v9857_v5 = vld [vmem:[#allocation2 + $0xc50] sm:$0xf]  ;;  %v9602_v16 = vor.u32 %v12805_v21, %v9601_v62  ;;  %5641 = vmatpush.bf16.msra.mxu0 %v9346_v12 }
 0x31e   :  { %v12869_v6 = vld [vmem:[#allocation2 + $0xc6c] sm:$0xf0] }
 0x31f   :  { %v10113_v8 = vld [vmem:[#allocation2 + $0xe50] sm:$0xf]  ;;  %v9858_v17 = vor.u32 %v12869_v6, %v9857_v5  ;;  %5654 = vmatpush.bf16.msra.mxu1 %v9602_v16  ;;  %v930_v6 = vperm.slane %v13812_v7, 3 }
 0x320   :  { %v12933_v9 = vld [vmem:[#allocation2 + $0xe6c] sm:$0xf0] }
 0x321   :  { %v9313_v13 = vld [vmem:[#allocation2 + $0x810] sm:$0xf]  ;;  %v10114_v28 = vor.u32 %v12933_v9, %v10113_v8  ;;  %5667 = vmatpush.bf16.msra.mxu2 %v9858_v17  ;;  %v5423_v17 = vpop.f32.mrf.mxu3 }
 0x322   :  { %v12733_v14 = vld [vmem:[#allocation2 + $0x82c] sm:$0xf0] }
 0x323   :  { %v9569_v10 = vld [vmem:[#allocation2 + $0xa10] sm:$0xf]  ;;  %v9314_v4 = vor.u32 %v12733_v14, %v9313_v13  ;;  %5680 = vmatpush.bf16.msra.mxu3 %v10114_v28 }
 0x324   :  { %v12797_v18 = vld [vmem:[#allocation2 + $0xa2c] sm:$0xf0] }
 0x325   :  { %v9825_v20 = vld [vmem:[#allocation2 + $0xc10] sm:$0xf]  ;;  %v9570_v47 = vor.u32 %v12797_v18, %v9569_v10  ;;  %5642 = vmatpush.bf16.msra.mxu0 %v9314_v4 }
 0x326   :  { %v12861_v45 = vld [vmem:[#allocation2 + $0xc2c] sm:$0xf0] }
 0x327   :  { %v10081_v31 = vld [vmem:[#allocation2 + $0xe10] sm:$0xf]  ;;  %v9826_v48 = vor.u32 %v12861_v45, %v9825_v20  ;;  %5655 = vmatpush.bf16.msra.mxu1 %v9570_v47  ;;  %v5424_v45 = vadd.f32 %v5423_v17, %v930_v6  ;;  %v5449_v47 = vpop.f32.mrf.mxu1 }
 0x328   :  { %v12925_v34 = vld [vmem:[#allocation2 + $0xe2c] sm:$0xf0]  ;;  %5643 = vmatmul.bf16.vlgmr.msra.gmra.mxu0 %v13736_v41 }
 0x329   :  { %v10561_v36 = vld [vmem:[#allocation2 + $0x11d0] sm:$0xf]  ;;  %v10082_v35 = vor.u32 %v12925_v34, %v10081_v31  ;;  %5668 = vmatpush.bf16.msra.mxu2 %v9826_v48 }
 0x32a   :  { %v13045_v37 = vld [vmem:[#allocation2 + $0x11ec] sm:$0xf0]  ;;  %5656 = vmatmul.bf16.vlgmr.msra.gmra.mxu1 %v13740_v44 }
 0x32b   :  { %v10817_v39 = vld [vmem:[#allocation2 + $0x13d0] sm:$0xf]  ;;  %v10562_v51 = vor.u32 %v13045_v37, %v10561_v36  ;;  %5681 = vmatpush.bf16.msra.mxu3 %v10082_v35 }
 0x32c   :  { %v13109_v40 = vld [vmem:[#allocation2 + $0x13ec] sm:$0xf0]  ;;  %5669 = vmatmul.bf16.vlgmr.msra.gmra.mxu2 %v13734_v38 }
 0x32d   :  { %v11073_v43 = vld [vmem:[#allocation2 + $0x15d0] sm:$0xf]  ;;  %v10818_v52 = vor.u32 %v13109_v40, %v10817_v39  ;;  %5687 = vmatpush.bf16.msrb.mxu0 %v10562_v51  ;;  %v5436_v40 = vpop.f32.mrf.mxu0 }
 0x32e   :  { %v13173_v46 = vld [vmem:[#allocation2 + $0x15ec] sm:$0xf0]  ;;  %5682 = vmatmul.bf16.vlgmr.msra.gmra.mxu3 %v13738_v42 }
 0x32f   :  { %v11329_v49 = vld [vmem:[#allocation2 + $0x17d0] sm:$0xf]  ;;  %v11074_v53 = vor.u32 %v13173_v46, %v11073_v43  ;;  %5700 = vmatpush.bf16.msrb.mxu1 %v10818_v52  ;;  %v5437_v46 = vadd.f32 %v5436_v40, %v5424_v45 }
 0x330   :  { %v13237_v50 = vld [vmem:[#allocation2 + $0x17ec] sm:$0xf0] }
 0x331   :  { %v10529_v54 = vld [vmem:[#allocation2 + $0x1190] sm:$0xf]  ;;  %v11330_v57 = vor.u32 %v13237_v50, %v11329_v49  ;;  %5713 = vmatpush.bf16.msrb.mxu2 %v11074_v53 }
 0x332   :  { %v13037_v55 = vld [vmem:[#allocation2 + $0x11ac] sm:$0xf0] }
 0x333   :  { %v10785_v56 = vld [vmem:[#allocation2 + $0x1390] sm:$0xf]  ;;  %v10530_v0 = vor.u32 %v13037_v55, %v10529_v54  ;;  %5726 = vmatpush.bf16.msrb.mxu3 %v11330_v57 }
 0x334   :  { %v13101_v58 = vld [vmem:[#allocation2 + $0x13ac] sm:$0xf0] }
 0x335   :  { %v11041_v59 = vld [vmem:[#allocation2 + $0x1590] sm:$0xf]  ;;  %v10786_v62 = vor.u32 %v13101_v58, %v10785_v56  ;;  %5688 = vmatpush.bf16.msrb.mxu0 %v10530_v0  ;;  %v5450_v56 = vadd.f32 %v5449_v47, %v5437_v46 }
 0x336   :  { %v13165_v11 = vld [vmem:[#allocation2 + $0x15ac] sm:$0xf0] }
 0x337   :  { %v11297_v60 = vld [vmem:[#allocation2 + $0x1790] sm:$0xf]  ;;  %v11042_v2 = vor.u32 %v13165_v11, %v11041_v59  ;;  %5701 = vmatpush.bf16.msrb.mxu1 %v10786_v62  ;;  %v5425_v11 = vpop.f32.mrf.mxu3  ;;  %v5462_v62 = vpop.f32.mrf.mxu2 }
 0x338   :  { %v13229_v61 = vld [vmem:[#allocation2 + $0x17ac] sm:$0xf0] }
 0x339   :  { %v10497_v1 = vld [vmem:[#allocation2 + $0x1150] sm:$0xf]  ;;  %v11298_v8 = vor.u32 %v13229_v61, %v11297_v60  ;;  %5714 = vmatpush.bf16.msrb.mxu2 %v11042_v2 }
 0x33a   :  { %v13029_v21 = vld [vmem:[#allocation2 + $0x116c] sm:$0xf0] }
 0x33b   :  { %v10753_v5 = vld [vmem:[#allocation2 + $0x1350] sm:$0xf]  ;;  %v10498_v16 = vor.u32 %v13029_v21, %v10497_v1  ;;  %5727 = vmatpush.bf16.msrb.mxu3 %v11298_v8  ;;  %v13841_v8 = vadd.f32 %v5462_v62, %v5450_v56 }
 0x33c   :  { %v13093_v9 = vld [vmem:[#allocation2 + $0x136c] sm:$0xf0] }
 0x33d   :  { %v11009_v12 = vld [vmem:[#allocation2 + $0x1550] sm:$0xf]  ;;  %v10754_v7 = vor.u32 %v13093_v9, %v10753_v5  ;;  %5689 = vmatpush.bf16.msrb.mxu0 %v10498_v16 }
 0x33e   :  { %v13157_v13 = vld [vmem:[#allocation2 + $0x156c] sm:$0xf0] }
 0x33f   :  { %v11265_v14 = vld [vmem:[#allocation2 + $0x1750] sm:$0xf]  ;;  %v11010_v10 = vor.u32 %v13157_v13, %v11009_v12  ;;  %5702 = vmatpush.bf16.msrb.mxu1 %v10754_v7  ;;  %v5438_v13 = vpop.f32.mrf.mxu0 }
 0x340   :  { %v13221_v15 = vld [vmem:[#allocation2 + $0x176c] sm:$0xf0]  ;;  %v12585_v13 = vld [vmem:[#allocation2 + $0x394] sm:$0xf] }
 0x341   :  { %v10465_v18 = vld [vmem:[#allocation2 + $0x1110] sm:$0xf]  ;;  %v11266_v31 = vor.u32 %v13221_v15, %v11265_v14  ;;  %5715 = vmatpush.bf16.msrb.mxu2 %v11010_v10  ;;  %v5451_v15 = vpop.f32.mrf.mxu1 }
 0x342   :  { %v13021_v20 = vld [vmem:[#allocation2 + $0x112c] sm:$0xf0]  ;;  %v12649_v15 = vld [vmem:[#allocation2 + $0x594] sm:$0xf] }
 0x343   :  { %v10721_v28 = vld [vmem:[#allocation2 + $0x1310] sm:$0xf]  ;;  %v10466_v43 = vor.u32 %v13021_v20, %v10465_v18  ;;  %5728 = vmatpush.bf16.msrb.mxu3 %v11266_v31 }
 0x344   :  { %v13085_v34 = vld [vmem:[#allocation2 + $0x132c] sm:$0xf0] }
 0x345   :  { %v10977_v36 = vld [vmem:[#allocation2 + $0x1510] sm:$0xf]  ;;  %v10722_v48 = vor.u32 %v13085_v34, %v10721_v28  ;;  %5690 = vmatpush.bf16.msrb.mxu0 %v10466_v43 }
 0x346   :  { %v13149_v37 = vld [vmem:[#allocation2 + $0x152c] sm:$0xf0] }
 0x347   :  { %v11233_v39 = vld [vmem:[#allocation2 + $0x1710] sm:$0xf]  ;;  %v10978_v49 = vor.u32 %v13149_v37, %v10977_v36  ;;  %5703 = vmatpush.bf16.msrb.mxu1 %v10722_v48 }
 0x348   :  { %v13213_v4 = vld [vmem:[#allocation2 + $0x172c] sm:$0xf0] }
 0x349   :  { %v10433_v50 = vld [vmem:[#allocation2 + $0x10d0] sm:$0xf]  ;;  %v11234_v52 = vor.u32 %v13213_v4, %v11233_v39  ;;  %5716 = vmatpush.bf16.msrb.mxu2 %v10978_v49  ;;  %v5464_v49 = vpop.f32.mrf.mxu2 }
 0x34a   :  { %v13013_v35 = vld [vmem:[#allocation2 + $0x10ec] sm:$0xf0]  ;;  %v12505_v49 = vld [vmem:[#allocation2 + $0x114] sm:$0xf] }
 0x34b   :  { %v10689_v51 = vld [vmem:[#allocation2 + $0x12d0] sm:$0xf]  ;;  %v10434_v59 = vor.u32 %v13013_v35, %v10433_v50  ;;  %5729 = vmatpush.bf16.msrb.mxu3 %v11234_v52 }
 0x34c   :  { %v13077_v53 = vld [vmem:[#allocation2 + $0x12ec] sm:$0xf0] }
 0x34d   :  { %v10945_v54 = vld [vmem:[#allocation2 + $0x14d0] sm:$0xf]  ;;  %v10690_v60 = vor.u32 %v13077_v53, %v10689_v51  ;;  %5691 = vmatpush.bf16.msrb.mxu0 %v10434_v59  ;;  %v8771_v59 = vld [vmem:[#allocation2 + $0x3f0] sm:$0xf0] }
 0x34e   :  { %v13141_v55 = vld [vmem:[#allocation2 + $0x14ec] sm:$0xf0] }
 0x34f   :  { %v11201_v57 = vld [vmem:[#allocation2 + $0x16d0] sm:$0xf]  ;;  %v10946_v61 = vor.u32 %v13141_v55, %v10945_v54  ;;  %5704 = vmatpush.bf16.msrb.mxu1 %v10690_v60  ;;  %v12529_v55 = vld [vmem:[#allocation2 + $0x1d4] sm:$0xf] }
 0x350   :  { %v13205_v58 = vld [vmem:[#allocation2 + $0x16ec] sm:$0xf0] }
 0x351   :  { %v10401_v63 = vld [vmem:[#allocation2 + $0x1090] sm:$0xf]  ;;  %v11202_v2 = vor.u32 %v13205_v58, %v11201_v57  ;;  %5717 = vmatpush.bf16.msrb.mxu2 %v10946_v61  ;;  %v8515_v57 = vld [vmem:[#allocation2 + $0x1f0] sm:$0xf0] }
 0x352   :  { %v13005_v0 = vld [vmem:[#allocation2 + $0x10ac] sm:$0xf0]  ;;  %v12593_v58 = vld [vmem:[#allocation2 + $0x3d4] sm:$0xf]  ;;  %v8518_v62 = vor.u32 %v12529_v55, %v8515_v57 }
 0x353   :  { %v10657_v1 = vld [vmem:[#allocation2 + $0x1290] sm:$0xf]  ;;  %v10402_v14 = vor.u32 %v13005_v0, %v10401_v63  ;;  %5730 = vmatpush.bf16.msrb.mxu3 %v11202_v2  ;;  %v12657_v61 = vld [vmem:[#allocation2 + $0x5d4] sm:$0xf]  ;;  %v8774_v2 = vor.u32 %v12593_v58, %v8771_v59  ;;  %v5488_v59 = vpop.f32.mrf.mxu0 }
 0x354   :  { %v13069_v21 = vld [vmem:[#allocation2 + $0x12ac] sm:$0xf0]  ;;  %v9027_v63 = vld [vmem:[#allocation2 + $0x5f0] sm:$0xf0] }
 0x355   :  { %v10913_v5 = vld [vmem:[#allocation2 + $0x1490] sm:$0xf]  ;;  %v10658_v16 = vor.u32 %v13069_v21, %v10657_v1  ;;  %5692 = vmatpush.bf16.msrb.mxu0 %v10402_v14  ;;  %v8739_v14 = vld [vmem:[#allocation2 + $0x3b0] sm:$0xf0] }
 0x356   :  { %v13133_v6 = vld [vmem:[#allocation2 + $0x14ac] sm:$0xf0]  ;;  %v12633_v55 = vld [vmem:[#allocation2 + $0x514] sm:$0xf] }
 0x357   :  { %v11169_v9 = vld [vmem:[#allocation2 + $0x1690] sm:$0xf]  ;;  %v10914_v17 = vor.u32 %v13133_v6, %v10913_v5  ;;  %5705 = vmatpush.bf16.msrb.mxu1 %v10658_v16  ;;  %v12521_v6 = vld [vmem:[#allocation2 + $0x194] sm:$0xf] }
 0x358   :  { %v13197_v12 = vld [vmem:[#allocation2 + $0x16ac] sm:$0xf0]  ;;  %v8995_v16 = vld [vmem:[#allocation2 + $0x5b0] sm:$0xf0] }
 0x359   :  { %v10369_v7 = vld [vmem:[#allocation2 + $0x1050] sm:$0xf]  ;;  %v11170_v20 = vor.u32 %v13197_v12, %v11169_v9  ;;  %5718 = vmatpush.bf16.msrb.mxu2 %v10914_v17  ;;  %v9030_v9 = vor.u32 %v12657_v61, %v9027_v63  ;;  %v8483_v12 = vld [vmem:[#allocation2 + $0x1b0] sm:$0xf0] }
 0x35a   :  { %v12997_v10 = vld [vmem:[#allocation2 + $0x106c] sm:$0xf0]  ;;  %v12713_v57 = vld [vmem:[#allocation2 + $0x794] sm:$0xf] }
 0x35b   :  { %v10625_v18 = vld [vmem:[#allocation2 + $0x1250] sm:$0xf]  ;;  %v10370_v37 = vor.u32 %v12997_v10, %v10369_v7  ;;  %5731 = vmatpush.bf16.msrb.mxu3 %v11170_v20  ;;  %v8486_v10 = vor.u32 %v12521_v6, %v8483_v12  ;;  %v9251_v58 = vld [vmem:[#allocation2 + $0x7b0] sm:$0xf0] }
 0x35c   :  { %v13061_v28 = vld [vmem:[#allocation2 + $0x126c] sm:$0xf0]  ;;  %v12705_v12 = vld [vmem:[#allocation2 + $0x754] sm:$0xf] }
 0x35d   :  { %v10881_v45 = vld [vmem:[#allocation2 + $0x1450] sm:$0xf]  ;;  %v10626_v40 = vor.u32 %v13061_v28, %v10625_v18  ;;  %5693 = vmatpush.bf16.msrb.mxu0 %v10370_v37  ;;  %v8742_v18 = vor.u32 %v12585_v13, %v8739_v14  ;;  %v12513_v28 = vld [vmem:[#allocation2 + $0x154] sm:$0xf] }
 0x35e   :  { %v13125_v31 = vld [vmem:[#allocation2 + $0x146c] sm:$0xf0]  ;;  %v12641_v37 = vld [vmem:[#allocation2 + $0x554] sm:$0xf] }
 0x35f   :  { %v11137_v34 = vld [vmem:[#allocation2 + $0x1650] sm:$0xf]  ;;  %v10882_v43 = vor.u32 %v13125_v31, %v10881_v45  ;;  %5706 = vmatpush.bf16.msrb.mxu1 %v10626_v40  ;;  %v8451_v45 = vld [vmem:[#allocation2 + $0x170] sm:$0xf0]  ;;  %v8998_v31 = vor.u32 %v12649_v15, %v8995_v16 }
 0x360   :  { %v13189_v36 = vld [vmem:[#allocation2 + $0x166c] sm:$0xf0]  ;;  %v9283_v40 = vld [vmem:[#allocation2 + $0x7f0] sm:$0xf0] }
 0x361   :  { %v10337_v39 = vld [vmem:[#allocation2 + $0x1010] sm:$0xf]  ;;  %v11138_v50 = vor.u32 %v13189_v36, %v11137_v34  ;;  %5719 = vmatpush.bf16.msrb.mxu2 %v10882_v43  ;;  %v12577_v34 = vld [vmem:[#allocation2 + $0x354] sm:$0xf] }
 0x362   :  { %v12989_v4 = vld [vmem:[#allocation2 + $0x102c] sm:$0xf0]  ;;  %v8707_v36 = vld [vmem:[#allocation2 + $0x370] sm:$0xf0] }
 0x363   :  { %v10593_v46 = vld [vmem:[#allocation2 + $0x1210] sm:$0xf]  ;;  %v10338_v56 = vor.u32 %v12989_v4, %v10337_v39  ;;  %5732 = vmatpush.bf16.msrb.mxu3 %v11138_v50  ;;  %v8963_v39 = vld [vmem:[#allocation2 + $0x570] sm:$0xf0] }
 0x364   :  { %v13053_v47 = vld [vmem:[#allocation2 + $0x122c] sm:$0xf0]  ;;  %v12721_v4 = vld [vmem:[#allocation2 + $0x7d4] sm:$0xf] }
 0x365   :  { %v10849_v48 = vld [vmem:[#allocation2 + $0x1410] sm:$0xf]  ;;  %v10594_v11 = vor.u32 %v13053_v47, %v10593_v46  ;;  %5694 = vmatpush.bf16.msrb.mxu0 %v10338_v56  ;;  %v5475_v46 = vpop.f32.mrf.mxu3  ;;  %v8454_v47 = vor.u32 %v12513_v28, %v8451_v45  ;;  %v8419_v50 = vld [vmem:[#allocation2 + $0x130] sm:$0xf0] }
 0x366   :  { %v13117_v35 = vld [vmem:[#allocation2 + $0x142c] sm:$0xf0]  ;;  %v8931_v56 = vld [vmem:[#allocation2 + $0x530] sm:$0xf0]  ;;  %v8422_v61 = vor.u32 %v12505_v49, %v8419_v50 }
 0x367   :  { %v11105_v51 = vld [vmem:[#allocation2 + $0x1610] sm:$0xf]  ;;  %v10850_v60 = vor.u32 %v13117_v35, %v10849_v48  ;;  %5707 = vmatpush.bf16.msrb.mxu1 %v10594_v11  ;;  %v8710_v48 = vor.u32 %v12577_v34, %v8707_v36  ;;  %v5476_v35 = vadd.f32 %v5475_v46, %v13841_v8  ;;  %v8934_v8 = vor.u32 %v12633_v55, %v8931_v56  ;;  %v9219_v13 = vld [vmem:[#allocation2 + $0x770] sm:$0xf0] }
 0x368   :  { %v13181_v52 = vld [vmem:[#allocation2 + $0x162c] sm:$0xf0]  ;;  %5695 = vmatmul.bf16.vlgmr.msrb.gmra.mxu0 %v13746_v19  ;;  %v12553_v45 = vld [vmem:[#allocation2 + $0x294] sm:$0xf] }
 0x369   :  { %v11425_v53 = vld [vmem:[#allocation2 + $0x1890] sm:$0xf]  ;;  %v11106_v0 = vor.u32 %v13181_v52, %v11105_v51  ;;  %5720 = vmatpush.bf16.msrb.mxu2 %v10850_v60  ;;  %v8966_v51 = vor.u32 %v12641_v37, %v8963_v39  ;;  %v9286_v52 = vor.u32 %v12721_v4, %v9283_v40  ;;  %v5489_v11 = vadd.f32 %v5488_v59, %v5476_v35  ;;  %v5501_v60 = vpop.f32.mrf.mxu1  ;;  %v12617_v34 = vld [vmem:[#allocation2 + $0x494] sm:$0xf]  ;;  %v5490_v4 = vpop.f32.mrf.mxu0 }
 0x36a   :  { %v13261_v54 = vld [vmem:[#allocation2 + $0x18ac] sm:$0xf0]  ;;  %5708 = vmatmul.bf16.vlgmr.msrb.gmra.mxu1 %v13750_v24  ;;  %v8867_v36 = vld [vmem:[#allocation2 + $0x4b0] sm:$0xf0] }
 0x36b   :  { %v11426_v1 = vor.u32 %v13261_v54, %v11425_v53  ;;  %v11393_v21 = vld [vmem:[#allocation2 + $0x1850] sm:$0xf]  ;;  %5733 = vmatpush.bf16.msrb.mxu3 %v11106_v0  ;;  %5752 = vmatpush.bf16.msra.mxu1 %v8518_v62  ;;  %v12569_v53 = vld [vmem:[#allocation2 + $0x314] sm:$0xf]  ;;  %v9254_v62 = vor.u32 %v12713_v57, %v9251_v58  ;;  %v5502_v6 = vadd.f32 %v5501_v60, %v5489_v11 }
 0x36c   :  { %v13253_v5 = vld [vmem:[#allocation2 + $0x186c] sm:$0xf0]  ;;  %5721 = vmatmul.bf16.vlgmr.msrb.gmra.mxu2 %v13748_v23  ;;  %v8675_v54 = vld [vmem:[#allocation2 + $0x330] sm:$0xf0]  ;;  %v8870_v49 = vor.u32 %v12617_v34, %v8867_v36 }
 0x36d   :  { %5744 = vmatpush.bf16.msra.mxu0 %v11426_v1  ;;  %v11394_v17 = vor.u32 %v13253_v5, %v11393_v21  ;;  %v11361_v7 = vld [vmem:[#allocation2 + $0x1810] sm:$0xf]  ;;  %5765 = vmatpush.bf16.msra.mxu2 %v8774_v2  ;;  %v8678_v63 = vor.u32 %v12569_v53, %v8675_v54  ;;  %v12497_v0 = vld [vmem:[#allocation2 + $0xd4] sm:$0xf]  ;;  %v5477_v14 = vpop.f32.mrf.mxu3 }
 0x36e   :  { %v13245_v20 = vld [vmem:[#allocation2 + $0x182c] sm:$0xf0]  ;;  %5734 = vmatmul.bf16.vlgmr.msrb.gmra.mxu3 %v13752_v29  ;;  %v8387_v1 = vld [vmem:[#allocation2 + $0xf0] sm:$0xf0] }
 0x36f   :  { %5778 = vmatpush.bf16.msra.mxu3 %v9030_v9  ;;  %v11362_v43 = vor.u32 %v13245_v20, %v11361_v7  ;;  %5753 = vmatpush.bf16.msra.mxu1 %v8486_v10  ;;  %v12561_v2 = vld [vmem:[#allocation2 + $0x2d4] sm:$0xf]  ;;  %v8390_v15 = vor.u32 %v12497_v0, %v8387_v1  ;;  %v9222_v20 = vor.u32 %v12705_v12, %v9219_v13 }
 0x370   :  { %v8643_v21 = vld [vmem:[#allocation2 + $0x2f0] sm:$0xf0] }
 0x371   :  { %5745 = vmatpush.bf16.msra.mxu0 %v11394_v17  ;;  %5766 = vmatpush.bf16.msra.mxu2 %v8742_v18  ;;  %v12625_v5 = vld [vmem:[#allocation2 + $0x4d4] sm:$0xf]  ;;  %v8646_v16 = vor.u32 %v12561_v2, %v8643_v21  ;;  %v5514_v17 = vpop.f32.mrf.mxu2  ;;  %v5503_v40 = vpop.f32.mrf.mxu1 }
 0x372   :  { %v8899_v9 = vld [vmem:[#allocation2 + $0x4f0] sm:$0xf0]  ;;  %v13848_v28 = vadd.f32 %v5514_v17, %v5502_v6 }
 0x373   :  { %5779 = vmatpush.bf16.msra.mxu3 %v8998_v31  ;;  %5754 = vmatpush.bf16.msra.mxu1 %v8454_v47  ;;  %v12489_v7 = vld [vmem:[#allocation2 + $0x94] sm:$0xf]  ;;  %v8902_v18 = vor.u32 %v12625_v5, %v8899_v9 }
 0x374   :  { %v8355_v10 = vld [vmem:[#allocation2 + $0xb0] sm:$0xf0] }
 0x375   :  { %5746 = vmatpush.bf16.msra.mxu0 %v11362_v43  ;;  %5767 = vmatpush.bf16.msra.mxu2 %v8710_v48  ;;  %v8611_v31 = vld [vmem:[#allocation2 + $0x2b0] sm:$0xf0]  ;;  %v8358_v43 = vor.u32 %v12489_v7, %v8355_v10 }
 0x376   :  { %v12697_v37 = vld [vmem:[#allocation2 + $0x714] sm:$0xf]  ;;  %v8614_v46 = vor.u32 %v12553_v45, %v8611_v31 }
 0x377   :  { %5780 = vmatpush.bf16.msra.mxu3 %v8966_v51  ;;  %5755 = vmatpush.bf16.msra.mxu1 %v8422_v61  ;;  %v9187_v39 = vld [vmem:[#allocation2 + $0x730] sm:$0xf0] }
 0x378   :  { %v12481_v47 = vld [vmem:[#allocation2 + $0x54] sm:$0xf]  ;;  %v9190_v50 = vor.u32 %v12697_v37, %v9187_v39  ;;  %11443 = vmatmul.msk.bf16.vlgmr.msra.gmra.mxu0 %vm4903_vm0, %v13758_v22 }
 0x379   :  { %5791 = vmatpush.bf16.msrb.mxu0 %v9286_v52  ;;  %5768 = vmatpush.bf16.msra.mxu2 %v8678_v63  ;;  %v8323_v48 = vld [vmem:[#allocation2 + $0x70] sm:$0xf0]  ;;  %v5516_v60 = vpop.f32.mrf.mxu2 }
 0x37a   :  { %v12545_v35 = vld [vmem:[#allocation2 + $0x254] sm:$0xf]  ;;  %v8326_v56 = vor.u32 %v12481_v47, %v8323_v48 }
 0x37b   :  { %5781 = vmatpush.bf16.msra.mxu3 %v8934_v8  ;;  %5756 = vmatpush.bf16.msra.mxu1 %v8390_v15  ;;  %v8579_v51 = vld [vmem:[#allocation2 + $0x270] sm:$0xf0] }
 0x37c   :  { %v12609_v52 = vld [vmem:[#allocation2 + $0x454] sm:$0xf]  ;;  %v8582_v57 = vor.u32 %v12545_v35, %v8579_v51 }
 0x37d   :  { %5792 = vmatpush.bf16.msrb.mxu0 %v9254_v62  ;;  %5769 = vmatpush.bf16.msra.mxu2 %v8646_v16  ;;  %v8835_v53 = vld [vmem:[#allocation2 + $0x470] sm:$0xf0] }
 0x37e   :  { %v12689_v54 = vld [vmem:[#allocation2 + $0x6d4] sm:$0xf]  ;;  %v8838_v61 = vor.u32 %v12609_v52, %v8835_v53 }
 0x37f   :  { %5782 = vmatpush.bf16.msra.mxu3 %v8902_v18  ;;  %v9155_v55 = vld [vmem:[#allocation2 + $0x6f0] sm:$0xf0]  ;;  %5757 = vmatpush.bf16.msra.mxu1 %v8358_v43 }
 0x380   :  { %v12473_v58 = vld [vmem:[#allocation2 + $0x14] sm:$0xf]  ;;  %v9158_v63 = vor.u32 %v12689_v54, %v9155_v55 }
 0x381   :  { %5793 = vmatpush.bf16.msrb.mxu0 %v9222_v20  ;;  %5770 = vmatpush.bf16.msra.mxu2 %v8614_v46  ;;  %v8291_v59 = vld [vmem:[#allocation2 + $0x30] sm:$0xf0] }
 0x382   :  { %v12537_v11 = vld [vmem:[#allocation2 + $0x214] sm:$0xf]  ;;  %v8294_v12 = vor.u32 %v12473_v58, %v8291_v59 }
 0x383   :  { %5783 = vmatpush.bf16.msra.mxu3 %v8870_v49  ;;  %v8547_v0 = vld [vmem:[#allocation2 + $0x230] sm:$0xf0]  ;;  %5758 = vmatpush.bf16.msra.mxu1 %v8326_v56 }
 0x384   :  { %v12601_v1 = vld [vmem:[#allocation2 + $0x414] sm:$0xf]  ;;  %v8550_v13 = vor.u32 %v12537_v11, %v8547_v0 }
 0x385   :  { %5794 = vmatpush.bf16.msrb.mxu0 %v9190_v50  ;;  %v8803_v8 = vld [vmem:[#allocation2 + $0x430] sm:$0xf0]  ;;  %5771 = vmatpush.bf16.msra.mxu2 %v8582_v57  ;;  %v5527_v57 = vpop.f32.mrf.mxu3 }
 0x386   :  { %v12681_v62 = vld [vmem:[#allocation2 + $0x694] sm:$0xf]  ;;  %v8806_v16 = vor.u32 %v12601_v1, %v8803_v8  ;;  %v5528_v59 = vadd.f32 %v5527_v57, %v13848_v28 }
 0x387   :  { %v9123_v2 = vld [vmem:[#allocation2 + $0x6b0] sm:$0xf0]  ;;  %5784 = vmatpush.bf16.msra.mxu3 %v8838_v61  ;;  %5759 = vmatpush.bf16.msra.mxu1 %v8294_v12 }
 0x388   :  { %v12785_v21 = vld [vmem:[#allocation2 + $0x9d4] sm:$0xf]  ;;  %v9126_v17 = vor.u32 %v12681_v62, %v9123_v2 }
 0x389   :  { %v9539_v5 = vld [vmem:[#allocation2 + $0x9f0] sm:$0xf0]  ;;  %5795 = vmatpush.bf16.msrb.mxu0 %v9158_v63  ;;  %5772 = vmatpush.bf16.msra.mxu2 %v8550_v13  ;;  %v5553_v13 = vpop.f32.mrf.mxu1 }
 0x38a   :  { %v12849_v6 = vld [vmem:[#allocation2 + $0xbd4] sm:$0xf]  ;;  %v9542_v7 = vor.u32 %v12785_v21, %v9539_v5  ;;  %5760 = vmatmul.bf16.vlgmr.msra.gmra.mxu1 %v13718_v27  ;;  %v5540_v21 = vpop.f32.mrf.mxu0 }
 0x38b   :  { %v9795_v9 = vld [vmem:[#allocation2 + $0xbf0] sm:$0xf0]  ;;  %5785 = vmatpush.bf16.msra.mxu3 %v8806_v16  ;;  %v5541_v12 = vadd.f32 %v5540_v21, %v5528_v59 }
 0x38c   :  { %v12913_v14 = vld [vmem:[#allocation2 + $0xdd4] sm:$0xf]  ;;  %v9798_v10 = vor.u32 %v12849_v6, %v9795_v9  ;;  %5804 = vmatpush.bf16.msrb.mxu1 %v9542_v7  ;;  %5773 = vmatmul.bf16.vlgmr.msra.gmra.mxu2 %v13722_v33 }
 0x38d   :  { %v10051_v15 = vld [vmem:[#allocation2 + $0xdf0] sm:$0xf0]  ;;  %5796 = vmatpush.bf16.msrb.mxu0 %v9126_v17  ;;  %v5554_v7 = vadd.f32 %v5553_v13, %v5541_v12 }
 0x38e   :  { %v12673_v18 = vld [vmem:[#allocation2 + $0x654] sm:$0xf]  ;;  %v10054_v31 = vor.u32 %v12913_v14, %v10051_v15  ;;  %5817 = vmatpush.bf16.msrb.mxu2 %v9798_v10  ;;  %5786 = vmatmul.bf16.vlgmr.msra.gmra.mxu3 %v13716_v26 }
 0x38f   :  { %v9091_v20 = vld [vmem:[#allocation2 + $0x670] sm:$0xf0] }
 0x390   :  { %v12777_v45 = vld [vmem:[#allocation2 + $0x994] sm:$0xf]  ;;  %v9094_v40 = vor.u32 %v12673_v18, %v9091_v20  ;;  %5830 = vmatpush.bf16.msrb.mxu3 %v10054_v31 }
 0x391   :  { %v9507_v34 = vld [vmem:[#allocation2 + $0x9b0] sm:$0xf0] }
 0x392   :  { %v12841_v36 = vld [vmem:[#allocation2 + $0xb94] sm:$0xf]  ;;  %v9510_v46 = vor.u32 %v12777_v45, %v9507_v34  ;;  %5797 = vmatpush.bf16.msrb.mxu0 %v9094_v40 }
 0x393   :  { %v9763_v37 = vld [vmem:[#allocation2 + $0xbb0] sm:$0xf0] }
 0x394   :  { %v12905_v39 = vld [vmem:[#allocation2 + $0xd94] sm:$0xf]  ;;  %v9766_v47 = vor.u32 %v12841_v36, %v9763_v37  ;;  %5805 = vmatpush.bf16.msrb.mxu1 %v9510_v46  ;;  %v5529_v37 = vpop.f32.mrf.mxu3 }
 0x395   :  { %v10019_v4 = vld [vmem:[#allocation2 + $0xdb0] sm:$0xf0] }
 0x396   :  { %v12665_v43 = vld [vmem:[#allocation2 + $0x614] sm:$0xf]  ;;  %v10022_v35 = vor.u32 %v12905_v39, %v10019_v4  ;;  %5818 = vmatpush.bf16.msrb.mxu2 %v9766_v47  ;;  %v5566_v47 = vpop.f32.mrf.mxu2 }
 0x397   :  { %v9059_v48 = vld [vmem:[#allocation2 + $0x630] sm:$0xf0] }
 0x398   :  { %v12769_v49 = vld [vmem:[#allocation2 + $0x954] sm:$0xf]  ;;  %v9062_v58 = vor.u32 %v12665_v43, %v9059_v48  ;;  %5831 = vmatpush.bf16.msrb.mxu3 %v10022_v35 }
 0x399   :  { %v9475_v50 = vld [vmem:[#allocation2 + $0x970] sm:$0xf0] }
 0x39a   :  { %v12833_v51 = vld [vmem:[#allocation2 + $0xb54] sm:$0xf]  ;;  %v9478_v11 = vor.u32 %v12769_v49, %v9475_v50  ;;  %5798 = vmatpush.bf16.msrb.mxu0 %v9062_v58 }
 0x39b   :  { %v9731_v52 = vld [vmem:[#allocation2 + $0xb70] sm:$0xf0] }
 0x39c   :  { %v12897_v53 = vld [vmem:[#allocation2 + $0xd54] sm:$0xf]  ;;  %v9734_v60 = vor.u32 %v12833_v51, %v9731_v52  ;;  %5806 = vmatpush.bf16.msrb.mxu1 %v9478_v11  ;;  %v5567_v51 = vadd.f32 %v5566_v47, %v5554_v7  ;;  %v5579_v13 = vpop.f32.mrf.mxu3 }
 0x39d   :  { %v9987_v54 = vld [vmem:[#allocation2 + $0xd70] sm:$0xf0]  ;;  %5799 = vmatmul.bf16.vlgmr.msrb.gmra.mxu0 %v13720_v32 }
 0x39e   :  { %v12977_v55 = vld [vmem:[#allocation2 + $0xfd4] sm:$0xf]  ;;  %v9990_v0 = vor.u32 %v12897_v53, %v9987_v54  ;;  %5819 = vmatpush.bf16.msrb.mxu2 %v9734_v60  ;;  %v5568_v7 = vpop.f32.mrf.mxu2 }
 0x39f   :  { %v10307_v56 = vld [vmem:[#allocation2 + $0xff0] sm:$0xf0] }
 0x3a0   :  { %v12761_v61 = vld [vmem:[#allocation2 + $0x914] sm:$0xf]  ;;  %v10310_v1 = vor.u32 %v12977_v55, %v10307_v56  ;;  %5832 = vmatpush.bf16.msrb.mxu3 %v9990_v0  ;;  %v5542_v55 = vpop.f32.mrf.mxu0  ;;  %v5555_v56 = vpop.f32.mrf.mxu1 }
 0x3a1   :  { %v9443_v63 = vld [vmem:[#allocation2 + $0x930] sm:$0xf0] }
 0x3a2   :  { %v12825_v8 = vld [vmem:[#allocation2 + $0xb14] sm:$0xf]  ;;  %v9446_v28 = vor.u32 %v12761_v61, %v9443_v63  ;;  %5843 = vmatpush.bf16.msra.mxu0 %v10310_v1 }
 0x3a3   :  { %v9699_v62 = vld [vmem:[#allocation2 + $0xb30] sm:$0xf0] }
 0x3a4   :  { %v12889_v2 = vld [vmem:[#allocation2 + $0xd14] sm:$0xf]  ;;  %v9702_v14 = vor.u32 %v12825_v8, %v9699_v62  ;;  %5807 = vmatpush.bf16.msrb.mxu1 %v9446_v28 }
 0x3a5   :  { %v9955_v5 = vld [vmem:[#allocation2 + $0xd30] sm:$0xf0] }
 0x3a6   :  { %v12969_v6 = vld [vmem:[#allocation2 + $0xf94] sm:$0xf]  ;;  %v9958_v17 = vor.u32 %v12889_v2, %v9955_v5  ;;  %5820 = vmatpush.bf16.msrb.mxu2 %v9702_v14 }
 0x3a7   :  { %v10275_v9 = vld [vmem:[#allocation2 + $0xfb0] sm:$0xf0] }
 0x3a8   :  { %v12753_v15 = vld [vmem:[#allocation2 + $0x8d4] sm:$0xf]  ;;  %v10278_v10 = vor.u32 %v12969_v6, %v10275_v9  ;;  %5833 = vmatpush.bf16.msrb.mxu3 %v9958_v17 }
 0x3a9   :  { %v9411_v16 = vld [vmem:[#allocation2 + $0x8f0] sm:$0xf0] }
 0x3aa   :  { %v12817_v18 = vld [vmem:[#allocation2 + $0xad4] sm:$0xf]  ;;  %v9414_v39 = vor.u32 %v12753_v15, %v9411_v16  ;;  %5844 = vmatpush.bf16.msra.mxu0 %v10278_v10  ;;  %v13857_v10 = vadd.f32 %v5579_v13, %v5567_v51 }
 0x3ab   :  { %v9667_v20 = vld [vmem:[#allocation2 + $0xaf0] sm:$0xf0] }
 0x3ac   :  { %v12881_v45 = vld [vmem:[#allocation2 + $0xcd4] sm:$0xf]  ;;  %v9670_v4 = vor.u32 %v12817_v18, %v9667_v20  ;;  %5808 = vmatpush.bf16.msrb.mxu1 %v9414_v39 }
 0x3ad   :  { %v9923_v31 = vld [vmem:[#allocation2 + $0xcf0] sm:$0xf0] }
 0x3ae   :  { %v12961_v34 = vld [vmem:[#allocation2 + $0xf54] sm:$0xf]  ;;  %v9926_v46 = vor.u32 %v12881_v45, %v9923_v31  ;;  %5821 = vmatpush.bf16.msrb.mxu2 %v9670_v4 }
 0x3af   :  { %v10243_v36 = vld [vmem:[#allocation2 + $0xf70] sm:$0xf0] }
 0x3b0   :  { %v12745_v40 = vld [vmem:[#allocation2 + $0x894] sm:$0xf]  ;;  %v10246_v48 = vor.u32 %v12961_v34, %v10243_v36  ;;  %5834 = vmatpush.bf16.msrb.mxu3 %v9926_v46 }
 0x3b1   :  { %v9379_v43 = vld [vmem:[#allocation2 + $0x8b0] sm:$0xf0] }
 0x3b2   :  { %v12809_v49 = vld [vmem:[#allocation2 + $0xa94] sm:$0xf]  ;;  %v9382_v57 = vor.u32 %v12745_v40, %v9379_v43  ;;  %5845 = vmatpush.bf16.msra.mxu0 %v10246_v48 }
 0x3b3   :  { %v9635_v50 = vld [vmem:[#allocation2 + $0xab0] sm:$0xf0] }
 0x3b4   :  { %v12873_v35 = vld [vmem:[#allocation2 + $0xc94] sm:$0xf]  ;;  %v9638_v58 = vor.u32 %v12809_v49, %v9635_v50  ;;  %5809 = vmatpush.bf16.msrb.mxu1 %v9382_v57 }
 0x3b5   :  { %v9891_v52 = vld [vmem:[#allocation2 + $0xcb0] sm:$0xf0] }
 0x3b6   :  { %v12953_v53 = vld [vmem:[#allocation2 + $0xf14] sm:$0xf]  ;;  %v9894_v60 = vor.u32 %v12873_v35, %v9891_v52  ;;  %5822 = vmatpush.bf16.msrb.mxu2 %v9638_v58 }
 0x3b7   :  { %v10211_v54 = vld [vmem:[#allocation2 + $0xf30] sm:$0xf0] }
 0x3b8   :  { %v12737_v59 = vld [vmem:[#allocation2 + $0x854] sm:$0xf]  ;;  %v10214_v61 = vor.u32 %v12953_v53, %v10211_v54  ;;  %5835 = vmatpush.bf16.msrb.mxu3 %v9894_v60 }
 0x3b9   :  { %v9347_v11 = vld [vmem:[#allocation2 + $0x870] sm:$0xf0] }
 0x3ba   :  { %v12801_v63 = vld [vmem:[#allocation2 + $0xa54] sm:$0xf]  ;;  %v9350_v21 = vor.u32 %v12737_v59, %v9347_v11  ;;  %5846 = vmatpush.bf16.msra.mxu0 %v10214_v61  ;;  %v5581_v59 = vpop.f32.mrf.mxu3 }
 0x3bb   :  { %v9603_v0 = vld [vmem:[#allocation2 + $0xa70] sm:$0xf0] }
 0x3bc   :  { %v12865_v1 = vld [vmem:[#allocation2 + $0xc54] sm:$0xf]  ;;  %v9606_v5 = vor.u32 %v12801_v63, %v9603_v0  ;;  %5810 = vmatpush.bf16.msrb.mxu1 %v9350_v21 }
 0x3bd   :  { %v9859_v8 = vld [vmem:[#allocation2 + $0xc70] sm:$0xf0] }
 0x3be   :  { %v12945_v62 = vld [vmem:[#allocation2 + $0xed4] sm:$0xf]  ;;  %v9862_v28 = vor.u32 %v12865_v1, %v9859_v8  ;;  %5823 = vmatpush.bf16.msrb.mxu2 %v9606_v5 }
 0x3bf   :  { %v10179_v2 = vld [vmem:[#allocation2 + $0xef0] sm:$0xf0] }
 0x3c0   :  { %v12729_v6 = vld [vmem:[#allocation2 + $0x814] sm:$0xf]  ;;  %v10182_v14 = vor.u32 %v12945_v62, %v10179_v2  ;;  %5836 = vmatpush.bf16.msrb.mxu3 %v9862_v28 }
 0x3c1   :  { %v9315_v9 = vld [vmem:[#allocation2 + $0x830] sm:$0xf0] }
 0x3c2   :  { %v12793_v12 = vld [vmem:[#allocation2 + $0xa14] sm:$0xf]  ;;  %v9318_v37 = vor.u32 %v12729_v6, %v9315_v9  ;;  %5847 = vmatpush.bf16.msra.mxu0 %v10182_v14 }
 0x3c3   :  { %v9571_v15 = vld [vmem:[#allocation2 + $0xa30] sm:$0xf0] }
 0x3c4   :  { %v12857_v16 = vld [vmem:[#allocation2 + $0xc14] sm:$0xf]  ;;  %v9574_v39 = vor.u32 %v12793_v12, %v9571_v15  ;;  %5811 = vmatpush.bf16.msrb.mxu1 %v9318_v37  ;;  %v13862_v15 = vld [vmem:[#allocation5] sm:$0xff]  ;;  %v5592_v37 = vpop.f32.mrf.mxu0 }
 0x3c5   :  { %v9827_v17 = vld [vmem:[#allocation2 + $0xc30] sm:$0xf0] }
 0x3c6   :  { %v12937_v18 = vld [vmem:[#allocation2 + $0xe94] sm:$0xf]  ;;  %v9830_v43 = vor.u32 %v12857_v16, %v9827_v17  ;;  %5824 = vmatpush.bf16.msrb.mxu2 %v9574_v39  ;;  %v931_v16 = vperm.slane %v13862_v15, 4 }
 0x3c7   :  { %v10147_v20 = vld [vmem:[#allocation2 + $0xeb0] sm:$0xf0]  ;;  %5812 = vmatmul.bf16.vlgmr.msrb.gmra.mxu1 %v13736_v41 }
 0x3c8   :  { %v13041_v45 = vld [vmem:[#allocation2 + $0x11d4] sm:$0xf]  ;;  %v10150_v46 = vor.u32 %v12937_v18, %v10147_v20  ;;  %5837 = vmatpush.bf16.msrb.mxu3 %v9830_v43 }
 0x3c9   :  { %v10563_v31 = vld [vmem:[#allocation2 + $0x11f0] sm:$0xf0]  ;;  %5825 = vmatmul.bf16.vlgmr.msrb.gmra.mxu2 %v13740_v44 }
 0x3ca   :  { %v13105_v34 = vld [vmem:[#allocation2 + $0x13d4] sm:$0xf]  ;;  %v10566_v47 = vor.u32 %v13041_v45, %v10563_v31  ;;  %5848 = vmatpush.bf16.msra.mxu0 %v10150_v46  ;;  %v5593_v46 = vadd.f32 %v5592_v37, %v931_v16 }
 0x3cb   :  { %v10819_v36 = vld [vmem:[#allocation2 + $0x13f0] sm:$0xf0]  ;;  %5838 = vmatmul.bf16.vlgmr.msrb.gmra.mxu3 %v13734_v38 }
 0x3cc   :  { %v13169_v4 = vld [vmem:[#allocation2 + $0x15d4] sm:$0xf]  ;;  %v10822_v48 = vor.u32 %v13105_v34, %v10819_v36  ;;  %5856 = vmatpush.bf16.msra.mxu1 %v10566_v47  ;;  %v5605_v47 = vpop.f32.mrf.mxu1 }
 0x3cd   :  { %v11075_v40 = vld [vmem:[#allocation2 + $0x15f0] sm:$0xf0] }
 0x3ce   :  { %v12929_v49 = vld [vmem:[#allocation2 + $0xe54] sm:$0xf]  ;;  %v11078_v51 = vor.u32 %v13169_v4, %v11075_v40  ;;  %5869 = vmatpush.bf16.msra.mxu2 %v10822_v48 }
 0x3cf   :  { %v10115_v50 = vld [vmem:[#allocation2 + $0xe70] sm:$0xf0] }
 0x3d0   :  { %v13033_v35 = vld [vmem:[#allocation2 + $0x1194] sm:$0xf]  ;;  %v10118_v57 = vor.u32 %v12929_v49, %v10115_v50  ;;  %5882 = vmatpush.bf16.msra.mxu3 %v11078_v51 }
 0x3d1   :  { %v10531_v52 = vld [vmem:[#allocation2 + $0x11b0] sm:$0xf0] }
 0x3d2   :  { %v13097_v53 = vld [vmem:[#allocation2 + $0x1394] sm:$0xf]  ;;  %v10534_v11 = vor.u32 %v13033_v35, %v10531_v52  ;;  %5849 = vmatpush.bf16.msra.mxu0 %v10118_v57 }
 0x3d3   :  { %v10787_v54 = vld [vmem:[#allocation2 + $0x13b0] sm:$0xf0] }
 0x3d4   :  { %v13161_v55 = vld [vmem:[#allocation2 + $0x1594] sm:$0xf]  ;;  %v10790_v60 = vor.u32 %v13097_v53, %v10787_v54  ;;  %5857 = vmatpush.bf16.msra.mxu1 %v10534_v11  ;;  %v5618_v11 = vpop.f32.mrf.mxu2  ;;  %v5607_v16 = vpop.f32.mrf.mxu1 }
 0x3d5   :  { %v11043_v56 = vld [vmem:[#allocation2 + $0x15b0] sm:$0xf0] }
 0x3d6   :  { %v12921_v58 = vld [vmem:[#allocation2 + $0xe14] sm:$0xf]  ;;  %v11046_v1 = vor.u32 %v13161_v55, %v11043_v56  ;;  %5870 = vmatpush.bf16.msra.mxu2 %v10790_v60  ;;  %v5606_v55 = vadd.f32 %v5605_v47, %v5593_v46 }
 0x3d7   :  { %v10083_v61 = vld [vmem:[#allocation2 + $0xe30] sm:$0xf0] }
 0x3d8   :  { %v13025_v63 = vld [vmem:[#allocation2 + $0x1154] sm:$0xf]  ;;  %v10086_v9 = vor.u32 %v12921_v58, %v10083_v61  ;;  %5883 = vmatpush.bf16.msra.mxu3 %v11046_v1 }
 0x3d9   :  { %v10499_v0 = vld [vmem:[#allocation2 + $0x1170] sm:$0xf0] }
 0x3da   :  { %v13089_v8 = vld [vmem:[#allocation2 + $0x1354] sm:$0xf]  ;;  %v10502_v12 = vor.u32 %v13025_v63, %v10499_v0  ;;  %5850 = vmatpush.bf16.msra.mxu0 %v10086_v9  ;;  %v5594_v9 = vpop.f32.mrf.mxu0 }
 0x3db   :  { %v10755_v62 = vld [vmem:[#allocation2 + $0x1370] sm:$0xf0]  ;;  %v8489_v9 = vld [vmem:[#allocation2 + $0x198] sm:$0xf] }
 0x3dc   :  { %v13153_v2 = vld [vmem:[#allocation2 + $0x1554] sm:$0xf]  ;;  %v10758_v13 = vor.u32 %v13089_v8, %v10755_v62  ;;  %5858 = vmatpush.bf16.msra.mxu1 %v10502_v12  ;;  %v5619_v8 = vadd.f32 %v5618_v11, %v5606_v55  ;;  %v5631_v62 = vpop.f32.mrf.mxu3  ;;  %v5620_v46 = vpop.f32.mrf.mxu2  ;;  %v8777_v11 = vld [vmem:[#allocation2 + $0x3d8] sm:$0xf] }
 0x3dd   :  { %v11011_v21 = vld [vmem:[#allocation2 + $0x1570] sm:$0xf0]  ;;  %5851 = vmatmul.bf16.vlgmr.msra.gmra.mxu0 %v13738_v42  ;;  %v9289_v46 = vld [vmem:[#allocation2 + $0x7d8] sm:$0xf] }
 0x3de   :  { %v13233_v5 = vld [vmem:[#allocation2 + $0x17d4] sm:$0xf]  ;;  %v11014_v17 = vor.u32 %v13153_v2, %v11011_v21  ;;  %5871 = vmatpush.bf16.msra.mxu2 %v10758_v13 }
 0x3df   :  { %v11331_v6 = vld [vmem:[#allocation2 + $0x17f0] sm:$0xf0] }
 0x3e0   :  { %v13017_v28 = vld [vmem:[#allocation2 + $0x1114] sm:$0xf]  ;;  %v11334_v7 = vor.u32 %v13233_v5, %v11331_v6  ;;  %5884 = vmatpush.bf16.msra.mxu3 %v11014_v17  ;;  %v13866_v6 = vadd.f32 %v5631_v62, %v5619_v8 }
 0x3e1   :  { %v10467_v14 = vld [vmem:[#allocation2 + $0x1130] sm:$0xf0] }
 0x3e2   :  { %v13081_v18 = vld [vmem:[#allocation2 + $0x1314] sm:$0xf]  ;;  %v10470_v39 = vor.u32 %v13017_v28, %v10467_v14  ;;  %5895 = vmatpush.bf16.msrb.mxu0 %v11334_v7 }
 0x3e3   :  { %v10723_v20 = vld [vmem:[#allocation2 + $0x1330] sm:$0xf0] }
 0x3e4   :  { %v13145_v45 = vld [vmem:[#allocation2 + $0x1514] sm:$0xf]  ;;  %v10726_v4 = vor.u32 %v13081_v18, %v10723_v20  ;;  %5859 = vmatpush.bf16.msra.mxu1 %v10470_v39 }
 0x3e5   :  { %v10979_v31 = vld [vmem:[#allocation2 + $0x1530] sm:$0xf0] }
 0x3e6   :  { %v13225_v34 = vld [vmem:[#allocation2 + $0x1794] sm:$0xf]  ;;  %v10982_v48 = vor.u32 %v13145_v45, %v10979_v31  ;;  %5872 = vmatpush.bf16.msra.mxu2 %v10726_v4 }
 0x3e7   :  { %v11299_v36 = vld [vmem:[#allocation2 + $0x17b0] sm:$0xf0] }
 0x3e8   :  { %v13009_v40 = vld [vmem:[#allocation2 + $0x10d4] sm:$0xf]  ;;  %v11302_v49 = vor.u32 %v13225_v34, %v11299_v36  ;;  %5885 = vmatpush.bf16.msra.mxu3 %v10982_v48 }
 0x3e9   :  { %v10435_v43 = vld [vmem:[#allocation2 + $0x10f0] sm:$0xf0] }
 0x3ea   :  { %v13073_v50 = vld [vmem:[#allocation2 + $0x12d4] sm:$0xf]  ;;  %v10438_v56 = vor.u32 %v13009_v40, %v10435_v43  ;;  %5896 = vmatpush.bf16.msrb.mxu0 %v11302_v49 }
 0x3eb   :  { %v10691_v35 = vld [vmem:[#allocation2 + $0x12f0] sm:$0xf0] }
 0x3ec   :  { %v13137_v51 = vld [vmem:[#allocation2 + $0x14d4] sm:$0xf]  ;;  %v10694_v57 = vor.u32 %v13073_v50, %v10691_v35  ;;  %5860 = vmatpush.bf16.msra.mxu1 %v10438_v56  ;;  %v8521_v56 = vld [vmem:[#allocation2 + $0x1d8] sm:$0xf] }
 0x3ed   :  { %v10947_v52 = vld [vmem:[#allocation2 + $0x14f0] sm:$0xf0] }
 0x3ee   :  { %v13217_v53 = vld [vmem:[#allocation2 + $0x1754] sm:$0xf]  ;;  %v10950_v60 = vor.u32 %v13137_v51, %v10947_v52  ;;  %5873 = vmatpush.bf16.msra.mxu2 %v10694_v57  ;;  %v5633_v51 = vpop.f32.mrf.mxu3  ;;  %v12534_v57 = vld [vmem:[#allocation2 + $0x1f4] sm:$0xf0] }
 0x3ef   :  { %v11267_v54 = vld [vmem:[#allocation2 + $0x1770] sm:$0xf0]  ;;  %v8425_v51 = vld [vmem:[#allocation2 + $0x118] sm:$0xf] }
 0x3f0   :  { %v13001_v58 = vld [vmem:[#allocation2 + $0x1094] sm:$0xf]  ;;  %v11270_v61 = vor.u32 %v13217_v53, %v11267_v54  ;;  %5886 = vmatpush.bf16.msra.mxu3 %v10950_v60  ;;  %v12598_v60 = vld [vmem:[#allocation2 + $0x3f4] sm:$0xf0] }
 0x3f1   :  { %v10403_v59 = vld [vmem:[#allocation2 + $0x10b0] sm:$0xf0] }
 0x3f2   :  { %v13065_v63 = vld [vmem:[#allocation2 + $0x1294] sm:$0xf]  ;;  %v10406_v12 = vor.u32 %v13001_v58, %v10403_v59  ;;  %5897 = vmatpush.bf16.msrb.mxu0 %v11270_v61 }
 0x3f3   :  { %v10659_v0 = vld [vmem:[#allocation2 + $0x12b0] sm:$0xf0] }
 0x3f4   :  { %v13129_v1 = vld [vmem:[#allocation2 + $0x1494] sm:$0xf]  ;;  %v10662_v13 = vor.u32 %v13065_v63, %v10659_v0  ;;  %5861 = vmatpush.bf16.msra.mxu1 %v10406_v12  ;;  %v12526_v12 = vld [vmem:[#allocation2 + $0x1b4] sm:$0xf0] }
 0x3f5   :  { %v10915_v2 = vld [vmem:[#allocation2 + $0x14b0] sm:$0xf0] }
 0x3f6   :  { %v13209_v21 = vld [vmem:[#allocation2 + $0x1714] sm:$0xf]  ;;  %v10918_v17 = vor.u32 %v13129_v1, %v10915_v2  ;;  %5874 = vmatpush.bf16.msra.mxu2 %v10662_v13  ;;  %v8522_v1 = vor.u32 %v12534_v57, %v8521_v56  ;;  %v8745_v13 = vld [vmem:[#allocation2 + $0x398] sm:$0xf] }
 0x3f7   :  { %v11235_v5 = vld [vmem:[#allocation2 + $0x1730] sm:$0xf0]  ;;  %v9001_v56 = vld [vmem:[#allocation2 + $0x598] sm:$0xf] }
 0x3f8   :  { %v12993_v28 = vld [vmem:[#allocation2 + $0x1054] sm:$0xf]  ;;  %v11238_v7 = vor.u32 %v13209_v21, %v11235_v5  ;;  %5887 = vmatpush.bf16.msra.mxu3 %v10918_v17  ;;  %v8778_v21 = vor.u32 %v12598_v60, %v8777_v11  ;;  %v12654_v57 = vld [vmem:[#allocation2 + $0x5b4] sm:$0xf0]  ;;  %v5644_v11 = vpop.f32.mrf.mxu0 }
 0x3f9   :  { %v10371_v14 = vld [vmem:[#allocation2 + $0x1070] sm:$0xf0] }
 0x3fa   :  { %v13057_v18 = vld [vmem:[#allocation2 + $0x1254] sm:$0xf]  ;;  %v10374_v37 = vor.u32 %v12993_v28, %v10371_v14  ;;  %5898 = vmatpush.bf16.msrb.mxu0 %v11238_v7  ;;  %v12590_v28 = vld [vmem:[#allocation2 + $0x3b4] sm:$0xf0]  ;;  %v8490_v7 = vor.u32 %v12526_v12, %v8489_v9 }
 0x3fb   :  { %v10627_v20 = vld [vmem:[#allocation2 + $0x1270] sm:$0xf0]  ;;  %v8969_v9 = vld [vmem:[#allocation2 + $0x558] sm:$0xf] }
 0x3fc   :  { %v13121_v45 = vld [vmem:[#allocation2 + $0x1454] sm:$0xf]  ;;  %v10630_v39 = vor.u32 %v13057_v18, %v10627_v20  ;;  %5862 = vmatpush.bf16.msra.mxu1 %v10374_v37  ;;  %v8713_v37 = vld [vmem:[#allocation2 + $0x358] sm:$0xf] }
 0x3fd   :  { %v10883_v31 = vld [vmem:[#allocation2 + $0x1470] sm:$0xf0]  ;;  %v12646_v12 = vld [vmem:[#allocation2 + $0x574] sm:$0xf0] }
 0x3fe   :  { %v13201_v34 = vld [vmem:[#allocation2 + $0x16d4] sm:$0xf]  ;;  %v10886_v47 = vor.u32 %v13121_v45, %v10883_v31  ;;  %5875 = vmatpush.bf16.msra.mxu2 %v10630_v39  ;;  %v8746_v31 = vor.u32 %v12590_v28, %v8745_v13  ;;  %v12582_v39 = vld [vmem:[#allocation2 + $0x374] sm:$0xf0] }
 0x3ff   :  { %v11203_v36 = vld [vmem:[#allocation2 + $0x16f0] sm:$0xf0]  ;;  %v9225_v28 = vld [vmem:[#allocation2 + $0x758] sm:$0xf] }
 0x400   :  { %v12985_v4 = vld [vmem:[#allocation2 + $0x1014] sm:$0xf]  ;;  %v11206_v48 = vor.u32 %v13201_v34, %v11203_v36  ;;  %5888 = vmatpush.bf16.msra.mxu3 %v10886_v47  ;;  %v8457_v34 = vld [vmem:[#allocation2 + $0x158] sm:$0xf] }
 0x401   :  { %v10339_v40 = vld [vmem:[#allocation2 + $0x1030] sm:$0xf0]  ;;  %v12518_v36 = vld [vmem:[#allocation2 + $0x174] sm:$0xf0] }
 0x402   :  { %v13049_v43 = vld [vmem:[#allocation2 + $0x1214] sm:$0xf]  ;;  %v10342_v58 = vor.u32 %v12985_v4, %v10339_v40  ;;  %5899 = vmatpush.bf16.msrb.mxu0 %v11206_v48  ;;  %v9033_v4 = vld [vmem:[#allocation2 + $0x5d8] sm:$0xf] }
 0x403   :  { %v10595_v49 = vld [vmem:[#allocation2 + $0x1230] sm:$0xf0]  ;;  %v12662_v40 = vld [vmem:[#allocation2 + $0x5f4] sm:$0xf0] }
 0x404   :  { %v13113_v50 = vld [vmem:[#allocation2 + $0x1414] sm:$0xf]  ;;  %v10598_v59 = vor.u32 %v13049_v43, %v10595_v49  ;;  %5863 = vmatpush.bf16.msra.mxu1 %v10342_v58  ;;  %v12726_v47 = vld [vmem:[#allocation2 + $0x7f4] sm:$0xf0]  ;;  %v8458_v49 = vor.u32 %v12518_v36, %v8457_v34  ;;  %v5683_v34 = vpop.f32.mrf.mxu3 }
 0x405   :  { %v10851_v35 = vld [vmem:[#allocation2 + $0x1430] sm:$0xf0]  ;;  %v9257_v58 = vld [vmem:[#allocation2 + $0x798] sm:$0xf] }
 0x406   :  { %v13193_v52 = vld [vmem:[#allocation2 + $0x1694] sm:$0xf]  ;;  %v10854_v61 = vor.u32 %v13113_v50, %v10851_v35  ;;  %5876 = vmatpush.bf16.msra.mxu2 %v10598_v59  ;;  %v8714_v50 = vor.u32 %v12582_v39, %v8713_v37  ;;  %v9034_v35 = vor.u32 %v12662_v40, %v9033_v4  ;;  %v12718_v59 = vld [vmem:[#allocation2 + $0x7b4] sm:$0xf0] }
 0x407   :  { %v11171_v53 = vld [vmem:[#allocation2 + $0x16b0] sm:$0xf0]  ;;  %5864 = vmatmul.bf16.vlgmr.msra.gmra.mxu1 %v13746_v19  ;;  %v12558_v37 = vld [vmem:[#allocation2 + $0x2b4] sm:$0xf0] }
 0x408   :  { %v13257_v54 = vld [vmem:[#allocation2 + $0x1894] sm:$0xf]  ;;  %v11174_v63 = vor.u32 %v13193_v52, %v11171_v53  ;;  %5889 = vmatpush.bf16.msra.mxu3 %v10854_v61  ;;  %v12510_v52 = vld [vmem:[#allocation2 + $0x134] sm:$0xf0]  ;;  %v5645_v61 = vadd.f32 %v5644_v11, %v13866_v6 }
 0x409   :  { %v11427_v55 = vld [vmem:[#allocation2 + $0x18b0] sm:$0xf0]  ;;  %5877 = vmatmul.bf16.vlgmr.msra.gmra.mxu2 %v13750_v24  ;;  %v8681_v53 = vld [vmem:[#allocation2 + $0x318] sm:$0xf]  ;;  %v8426_v60 = vor.u32 %v12510_v52, %v8425_v51 }
 0x40a   :  { %v11430_v0 = vor.u32 %v13257_v54, %v11427_v55  ;;  %v13185_v8 = vld [vmem:[#allocation2 + $0x1654] sm:$0xf]  ;;  %5900 = vmatpush.bf16.msrb.mxu0 %v11174_v63  ;;  %5921 = vmatpush.bf16.msrb.mxu2 %v8522_v1  ;;  %v9290_v54 = vor.u32 %v12726_v47, %v9289_v46  ;;  %v12574_v55 = vld [vmem:[#allocation2 + $0x334] sm:$0xf0]  ;;  %v5657_v63 = vpop.f32.mrf.mxu1  ;;  %v9002_v1 = vor.u32 %v12654_v57, %v9001_v56  ;;  %v5646_v47 = vpop.f32.mrf.mxu0 }
 0x40b   :  { %v11139_v62 = vld [vmem:[#allocation2 + $0x1670] sm:$0xf0]  ;;  %5890 = vmatmul.bf16.vlgmr.msra.gmra.mxu3 %v13748_v23  ;;  %v5658_v13 = vadd.f32 %v5657_v63, %v5645_v61  ;;  %v8937_v39 = vld [vmem:[#allocation2 + $0x518] sm:$0xf] }
 0x40c   :  { %v13249_v2 = vld [vmem:[#allocation2 + $0x1854] sm:$0xf]  ;;  %v11142_v14 = vor.u32 %v13185_v8, %v11139_v62  ;;  %5913 = vmatpush.bf16.msrb.mxu1 %v11430_v0  ;;  %5934 = vmatpush.bf16.msrb.mxu3 %v8778_v21  ;;  %v8682_v0 = vor.u32 %v12574_v55, %v8681_v53  ;;  %v8393_v8 = vld [vmem:[#allocation2 + $0xd8] sm:$0xf]  ;;  %v9258_v21 = vor.u32 %v12718_v59, %v9257_v58 }
 0x40d   :  { %v11395_v5 = vld [vmem:[#allocation2 + $0x1870] sm:$0xf0]  ;;  %v12502_v62 = vld [vmem:[#allocation2 + $0xf4] sm:$0xf0] }
 0x40e   :  { %v13177_v16 = vld [vmem:[#allocation2 + $0x1614] sm:$0xf]  ;;  %v11398_v17 = vor.u32 %v13249_v2, %v11395_v5  ;;  %5901 = vmatpush.bf16.msrb.mxu0 %v11142_v14  ;;  %5922 = vmatpush.bf16.msrb.mxu2 %v8490_v7  ;;  %v8649_v2 = vld [vmem:[#allocation2 + $0x2d8] sm:$0xf]  ;;  %v8394_v6 = vor.u32 %v12502_v62, %v8393_v8  ;;  %v8970_v7 = vor.u32 %v12646_v12, %v8969_v9 }
 0x40f   :  { %v11107_v18 = vld [vmem:[#allocation2 + $0x1630] sm:$0xf0]  ;;  %v12566_v5 = vld [vmem:[#allocation2 + $0x2f4] sm:$0xf0] }
 0x410   :  { %v13241_v20 = vld [vmem:[#allocation2 + $0x1814] sm:$0xf]  ;;  %v11110_v43 = vor.u32 %v13177_v16, %v11107_v18  ;;  %5914 = vmatpush.bf16.msrb.mxu1 %v11398_v17  ;;  %5935 = vmatpush.bf16.msrb.mxu3 %v8746_v31  ;;  %v12710_v14 = vld [vmem:[#allocation2 + $0x774] sm:$0xf0]  ;;  %v5670_v16 = vpop.f32.mrf.mxu2  ;;  %v8650_v17 = vor.u32 %v12566_v5, %v8649_v2  ;;  %v5685_v2 = vpop.f32.mrf.mxu3 }
 0x411   :  { %v11363_v45 = vld [vmem:[#allocation2 + $0x1830] sm:$0xf0]  ;;  %v8361_v18 = vld [vmem:[#allocation2 + $0x98] sm:$0xf]  ;;  %v5671_v31 = vadd.f32 %v5670_v16, %v5658_v13  ;;  %v9226_v36 = vor.u32 %v12710_v14, %v9225_v28 }
 0x412   :  { %v11366_v48 = vor.u32 %v13241_v20, %v11363_v45  ;;  %5902 = vmatpush.bf16.msrb.mxu0 %v11110_v43  ;;  %5923 = vmatpush.bf16.msrb.mxu2 %v8458_v49  ;;  %v12494_v20 = vld [vmem:[#allocation2 + $0xb4] sm:$0xf0]  ;;  %v5659_v49 = vpop.f32.mrf.mxu1 }
 0x413   :  { %v8617_v45 = vld [vmem:[#allocation2 + $0x298] sm:$0xf]  ;;  %v13873_v46 = vadd.f32 %v5683_v34, %v5671_v31 }
 0x414   :  { %5915 = vmatpush.bf16.msrb.mxu1 %v11366_v48  ;;  %5936 = vmatpush.bf16.msrb.mxu3 %v8714_v50  ;;  %v12638_v4 = vld [vmem:[#allocation2 + $0x534] sm:$0xf0]  ;;  %v8362_v48 = vor.u32 %v12494_v20, %v8361_v18  ;;  %v8618_v50 = vor.u32 %v12558_v37, %v8617_v45 }
 0x415   :  { %5903 = vmatmul.bf16.vlgmr.msrb.gmra.mxu0 %v13752_v29  ;;  %v9193_v40 = vld [vmem:[#allocation2 + $0x718] sm:$0xf] }
 0x416   :  { %5947 = vmatpush.bf16.msra.mxu0 %v9034_v35  ;;  %5924 = vmatpush.bf16.msrb.mxu2 %v8426_v60  ;;  %v12702_v43 = vld [vmem:[#allocation2 + $0x734] sm:$0xf0]  ;;  %v8938_v35 = vor.u32 %v12638_v4, %v8937_v39 }
 0x417   :  { %v8329_v51 = vld [vmem:[#allocation2 + $0x58] sm:$0xf]  ;;  %11444 = vmatmul.msk.bf16.vlgmr.msrb.gmra.mxu1 %vm4903_vm0, %v13758_v22 }
 0x418   :  { %5960 = vmatpush.bf16.msra.mxu1 %v9290_v54  ;;  %5937 = vmatpush.bf16.msrb.mxu3 %v8682_v0  ;;  %v12486_v52 = vld [vmem:[#allocation2 + $0x74] sm:$0xf0]  ;;  %v9194_v54 = vor.u32 %v12702_v43, %v9193_v40  ;;  %v5672_v61 = vpop.f32.mrf.mxu2 }
 0x419   :  { %v8585_v53 = vld [vmem:[#allocation2 + $0x258] sm:$0xf]  ;;  %v8330_v11 = vor.u32 %v12486_v52, %v8329_v51 }
 0x41a   :  { %5948 = vmatpush.bf16.msra.mxu0 %v9002_v1  ;;  %5925 = vmatpush.bf16.msrb.mxu2 %v8394_v6  ;;  %v12550_v55 = vld [vmem:[#allocation2 + $0x274] sm:$0xf0] }
 0x41b   :  { %v8905_v56 = vld [vmem:[#allocation2 + $0x4d8] sm:$0xf]  ;;  %v8586_v63 = vor.u32 %v12550_v55, %v8585_v53 }
 0x41c   :  { %5961 = vmatpush.bf16.msra.mxu1 %v9258_v21  ;;  %5938 = vmatpush.bf16.msrb.mxu3 %v8650_v17  ;;  %v12630_v57 = vld [vmem:[#allocation2 + $0x4f4] sm:$0xf0] }
 0x41d   :  { %v9161_v58 = vld [vmem:[#allocation2 + $0x6d8] sm:$0xf]  ;;  %v8906_v0 = vor.u32 %v12630_v57, %v8905_v56 }
 0x41e   :  { %5949 = vmatpush.bf16.msra.mxu0 %v8970_v7  ;;  %v12694_v59 = vld [vmem:[#allocation2 + $0x6f4] sm:$0xf0]  ;;  %5926 = vmatpush.bf16.msrb.mxu2 %v8362_v48 }
 0x41f   :  { %v8297_v60 = vld [vmem:[#allocation2 + $0x18] sm:$0xf]  ;;  %v9162_v21 = vor.u32 %v12694_v59, %v9161_v58 }
 0x420   :  { %5962 = vmatpush.bf16.msra.mxu1 %v9226_v36  ;;  %5939 = vmatpush.bf16.msrb.mxu3 %v8618_v50  ;;  %v12478_v1 = vld [vmem:[#allocation2 + $0x34] sm:$0xf0] }
 0x421   :  { %v8553_v8 = vld [vmem:[#allocation2 + $0x218] sm:$0xf]  ;;  %v8298_v6 = vor.u32 %v12478_v1, %v8297_v60 }
 0x422   :  { %5950 = vmatpush.bf16.msra.mxu0 %v8938_v35  ;;  %v12542_v62 = vld [vmem:[#allocation2 + $0x234] sm:$0xf0]  ;;  %5927 = vmatpush.bf16.msrb.mxu2 %v8330_v11 }
 0x423   :  { %v8873_v5 = vld [vmem:[#allocation2 + $0x498] sm:$0xf]  ;;  %v8554_v7 = vor.u32 %v12542_v62, %v8553_v8 }
 0x424   :  { %5963 = vmatpush.bf16.msra.mxu1 %v9194_v54  ;;  %v12622_v9 = vld [vmem:[#allocation2 + $0x4b4] sm:$0xf0]  ;;  %5940 = vmatpush.bf16.msrb.mxu3 %v8586_v63 }
 0x425   :  { %v9129_v12 = vld [vmem:[#allocation2 + $0x698] sm:$0xf]  ;;  %v8874_v18 = vor.u32 %v12622_v9, %v8873_v5 }
 0x426   :  { %v12686_v13 = vld [vmem:[#allocation2 + $0x6b4] sm:$0xf0]  ;;  %5951 = vmatpush.bf16.msra.mxu0 %v8906_v0  ;;  %5928 = vmatpush.bf16.msrb.mxu2 %v8298_v6 }
 0x427   :  { %v9545_v28 = vld [vmem:[#allocation2 + $0x9d8] sm:$0xf]  ;;  %v9130_v20 = vor.u32 %v12686_v13, %v9129_v12  ;;  %v5696_v12 = vpop.f32.mrf.mxu0 }
 0x428   :  { %v12790_v14 = vld [vmem:[#allocation2 + $0x9f4] sm:$0xf0]  ;;  %5964 = vmatpush.bf16.msra.mxu1 %v9162_v21  ;;  %5941 = vmatpush.bf16.msrb.mxu3 %v8554_v7  ;;  %v5697_v6 = vadd.f32 %v5696_v12, %v13873_v46 }
 0x429   :  { %v9801_v16 = vld [vmem:[#allocation2 + $0xbd8] sm:$0xf]  ;;  %v9546_v45 = vor.u32 %v12790_v14, %v9545_v28  ;;  %5929 = vmatmul.bf16.vlgmr.msrb.gmra.mxu2 %v13718_v27 }
 0x42a   :  { %v12854_v17 = vld [vmem:[#allocation2 + $0xbf4] sm:$0xf0]  ;;  %5952 = vmatpush.bf16.msra.mxu0 %v8874_v18 }
 0x42b   :  { %v8841_v31 = vld [vmem:[#allocation2 + $0x458] sm:$0xf]  ;;  %v9802_v37 = vor.u32 %v12854_v17, %v9801_v16  ;;  %5973 = vmatpush.bf16.msra.mxu2 %v9546_v45  ;;  %5942 = vmatmul.bf16.vlgmr.msrb.gmra.mxu3 %v13722_v33  ;;  %v5709_v16 = vpop.f32.mrf.mxu1 }
 0x42c   :  { %v12614_v34 = vld [vmem:[#allocation2 + $0x474] sm:$0xf0]  ;;  %5965 = vmatpush.bf16.msra.mxu1 %v9130_v20  ;;  %v5710_v45 = vadd.f32 %v5709_v16, %v5697_v6 }
 0x42d   :  { %v9097_v36 = vld [vmem:[#allocation2 + $0x658] sm:$0xf]  ;;  %v8842_v48 = vor.u32 %v12614_v34, %v8841_v31  ;;  %5986 = vmatpush.bf16.msra.mxu3 %v9802_v37 }
 0x42e   :  { %v12678_v39 = vld [vmem:[#allocation2 + $0x674] sm:$0xf0] }
 0x42f   :  { %v9513_v4 = vld [vmem:[#allocation2 + $0x998] sm:$0xf]  ;;  %v9098_v50 = vor.u32 %v12678_v39, %v9097_v36  ;;  %5953 = vmatpush.bf16.msra.mxu0 %v8842_v48 }
 0x430   :  { %v12782_v40 = vld [vmem:[#allocation2 + $0x9b4] sm:$0xf0] }
 0x431   :  { %v9769_v43 = vld [vmem:[#allocation2 + $0xb98] sm:$0xf]  ;;  %v9514_v35 = vor.u32 %v12782_v40, %v9513_v4  ;;  %5966 = vmatpush.bf16.msra.mxu1 %v9098_v50  ;;  %v5722_v50 = vpop.f32.mrf.mxu2 }
 0x432   :  { %v12846_v47 = vld [vmem:[#allocation2 + $0xbb4] sm:$0xf0] }
 0x433   :  { %v8809_v49 = vld [vmem:[#allocation2 + $0x418] sm:$0xf]  ;;  %v9770_v54 = vor.u32 %v12846_v47, %v9769_v43  ;;  %5974 = vmatpush.bf16.msra.mxu2 %v9514_v35 }
 0x434   :  { %v12606_v51 = vld [vmem:[#allocation2 + $0x434] sm:$0xf0] }
 0x435   :  { %v9065_v52 = vld [vmem:[#allocation2 + $0x618] sm:$0xf]  ;;  %v8810_v60 = vor.u32 %v12606_v51, %v8809_v49  ;;  %5987 = vmatpush.bf16.msra.mxu3 %v9770_v54  ;;  %v5723_v54 = vadd.f32 %v5722_v50, %v5710_v45 }
 0x436   :  { %v12670_v53 = vld [vmem:[#allocation2 + $0x634] sm:$0xf0] }
 0x437   :  { %v9481_v55 = vld [vmem:[#allocation2 + $0x958] sm:$0xf]  ;;  %v9066_v0 = vor.u32 %v12670_v53, %v9065_v52  ;;  %5954 = vmatpush.bf16.msra.mxu0 %v8810_v60 }
 0x438   :  { %v12774_v56 = vld [vmem:[#allocation2 + $0x974] sm:$0xf0] }
 0x439   :  { %v9737_v57 = vld [vmem:[#allocation2 + $0xb58] sm:$0xf]  ;;  %v9482_v1 = vor.u32 %v12774_v56, %v9481_v55  ;;  %5967 = vmatpush.bf16.msra.mxu1 %v9066_v0  ;;  %v5698_v56 = vpop.f32.mrf.mxu0 }
 0x43a   :  { %v12838_v58 = vld [vmem:[#allocation2 + $0xb74] sm:$0xf0]  ;;  %5955 = vmatmul.bf16.vlgmr.msra.gmra.mxu0 %v13716_v26 }
 0x43b   :  { %v10057_v59 = vld [vmem:[#allocation2 + $0xdd8] sm:$0xf]  ;;  %v9738_v8 = vor.u32 %v12838_v58, %v9737_v57  ;;  %5975 = vmatpush.bf16.msra.mxu2 %v9482_v1  ;;  %v5735_v57 = vpop.f32.mrf.mxu3 }
 0x43c   :  { %v12918_v11 = vld [vmem:[#allocation2 + $0xdf4] sm:$0xf0]  ;;  %5968 = vmatmul.bf16.vlgmr.msra.gmra.mxu1 %v13720_v32  ;;  %v5736_v0 = vadd.f32 %v5735_v57, %v5723_v54 }
 0x43d   :  { %v10313_v61 = vld [vmem:[#allocation2 + $0xfd8] sm:$0xf]  ;;  %v10058_v62 = vor.u32 %v12918_v11, %v10057_v59  ;;  %5988 = vmatpush.bf16.msra.mxu3 %v9738_v8 }
 0x43e   :  { %v12982_v63 = vld [vmem:[#allocation2 + $0xff4] sm:$0xf0] }
 0x43f   :  { %v9449_v2 = vld [vmem:[#allocation2 + $0x918] sm:$0xf]  ;;  %v10314_v9 = vor.u32 %v12982_v63, %v10313_v61  ;;  %5999 = vmatpush.bf16.msrb.mxu0 %v10058_v62  ;;  %v5711_v63 = vpop.f32.mrf.mxu1 }
 0x440   :  { %v12766_v21 = vld [vmem:[#allocation2 + $0x934] sm:$0xf0] }
 0x441   :  { %v9705_v5 = vld [vmem:[#allocation2 + $0xb18] sm:$0xf]  ;;  %v9450_v18 = vor.u32 %v12766_v21, %v9449_v2  ;;  %6012 = vmatpush.bf16.msrb.mxu1 %v10314_v9 }
 0x442   :  { %v12830_v13 = vld [vmem:[#allocation2 + $0xb34] sm:$0xf0] }
 0x443   :  { %v10025_v28 = vld [vmem:[#allocation2 + $0xd98] sm:$0xf]  ;;  %v9706_v20 = vor.u32 %v12830_v13, %v9705_v5  ;;  %5976 = vmatpush.bf16.msra.mxu2 %v9450_v18 }
 0x444   :  { %v12910_v14 = vld [vmem:[#allocation2 + $0xdb4] sm:$0xf0] }
 0x445   :  { %v10281_v17 = vld [vmem:[#allocation2 + $0xf98] sm:$0xf]  ;;  %v10026_v31 = vor.u32 %v12910_v14, %v10025_v28  ;;  %5989 = vmatpush.bf16.msra.mxu3 %v9706_v20 }
 0x446   :  { %v12974_v7 = vld [vmem:[#allocation2 + $0xfb4] sm:$0xf0] }
 0x447   :  { %v9417_v34 = vld [vmem:[#allocation2 + $0x8d8] sm:$0xf]  ;;  %v10282_v39 = vor.u32 %v12974_v7, %v10281_v17  ;;  %6000 = vmatpush.bf16.msrb.mxu0 %v10026_v31 }
 0x448   :  { %v12758_v36 = vld [vmem:[#allocation2 + $0x8f4] sm:$0xf0] }
 0x449   :  { %v9673_v37 = vld [vmem:[#allocation2 + $0xad8] sm:$0xf]  ;;  %v9418_v48 = vor.u32 %v12758_v36, %v9417_v34  ;;  %6013 = vmatpush.bf16.msrb.mxu1 %v10282_v39  ;;  %v5724_v34 = vpop.f32.mrf.mxu2 }
 0x44a   :  { %v12822_v4 = vld [vmem:[#allocation2 + $0xaf4] sm:$0xf0] }
 0x44b   :  { %v9993_v40 = vld [vmem:[#allocation2 + $0xd58] sm:$0xf]  ;;  %v9674_v49 = vor.u32 %v12822_v4, %v9673_v37  ;;  %5977 = vmatpush.bf16.msra.mxu2 %v9418_v48 }
 0x44c   :  { %v12902_v43 = vld [vmem:[#allocation2 + $0xd74] sm:$0xf0] }
 0x44d   :  { %v10249_v46 = vld [vmem:[#allocation2 + $0xf58] sm:$0xf]  ;;  %v9994_v35 = vor.u32 %v12902_v43, %v9993_v40  ;;  %5990 = vmatpush.bf16.msra.mxu3 %v9674_v49  ;;  %v5737_v40 = vpop.f32.mrf.mxu3  ;;  %v5748_v43 = vpop.f32.mrf.mxu0 }
 0x44e   :  { %v12966_v47 = vld [vmem:[#allocation2 + $0xf74] sm:$0xf0]  ;;  %v13882_v49 = vadd.f32 %v5748_v43, %v5736_v0  ;;  %v932_v43 = vperm.slane %v13862_v15, 5 }
 0x44f   :  { %v9385_v51 = vld [vmem:[#allocation2 + $0x898] sm:$0xf]  ;;  %v10250_v55 = vor.u32 %v12966_v47, %v10249_v46  ;;  %6001 = vmatpush.bf16.msrb.mxu0 %v9994_v35 }
 0x450   :  { %v12750_v52 = vld [vmem:[#allocation2 + $0x8b4] sm:$0xf0] }
 0x451   :  { %v9641_v53 = vld [vmem:[#allocation2 + $0xa98] sm:$0xf]  ;;  %v9386_v1 = vor.u32 %v12750_v52, %v9385_v51  ;;  %6014 = vmatpush.bf16.msrb.mxu1 %v10250_v55 }
 0x452   :  { %v12814_v58 = vld [vmem:[#allocation2 + $0xab4] sm:$0xf0] }
 0x453   :  { %v9961_v59 = vld [vmem:[#allocation2 + $0xd18] sm:$0xf]  ;;  %v9642_v8 = vor.u32 %v12814_v58, %v9641_v53  ;;  %5978 = vmatpush.bf16.msra.mxu2 %v9386_v1 }
 0x454   :  { %v12894_v11 = vld [vmem:[#allocation2 + $0xd34] sm:$0xf0] }
 0x455   :  { %v10217_v60 = vld [vmem:[#allocation2 + $0xf18] sm:$0xf]  ;;  %v9962_v62 = vor.u32 %v12894_v11, %v9961_v59  ;;  %5991 = vmatpush.bf16.msra.mxu3 %v9642_v8 }
 0x456   :  { %v12958_v61 = vld [vmem:[#allocation2 + $0xf34] sm:$0xf0] }
 0x457   :  { %v9353_v2 = vld [vmem:[#allocation2 + $0x858] sm:$0xf]  ;;  %v10218_v9 = vor.u32 %v12958_v61, %v10217_v60  ;;  %6002 = vmatpush.bf16.msrb.mxu0 %v9962_v62 }
 0x458   :  { %v12742_v21 = vld [vmem:[#allocation2 + $0x874] sm:$0xf0] }
 0x459   :  { %v9609_v5 = vld [vmem:[#allocation2 + $0xa58] sm:$0xf]  ;;  %v9354_v16 = vor.u32 %v12742_v21, %v9353_v2  ;;  %6015 = vmatpush.bf16.msrb.mxu1 %v10218_v9 }
 0x45a   :  { %v12806_v12 = vld [vmem:[#allocation2 + $0xa74] sm:$0xf0] }
 0x45b   :  { %v9929_v13 = vld [vmem:[#allocation2 + $0xcd8] sm:$0xf]  ;;  %v9610_v7 = vor.u32 %v12806_v12, %v9609_v5  ;;  %5979 = vmatpush.bf16.msra.mxu2 %v9354_v16 }
 0x45c   :  { %v12886_v28 = vld [vmem:[#allocation2 + $0xcf4] sm:$0xf0] }
 0x45d   :  { %v10185_v14 = vld [vmem:[#allocation2 + $0xed8] sm:$0xf]  ;;  %v9930_v18 = vor.u32 %v12886_v28, %v9929_v13  ;;  %5992 = vmatpush.bf16.msra.mxu3 %v9610_v7 }
 0x45e   :  { %v12950_v6 = vld [vmem:[#allocation2 + $0xef4] sm:$0xf0] }
 0x45f   :  { %v9321_v17 = vld [vmem:[#allocation2 + $0x818] sm:$0xf]  ;;  %v10186_v36 = vor.u32 %v12950_v6, %v10185_v14  ;;  %6003 = vmatpush.bf16.msrb.mxu0 %v9930_v18  ;;  %v5750_v6 = vpop.f32.mrf.mxu0 }
 0x460   :  { %v12734_v20 = vld [vmem:[#allocation2 + $0x834] sm:$0xf0] }
 0x461   :  { %v9577_v45 = vld [vmem:[#allocation2 + $0xa18] sm:$0xf]  ;;  %v9322_v50 = vor.u32 %v12734_v20, %v9321_v17  ;;  %6016 = vmatpush.bf16.msrb.mxu1 %v10186_v36 }
 0x462   :  { %v12798_v31 = vld [vmem:[#allocation2 + $0xa34] sm:$0xf0] }
 0x463   :  { %v9897_v37 = vld [vmem:[#allocation2 + $0xc98] sm:$0xf]  ;;  %v9578_v52 = vor.u32 %v12798_v31, %v9577_v45  ;;  %5980 = vmatpush.bf16.msra.mxu2 %v9322_v50 }
 0x464   :  { %v12878_v39 = vld [vmem:[#allocation2 + $0xcb4] sm:$0xf0] }
 0x465   :  { %v10153_v4 = vld [vmem:[#allocation2 + $0xe98] sm:$0xf]  ;;  %v9898_v53 = vor.u32 %v12878_v39, %v9897_v37  ;;  %5993 = vmatpush.bf16.msra.mxu3 %v9578_v52  ;;  %v5761_v52 = vpop.f32.mrf.mxu1 }
 0x466   :  { %v12942_v46 = vld [vmem:[#allocation2 + $0xeb4] sm:$0xf0]  ;;  %5981 = vmatmul.bf16.vlgmr.msra.gmra.mxu2 %v13736_v41 }
 0x467   :  { %v10569_v47 = vld [vmem:[#allocation2 + $0x11d8] sm:$0xf]  ;;  %v10154_v54 = vor.u32 %v12942_v46, %v10153_v4  ;;  %6004 = vmatpush.bf16.msrb.mxu0 %v9898_v53 }
 0x468   :  { %v13046_v48 = vld [vmem:[#allocation2 + $0x11f4] sm:$0xf0]  ;;  %5994 = vmatmul.bf16.vlgmr.msra.gmra.mxu3 %v13740_v44 }
 0x469   :  { %v10825_v35 = vld [vmem:[#allocation2 + $0x13d8] sm:$0xf]  ;;  %v10570_v55 = vor.u32 %v13046_v48, %v10569_v47  ;;  %6017 = vmatpush.bf16.msrb.mxu1 %v10154_v54 }
 0x46a   :  { %v13110_v51 = vld [vmem:[#allocation2 + $0x13f4] sm:$0xf0] }
 0x46b   :  { %v9865_v56 = vld [vmem:[#allocation2 + $0xc58] sm:$0xf]  ;;  %v10826_v59 = vor.u32 %v13110_v51, %v10825_v35  ;;  %6025 = vmatpush.bf16.msrb.mxu2 %v10570_v55 }
 0x46c   :  { %v12870_v57 = vld [vmem:[#allocation2 + $0xc74] sm:$0xf0] }
 0x46d   :  { %v10121_v58 = vld [vmem:[#allocation2 + $0xe58] sm:$0xf]  ;;  %v9866_v1 = vor.u32 %v12870_v57, %v9865_v56  ;;  %6038 = vmatpush.bf16.msrb.mxu3 %v10826_v59  ;;  %v5762_v59 = vadd.f32 %v5761_v52, %v932_v43 }
 0x46e   :  { %v12934_v11 = vld [vmem:[#allocation2 + $0xe74] sm:$0xf0] }
 0x46f   :  { %v10537_v60 = vld [vmem:[#allocation2 + $0x1198] sm:$0xf]  ;;  %v10122_v62 = vor.u32 %v12934_v11, %v10121_v58  ;;  %6005 = vmatpush.bf16.msrb.mxu0 %v9866_v1 }
 0x470   :  { %v13038_v61 = vld [vmem:[#allocation2 + $0x11b4] sm:$0xf0] }
 0x471   :  { %v10793_v63 = vld [vmem:[#allocation2 + $0x1398] sm:$0xf]  ;;  %v10538_v2 = vor.u32 %v13038_v61, %v10537_v60  ;;  %6018 = vmatpush.bf16.msrb.mxu1 %v10122_v62 }
 0x472   :  { %v13102_v0 = vld [vmem:[#allocation2 + $0x13b4] sm:$0xf0] }
 0x473   :  { %v9833_v8 = vld [vmem:[#allocation2 + $0xc18] sm:$0xf]  ;;  %v10794_v12 = vor.u32 %v13102_v0, %v10793_v63  ;;  %6026 = vmatpush.bf16.msrb.mxu2 %v10538_v2 }
 0x474   :  { %v12862_v21 = vld [vmem:[#allocation2 + $0xc34] sm:$0xf0] }
 0x475   :  { %v10089_v5 = vld [vmem:[#allocation2 + $0xe18] sm:$0xf]  ;;  %v9834_v18 = vor.u32 %v12862_v21, %v9833_v8  ;;  %6039 = vmatpush.bf16.msrb.mxu3 %v10794_v12  ;;  %v5774_v8 = vpop.f32.mrf.mxu2 }
 0x476   :  { %v12926_v9 = vld [vmem:[#allocation2 + $0xe34] sm:$0xf0]  ;;  %v5775_v12 = vadd.f32 %v5774_v8, %v5762_v59 }
 0x477   :  { %v10505_v13 = vld [vmem:[#allocation2 + $0x1158] sm:$0xf]  ;;  %v10090_v31 = vor.u32 %v12926_v9, %v10089_v5  ;;  %6006 = vmatpush.bf16.msrb.mxu0 %v9834_v18 }
 0x478   :  { %v13030_v28 = vld [vmem:[#allocation2 + $0x1174] sm:$0xf0] }
 0x479   :  { %v10761_v14 = vld [vmem:[#allocation2 + $0x1358] sm:$0xf]  ;;  %v10506_v34 = vor.u32 %v13030_v28, %v10505_v13  ;;  %6019 = vmatpush.bf16.msrb.mxu1 %v10090_v31  ;;  %v5787_v13 = vpop.f32.mrf.mxu3 }
 0x47a   :  { %v13094_v16 = vld [vmem:[#allocation2 + $0x1374] sm:$0xf0]  ;;  %6007 = vmatmul.bf16.vlgmr.msrb.gmra.mxu0 %v13734_v38  ;;  %v5788_v18 = vadd.f32 %v5787_v13, %v5775_v12 }
 0x47b   :  { %v11081_v17 = vld [vmem:[#allocation2 + $0x15d8] sm:$0xf]  ;;  %v10762_v37 = vor.u32 %v13094_v16, %v10761_v14  ;;  %6027 = vmatpush.bf16.msrb.mxu2 %v10506_v34 }
 0x47c   :  { %v13174_v7 = vld [vmem:[#allocation2 + $0x15f4] sm:$0xf0]  ;;  %6020 = vmatmul.bf16.vlgmr.msrb.gmra.mxu1 %v13738_v42 }
 0x47d   :  { %v11337_v20 = vld [vmem:[#allocation2 + $0x17d8] sm:$0xf]  ;;  %v11082_v39 = vor.u32 %v13174_v7, %v11081_v17  ;;  %6040 = vmatpush.bf16.msrb.mxu3 %v10762_v37 }
 0x47e   :  { %v13238_v45 = vld [vmem:[#allocation2 + $0x17f4] sm:$0xf0] }
 0x47f   :  { %v10473_v36 = vld [vmem:[#allocation2 + $0x1118] sm:$0xf]  ;;  %v11338_v46 = vor.u32 %v13238_v45, %v11337_v20  ;;  %6051 = vmatpush.bf16.msra.mxu0 %v11082_v39  ;;  %v5800_v20 = vpop.f32.mrf.mxu0  ;;  %v5763_v45 = vpop.f32.mrf.mxu1 }
 0x480   :  { %v13022_v4 = vld [vmem:[#allocation2 + $0x1134] sm:$0xf0]  ;;  %v8491_v45 = vld [vmem:[#allocation2 + $0x1b8] sm:$0xf0] }
 0x481   :  { %v10729_v40 = vld [vmem:[#allocation2 + $0x1318] sm:$0xf]  ;;  %v10474_v53 = vor.u32 %v13022_v4, %v10473_v36  ;;  %6064 = vmatpush.bf16.msra.mxu1 %v11338_v46  ;;  %v5789_v59 = vpop.f32.mrf.mxu3 }
 0x482   :  { %v13086_v47 = vld [vmem:[#allocation2 + $0x1334] sm:$0xf0] }
 0x483   :  { %v11049_v48 = vld [vmem:[#allocation2 + $0x1598] sm:$0xf]  ;;  %v10730_v54 = vor.u32 %v13086_v47, %v10729_v40  ;;  %6028 = vmatpush.bf16.msrb.mxu2 %v10474_v53  ;;  %v13889_v40 = vadd.f32 %v5800_v20, %v5788_v18  ;;  %v5776_v53 = vpop.f32.mrf.mxu2  ;;  %v12522_v20 = vld [vmem:[#allocation2 + $0x19c] sm:$0xf] }
 0x484   :  { %v13166_v50 = vld [vmem:[#allocation2 + $0x15b4] sm:$0xf0]  ;;  %v12658_v53 = vld [vmem:[#allocation2 + $0x5dc] sm:$0xf] }
 0x485   :  { %v11305_v35 = vld [vmem:[#allocation2 + $0x1798] sm:$0xf]  ;;  %v11050_v55 = vor.u32 %v13166_v50, %v11049_v48  ;;  %6041 = vmatpush.bf16.msrb.mxu3 %v10730_v54 }
 0x486   :  { %v13230_v51 = vld [vmem:[#allocation2 + $0x17b4] sm:$0xf0] }
 0x487   :  { %v10441_v56 = vld [vmem:[#allocation2 + $0x10d8] sm:$0xf]  ;;  %v11306_v15 = vor.u32 %v13230_v51, %v11305_v35  ;;  %6052 = vmatpush.bf16.msra.mxu0 %v11050_v55  ;;  %v5802_v8 = vpop.f32.mrf.mxu0 }
 0x488   :  { %v13014_v57 = vld [vmem:[#allocation2 + $0x10f4] sm:$0xf0]  ;;  %v8747_v8 = vld [vmem:[#allocation2 + $0x3b8] sm:$0xf0] }
 0x489   :  { %v10697_v58 = vld [vmem:[#allocation2 + $0x12d8] sm:$0xf]  ;;  %v10442_v1 = vor.u32 %v13014_v57, %v10441_v56  ;;  %6065 = vmatpush.bf16.msra.mxu1 %v11306_v15 }
 0x48a   :  { %v13078_v11 = vld [vmem:[#allocation2 + $0x12f4] sm:$0xf0] }
 0x48b   :  { %v11017_v60 = vld [vmem:[#allocation2 + $0x1558] sm:$0xf]  ;;  %v10698_v62 = vor.u32 %v13078_v11, %v10697_v58  ;;  %6029 = vmatpush.bf16.msrb.mxu2 %v10442_v1 }
 0x48c   :  { %v13158_v61 = vld [vmem:[#allocation2 + $0x1574] sm:$0xf0] }
 0x48d   :  { %v11273_v63 = vld [vmem:[#allocation2 + $0x1758] sm:$0xf]  ;;  %v11018_v2 = vor.u32 %v13158_v61, %v11017_v60  ;;  %6042 = vmatpush.bf16.msrb.mxu3 %v10698_v62 }
 0x48e   :  { %v13222_v0 = vld [vmem:[#allocation2 + $0x1774] sm:$0xf0] }
 0x48f   :  { %v10409_v21 = vld [vmem:[#allocation2 + $0x1098] sm:$0xf]  ;;  %v11274_v28 = vor.u32 %v13222_v0, %v11273_v63  ;;  %6053 = vmatpush.bf16.msra.mxu0 %v11018_v2  ;;  %v12530_v2 = vld [vmem:[#allocation2 + $0x1dc] sm:$0xf] }
 0x490   :  { %v13006_v5 = vld [vmem:[#allocation2 + $0x10b4] sm:$0xf0] }
 0x491   :  { %v10665_v9 = vld [vmem:[#allocation2 + $0x1298] sm:$0xf]  ;;  %v10410_v31 = vor.u32 %v13006_v5, %v10409_v21  ;;  %6066 = vmatpush.bf16.msra.mxu1 %v11274_v28  ;;  %v8523_v21 = vld [vmem:[#allocation2 + $0x1f8] sm:$0xf0] }
 0x492   :  { %v13070_v14 = vld [vmem:[#allocation2 + $0x12b4] sm:$0xf0] }
 0x493   :  { %v10985_v6 = vld [vmem:[#allocation2 + $0x1518] sm:$0xf]  ;;  %v10666_v34 = vor.u32 %v13070_v14, %v10665_v9  ;;  %6030 = vmatpush.bf16.msrb.mxu2 %v10410_v31 }
 0x494   :  { %v13150_v16 = vld [vmem:[#allocation2 + $0x1534] sm:$0xf0] }
 0x495   :  { %v11241_v17 = vld [vmem:[#allocation2 + $0x1718] sm:$0xf]  ;;  %v10986_v36 = vor.u32 %v13150_v16, %v10985_v6  ;;  %6043 = vmatpush.bf16.msrb.mxu3 %v10666_v34  ;;  %v8526_v16 = vor.u32 %v12530_v2, %v8523_v21  ;;  %v9003_v2 = vld [vmem:[#allocation2 + $0x5b8] sm:$0xf0] }
 0x496   :  { %v13214_v7 = vld [vmem:[#allocation2 + $0x1734] sm:$0xf0]  ;;  %v12714_v21 = vld [vmem:[#allocation2 + $0x79c] sm:$0xf] }
 0x497   :  { %v10377_v37 = vld [vmem:[#allocation2 + $0x1058] sm:$0xf]  ;;  %v11242_v43 = vor.u32 %v13214_v7, %v11241_v17  ;;  %6054 = vmatpush.bf16.msra.mxu0 %v10986_v36 }
 0x498   :  { %v12998_v39 = vld [vmem:[#allocation2 + $0x1074] sm:$0xf0] }
 0x499   :  { %v10633_v4 = vld [vmem:[#allocation2 + $0x1258] sm:$0xf]  ;;  %v10378_v51 = vor.u32 %v12998_v39, %v10377_v37  ;;  %6067 = vmatpush.bf16.msra.mxu1 %v11242_v43 }
 0x49a   :  { %v13062_v46 = vld [vmem:[#allocation2 + $0x1274] sm:$0xf0] }
 0x49b   :  { %v10953_v47 = vld [vmem:[#allocation2 + $0x14d8] sm:$0xf]  ;;  %v10634_v54 = vor.u32 %v13062_v46, %v10633_v4  ;;  %6031 = vmatpush.bf16.msrb.mxu2 %v10378_v51  ;;  %v12594_v51 = vld [vmem:[#allocation2 + $0x3dc] sm:$0xf] }
 0x49c   :  { %v13142_v48 = vld [vmem:[#allocation2 + $0x14f4] sm:$0xf0] }
 0x49d   :  { %v11209_v50 = vld [vmem:[#allocation2 + $0x16d8] sm:$0xf]  ;;  %v10954_v55 = vor.u32 %v13142_v48, %v10953_v47  ;;  %6044 = vmatpush.bf16.msrb.mxu3 %v10634_v54  ;;  %v8494_v47 = vor.u32 %v12522_v20, %v8491_v45  ;;  %v12642_v20 = vld [vmem:[#allocation2 + $0x55c] sm:$0xf] }
 0x49e   :  { %v13206_v35 = vld [vmem:[#allocation2 + $0x16f4] sm:$0xf0]  ;;  %v8971_v45 = vld [vmem:[#allocation2 + $0x578] sm:$0xf0] }
 0x49f   :  { %v10345_v52 = vld [vmem:[#allocation2 + $0x1018] sm:$0xf]  ;;  %v11210_v15 = vor.u32 %v13206_v35, %v11209_v50  ;;  %6055 = vmatpush.bf16.msra.mxu0 %v10954_v55  ;;  %v12514_v50 = vld [vmem:[#allocation2 + $0x15c] sm:$0xf] }
 0x4a0   :  { %v12990_v56 = vld [vmem:[#allocation2 + $0x1034] sm:$0xf0]  ;;  %v8459_v35 = vld [vmem:[#allocation2 + $0x178] sm:$0xf0] }
 0x4a1   :  { %v10601_v57 = vld [vmem:[#allocation2 + $0x1218] sm:$0xf]  ;;  %v10346_v62 = vor.u32 %v12990_v56, %v10345_v52  ;;  %6068 = vmatpush.bf16.msra.mxu1 %v11210_v15  ;;  %v8779_v52 = vld [vmem:[#allocation2 + $0x3f8] sm:$0xf0]  ;;  %v8462_v15 = vor.u32 %v12514_v50, %v8459_v35 }
 0x4a2   :  { %v13054_v58 = vld [vmem:[#allocation2 + $0x1234] sm:$0xf0]  ;;  %v9035_v55 = vld [vmem:[#allocation2 + $0x5f8] sm:$0xf0] }
 0x4a3   :  { %v10921_v11 = vld [vmem:[#allocation2 + $0x1498] sm:$0xf]  ;;  %v10602_v5 = vor.u32 %v13054_v58, %v10601_v57  ;;  %6032 = vmatpush.bf16.msrb.mxu2 %v10346_v62  ;;  %v12722_v56 = vld [vmem:[#allocation2 + $0x7dc] sm:$0xf] }
 0x4a4   :  { %v13134_v60 = vld [vmem:[#allocation2 + $0x14b4] sm:$0xf0]  ;;  %v9291_v57 = vld [vmem:[#allocation2 + $0x7f8] sm:$0xf0] }
 0x4a5   :  { %v11177_v61 = vld [vmem:[#allocation2 + $0x1698] sm:$0xf]  ;;  %v10922_v9 = vor.u32 %v13134_v60, %v10921_v11  ;;  %6045 = vmatpush.bf16.msrb.mxu3 %v10602_v5  ;;  %v8782_v11 = vor.u32 %v12594_v51, %v8779_v52  ;;  %v12506_v60 = vld [vmem:[#allocation2 + $0x11c] sm:$0xf] }
 0x4a6   :  { %v13198_v63 = vld [vmem:[#allocation2 + $0x16b4] sm:$0xf0]  ;;  %6033 = vmatmul.bf16.vlgmr.msrb.gmra.mxu2 %v13746_v19  ;;  %v12650_v62 = vld [vmem:[#allocation2 + $0x59c] sm:$0xf] }
 0x4a7   :  { %v11433_v0 = vld [vmem:[#allocation2 + $0x1898] sm:$0xf]  ;;  %v11178_v12 = vor.u32 %v13198_v63, %v11177_v61  ;;  %6056 = vmatpush.bf16.msra.mxu0 %v10922_v9  ;;  %v8427_v61 = vld [vmem:[#allocation2 + $0x138] sm:$0xf0]  ;;  %v9038_v63 = vor.u32 %v12658_v53, %v9035_v55  ;;  %v5813_v9 = vpop.f32.mrf.mxu1 }
 0x4a8   :  { %v13262_v1 = vld [vmem:[#allocation2 + $0x18b4] sm:$0xf0]  ;;  %6046 = vmatmul.bf16.vlgmr.msrb.gmra.mxu3 %v13750_v24  ;;  %v9259_v5 = vld [vmem:[#allocation2 + $0x7b8] sm:$0xf0] }
 0x4a9   :  { %v11434_v13 = vor.u32 %v13262_v1, %v11433_v0  ;;  %v10889_v28 = vld [vmem:[#allocation2 + $0x1458] sm:$0xf]  ;;  %6069 = vmatpush.bf16.msra.mxu1 %v11178_v12  ;;  %6090 = vmatpush.bf16.msra.mxu3 %v8526_v16  ;;  %v9294_v0 = vor.u32 %v12722_v56, %v9291_v57  ;;  %v12586_v1 = vld [vmem:[#allocation2 + $0x39c] sm:$0xf]  ;;  %v5814_v12 = vadd.f32 %v5813_v9, %v13889_v40  ;;  %v5852_v56 = vpop.f32.mrf.mxu0 }
 0x4aa   :  { %v13126_v14 = vld [vmem:[#allocation2 + $0x1474] sm:$0xf0]  ;;  %v9006_v16 = vor.u32 %v12650_v62, %v9003_v2  ;;  %v9227_v40 = vld [vmem:[#allocation2 + $0x778] sm:$0xf0] }
 0x4ab   :  { %v11145_v6 = vld [vmem:[#allocation2 + $0x1658] sm:$0xf]  ;;  %v10890_v31 = vor.u32 %v13126_v14, %v10889_v28  ;;  %6082 = vmatpush.bf16.msra.mxu2 %v11434_v13  ;;  %v8430_v13 = vor.u32 %v12506_v60, %v8427_v61  ;;  %v8750_v28 = vor.u32 %v12586_v1, %v8747_v8  ;;  %v12498_v14 = vld [vmem:[#allocation2 + $0xdc] sm:$0xf] }
 0x4ac   :  { %v13190_v17 = vld [vmem:[#allocation2 + $0x1674] sm:$0xf0]  ;;  %v12570_v50 = vld [vmem:[#allocation2 + $0x31c] sm:$0xf] }
 0x4ad   :  { %v11401_v7 = vld [vmem:[#allocation2 + $0x1858] sm:$0xf]  ;;  %v11146_v37 = vor.u32 %v13190_v17, %v11145_v6  ;;  %6057 = vmatpush.bf16.msra.mxu0 %v10890_v31  ;;  %6091 = vmatpush.bf16.msra.mxu3 %v8494_v47  ;;  %v8395_v6 = vld [vmem:[#allocation2 + $0xf8] sm:$0xf0]  ;;  %v9262_v17 = vor.u32 %v12714_v21, %v9259_v5  ;;  %v8974_v47 = vor.u32 %v12642_v20, %v8971_v45 }
 0x4ae   :  { %v13254_v18 = vld [vmem:[#allocation2 + $0x1874] sm:$0xf0]  ;;  %v12706_v31 = vld [vmem:[#allocation2 + $0x75c] sm:$0xf] }
 0x4af   :  { %v10857_v34 = vld [vmem:[#allocation2 + $0x1418] sm:$0xf]  ;;  %v11402_v39 = vor.u32 %v13254_v18, %v11401_v7  ;;  %6070 = vmatpush.bf16.msra.mxu1 %v11146_v37  ;;  %v12578_v7 = vld [vmem:[#allocation2 + $0x35c] sm:$0xf]  ;;  %v5815_v57 = vpop.f32.mrf.mxu1 }
 0x4b0   :  { %v13118_v36 = vld [vmem:[#allocation2 + $0x1434] sm:$0xf0]  ;;  %v8715_v18 = vld [vmem:[#allocation2 + $0x378] sm:$0xf0] }
 0x4b1   :  { %v11113_v4 = vld [vmem:[#allocation2 + $0x1618] sm:$0xf]  ;;  %v10858_v54 = vor.u32 %v13118_v36, %v10857_v34  ;;  %6083 = vmatpush.bf16.msra.mxu2 %v11402_v39  ;;  %6092 = vmatpush.bf16.msra.mxu3 %v8462_v15  ;;  %v5826_v34 = vpop.f32.mrf.mxu2  ;;  %v8398_v36 = vor.u32 %v12498_v14, %v8395_v6  ;;  %v8718_v37 = vor.u32 %v12578_v7, %v8715_v18  ;;  %v12490_v39 = vld [vmem:[#allocation2 + $0x9c] sm:$0xf] }
 0x4b2   :  { %v13182_v43 = vld [vmem:[#allocation2 + $0x1634] sm:$0xf0]  ;;  %v8683_v35 = vld [vmem:[#allocation2 + $0x338] sm:$0xf0] }
 0x4b3   :  { %v11369_v46 = vld [vmem:[#allocation2 + $0x1818] sm:$0xf]  ;;  %v11114_v58 = vor.u32 %v13182_v43, %v11113_v4  ;;  %6058 = vmatpush.bf16.msra.mxu0 %v10858_v54  ;;  %v8363_v4 = vld [vmem:[#allocation2 + $0xb8] sm:$0xf0]  ;;  %v5827_v43 = vadd.f32 %v5826_v34, %v5814_v12 }
 0x4b4   :  { %v13246_v48 = vld [vmem:[#allocation2 + $0x1834] sm:$0xf0]  ;;  %v12634_v51 = vld [vmem:[#allocation2 + $0x51c] sm:$0xf] }
 0x4b5   :  { %v11370_v59 = vor.u32 %v13246_v48, %v11369_v46  ;;  %6071 = vmatpush.bf16.msra.mxu1 %v11114_v58  ;;  %6093 = vmatpush.bf16.msra.mxu3 %v8430_v13  ;;  %v5839_v46 = vpop.f32.mrf.mxu3  ;;  %v9230_v48 = vor.u32 %v12706_v31, %v9227_v40  ;;  %v8939_v52 = vld [vmem:[#allocation2 + $0x538] sm:$0xf0]  ;;  %v8366_v58 = vor.u32 %v12490_v39, %v8363_v4  ;;  %v5854_v40 = vpop.f32.mrf.mxu0 }
 0x4b6   :  { %6059 = vmatmul.bf16.vlgmr.msra.gmra.mxu0 %v13748_v23  ;;  %v12698_v53 = vld [vmem:[#allocation2 + $0x71c] sm:$0xf]  ;;  %v5840_v55 = vadd.f32 %v5839_v46, %v5827_v43  ;;  %v8942_v61 = vor.u32 %v12634_v51, %v8939_v52 }
 0x4b7   :  { %6084 = vmatpush.bf16.msra.mxu2 %v11370_v59  ;;  %6103 = vmatpush.bf16.msrb.mxu0 %v8782_v11  ;;  %v9195_v54 = vld [vmem:[#allocation2 + $0x738] sm:$0xf0]  ;;  %v8686_v59 = vor.u32 %v12570_v50, %v8683_v35 }
 0x4b8   :  { %6072 = vmatmul.bf16.vlgmr.msra.gmra.mxu1 %v13752_v29  ;;  %v12482_v15 = vld [vmem:[#allocation2 + $0x5c] sm:$0xf]  ;;  %v13896_v60 = vadd.f32 %v5852_v56, %v5840_v55 }
 0x4b9   :  { %6116 = vmatpush.bf16.msrb.mxu1 %v9038_v63  ;;  %6094 = vmatpush.bf16.msra.mxu3 %v8398_v36  ;;  %v8331_v11 = vld [vmem:[#allocation2 + $0x78] sm:$0xf0]  ;;  %v9198_v63 = vor.u32 %v12698_v53, %v9195_v54  ;;  %v5828_v5 = vpop.f32.mrf.mxu2 }
 0x4ba   :  { %v8651_v1 = vld [vmem:[#allocation2 + $0x2f8] sm:$0xf0]  ;;  %11445 = vmatmul.msk.bf16.vlgmr.msra.gmra.mxu2 %vm4903_vm0, %v13758_v22  ;;  %v8334_v9 = vor.u32 %v12482_v15, %v8331_v11 }
 0x4bb   :  { %6129 = vmatpush.bf16.msrb.mxu2 %v9294_v0  ;;  %6104 = vmatpush.bf16.msrb.mxu0 %v8750_v28  ;;  %v12562_v0 = vld [vmem:[#allocation2 + $0x2dc] sm:$0xf] }
 0x4bc   :  { %v12626_v8 = vld [vmem:[#allocation2 + $0x4dc] sm:$0xf]  ;;  %v8654_v12 = vor.u32 %v12562_v0, %v8651_v1 }
 0x4bd   :  { %6117 = vmatpush.bf16.msrb.mxu1 %v9006_v16  ;;  %v8907_v62 = vld [vmem:[#allocation2 + $0x4f8] sm:$0xf0]  ;;  %6095 = vmatpush.bf16.msra.mxu3 %v8366_v58  ;;  %v5841_v14 = vpop.f32.mrf.mxu3 }
 0x4be   :  { %v12690_v2 = vld [vmem:[#allocation2 + $0x6dc] sm:$0xf]  ;;  %v8910_v6 = vor.u32 %v12626_v8, %v8907_v62 }
 0x4bf   :  { %6130 = vmatpush.bf16.msrb.mxu2 %v9262_v17  ;;  %6105 = vmatpush.bf16.msrb.mxu0 %v8718_v37  ;;  %v9163_v21 = vld [vmem:[#allocation2 + $0x6f8] sm:$0xf0] }
 0x4c0   :  { %v12474_v13 = vld [vmem:[#allocation2 + $0x1c] sm:$0xf]  ;;  %v9166_v16 = vor.u32 %v12690_v2, %v9163_v21 }
 0x4c1   :  { %6118 = vmatpush.bf16.msrb.mxu1 %v8974_v47  ;;  %v8299_v28 = vld [vmem:[#allocation2 + $0x38] sm:$0xf0]  ;;  %6096 = vmatpush.bf16.msra.mxu3 %v8334_v9 }
 0x4c2   :  { %v12554_v17 = vld [vmem:[#allocation2 + $0x29c] sm:$0xf]  ;;  %v8302_v37 = vor.u32 %v12474_v13, %v8299_v28 }
 0x4c3   :  { %6131 = vmatpush.bf16.msrb.mxu2 %v9230_v48  ;;  %6106 = vmatpush.bf16.msrb.mxu0 %v8686_v59  ;;  %v8619_v7 = vld [vmem:[#allocation2 + $0x2b8] sm:$0xf0] }
 0x4c4   :  { %v12618_v18 = vld [vmem:[#allocation2 + $0x49c] sm:$0xf]  ;;  %v8622_v39 = vor.u32 %v12554_v17, %v8619_v7 }
 0x4c5   :  { %6119 = vmatpush.bf16.msrb.mxu1 %v8942_v61  ;;  %v8875_v20 = vld [vmem:[#allocation2 + $0x4b8] sm:$0xf0]  ;;  %6097 = vmatpush.bf16.msra.mxu3 %v8302_v37 }
 0x4c6   :  { %v12682_v45 = vld [vmem:[#allocation2 + $0x69c] sm:$0xf]  ;;  %v8878_v4 = vor.u32 %v12618_v18, %v8875_v20 }
 0x4c7   :  { %6132 = vmatpush.bf16.msrb.mxu2 %v9198_v63  ;;  %v9131_v31 = vld [vmem:[#allocation2 + $0x6b8] sm:$0xf0]  ;;  %6107 = vmatpush.bf16.msrb.mxu0 %v8654_v12 }
 0x4c8   :  { %v12786_v34 = vld [vmem:[#allocation2 + $0x9dc] sm:$0xf]  ;;  %v9134_v43 = vor.u32 %v12682_v45, %v9131_v31  ;;  %6098 = vmatmul.bf16.vlgmr.msra.gmra.mxu3 %v13718_v27  ;;  %v5865_v45 = vpop.f32.mrf.mxu1 }
 0x4c9   :  { %v9547_v36 = vld [vmem:[#allocation2 + $0x9f8] sm:$0xf0]  ;;  %6120 = vmatpush.bf16.msrb.mxu1 %v8910_v6 }
 0x4ca   :  { %v12546_v46 = vld [vmem:[#allocation2 + $0x25c] sm:$0xf]  ;;  %v9550_v50 = vor.u32 %v12786_v34, %v9547_v36  ;;  %v5866_v34 = vadd.f32 %v5865_v45, %v13896_v60 }
 0x4cb   :  { %6133 = vmatpush.bf16.msrb.mxu2 %v9166_v16  ;;  %v8587_v47 = vld [vmem:[#allocation2 + $0x278] sm:$0xf0]  ;;  %6108 = vmatpush.bf16.msrb.mxu0 %v8622_v39 }
 0x4cc   :  { %v12610_v48 = vld [vmem:[#allocation2 + $0x45c] sm:$0xf]  ;;  %v8590_v55 = vor.u32 %v12546_v46, %v8587_v47  ;;  %6142 = vmatpush.bf16.msrb.mxu3 %v9550_v50 }
 0x4cd   :  { %v8843_v35 = vld [vmem:[#allocation2 + $0x478] sm:$0xf0]  ;;  %6121 = vmatpush.bf16.msrb.mxu1 %v8878_v4 }
 0x4ce   :  { %v12674_v51 = vld [vmem:[#allocation2 + $0x65c] sm:$0xf]  ;;  %v8846_v58 = vor.u32 %v12610_v48, %v8843_v35 }
 0x4cf   :  { %v9099_v52 = vld [vmem:[#allocation2 + $0x678] sm:$0xf0]  ;;  %6134 = vmatpush.bf16.msrb.mxu2 %v9134_v43  ;;  %6109 = vmatpush.bf16.msrb.mxu0 %v8590_v55 }
 0x4d0   :  { %v12778_v53 = vld [vmem:[#allocation2 + $0x99c] sm:$0xf]  ;;  %v9102_v59 = vor.u32 %v12674_v51, %v9099_v52 }
 0x4d1   :  { %v9515_v54 = vld [vmem:[#allocation2 + $0x9b8] sm:$0xf0]  ;;  %6122 = vmatpush.bf16.msrb.mxu1 %v8846_v58  ;;  %v5891_v58 = vpop.f32.mrf.mxu3 }
 0x4d2   :  { %v12538_v56 = vld [vmem:[#allocation2 + $0x21c] sm:$0xf]  ;;  %v9518_v63 = vor.u32 %v12778_v53, %v9515_v54 }
 0x4d3   :  { %v8555_v57 = vld [vmem:[#allocation2 + $0x238] sm:$0xf0]  ;;  %6135 = vmatpush.bf16.msrb.mxu2 %v9102_v59 }
 0x4d4   :  { %v12602_v15 = vld [vmem:[#allocation2 + $0x41c] sm:$0xf]  ;;  %v8558_v5 = vor.u32 %v12538_v56, %v8555_v57  ;;  %6143 = vmatpush.bf16.msrb.mxu3 %v9518_v63  ;;  %v5878_v56 = vpop.f32.mrf.mxu2 }
 0x4d5   :  { %v8811_v11 = vld [vmem:[#allocation2 + $0x438] sm:$0xf0] }
 0x4d6   :  { %v12666_v61 = vld [vmem:[#allocation2 + $0x61c] sm:$0xf]  ;;  %v8814_v28 = vor.u32 %v12602_v15, %v8811_v11  ;;  %6110 = vmatpush.bf16.msrb.mxu0 %v8558_v5  ;;  %v5879_v11 = vadd.f32 %v5878_v56, %v5866_v34 }
 0x4d7   :  { %v9067_v0 = vld [vmem:[#allocation2 + $0x638] sm:$0xf0] }
 0x4d8   :  { %v12770_v1 = vld [vmem:[#allocation2 + $0x95c] sm:$0xf]  ;;  %v9070_v14 = vor.u32 %v12666_v61, %v9067_v0  ;;  %6123 = vmatpush.bf16.msrb.mxu1 %v8814_v28  ;;  %v5867_v0 = vpop.f32.mrf.mxu1 }
 0x4d9   :  { %v9483_v8 = vld [vmem:[#allocation2 + $0x978] sm:$0xf0]  ;;  %6111 = vmatmul.bf16.vlgmr.msrb.gmra.mxu0 %v13722_v33  ;;  %v5904_v33 = vpop.f32.mrf.mxu0 }
 0x4da   :  { %v12850_v62 = vld [vmem:[#allocation2 + $0xbdc] sm:$0xf]  ;;  %v9486_v6 = vor.u32 %v12770_v1, %v9483_v8  ;;  %6136 = vmatpush.bf16.msrb.mxu2 %v9070_v14 }
 0x4db   :  { %v9803_v2 = vld [vmem:[#allocation2 + $0xbf8] sm:$0xf0]  ;;  %6124 = vmatmul.bf16.vlgmr.msrb.gmra.mxu1 %v13716_v26 }
 0x4dc   :  { %v12914_v21 = vld [vmem:[#allocation2 + $0xddc] sm:$0xf]  ;;  %v9806_v16 = vor.u32 %v12850_v62, %v9803_v2  ;;  %6144 = vmatpush.bf16.msrb.mxu3 %v9486_v6 }
 0x4dd   :  { %v10059_v9 = vld [vmem:[#allocation2 + $0xdf8] sm:$0xf0]  ;;  %6137 = vmatmul.bf16.vlgmr.msrb.gmra.mxu2 %v13720_v32 }
 0x4de   :  { %v12978_v12 = vld [vmem:[#allocation2 + $0xfdc] sm:$0xf]  ;;  %v10062_v18 = vor.u32 %v12914_v21, %v10059_v9  ;;  %6155 = vmatpush.bf16.msra.mxu0 %v9806_v16  ;;  %v5892_v21 = vadd.f32 %v5891_v58, %v5879_v11 }
 0x4df   :  { %v10315_v13 = vld [vmem:[#allocation2 + $0xff8] sm:$0xf0] }
 0x4e0   :  { %v12762_v17 = vld [vmem:[#allocation2 + $0x91c] sm:$0xf]  ;;  %v10318_v20 = vor.u32 %v12978_v12, %v10315_v13  ;;  %6168 = vmatpush.bf16.msra.mxu1 %v10062_v18  ;;  %v5905_v28 = vadd.f32 %v5904_v33, %v5892_v21 }
 0x4e1   :  { %v9451_v7 = vld [vmem:[#allocation2 + $0x938] sm:$0xf0] }
 0x4e2   :  { %v12842_v31 = vld [vmem:[#allocation2 + $0xb9c] sm:$0xf]  ;;  %v9454_v4 = vor.u32 %v12762_v17, %v9451_v7  ;;  %6181 = vmatpush.bf16.msra.mxu2 %v10318_v20 }
 0x4e3   :  { %v9771_v40 = vld [vmem:[#allocation2 + $0xbb8] sm:$0xf0] }
 0x4e4   :  { %v12906_v27 = vld [vmem:[#allocation2 + $0xd9c] sm:$0xf]  ;;  %v9774_v43 = vor.u32 %v12842_v31, %v9771_v40  ;;  %6145 = vmatpush.bf16.msrb.mxu3 %v9454_v4 }
 0x4e5   :  { %v10027_v36 = vld [vmem:[#allocation2 + $0xdb8] sm:$0xf0] }
 0x4e6   :  { %v12970_v37 = vld [vmem:[#allocation2 + $0xf9c] sm:$0xf]  ;;  %v10030_v48 = vor.u32 %v12906_v27, %v10027_v36  ;;  %6156 = vmatpush.bf16.msra.mxu0 %v9774_v43  ;;  %v5893_v36 = vpop.f32.mrf.mxu3 }
 0x4e7   :  { %v10283_v39 = vld [vmem:[#allocation2 + $0xfb8] sm:$0xf0] }
 0x4e8   :  { %v12754_v46 = vld [vmem:[#allocation2 + $0x8dc] sm:$0xf]  ;;  %v10286_v50 = vor.u32 %v12970_v37, %v10283_v39  ;;  %6169 = vmatpush.bf16.msra.mxu1 %v10030_v48  ;;  %v5880_v37 = vpop.f32.mrf.mxu2 }
 0x4e9   :  { %v9419_v47 = vld [vmem:[#allocation2 + $0x8f8] sm:$0xf0] }
 0x4ea   :  { %v12834_v35 = vld [vmem:[#allocation2 + $0xb5c] sm:$0xf]  ;;  %v9422_v55 = vor.u32 %v12754_v46, %v9419_v47  ;;  %6182 = vmatpush.bf16.msra.mxu2 %v10286_v50 }
 0x4eb   :  { %v9739_v51 = vld [vmem:[#allocation2 + $0xb78] sm:$0xf0] }
 0x4ec   :  { %v12898_v52 = vld [vmem:[#allocation2 + $0xd5c] sm:$0xf]  ;;  %v9742_v57 = vor.u32 %v12834_v35, %v9739_v51  ;;  %6146 = vmatpush.bf16.msrb.mxu3 %v9422_v55  ;;  %v5906_v51 = vpop.f32.mrf.mxu0 }
 0x4ed   :  { %v9995_v53 = vld [vmem:[#allocation2 + $0xd78] sm:$0xf0] }
 0x4ee   :  { %v12962_v60 = vld [vmem:[#allocation2 + $0xf5c] sm:$0xf]  ;;  %v9998_v61 = vor.u32 %v12898_v52, %v9995_v53  ;;  %6157 = vmatpush.bf16.msra.mxu0 %v9742_v57  ;;  %v5917_v52 = vpop.f32.mrf.mxu1 }
 0x4ef   :  { %v10251_v54 = vld [vmem:[#allocation2 + $0xf78] sm:$0xf0] }
 0x4f0   :  { %v12746_v59 = vld [vmem:[#allocation2 + $0x89c] sm:$0xf]  ;;  %v10254_v63 = vor.u32 %v12962_v60, %v10251_v54  ;;  %6170 = vmatpush.bf16.msra.mxu1 %v9998_v61  ;;  %v13905_v54 = vadd.f32 %v5917_v52, %v5905_v28 }
 0x4f1   :  { %v9387_v15 = vld [vmem:[#allocation2 + $0x8b8] sm:$0xf0] }
 0x4f2   :  { %v12826_v1 = vld [vmem:[#allocation2 + $0xb1c] sm:$0xf]  ;;  %v9390_v5 = vor.u32 %v12746_v59, %v9387_v15  ;;  %6183 = vmatpush.bf16.msra.mxu2 %v10254_v63 }
 0x4f3   :  { %v9707_v32 = vld [vmem:[#allocation2 + $0xb38] sm:$0xf0] }
 0x4f4   :  { %v12890_v8 = vld [vmem:[#allocation2 + $0xd1c] sm:$0xf]  ;;  %v9710_v9 = vor.u32 %v12826_v1, %v9707_v32  ;;  %6147 = vmatpush.bf16.msrb.mxu3 %v9390_v5 }
 0x4f5   :  { %v9963_v62 = vld [vmem:[#allocation2 + $0xd38] sm:$0xf0] }
 0x4f6   :  { %v12954_v26 = vld [vmem:[#allocation2 + $0xf1c] sm:$0xf]  ;;  %v9966_v14 = vor.u32 %v12890_v8, %v9963_v62  ;;  %6158 = vmatpush.bf16.msra.mxu0 %v9710_v9 }
 0x4f7   :  { %v10219_v2 = vld [vmem:[#allocation2 + $0xf38] sm:$0xf0] }
 0x4f8   :  { %v12738_v12 = vld [vmem:[#allocation2 + $0x85c] sm:$0xf]  ;;  %v10222_v6 = vor.u32 %v12954_v26, %v10219_v2  ;;  %6171 = vmatpush.bf16.msra.mxu1 %v9966_v14 }
 0x4f9   :  { %v9355_v13 = vld [vmem:[#allocation2 + $0x878] sm:$0xf0] }
 0x4fa   :  { %v12818_v16 = vld [vmem:[#allocation2 + $0xadc] sm:$0xf]  ;;  %v9358_v31 = vor.u32 %v12738_v12, %v9355_v13  ;;  %6184 = vmatpush.bf16.msra.mxu2 %v10222_v6 }
 0x4fb   :  { %v9675_v17 = vld [vmem:[#allocation2 + $0xaf8] sm:$0xf0] }
 0x4fc   :  { %v12882_v7 = vld [vmem:[#allocation2 + $0xcdc] sm:$0xf]  ;;  %v9678_v40 = vor.u32 %v12818_v16, %v9675_v17  ;;  %6148 = vmatpush.bf16.msrb.mxu3 %v9358_v31 }
 0x4fd   :  { %v9931_v18 = vld [vmem:[#allocation2 + $0xcf8] sm:$0xf0] }
 0x4fe   :  { %v12946_v20 = vld [vmem:[#allocation2 + $0xedc] sm:$0xf]  ;;  %v9934_v39 = vor.u32 %v12882_v7, %v9931_v18  ;;  %6159 = vmatpush.bf16.msra.mxu0 %v9678_v40  ;;  %v5919_v18 = vpop.f32.mrf.mxu1 }
 0x4ff   :  { %v10187_v45 = vld [vmem:[#allocation2 + $0xef8] sm:$0xf0] }
 0x500   :  { %v12730_v27 = vld [vmem:[#allocation2 + $0x81c] sm:$0xf]  ;;  %v10190_v4 = vor.u32 %v12946_v20, %v10187_v45  ;;  %6172 = vmatpush.bf16.msra.mxu1 %v9934_v39 }
 0x501   :  { %v9323_v34 = vld [vmem:[#allocation2 + $0x838] sm:$0xf0] }
 0x502   :  { %v12810_v43 = vld [vmem:[#allocation2 + $0xa9c] sm:$0xf]  ;;  %v9326_v55 = vor.u32 %v12730_v27, %v9323_v34  ;;  %6185 = vmatpush.bf16.msra.mxu2 %v10190_v4 }
 0x503   :  { %v9643_v46 = vld [vmem:[#allocation2 + $0xab8] sm:$0xf0] }
 0x504   :  { %v12874_v47 = vld [vmem:[#allocation2 + $0xc9c] sm:$0xf]  ;;  %v9646_v56 = vor.u32 %v12810_v43, %v9643_v46  ;;  %6149 = vmatpush.bf16.msrb.mxu3 %v9326_v55 }
 0x505   :  { %v9899_v48 = vld [vmem:[#allocation2 + $0xcb8] sm:$0xf0] }
 0x506   :  { %v12938_v50 = vld [vmem:[#allocation2 + $0xe9c] sm:$0xf]  ;;  %v9902_v57 = vor.u32 %v12874_v47, %v9899_v48  ;;  %6160 = vmatpush.bf16.msra.mxu0 %v9646_v56 }
 0x507   :  { %v10155_v35 = vld [vmem:[#allocation2 + $0xeb8] sm:$0xf0]  ;;  %6150 = vmatmul.bf16.vlgmr.msrb.gmra.mxu3 %v13736_v41 }
 0x508   :  { %v13042_v53 = vld [vmem:[#allocation2 + $0x11dc] sm:$0xf]  ;;  %v10158_v58 = vor.u32 %v12938_v50, %v10155_v35  ;;  %6173 = vmatpush.bf16.msra.mxu1 %v9902_v57 }
 0x509   :  { %v10571_v60 = vld [vmem:[#allocation2 + $0x11f8] sm:$0xf0] }
 0x50a   :  { %v12802_v59 = vld [vmem:[#allocation2 + $0xa5c] sm:$0xf]  ;;  %v10574_v61 = vor.u32 %v13042_v53, %v10571_v60  ;;  %6186 = vmatpush.bf16.msra.mxu2 %v10158_v58 }
 0x50b   :  { %v9611_v15 = vld [vmem:[#allocation2 + $0xa78] sm:$0xf0] }
 0x50c   :  { %v12866_v11 = vld [vmem:[#allocation2 + $0xc5c] sm:$0xf]  ;;  %v9614_v33 = vor.u32 %v12802_v59, %v9611_v15  ;;  %6194 = vmatpush.bf16.msra.mxu3 %v10574_v61 }
 0x50d   :  { %v9867_v63 = vld [vmem:[#allocation2 + $0xc78] sm:$0xf0] }
 0x50e   :  { %v12930_v0 = vld [vmem:[#allocation2 + $0xe5c] sm:$0xf]  ;;  %v9870_v2 = vor.u32 %v12866_v11, %v9867_v63  ;;  %6161 = vmatpush.bf16.msra.mxu0 %v9614_v33 }
 0x50f   :  { %v10123_v1 = vld [vmem:[#allocation2 + $0xe78] sm:$0xf0] }
 0x510   :  { %v13034_v32 = vld [vmem:[#allocation2 + $0x119c] sm:$0xf]  ;;  %v10126_v21 = vor.u32 %v12930_v0, %v10123_v1  ;;  %6174 = vmatpush.bf16.msra.mxu1 %v9870_v2  ;;  %v13911_v0 = vpop.f32.mrf.mxu2 }
 0x511   :  { %v10539_v8 = vld [vmem:[#allocation2 + $0x11b8] sm:$0xf0] }
 0x512   :  { %v12794_v62 = vld [vmem:[#allocation2 + $0xa1c] sm:$0xf]  ;;  %v10542_v13 = vor.u32 %v13034_v32, %v10539_v8  ;;  %6187 = vmatpush.bf16.msra.mxu2 %v10126_v21 }
 0x513   :  { %v9579_v26 = vld [vmem:[#allocation2 + $0xa38] sm:$0xf0] }
 0x514   :  { %v12858_v5 = vld [vmem:[#allocation2 + $0xc1c] sm:$0xf]  ;;  %v9582_v20 = vor.u32 %v12794_v62, %v9579_v26  ;;  %6195 = vmatpush.bf16.msra.mxu3 %v10542_v13  ;;  %v13913_v62 = vpop.f32.mrf.mxu3  ;;  %v13917_v13 = vpop.f32.mrf.mxu1 }
 0x515   :  { %v9835_v9 = vld [vmem:[#allocation2 + $0xc38] sm:$0xf0] }
 0x516   :  { %v12922_v12 = vld [vmem:[#allocation2 + $0xe1c] sm:$0xf]  ;;  %v9838_v27 = vor.u32 %v12858_v5, %v9835_v9  ;;  %6162 = vmatpush.bf16.msra.mxu0 %v9582_v20 }
 0x517   :  { %v10091_v28 = vld [vmem:[#allocation2 + $0xe38] sm:$0xf0] }
 0x518   :  { %v13026_v14 = vld [vmem:[#allocation2 + $0x115c] sm:$0xf]  ;;  %v10094_v34 = vor.u32 %v12922_v12, %v10091_v28  ;;  %6175 = vmatpush.bf16.msra.mxu1 %v9838_v27  ;;  %v13915_v12 = vpop.f32.mrf.mxu0 }
 0x519   :  { %v10507_v6 = vld [vmem:[#allocation2 + $0x1178] sm:$0xf0]  ;;  %6163 = vmatmul.bf16.vlgmr.msra.gmra.mxu0 %v13740_v44 }
 0x51a   :  { %v13106_v16 = vld [vmem:[#allocation2 + $0x13dc] sm:$0xf]  ;;  %v10510_v36 = vor.u32 %v13026_v14, %v10507_v6  ;;  %6188 = vmatpush.bf16.msra.mxu2 %v10094_v34  ;;  %v5932_v34 = vpop.f32.mrf.mxu2 }
 0x51b   :  { %v10827_v17 = vld [vmem:[#allocation2 + $0x13f8] sm:$0xf0]  ;;  %6176 = vmatmul.bf16.vlgmr.msra.gmra.mxu1 %v13734_v38  ;;  %v13357_v34 = vld [vmem:[#allocation7 + $0x2ec] sm:$0xf0] }
 0x51c   :  { %v13170_v7 = vld [vmem:[#allocation2 + $0x15dc] sm:$0xf]  ;;  %v10830_v37 = vor.u32 %v13106_v16, %v10827_v17  ;;  %6196 = vmatpush.bf16.msra.mxu3 %v10510_v36 }
 0x51d   :  { %v11083_v45 = vld [vmem:[#allocation2 + $0x15f8] sm:$0xf0]  ;;  %6189 = vmatmul.bf16.vlgmr.msra.gmra.mxu2 %v13738_v42 }
 0x51e   :  { %v13234_v31 = vld [vmem:[#allocation2 + $0x17dc] sm:$0xf]  ;;  %v11086_v43 = vor.u32 %v13170_v7, %v11083_v45  ;;  %6207 = vmatpush.bf16.msrb.mxu0 %v10830_v37 }
 0x51f   :  { %v11339_v40 = vld [vmem:[#allocation2 + $0x17f8] sm:$0xf0] }
 0x520   :  { %v13018_v39 = vld [vmem:[#allocation2 + $0x111c] sm:$0xf]  ;;  %v11342_v41 = vor.u32 %v13234_v31, %v11339_v40  ;;  %6220 = vmatpush.bf16.msrb.mxu1 %v11086_v43  ;;  %v5945_v43 = vpop.f32.mrf.mxu3 }
 0x521   :  { %v10475_v4 = vld [vmem:[#allocation2 + $0x1138] sm:$0xf0] }
 0x522   :  { %v13098_v46 = vld [vmem:[#allocation2 + $0x139c] sm:$0xf]  ;;  %v10478_v52 = vor.u32 %v13018_v39, %v10475_v4  ;;  %6233 = vmatpush.bf16.msrb.mxu2 %v11342_v41 }
 0x523   :  { %v10795_v47 = vld [vmem:[#allocation2 + $0x13b8] sm:$0xf0] }
 0x524   :  { %v13162_v48 = vld [vmem:[#allocation2 + $0x159c] sm:$0xf]  ;;  %v10798_v53 = vor.u32 %v13098_v46, %v10795_v47  ;;  %6197 = vmatpush.bf16.msra.mxu3 %v10478_v52 }
 0x525   :  { %v11051_v50 = vld [vmem:[#allocation2 + $0x15b8] sm:$0xf0] }
 0x526   :  { %v13226_v35 = vld [vmem:[#allocation2 + $0x179c] sm:$0xf]  ;;  %v11054_v56 = vor.u32 %v13162_v48, %v11051_v50  ;;  %6208 = vmatpush.bf16.msrb.mxu0 %v10798_v53  ;;  %v5958_v53 = vpop.f32.mrf.mxu0 }
 0x527   :  { %v11307_v51 = vld [vmem:[#allocation2 + $0x17b8] sm:$0xf0]  ;;  %v13353_v53 = vld [vmem:[#allocation7 + $0x2cc] sm:$0xf0] }
 0x528   :  { %v13010_v60 = vld [vmem:[#allocation2 + $0x10dc] sm:$0xf]  ;;  %v11310_v57 = vor.u32 %v13226_v35, %v11307_v51  ;;  %6221 = vmatpush.bf16.msrb.mxu1 %v11054_v56  ;;  %v5971_v56 = vpop.f32.mrf.mxu1 }
 0x529   :  { %v10443_v55 = vld [vmem:[#allocation2 + $0x10f8] sm:$0xf0] }
 0x52a   :  { %v13090_v58 = vld [vmem:[#allocation2 + $0x135c] sm:$0xf]  ;;  %v10446_v1 = vor.u32 %v13010_v60, %v10443_v55  ;;  %6234 = vmatpush.bf16.msrb.mxu2 %v11310_v57 }
 0x52b   :  { %v10763_v59 = vld [vmem:[#allocation2 + $0x1378] sm:$0xf0] }
 0x52c   :  { %v13154_v15 = vld [vmem:[#allocation2 + $0x155c] sm:$0xf]  ;;  %v10766_v32 = vor.u32 %v13090_v58, %v10763_v59  ;;  %6198 = vmatpush.bf16.msra.mxu3 %v10446_v1 }
 0x52d   :  { %v11019_v11 = vld [vmem:[#allocation2 + $0x1578] sm:$0xf0] }
 0x52e   :  { %v13218_v61 = vld [vmem:[#allocation2 + $0x175c] sm:$0xf]  ;;  %v11022_v42 = vor.u32 %v13154_v15, %v11019_v11  ;;  %6209 = vmatpush.bf16.msrb.mxu0 %v10766_v32 }
 0x52f   :  { %v11275_v63 = vld [vmem:[#allocation2 + $0x1778] sm:$0xf0] }
 0x530   :  { %v13002_v8 = vld [vmem:[#allocation2 + $0x109c] sm:$0xf]  ;;  %v11278_v26 = vor.u32 %v13218_v61, %v11275_v63  ;;  %6222 = vmatpush.bf16.msrb.mxu1 %v11022_v42 }
 0x531   :  { %v10411_v33 = vld [vmem:[#allocation2 + $0x10b8] sm:$0xf0] }
 0x532   :  { %v13082_v44 = vld [vmem:[#allocation2 + $0x131c] sm:$0xf]  ;;  %v10414_v28 = vor.u32 %v13002_v8, %v10411_v33  ;;  %6235 = vmatpush.bf16.msrb.mxu2 %v11278_v26 }
 0x533   :  { %v10731_v2 = vld [vmem:[#allocation2 + $0x1338] sm:$0xf0] }
 0x534   :  { %v13146_v21 = vld [vmem:[#allocation2 + $0x151c] sm:$0xf]  ;;  %v10734_v14 = vor.u32 %v13082_v44, %v10731_v2  ;;  %6199 = vmatpush.bf16.msra.mxu3 %v10414_v28 }
 0x535   :  { %v10987_v5 = vld [vmem:[#allocation2 + $0x1538] sm:$0xf0] }
 0x536   :  { %v13210_v9 = vld [vmem:[#allocation2 + $0x171c] sm:$0xf]  ;;  %v10990_v17 = vor.u32 %v13146_v21, %v10987_v5  ;;  %6210 = vmatpush.bf16.msrb.mxu0 %v10734_v14 }
 0x537   :  { %v11243_v38 = vld [vmem:[#allocation2 + $0x1738] sm:$0xf0] }
 0x538   :  { %v12994_v6 = vld [vmem:[#allocation2 + $0x105c] sm:$0xf]  ;;  %v11246_v7 = vor.u32 %v13210_v9, %v11243_v38  ;;  %6223 = vmatpush.bf16.msrb.mxu1 %v10990_v17 }
 0x539   :  { %v10379_v16 = vld [vmem:[#allocation2 + $0x1078] sm:$0xf0] }
 0x53a   :  { %v13074_v18 = vld [vmem:[#allocation2 + $0x12dc] sm:$0xf]  ;;  %v10382_v36 = vor.u32 %v12994_v6, %v10379_v16  ;;  %6236 = vmatpush.bf16.msrb.mxu2 %v11246_v7 }
 0x53b   :  { %v10699_v20 = vld [vmem:[#allocation2 + $0x12f8] sm:$0xf0] }
 0x53c   :  { %v13138_v45 = vld [vmem:[#allocation2 + $0x14dc] sm:$0xf]  ;;  %v10702_v37 = vor.u32 %v13074_v18, %v10699_v20  ;;  %6200 = vmatpush.bf16.msra.mxu3 %v10382_v36  ;;  %v11561_v18 = vld [vmem:[#allocation7 + $0xe0] sm:$0xf]  ;;  %v13293_v20 = vld [vmem:[#allocation7 + $0xec] sm:$0xf0] }
 0x53d   :  { %v10955_v31 = vld [vmem:[#allocation2 + $0x14f8] sm:$0xf0] }
 0x53e   :  { %v13202_v40 = vld [vmem:[#allocation2 + $0x16dc] sm:$0xf]  ;;  %v10958_v41 = vor.u32 %v13138_v45, %v10955_v31  ;;  %6211 = vmatpush.bf16.msrb.mxu0 %v10702_v37  ;;  %v11689_v45 = vld [vmem:[#allocation7 + $0x1e0] sm:$0xf] }
 0x53f   :  { %v11211_v27 = vld [vmem:[#allocation2 + $0x16f8] sm:$0xf0] }
 0x540   :  { %v12986_v39 = vld [vmem:[#allocation2 + $0x101c] sm:$0xf]  ;;  %v11214_v46 = vor.u32 %v13202_v40, %v11211_v27  ;;  %6224 = vmatpush.bf16.msrb.mxu1 %v10958_v41  ;;  %v13325_v40 = vld [vmem:[#allocation7 + $0x1ec] sm:$0xf0]  ;;  %v11817_v27 = vld [vmem:[#allocation7 + $0x2e0] sm:$0xf]  ;;  %v11562_v41 = vor.u32 %v13293_v20, %v11561_v18  ;;  %v13932_v18 = vpop.f32.mrf.mxu1 }
 0x541   :  { %v10347_v4 = vld [vmem:[#allocation2 + $0x1038] sm:$0xf0] }
 0x542   :  { %v13066_v47 = vld [vmem:[#allocation2 + $0x129c] sm:$0xf]  ;;  %v10350_v57 = vor.u32 %v12986_v39, %v10347_v4  ;;  %6237 = vmatpush.bf16.msrb.mxu2 %v11214_v46  ;;  %v11945_v39 = vld [vmem:[#allocation7 + $0x3e0] sm:$0xf]  ;;  %v13389_v4 = vld [vmem:[#allocation7 + $0x3ec] sm:$0xf0]  ;;  %v11690_v46 = vor.u32 %v13325_v40, %v11689_v45 }
 0x543   :  { %v10667_v48 = vld [vmem:[#allocation2 + $0x12b8] sm:$0xf0] }
 0x544   :  { %v13130_v50 = vld [vmem:[#allocation2 + $0x149c] sm:$0xf]  ;;  %v10670_v58 = vor.u32 %v13066_v47, %v10667_v48  ;;  %6201 = vmatpush.bf16.msra.mxu3 %v10350_v57  ;;  %v11818_v47 = vor.u32 %v13357_v34, %v11817_v27  ;;  %v13289_v48 = vld [vmem:[#allocation7 + $0xcc] sm:$0xf0]  ;;  %v11497_v27 = vld [vmem:[#allocation7 + $0x60] sm:$0xf] }
 0x545   :  { %v10923_v35 = vld [vmem:[#allocation2 + $0x14b8] sm:$0xf0]  ;;  %v13277_v34 = vld [vmem:[#allocation7 + $0x6c] sm:$0xf0] }
 0x546   :  { %v13194_v51 = vld [vmem:[#allocation2 + $0x169c] sm:$0xf]  ;;  %v10926_v59 = vor.u32 %v13130_v50, %v10923_v35  ;;  %6212 = vmatpush.bf16.msrb.mxu0 %v10670_v58  ;;  %v11673_v50 = vld [vmem:[#allocation7 + $0x1c0] sm:$0xf]  ;;  %v11946_v35 = vor.u32 %v13389_v4, %v11945_v39  ;;  %v13309_v39 = vld [vmem:[#allocation7 + $0x16c] sm:$0xf0] }
 0x547   :  { %v11179_v52 = vld [vmem:[#allocation2 + $0x16b8] sm:$0xf0]  ;;  %6202 = vmatmul.bf16.vlgmr.msra.gmra.mxu3 %v13746_v19  ;;  %v11545_v19 = vld [vmem:[#allocation7 + $0xc0] sm:$0xf] }
 0x548   :  { %v13258_v60 = vld [vmem:[#allocation2 + $0x189c] sm:$0xf]  ;;  %v11182_v15 = vor.u32 %v13194_v51, %v11179_v52  ;;  %6225 = vmatpush.bf16.msrb.mxu1 %v10926_v59  ;;  %v13321_v51 = vld [vmem:[#allocation7 + $0x1cc] sm:$0xf0]  ;;  %v11801_v52 = vld [vmem:[#allocation7 + $0x2c0] sm:$0xf]  ;;  %v11546_v56 = vor.u32 %v13289_v48, %v11545_v19  ;;  %v11498_v19 = vor.u32 %v13277_v34, %v11497_v27 }
 0x549   :  { %v11435_v55 = vld [vmem:[#allocation2 + $0x18b8] sm:$0xf0]  ;;  %v11674_v57 = vor.u32 %v13321_v51, %v11673_v50  ;;  %v11802_v58 = vor.u32 %v13353_v53, %v11801_v52  ;;  %v11529_v59 = vld [vmem:[#allocation7 + $0xa0] sm:$0xf]  ;;  %v13273_v52 = vld [vmem:[#allocation7 + $0x4c] sm:$0xf0] }
 0x54a   :  { %v13058_v11 = vld [vmem:[#allocation2 + $0x125c] sm:$0xf]  ;;  %v11438_v1 = vor.u32 %v13258_v60, %v11435_v55  ;;  %6238 = vmatpush.bf16.msrb.mxu2 %v11182_v15  ;;  %v11929_v60 = vld [vmem:[#allocation7 + $0x3c0] sm:$0xf]  ;;  %v13385_v55 = vld [vmem:[#allocation7 + $0x3cc] sm:$0xf0] }
 0x54b   :  { %v10635_v61 = vld [vmem:[#allocation2 + $0x1278] sm:$0xf0]  ;;  %v13285_v15 = vld [vmem:[#allocation7 + $0xac] sm:$0xf0]  ;;  %v11753_v4 = vld [vmem:[#allocation7 + $0x260] sm:$0xf] }
 0x54c   :  { %v13122_v63 = vld [vmem:[#allocation2 + $0x145c] sm:$0xf]  ;;  %v10638_v44 = vor.u32 %v13058_v11, %v10635_v61  ;;  %6251 = vmatpush.bf16.msrb.mxu3 %v11438_v1  ;;  %v11657_v11 = vld [vmem:[#allocation7 + $0x1a0] sm:$0xf]  ;;  %v11930_v61 = vor.u32 %v13385_v55, %v11929_v60  ;;  %v13305_v55 = vld [vmem:[#allocation7 + $0x14c] sm:$0xf0] }
 0x54d   :  { %v10891_v32 = vld [vmem:[#allocation2 + $0x1478] sm:$0xf0]  ;;  %v11785_v1 = vld [vmem:[#allocation7 + $0x2a0] sm:$0xf]  ;;  %v13421_v34 = vld [vmem:[#allocation7 + $0x4ec] sm:$0xf0] }
 0x54e   :  { %v13186_v8 = vld [vmem:[#allocation2 + $0x165c] sm:$0xf]  ;;  %v10894_v5 = vor.u32 %v13122_v63, %v10891_v32  ;;  %6213 = vmatpush.bf16.msrb.mxu0 %v10638_v44  ;;  %v13317_v63 = vld [vmem:[#allocation7 + $0x1ac] sm:$0xf0]  ;;  %v11481_v51 = vld [vmem:[#allocation7 + $0x40] sm:$0xf] }
 0x54f   :  { %v11147_v33 = vld [vmem:[#allocation2 + $0x1678] sm:$0xf0]  ;;  %v13349_v32 = vld [vmem:[#allocation7 + $0x2ac] sm:$0xf0]  ;;  %v11609_v53 = vld [vmem:[#allocation7 + $0x140] sm:$0xf] }
 0x550   :  { %v13250_v42 = vld [vmem:[#allocation2 + $0x185c] sm:$0xf]  ;;  %v11150_v9 = vor.u32 %v13186_v8, %v11147_v33  ;;  %6226 = vmatpush.bf16.msrb.mxu1 %v10894_v5  ;;  %v11913_v8 = vld [vmem:[#allocation7 + $0x3a0] sm:$0xf]  ;;  %v13381_v33 = vld [vmem:[#allocation7 + $0x3ac] sm:$0xf0]  ;;  %v11786_v5 = vor.u32 %v13349_v32, %v11785_v1 }
 0x551   :  { %v11403_v26 = vld [vmem:[#allocation2 + $0x1878] sm:$0xf0]  ;;  %v11465_v1 = vld [vmem:[#allocation7 + $0x20] sm:$0xf]  ;;  %v13269_v32 = vld [vmem:[#allocation7 + $0x2c] sm:$0xf0] }
 0x552   :  { %v13050_v2 = vld [vmem:[#allocation2 + $0x121c] sm:$0xf]  ;;  %v11406_v6 = vor.u32 %v13250_v42, %v11403_v26  ;;  %6239 = vmatpush.bf16.msrb.mxu2 %v11150_v9  ;;  %v13923_v42 = vpop.f32.mrf.mxu2  ;;  %v13925_v26 = vld [vmem:[#allocation5] sm:$0xff]  ;;  %v11513_v9 = vld [vmem:[#allocation7 + $0x80] sm:$0xf] }
 0x553   :  { %v10603_v21 = vld [vmem:[#allocation2 + $0x1238] sm:$0xf0]  ;;  %v933_v44 = vperm.slane %v13925_v26, 6  ;;  %v12073_v27 = vld [vmem:[#allocation7 + $0x4e0] sm:$0xf] }
 0x554   :  { %v13114_v38 = vld [vmem:[#allocation2 + $0x141c] sm:$0xf]  ;;  %v10606_v31 = vor.u32 %v13050_v2, %v10603_v21  ;;  %6252 = vmatpush.bf16.msrb.mxu3 %v11406_v6  ;;  %v11530_v2 = vor.u32 %v13285_v15, %v11529_v59  ;;  %v13928_v21 = vpop.f32.mrf.mxu3  ;;  %v13345_v6 = vld [vmem:[#allocation7 + $0x28c] sm:$0xf0]  ;;  %v6023_v15 = vpop.f32.mrf.mxu1 }
 0x555   :  { %v10859_v28 = vld [vmem:[#allocation2 + $0x1438] sm:$0xf0]  ;;  %v5931_v20 = vadd.f32 %v13911_v0, %v933_v44  ;;  %v13369_v59 = vld [vmem:[#allocation7 + $0x34c] sm:$0xf0]  ;;  %v12041_v15 = vld [vmem:[#allocation7 + $0x4a0] sm:$0xf] }
 0x556   :  { %v13178_v14 = vld [vmem:[#allocation2 + $0x161c] sm:$0xf]  ;;  %v10862_v36 = vor.u32 %v13114_v38, %v10859_v28  ;;  %6214 = vmatpush.bf16.msrb.mxu0 %v10606_v31  ;;  %v11641_v38 = vld [vmem:[#allocation7 + $0x180] sm:$0xf]  ;;  %v13313_v28 = vld [vmem:[#allocation7 + $0x18c] sm:$0xf0] }
 0x557   :  { %v11115_v16 = vld [vmem:[#allocation2 + $0x1638] sm:$0xf0]  ;;  %v11642_v31 = vor.u32 %v13313_v28, %v11641_v38  ;;  %v13301_v44 = vld [vmem:[#allocation7 + $0x12c] sm:$0xf0]  ;;  %v11449_v38 = vld [vmem:[#allocation7] sm:$0xf] }
 0x558   :  { %v13242_v17 = vld [vmem:[#allocation2 + $0x181c] sm:$0xf]  ;;  %v11118_v37 = vor.u32 %v13178_v14, %v11115_v16  ;;  %6227 = vmatpush.bf16.msrb.mxu1 %v10862_v36  ;;  %v11769_v14 = vld [vmem:[#allocation7 + $0x280] sm:$0xf]  ;;  %v13930_v16 = vpop.f32.mrf.mxu0 }
 0x559   :  { %v11371_v7 = vld [vmem:[#allocation2 + $0x1838] sm:$0xf0]  ;;  %6215 = vmatmul.bf16.vlgmr.msrb.gmra.mxu0 %v13750_v24  ;;  %v11658_v24 = vor.u32 %v13317_v63, %v11657_v11  ;;  %v11770_v40 = vor.u32 %v13345_v6, %v11769_v14  ;;  %v11625_v36 = vld [vmem:[#allocation7 + $0x160] sm:$0xf]  ;;  %v11482_v11 = vor.u32 %v13273_v52, %v11481_v51 }
 0x55a   :  { %v11374_v43 = vor.u32 %v13242_v17, %v11371_v7  ;;  %6240 = vmatpush.bf16.msrb.mxu2 %v11118_v37  ;;  %7821 = vmatpush.bf16.msra.mxu0 %v11562_v41  ;;  %v11897_v17 = vld [vmem:[#allocation7 + $0x380] sm:$0xf]  ;;  %v13377_v7 = vld [vmem:[#allocation7 + $0x38c] sm:$0xf0]  ;;  %v5984_v0 = vpop.f32.mrf.mxu2  ;;  %v11626_v50 = vor.u32 %v13309_v39, %v11625_v36 }
 0x55b   :  { %6228 = vmatmul.bf16.vlgmr.msrb.gmra.mxu1 %v13748_v23  ;;  %v11914_v23 = vor.u32 %v13381_v33, %v11913_v8  ;;  %v11898_v37 = vor.u32 %v13377_v7, %v11897_v17  ;;  %v11881_v41 = vld [vmem:[#allocation7 + $0x360] sm:$0xf]  ;;  %v13297_v17 = vld [vmem:[#allocation7 + $0x10c] sm:$0xf0] }
 0x55c   :  { %6253 = vmatpush.bf16.msrb.mxu3 %v11374_v43  ;;  %7834 = vmatpush.bf16.msra.mxu1 %v11690_v46  ;;  %v13341_v43 = vld [vmem:[#allocation7 + $0x26c] sm:$0xf0]  ;;  %v5997_v48 = vpop.f32.mrf.mxu3  ;;  %v11593_v8 = vld [vmem:[#allocation7 + $0x120] sm:$0xf] }
 0x55d   :  { %6241 = vmatmul.bf16.vlgmr.msrb.gmra.mxu2 %v13752_v29  ;;  %v13281_v29 = vld [vmem:[#allocation7 + $0x8c] sm:$0xf0]  ;;  %v11594_v28 = vor.u32 %v13301_v44, %v11593_v8  ;;  %v11577_v6 = vld [vmem:[#allocation7 + $0x100] sm:$0xf]  ;;  %v6262_v48 = vmax.f32 %v13857_v10, 0.0 }
 0x55e   :  { %7847 = vmatpush.bf16.msra.mxu2 %v11818_v47  ;;  %7822 = vmatpush.bf16.msra.mxu0 %v11546_v56  ;;  %v11514_v45 = vor.u32 %v13281_v29, %v11513_v9  ;;  %v13373_v46 = vld [vmem:[#allocation7 + $0x36c] sm:$0xf0]  ;;  %v5944_v47 = vadd.f32 %v13913_v62, %v5931_v20  ;;  %v11737_v56 = vld [vmem:[#allocation7 + $0x240] sm:$0xf]  ;;  %v11578_v0 = vor.u32 %v13297_v17, %v11577_v6 }
 0x55f   :  { %11446 = vmatmul.msk.bf16.vlgmr.msrb.gmra.mxu3 %vm4903_vm0, %v13758_v22  ;;  %v11882_v60 = vor.u32 %v13373_v46, %v11881_v41  ;;  %v13337_v22 = vld [vmem:[#allocation7 + $0x24c] sm:$0xf0]  ;;  %v11705_v7 = vld [vmem:[#allocation7 + $0x200] sm:$0xf]  ;;  %v6259_v41 = vmax.f32 %v13786_v30, 0.0  ;;  %v6260_v46 = vmax.f32 %v13809_v3, 0.0 }
 0x560   :  { %7860 = vmatpush.bf16.msra.mxu3 %v11946_v35  ;;  %7835 = vmatpush.bf16.msra.mxu1 %v11674_v57  ;;  %v11754_v35 = vor.u32 %v13341_v43, %v11753_v4  ;;  %v6010_v57 = vpop.f32.mrf.mxu0  ;;  %v5957_v62 = vadd.f32 %v13915_v12, %v5944_v47  ;;  %v11738_v63 = vor.u32 %v13337_v22, %v11737_v56  ;;  %v13365_v9 = vld [vmem:[#allocation7 + $0x32c] sm:$0xf0]  ;;  %v12201_v36 = vld [vmem:[#allocation7 + $0x5e0] sm:$0xf] }
 0x561   :  { %v11466_v12 = vor.u32 %v13269_v32, %v11465_v1  ;;  %v13453_v39 = vld [vmem:[#allocation7 + $0x5ec] sm:$0xf0]  ;;  %v12329_v4 = vld [vmem:[#allocation7 + $0x6e0] sm:$0xf]  ;;  %v13946_v22 = vpack.c.bf16 %v6259_v41, %v6259_v41 }
 0x562   :  { %7848 = vmatpush.bf16.msra.mxu2 %v11802_v58  ;;  %7823 = vmatpush.bf16.msra.mxu0 %v11530_v2  ;;  %v11865_v58 = vld [vmem:[#allocation7 + $0x340] sm:$0xf]  ;;  %v5970_v29 = vadd.f32 %v13917_v13, %v5957_v62  ;;  %v13485_v43 = vld [vmem:[#allocation7 + $0x6ec] sm:$0xf0]  ;;  %v6034_v8 = vpop.f32.mrf.mxu2 }
 0x563   :  { %v11866_v33 = vor.u32 %v13369_v59, %v11865_v58  ;;  %v11721_v2 = vld [vmem:[#allocation7 + $0x220] sm:$0xf]  ;;  %v12330_v51 = vor.u32 %v13485_v43, %v12329_v4  ;;  %v13449_v3 = vld [vmem:[#allocation7 + $0x5cc] sm:$0xf0]  ;;  %v13952_v58 = vpack.c.bf16 %v6262_v48, %v6262_v48 }
 0x564   :  { %7861 = vmatpush.bf16.msra.mxu3 %v11930_v61  ;;  %7836 = vmatpush.bf16.msra.mxu1 %v11658_v24  ;;  %v11610_v61 = vor.u32 %v13305_v55, %v11609_v53  ;;  %v13333_v24 = vld [vmem:[#allocation7 + $0x22c] sm:$0xf0]  ;;  %v5983_v13 = vadd.f32 %v13923_v42, %v5970_v29  ;;  %v12074_v42 = vor.u32 %v13421_v34, %v12073_v27  ;;  %v12057_v52 = vld [vmem:[#allocation7 + $0x4c0] sm:$0xf]  ;;  %v6047_v44 = vpop.f32.mrf.mxu3 }
 0x565   :  { %v11722_v14 = vor.u32 %v13333_v24, %v11721_v2  ;;  %v13417_v53 = vld [vmem:[#allocation7 + $0x4cc] sm:$0xf0]  ;;  %v12313_v55 = vld [vmem:[#allocation7 + $0x6c0] sm:$0xf] }
 0x566   :  { %7849 = vmatpush.bf16.msra.mxu2 %v11786_v5  ;;  %7824 = vmatpush.bf16.msra.mxu0 %v11514_v45  ;;  %v11849_v5 = vld [vmem:[#allocation7 + $0x320] sm:$0xf]  ;;  %v13329_v45 = vld [vmem:[#allocation7 + $0x20c] sm:$0xf0]  ;;  %v5996_v30 = vadd.f32 %v13928_v21, %v5983_v13  ;;  %v12058_v57 = vor.u32 %v13417_v53, %v12057_v52 }
 0x567   :  { %v11850_v20 = vor.u32 %v13365_v9, %v11849_v5  ;;  %v11706_v47 = vor.u32 %v13329_v45, %v11705_v7  ;;  %v13481_v56 = vld [vmem:[#allocation7 + $0x6cc] sm:$0xf0]  ;;  %v12297_v1 = vld [vmem:[#allocation7 + $0x6a0] sm:$0xf] }
 0x568   :  { %7862 = vmatpush.bf16.msra.mxu3 %v11914_v23  ;;  %7837 = vmatpush.bf16.msra.mxu1 %v11642_v31  ;;  %v13265_v23 = vld [vmem:[#allocation7 + $0xc] sm:$0xf0]  ;;  %v11833_v31 = vld [vmem:[#allocation7 + $0x300] sm:$0xf]  ;;  %v12314_v59 = vor.u32 %v13481_v56, %v12313_v55 }
 0x569   :  { %v13413_v62 = vld [vmem:[#allocation7 + $0x4ac] sm:$0xf0]  ;;  %v12153_v9 = vld [vmem:[#allocation7 + $0x580] sm:$0xf] }
 0x56a   :  { %7850 = vmatpush.bf16.msra.mxu2 %v11770_v40  ;;  %7825 = vmatpush.bf16.msra.mxu0 %v11498_v19  ;;  %v13361_v40 = vld [vmem:[#allocation7 + $0x30c] sm:$0xf0]  ;;  %v6261_v19 = vmax.f32 %v13834_v25, 0.0  ;;  %v13948_v25 = vpack.c.bf16 %v6260_v46, %v6260_v46  ;;  %v12009_v45 = vld [vmem:[#allocation7 + $0x460] sm:$0xf]  ;;  %v6036_v13 = vpop.f32.mrf.mxu2 }
 0x56b   :  { %v13477_v32 = vld [vmem:[#allocation7 + $0x6ac] sm:$0xf0]  ;;  %v12265_v34 = vld [vmem:[#allocation7 + $0x660] sm:$0xf]  ;;  %v13351_v13 = vld [vmem:[#allocation7 + $0x2c4] sm:$0xf] }
 0x56c   :  { %7863 = vmatpush.bf16.msra.mxu3 %v11898_v37  ;;  %7838 = vmatpush.bf16.msra.mxu1 %v11626_v50  ;;  %v11450_v37 = vor.u32 %v13265_v23, %v11449_v38  ;;  %v11834_v50 = vor.u32 %v13361_v40, %v11833_v31  ;;  %v13950_v10 = vpack.c.bf16 %v6261_v19, %v6261_v19  ;;  %v13409_v5 = vld [vmem:[#allocation7 + $0x48c] sm:$0xf0]  ;;  %v12281_v38 = vld [vmem:[#allocation7 + $0x680] sm:$0xf] }
 0x56d   :  { %v12298_v24 = vor.u32 %v13477_v32, %v12297_v1  ;;  %v13473_v23 = vld [vmem:[#allocation7 + $0x68c] sm:$0xf0]  ;;  %v12137_v40 = vld [vmem:[#allocation7 + $0x560] sm:$0xf] }
 0x56e   :  { %7851 = vmatpush.bf16.msra.mxu2 %v11754_v35  ;;  %7826 = vmatpush.bf16.msra.mxu0 %v11482_v11  ;;  %v12202_v35 = vor.u32 %v13453_v39, %v12201_v36  ;;  %v12169_v11 = vld [vmem:[#allocation7 + $0x5a0] sm:$0xf]  ;;  %v13405_v31 = vld [vmem:[#allocation7 + $0x46c] sm:$0xf0]  ;;  %v6049_v39 = vpop.f32.mrf.mxu3 }
 0x56f   :  { %v13437_v27 = vld [vmem:[#allocation7 + $0x56c] sm:$0xf0]  ;;  %v11993_v41 = vld [vmem:[#allocation7 + $0x440] sm:$0xf] }
 0x570   :  { %7864 = vmatpush.bf16.msra.mxu3 %v11882_v60  ;;  %7839 = vmatpush.bf16.msra.mxu1 %v11610_v61  ;;  %v12185_v60 = vld [vmem:[#allocation7 + $0x5c0] sm:$0xf]  ;;  %v6009_v61 = vadd.f32 %v13930_v16, %v5996_v30  ;;  %v13469_v36 = vld [vmem:[#allocation7 + $0x66c] sm:$0xf0]  ;;  %v12138_v4 = vor.u32 %v13437_v27, %v12137_v40  ;;  %v13319_v40 = vld [vmem:[#allocation7 + $0x1c4] sm:$0xf] }
 0x571   :  { %v12186_v21 = vor.u32 %v13449_v3, %v12185_v60  ;;  %v12025_v16 = vld [vmem:[#allocation7 + $0x480] sm:$0xf]  ;;  %v12266_v43 = vor.u32 %v13469_v36, %v12265_v34  ;;  %v13401_v46 = vld [vmem:[#allocation7 + $0x44c] sm:$0xf0]  ;;  %v11675_v27 = vld [vmem:[#allocation7 + $0x1d0] sm:$0xf0] }
 0x572   :  { %7852 = vmatpush.bf16.msra.mxu2 %v11738_v63  ;;  %7827 = vmatpush.bf16.msra.mxu0 %v11466_v12  ;;  %v13445_v63 = vld [vmem:[#allocation7 + $0x5ac] sm:$0xf0]  ;;  %v6022_v29 = vadd.f32 %v13932_v18, %v6009_v61  ;;  %v12026_v17 = vor.u32 %v13409_v5, %v12025_v16  ;;  %v12249_v19 = vld [vmem:[#allocation7 + $0x640] sm:$0xf]  ;;  %v13323_v16 = vld [vmem:[#allocation7 + $0x1e4] sm:$0xf] }
 0x573   :  { %v12170_v2 = vor.u32 %v13445_v63, %v12169_v11  ;;  %v13441_v12 = vld [vmem:[#allocation7 + $0x58c] sm:$0xf0]  ;;  %v11977_v60 = vld [vmem:[#allocation7 + $0x420] sm:$0xf]  ;;  %v11691_v5 = vld [vmem:[#allocation7 + $0x1f0] sm:$0xf0] }
 0x574   :  { %7865 = vmatpush.bf16.msra.mxu3 %v11866_v33  ;;  %7840 = vmatpush.bf16.msra.mxu1 %v11594_v28  ;;  %v12042_v33 = vor.u32 %v13413_v62, %v12041_v15  ;;  %v6060_v28 = vpop.f32.mrf.mxu0  ;;  %v6035_v6 = vadd.f32 %v6034_v8, %v6022_v29  ;;  %v12154_v7 = vor.u32 %v13441_v12, %v12153_v9  ;;  %v13465_v48 = vld [vmem:[#allocation7 + $0x64c] sm:$0xf0]  ;;  %v12105_v3 = vld [vmem:[#allocation7 + $0x520] sm:$0xf]  ;;  %v6086_v62 = vpop.f32.mrf.mxu2  ;;  %v13355_v12 = vld [vmem:[#allocation7 + $0x2e4] sm:$0xf] }
 0x575   :  { %v12250_v53 = vor.u32 %v13465_v48, %v12249_v19  ;;  %v13397_v30 = vld [vmem:[#allocation7 + $0x42c] sm:$0xf0]  ;;  %v12233_v56 = vld [vmem:[#allocation7 + $0x620] sm:$0xf]  ;;  %v11659_v48 = vld [vmem:[#allocation7 + $0x1b0] sm:$0xf0] }
 0x576   :  { %7853 = vmatpush.bf16.msra.mxu2 %v11722_v14  ;;  %7828 = vmatpush.bf16.msra.mxu0 %v11450_v37  ;;  %v6073_v14 = vpop.f32.mrf.mxu1  ;;  %v6048_v18 = vadd.f32 %v6047_v44, %v6035_v6  ;;  %v12010_v37 = vor.u32 %v13405_v31, %v12009_v45  ;;  %v13429_v55 = vld [vmem:[#allocation7 + $0x52c] sm:$0xf0]  ;;  %v11961_v15 = vld [vmem:[#allocation7 + $0x400] sm:$0xf]  ;;  %v6264_v6 = vmax.f32 %v13905_v54, 0.0 }
 0x577   :  { %v12106_v11 = vor.u32 %v13429_v55, %v12105_v3  ;;  %v13393_v63 = vld [vmem:[#allocation7 + $0x40c] sm:$0xf0]  ;;  %v12089_v1 = vld [vmem:[#allocation7 + $0x500] sm:$0xf]  ;;  %v11547_v45 = vld [vmem:[#allocation7 + $0xd0] sm:$0xf0] }
 0x578   :  { %7866 = vmatpush.bf16.msra.mxu3 %v11850_v20  ;;  %7841 = vmatpush.bf16.msra.mxu1 %v11578_v0  ;;  %v12282_v20 = vor.u32 %v13473_v23, %v12281_v38  ;;  %v12121_v0 = vld [vmem:[#allocation7 + $0x540] sm:$0xf]  ;;  %v13425_v32 = vld [vmem:[#allocation7 + $0x50c] sm:$0xf0]  ;;  %v11962_v29 = vor.u32 %v13393_v63, %v11961_v15  ;;  %v11819_v38 = vld [vmem:[#allocation7 + $0x2f0] sm:$0xf0] }
 0x579   :  { %7829 = vmatmul.bf16.vlgmr.msra.gmra.mxu0 %v13946_v22  ;;  %v13457_v44 = vld [vmem:[#allocation7 + $0x60c] sm:$0xf0]  ;;  %v6263_v23 = vmax.f32 %v13882_v49, 0.0  ;;  %v11822_v31 = vor.u32 %v13355_v12, %v11819_v38  ;;  %v12457_v34 = vld [vmem:[#allocation7 + $0x7e0] sm:$0xf] }
 0x57a   :  { %7854 = vmatpush.bf16.msra.mxu2 %v11706_v47  ;;  %7873 = vmatpush.bf16.msrb.mxu0 %v12074_v42  ;;  %v13433_v47 = vld [vmem:[#allocation7 + $0x54c] sm:$0xf0]  ;;  %v11515_v3 = vld [vmem:[#allocation7 + $0x90] sm:$0xf0]  ;;  %v13311_v55 = vld [vmem:[#allocation7 + $0x184] sm:$0xf] }
 0x57b   :  { %7842 = vmatmul.bf16.vlgmr.msra.gmra.mxu1 %v13948_v25  ;;  %v12122_v52 = vor.u32 %v13433_v47, %v12121_v0  ;;  %v13517_v49 = vld [vmem:[#allocation7 + $0x7ec] sm:$0xf0]  ;;  %v11531_v0 = vld [vmem:[#allocation7 + $0xb0] sm:$0xf0]  ;;  %v13315_v47 = vld [vmem:[#allocation7 + $0x1a4] sm:$0xf] }
 0x57c   :  { %7867 = vmatpush.bf16.msra.mxu3 %v11834_v50  ;;  %7886 = vmatpush.bf16.msrb.mxu1 %v12202_v35  ;;  %v6062_v50 = vpop.f32.mrf.mxu0  ;;  %v6061_v35 = vadd.f32 %v6060_v28, %v6048_v18  ;;  %v12090_v28 = vor.u32 %v13425_v32, %v12089_v1  ;;  %v11803_v18 = vld [vmem:[#allocation7 + $0x2d0] sm:$0xf0]  ;;  %v6088_v39 = vpop.f32.mrf.mxu2  ;;  %v12458_v54 = vor.u32 %v13517_v49, %v12457_v34  ;;  %v13509_v15 = vld [vmem:[#allocation7 + $0x7ac] sm:$0xf0]  ;;  %v13335_v34 = vld [vmem:[#allocation7 + $0x244] sm:$0xf] }
 0x57d   :  { %7855 = vmatmul.bf16.vlgmr.msra.gmra.mxu2 %v13950_v10  ;;  %v11806_v19 = vor.u32 %v13351_v13, %v11803_v18  ;;  %v12441_v50 = vld [vmem:[#allocation7 + $0x7c0] sm:$0xf]  ;;  %v11755_v12 = vld [vmem:[#allocation7 + $0x270] sm:$0xf0] }
 0x57e   :  { %7899 = vmatpush.bf16.msrb.mxu2 %v12330_v51  ;;  %7874 = vmatpush.bf16.msrb.mxu0 %v12058_v57  ;;  %v6075_v42 = vpop.f32.mrf.mxu1  ;;  %v11994_v51 = vor.u32 %v13401_v46, %v11993_v41  ;;  %v13461_v57 = vld [vmem:[#allocation7 + $0x62c] sm:$0xf0]  ;;  %v11678_v41 = vor.u32 %v13319_v40, %v11675_v27  ;;  %v13283_v46 = vld [vmem:[#allocation7 + $0xa4] sm:$0xf]  ;;  %v12393_v40 = vld [vmem:[#allocation7 + $0x760] sm:$0xf] }
 0x57f   :  { %7868 = vmatmul.bf16.vlgmr.msra.gmra.mxu3 %v13952_v58  ;;  %v12234_v61 = vor.u32 %v13461_v57, %v12233_v56  ;;  %v13513_v42 = vld [vmem:[#allocation7 + $0x7cc] sm:$0xf0]  ;;  %v13971_v56 = vpop.f32.mrf.mxu3  ;;  %v11739_v13 = vld [vmem:[#allocation7 + $0x250] sm:$0xf0] }
 0x580   :  { %7887 = vmatpush.bf16.msrb.mxu1 %v12186_v21  ;;  %v6074_v21 = vadd.f32 %v6073_v14, %v6061_v35  ;;  %v13347_v35 = vld [vmem:[#allocation7 + $0x2a4] sm:$0xf]  ;;  %7912 = vmatpush.bf16.msrb.mxu3 %v12458_v54  ;;  %v13501_v27 = vld [vmem:[#allocation7 + $0x76c] sm:$0xf0] }
 0x581   :  { %v12394_v49 = vor.u32 %v13501_v27, %v12393_v40  ;;  %v13387_v40 = vld [vmem:[#allocation7 + $0x3e4] sm:$0xf]  ;;  %v11947_v27 = vld [vmem:[#allocation7 + $0x3f0] sm:$0xf0] }
 0x582   :  { %7900 = vmatpush.bf16.msrb.mxu2 %v12314_v59  ;;  %7875 = vmatpush.bf16.msrb.mxu0 %v12042_v33  ;;  %v11978_v59 = vor.u32 %v13397_v30, %v11977_v60  ;;  %v6087_v8 = vadd.f32 %v6086_v62, %v6074_v21  ;;  %v12217_v33 = vld [vmem:[#allocation7 + $0x600] sm:$0xf]  ;;  %v11662_v60 = vor.u32 %v13315_v47, %v11659_v48  ;;  %v13279_v30 = vld [vmem:[#allocation7 + $0x84] sm:$0xf]  ;;  %v11643_v21 = vld [vmem:[#allocation7 + $0x190] sm:$0xf0] }
 0x583   :  { %v12218_v14 = vor.u32 %v13457_v44, %v12217_v33  ;;  %v13343_v62 = vld [vmem:[#allocation7 + $0x284] sm:$0xf]  ;;  %v11518_v1 = vor.u32 %v13279_v30, %v11515_v3  ;;  %v11646_v32 = vor.u32 %v13311_v55, %v11643_v21  ;;  %v11499_v33 = vld [vmem:[#allocation7 + $0x70] sm:$0xf0]  ;;  %v11742_v47 = vor.u32 %v13335_v34, %v11739_v13  ;;  %v12377_v48 = vld [vmem:[#allocation7 + $0x740] sm:$0xf] }
 0x584   :  { %7888 = vmatpush.bf16.msrb.mxu1 %v12170_v2  ;;  %v13291_v2 = vld [vmem:[#allocation7 + $0xe4] sm:$0xf]  ;;  %v6265_v9 = vmax.f32 %v6087_v8, 0.0  ;;  %v11579_v55 = vld [vmem:[#allocation7 + $0x110] sm:$0xf0] }
 0x585   :  { %v13275_v8 = vld [vmem:[#allocation7 + $0x64] sm:$0xf] }
 0x586   :  { %7901 = vmatpush.bf16.msrb.mxu2 %v12298_v24  ;;  %7876 = vmatpush.bf16.msrb.mxu0 %v12026_v17  ;;  %v11563_v24 = vld [vmem:[#allocation7 + $0xf0] sm:$0xf0]  ;;  %v13962_v36 = vpack.c.bf16 %v6265_v9, %v6265_v9  ;;  %v13307_v44 = vld [vmem:[#allocation7 + $0x164] sm:$0xf]  ;;  %v13505_v9 = vld [vmem:[#allocation7 + $0x78c] sm:$0xf0] }
 0x587   :  { %v11566_v17 = vor.u32 %v13291_v2, %v11563_v24  ;;  %v13975_v2 = vpop.f32.mrf.mxu1  ;;  %v13295_v3 = vld [vmem:[#allocation7 + $0x104] sm:$0xf] }
 0x588   :  { %7889 = vmatpush.bf16.msrb.mxu1 %v12154_v7  ;;  %v11694_v7 = vor.u32 %v13323_v16, %v11691_v5  ;;  %v11627_v16 = vld [vmem:[#allocation7 + $0x170] sm:$0xf0]  ;;  %v12409_v5 = vld [vmem:[#allocation7 + $0x780] sm:$0xf] }
 0x589   :  { %v12410_v38 = vor.u32 %v13505_v9, %v12409_v5  ;;  %v11582_v5 = vor.u32 %v13295_v3, %v11579_v55  ;;  %v13415_v9 = vld [vmem:[#allocation7 + $0x4c4] sm:$0xf] }
 0x58a   :  { %7902 = vmatpush.bf16.msrb.mxu2 %v12282_v20  ;;  %7877 = vmatpush.bf16.msrb.mxu0 %v12010_v37  ;;  %v13287_v20 = vld [vmem:[#allocation7 + $0xc4] sm:$0xf]  ;;  %v13964_v37 = vpack.c.bf16 %v6263_v23, %v6263_v23  ;;  %v11502_v23 = vor.u32 %v13275_v8, %v11499_v33  ;;  %v12203_v8 = vld [vmem:[#allocation7 + $0x5f0] sm:$0xf0] }
 0x58b   :  { %v13483_v33 = vld [vmem:[#allocation7 + $0x6e4] sm:$0xf] }
 0x58c   :  { %7890 = vmatpush.bf16.msrb.mxu1 %v12138_v4  ;;  %v13966_v4 = vpack.c.bf16 %v6264_v6, %v6264_v6  ;;  %v11483_v6 = vld [vmem:[#allocation7 + $0x50] sm:$0xf0]  ;;  %v13471_v3 = vld [vmem:[#allocation7 + $0x684] sm:$0xf] }
 0x58e   :  { %7903 = vmatpush.bf16.msrb.mxu2 %v12266_v43  ;;  %7878 = vmatpush.bf16.msrb.mxu0 %v11994_v51  ;;  %v11550_v43 = vor.u32 %v13287_v20, %v11547_v45  ;;  %v11787_v51 = vld [vmem:[#allocation7 + $0x2b0] sm:$0xf0] }
 0x58f   :  { %v11790_v57 = vor.u32 %v13347_v35, %v11787_v51  ;;  %v11611_v45 = vld [vmem:[#allocation7 + $0x150] sm:$0xf0]  ;;  %v13263_v51 = vld [vmem:[#allocation7 + $0x4] sm:$0xf] }
 0x590   :  { %7891 = vmatpush.bf16.msrb.mxu1 %v12122_v52  ;;  %v12442_v52 = vor.u32 %v13513_v42, %v12441_v50  ;;  %v13497_v50 = vld [vmem:[#allocation7 + $0x74c] sm:$0xf0]  ;;  %v13331_v42 = vld [vmem:[#allocation7 + $0x224] sm:$0xf]  ;;  %v11723_v35 = vld [vmem:[#allocation7 + $0x230] sm:$0xf0] }
 0x591   :  { %v11726_v21 = vor.u32 %v13331_v42, %v11723_v35  ;;  %v13407_v42 = vld [vmem:[#allocation7 + $0x484] sm:$0xf]  ;;  %v12027_v35 = vld [vmem:[#allocation7 + $0x490] sm:$0xf0] }
 0x592   :  { %7904 = vmatpush.bf16.msrb.mxu2 %v12250_v53  ;;  %7879 = vmatpush.bf16.msrb.mxu0 %v11978_v59  ;;  %v11534_v53 = vor.u32 %v13283_v46, %v11531_v0  ;;  %v12425_v59 = vld [vmem:[#allocation7 + $0x7a0] sm:$0xf]  ;;  %v13299_v46 = vld [vmem:[#allocation7 + $0x124] sm:$0xf]  ;;  %v6127_v0 = vpop.f32.mrf.mxu1 }
 0x593   :  { %7913 = vmatpush.bf16.msrb.mxu3 %v12442_v52  ;;  %v12426_v63 = vor.u32 %v13509_v15, %v12425_v59  ;;  %v11451_v52 = vld [vmem:[#allocation7 + $0x10] sm:$0xf0]  ;;  %v13475_v0 = vld [vmem:[#allocation7 + $0x6a4] sm:$0xf] }
 0x594   :  { %7892 = vmatpush.bf16.msrb.mxu1 %v12106_v11  ;;  %v11771_v11 = vld [vmem:[#allocation7 + $0x290] sm:$0xf0] }
 0x595   :  { %v11774_v24 = vor.u32 %v13343_v62, %v11771_v11  ;;  %v11707_v59 = vld [vmem:[#allocation7 + $0x210] sm:$0xf0]  ;;  %v12361_v62 = vld [vmem:[#allocation7 + $0x720] sm:$0xf]  ;;  %v13493_v11 = vld [vmem:[#allocation7 + $0x72c] sm:$0xf0] }
 0x596   :  { %7905 = vmatpush.bf16.msrb.mxu2 %v12234_v61  ;;  %7880 = vmatpush.bf16.msrb.mxu0 %v11962_v29  ;;  %v13973_v61 = vpop.f32.mrf.mxu0  ;;  %v13339_v29 = vld [vmem:[#allocation7 + $0x264] sm:$0xf] }
 0x597   :  { %7914 = vmatpush.bf16.msrb.mxu3 %v12426_v63  ;;  %v11758_v20 = vor.u32 %v13339_v29, %v11755_v12  ;;  %v13419_v63 = vld [vmem:[#allocation7 + $0x4e4] sm:$0xf] }
 0x598   :  { %7893 = vmatpush.bf16.msrb.mxu1 %v12090_v28  ;;  %v11630_v28 = vor.u32 %v13307_v44, %v11627_v16  ;;  %v12331_v44 = vld [vmem:[#allocation7 + $0x6f0] sm:$0xf0]  ;;  %v11454_v16 = vor.u32 %v13263_v51, %v11451_v52 }
 0x599   :  { %7881 = vmatmul.bf16.vlgmr.msrb.gmra.mxu0 %v13964_v37 }
 0x59a   :  { %7906 = vmatpush.bf16.msrb.mxu2 %v12218_v14  ;;  %7925 = vmatpush.bf16.msra.mxu0 %v11566_v17  ;;  %v13271_v14 = vld [vmem:[#allocation7 + $0x44] sm:$0xf] }
 0x59b   :  { %7894 = vmatmul.bf16.vlgmr.msrb.gmra.mxu1 %v13966_v4  ;;  %v13303_v17 = vld [vmem:[#allocation7 + $0x144] sm:$0xf]  ;;  %7915 = vmatpush.bf16.msrb.mxu3 %v12410_v38  ;;  %v11486_v39 = vor.u32 %v13271_v14, %v11483_v6  ;;  %v12059_v38 = vld [vmem:[#allocation7 + $0x4d0] sm:$0xf0]  ;;  %v12334_v6 = vor.u32 %v13483_v33, %v12331_v44 }
 0x59c   :  { %7938 = vmatpush.bf16.msra.mxu1 %v11694_v7  ;;  %v6101_v7 = vpop.f32.mrf.mxu3  ;;  %v11614_v54 = vor.u32 %v13303_v17, %v11611_v45  ;;  %v13479_v17 = vld [vmem:[#allocation7 + $0x6c4] sm:$0xf]  ;;  %v12315_v45 = vld [vmem:[#allocation7 + $0x6d0] sm:$0xf0]  ;;  %v12062_v13 = vor.u32 %v13415_v9, %v12059_v38 }
 0x59d   :  { %7907 = vmatmul.bf16.vlgmr.msrb.gmra.mxu2 %v13962_v36  ;;  %v12345_v7 = vld [vmem:[#allocation7 + $0x700] sm:$0xf]  ;;  %v13435_v44 = vld [vmem:[#allocation7 + $0x564] sm:$0xf]  ;;  %v12267_v9 = vld [vmem:[#allocation7 + $0x670] sm:$0xf0] }
 0x59e   :  { %7951 = vmatpush.bf16.msra.mxu2 %v11822_v31  ;;  %7926 = vmatpush.bf16.msra.mxu0 %v11550_v43  ;;  %v13977_v31 = vpop.f32.mrf.mxu2  ;;  %v6114_v18 = vpop.f32.mrf.mxu0  ;;  %v13267_v43 = vld [vmem:[#allocation7 + $0x24] sm:$0xf] }
 0x59f   :  { %7916 = vmatpush.bf16.msrb.mxu3 %v12394_v49  ;;  %v13411_v18 = vld [vmem:[#allocation7 + $0x4a4] sm:$0xf]  ;;  %v12043_v49 = vld [vmem:[#allocation7 + $0x4b0] sm:$0xf0] }
 0x5a0   :  { %7939 = vmatpush.bf16.msra.mxu1 %v11678_v41  ;;  %v11467_v41 = vld [vmem:[#allocation7 + $0x30] sm:$0xf0] }
 0x5a2   :  { %7952 = vmatpush.bf16.msra.mxu2 %v11806_v19  ;;  %7927 = vmatpush.bf16.msra.mxu0 %v11534_v53  ;;  %v11595_v19 = vld [vmem:[#allocation7 + $0x130] sm:$0xf0]  ;;  %v12378_v53 = vor.u32 %v13497_v50, %v12377_v48  ;;  %v12046_v50 = vor.u32 %v13411_v18, %v12043_v49 }
 0x5a3   :  { %v11598_v30 = vor.u32 %v13299_v46, %v11595_v19  ;;  %v12171_v46 = vld [vmem:[#allocation7 + $0x5b0] sm:$0xf0]  ;;  %v13383_v19 = vld [vmem:[#allocation7 + $0x3c4] sm:$0xf] }
 0x5a4   :  { %7940 = vmatpush.bf16.msra.mxu1 %v11662_v60  ;;  %v11470_v60 = vor.u32 %v13267_v43, %v11467_v41  ;;  %7917 = vmatpush.bf16.msrb.mxu3 %v12378_v53  ;;  %v12318_v43 = vor.u32 %v13479_v17, %v12315_v45  ;;  %v13443_v41 = vld [vmem:[#allocation7 + $0x5a4] sm:$0xf]  ;;  %v11931_v48 = vld [vmem:[#allocation7 + $0x3d0] sm:$0xf0]  ;;  %v13982_v55 = vpop.f32.mrf.mxu3 }
 0x5a5   :  { %v11934_v51 = vor.u32 %v13383_v19, %v11931_v48  ;;  %v12174_v52 = vor.u32 %v13443_v41, %v12171_v46  ;;  %v13463_v45 = vld [vmem:[#allocation7 + $0x644] sm:$0xf]  ;;  %v11883_v18 = vld [vmem:[#allocation7 + $0x370] sm:$0xf0] }
 0x5a6   :  { %7953 = vmatpush.bf16.msra.mxu2 %v11790_v57  ;;  %7928 = vmatpush.bf16.msra.mxu0 %v11518_v1  ;;  %v13327_v57 = vld [vmem:[#allocation7 + $0x204] sm:$0xf]  ;;  %v6140_v15 = vpop.f32.mrf.mxu2  ;;  %v12075_v1 = vld [vmem:[#allocation7 + $0x4f0] sm:$0xf0] }
 0x5a7   :  { %v11710_v29 = vor.u32 %v13327_v57, %v11707_v59  ;;  %v12078_v12 = vor.u32 %v13419_v63, %v12075_v1  ;;  %v12283_v57 = vld [vmem:[#allocation7 + $0x690] sm:$0xf0]  ;;  %v934_v15 = vperm.slane %v13925_v26, 7  ;;  %v13403_v63 = vld [vmem:[#allocation7 + $0x464] sm:$0xf] }
 0x5a8   :  { %7941 = vmatpush.bf16.msra.mxu1 %v11646_v32  ;;  %v13451_v32 = vld [vmem:[#allocation7 + $0x5e4] sm:$0xf]  ;;  %v11915_v59 = vld [vmem:[#allocation7 + $0x3b0] sm:$0xf0]  ;;  %v12286_v33 = vor.u32 %v13471_v3, %v12283_v57 }
 0x5a9   :  { %v12206_v14 = vor.u32 %v13451_v32, %v12203_v8  ;;  %v12011_v1 = vld [vmem:[#allocation7 + $0x470] sm:$0xf0]  ;;  %v13459_v48 = vld [vmem:[#allocation7 + $0x624] sm:$0xf] }
 0x5aa   :  { %7954 = vmatpush.bf16.msra.mxu2 %v11774_v24  ;;  %7929 = vmatpush.bf16.msra.mxu0 %v11502_v23  ;;  %v12362_v24 = vor.u32 %v13493_v11, %v12361_v62  ;;  %v13447_v23 = vld [vmem:[#allocation7 + $0x5c4] sm:$0xf]  ;;  %v12030_v62 = vor.u32 %v13407_v42, %v12027_v35  ;;  %v13985_v11 = vpop.f32.mrf.mxu0  ;;  %v11899_v26 = vld [vmem:[#allocation7 + $0x390] sm:$0xf0]  ;;  %v12014_v38 = vor.u32 %v13403_v63, %v12011_v1  ;;  %v11569_v63 = vld [vmem:[#allocation7 + $0xe8] sm:$0xf] }
 0x5ab   :  { %v12107_v19 = vld [vmem:[#allocation7 + $0x530] sm:$0xf0]  ;;  %v13367_v35 = vld [vmem:[#allocation7 + $0x344] sm:$0xf] }
 0x5ac   :  { %7942 = vmatpush.bf16.msra.mxu1 %v11630_v28  ;;  %v12187_v28 = vld [vmem:[#allocation7 + $0x5d0] sm:$0xf0]  ;;  %7918 = vmatpush.bf16.msrb.mxu3 %v12362_v24 }
 0x5ad   :  { %v12139_v24 = vld [vmem:[#allocation7 + $0x570] sm:$0xf0] }
 0x5ae   :  { %7955 = vmatpush.bf16.msra.mxu2 %v11758_v20  ;;  %7930 = vmatpush.bf16.msra.mxu0 %v11486_v39  ;;  %v13489_v20 = vld [vmem:[#allocation7 + $0x70c] sm:$0xf0]  ;;  %v11950_v39 = vor.u32 %v13387_v40, %v11947_v27  ;;  %v6153_v40 = vpop.f32.mrf.mxu3  ;;  %v13990_v27 = vpop.f32.mrf.mxu2  ;;  %v12235_v42 = vld [vmem:[#allocation7 + $0x630] sm:$0xf0] }
 0x5af   :  { %v12346_v34 = vor.u32 %v13489_v20, %v12345_v7  ;;  %v13431_v7 = vld [vmem:[#allocation7 + $0x544] sm:$0xf]  ;;  %v12123_v20 = vld [vmem:[#allocation7 + $0x550] sm:$0xf0]  ;;  %v13354_v40 = vld [vmem:[#allocation7 + $0x2d4] sm:$0xf0] }
 0x5b0   :  { %7943 = vmatpush.bf16.msra.mxu1 %v11614_v54  ;;  %v12190_v54 = vor.u32 %v13447_v23, %v12187_v28  ;;  %v13399_v23 = vld [vmem:[#allocation7 + $0x444] sm:$0xf]  ;;  %v11995_v28 = vld [vmem:[#allocation7 + $0x450] sm:$0xf0]  ;;  %v12126_v46 = vor.u32 %v13431_v7, %v12123_v20  ;;  %v11681_v7 = vld [vmem:[#allocation7 + $0x1c8] sm:$0xf] }
 0x5b1   :  { %7919 = vmatpush.bf16.msrb.mxu3 %v12346_v34  ;;  %v12251_v34 = vld [vmem:[#allocation7 + $0x650] sm:$0xf0]  ;;  %v11998_v49 = vor.u32 %v13399_v23, %v11995_v28  ;;  %v13322_v20 = vld [vmem:[#allocation7 + $0x1d4] sm:$0xf0] }
 0x5b2   :  { %7956 = vmatpush.bf16.msra.mxu2 %v11742_v47  ;;  %7931 = vmatpush.bf16.msra.mxu0 %v11470_v60  ;;  %v12299_v47 = vld [vmem:[#allocation7 + $0x6b0] sm:$0xf0]  ;;  %v13439_v60 = vld [vmem:[#allocation7 + $0x584] sm:$0xf] }
 0x5b3   :  { %v12302_v53 = vor.u32 %v13475_v0, %v12299_v47  ;;  %v12254_v0 = vor.u32 %v13463_v45, %v12251_v34  ;;  %v13427_v47 = vld [vmem:[#allocation7 + $0x524] sm:$0xf]  ;;  %v11809_v45 = vld [vmem:[#allocation7 + $0x2c8] sm:$0xf] }
 0x5b4   :  { %7944 = vmatpush.bf16.msra.mxu1 %v11598_v30  ;;  %v12155_v30 = vld [vmem:[#allocation7 + $0x590] sm:$0xf0]  ;;  %v12110_v57 = vor.u32 %v13427_v47, %v12107_v19  ;;  %v13359_v34 = vld [vmem:[#allocation7 + $0x304] sm:$0xf]  ;;  %v13350_v47 = vld [vmem:[#allocation7 + $0x2b4] sm:$0xf0] }
 0x5b5   :  { %7964 = vmatpush.bf16.msra.mxu3 %v11950_v39  ;;  %v12158_v8 = vor.u32 %v13439_v60, %v12155_v30  ;;  %v13395_v39 = vld [vmem:[#allocation7 + $0x424] sm:$0xf]  ;;  %v11963_v60 = vld [vmem:[#allocation7 + $0x410] sm:$0xf0] }
 0x5b6   :  { %7957 = vmatpush.bf16.msra.mxu2 %v11726_v21  ;;  %7932 = vmatpush.bf16.msra.mxu0 %v11454_v16  ;;  %v13379_v21 = vld [vmem:[#allocation7 + $0x3a4] sm:$0xf]  ;;  %v6192_v1 = vpop.f32.mrf.mxu2 }
 0x5b7   :  { %v11918_v32 = vor.u32 %v13379_v21, %v11915_v59  ;;  %v13467_v16 = vld [vmem:[#allocation7 + $0x664] sm:$0xf]  ;;  %v12238_v21 = vor.u32 %v13459_v48, %v12235_v42  ;;  %v12091_v59 = vld [vmem:[#allocation7 + $0x510] sm:$0xf0]  ;;  %v13310_v1 = vld [vmem:[#allocation7 + $0x174] sm:$0xf0] }
 0x5b8   :  { %7945 = vmatpush.bf16.msra.mxu1 %v11582_v5  ;;  %v13987_v5 = vpop.f32.mrf.mxu1  ;;  %v12270_v17 = vor.u32 %v13467_v16, %v12267_v9  ;;  %v13423_v30 = vld [vmem:[#allocation7 + $0x504] sm:$0xf]  ;;  %v11825_v9 = vld [vmem:[#allocation7 + $0x2e8] sm:$0xf] }
 0x5b9   :  { %7933 = vmatmul.bf16.vlgmr.msra.gmra.mxu0 %v13946_v22  ;;  %7965 = vmatpush.bf16.msra.mxu3 %v11934_v51  ;;  %v11867_v51 = vld [vmem:[#allocation7 + $0x350] sm:$0xf0] }
 0x5ba   :  { %7958 = vmatpush.bf16.msra.mxu2 %v11710_v29  ;;  %7977 = vmatpush.bf16.msrb.mxu0 %v12078_v12  ;;  %v13375_v29 = vld [vmem:[#allocation7 + $0x384] sm:$0xf]  ;;  %v6100_v12 = vadd.f32 %v13971_v56, %v934_v15  ;;  %v11870_v3 = vor.u32 %v13367_v35, %v11867_v51  ;;  %v13282_v51 = vld [vmem:[#allocation7 + $0x94] sm:$0xf0] }
 0x5bb   :  { %7946 = vmatmul.bf16.vlgmr.msra.gmra.mxu1 %v13948_v25  ;;  %v13455_v15 = vld [vmem:[#allocation7 + $0x604] sm:$0xf] }
 0x5bc   :  { %7990 = vmatpush.bf16.msrb.mxu1 %v12206_v14  ;;  %v11902_v14 = vor.u32 %v13375_v29, %v11899_v26  ;;  %v6113_v56 = vadd.f32 %v13973_v61, %v6100_v12  ;;  %v13358_v29 = vld [vmem:[#allocation7 + $0x2f4] sm:$0xf0]  ;;  %v12094_v12 = vor.u32 %v13423_v30, %v12091_v59 }
 0x5bd   :  { %7959 = vmatmul.bf16.vlgmr.msra.gmra.mxu2 %v13950_v10  ;;  %7966 = vmatpush.bf16.msra.mxu3 %v11918_v32  ;;  %v13363_v32 = vld [vmem:[#allocation7 + $0x324] sm:$0xf] }
 0x5be   :  { %8003 = vmatpush.bf16.msrb.mxu2 %v12334_v6  ;;  %7978 = vmatpush.bf16.msrb.mxu0 %v12062_v13  ;;  %v12142_v6 = vor.u32 %v13435_v44, %v12139_v24  ;;  %v13371_v13 = vld [vmem:[#allocation7 + $0x364] sm:$0xf]  ;;  %v6126_v61 = vadd.f32 %v13975_v2, %v6113_v56  ;;  %v11697_v2 = vld [vmem:[#allocation7 + $0x1e8] sm:$0xf]  ;;  %v13326_v44 = vld [vmem:[#allocation7 + $0x1f4] sm:$0xf0] }
 0x5bf   :  { %v11886_v41 = vor.u32 %v13371_v13, %v11883_v18  ;;  %v11698_v28 = vor.u32 %v13326_v44, %v11697_v2  ;;  %v11835_v13 = vld [vmem:[#allocation7 + $0x310] sm:$0xf0] }
 0x5c0   :  { %7991 = vmatpush.bf16.msrb.mxu1 %v12190_v54  ;;  %v11979_v54 = vld [vmem:[#allocation7 + $0x430] sm:$0xf0]  ;;  %v6139_v24 = vadd.f32 %v13977_v31, %v6126_v61  ;;  %v11838_v18 = vor.u32 %v13359_v34, %v11835_v13  ;;  %v11649_v61 = vld [vmem:[#allocation7 + $0x188] sm:$0xf]  ;;  %v13302_v34 = vld [vmem:[#allocation7 + $0x134] sm:$0xf0] }
 0x5c1   :  { %7967 = vmatpush.bf16.msra.mxu3 %v11902_v14  ;;  %v11553_v14 = vld [vmem:[#allocation7 + $0xc8] sm:$0xf] }
 0x5c2   :  { %8004 = vmatpush.bf16.msrb.mxu2 %v12318_v43  ;;  %7979 = vmatpush.bf16.msrb.mxu0 %v12046_v50  ;;  %v6166_v43 = vpop.f32.mrf.mxu0  ;;  %v6179_v50 = vpop.f32.mrf.mxu1  ;;  %v6152_v31 = vadd.f32 %v13982_v55, %v6139_v24  ;;  %v13318_v55 = vld [vmem:[#allocation7 + $0x1b4] sm:$0xf0]  ;;  %v11489_v24 = vld [vmem:[#allocation7 + $0x48] sm:$0xf] }
 0x5c3   :  { %v13286_v43 = vld [vmem:[#allocation7 + $0xb4] sm:$0xf0]  ;;  %v11521_v50 = vld [vmem:[#allocation7 + $0x88] sm:$0xf] }
 0x5c4   :  { %7992 = vmatpush.bf16.msrb.mxu1 %v12174_v52  ;;  %v11982_v52 = vor.u32 %v13395_v39, %v11979_v54  ;;  %v11537_v39 = vld [vmem:[#allocation7 + $0xa8] sm:$0xf]  ;;  %v11810_v54 = vor.u32 %v13354_v40, %v11809_v45 }
 0x5c5   :  { %7968 = vmatpush.bf16.msra.mxu3 %v11886_v41  ;;  %v11665_v41 = vld [vmem:[#allocation7 + $0x1a8] sm:$0xf]  ;;  %v11538_v19 = vor.u32 %v13286_v43, %v11537_v39  ;;  %v13266_v43 = vld [vmem:[#allocation7 + $0x14] sm:$0xf0] }
 0x5c6   :  { %8005 = vmatpush.bf16.msrb.mxu2 %v12302_v53  ;;  %7980 = vmatpush.bf16.msrb.mxu0 %v12030_v62  ;;  %v13391_v53 = vld [vmem:[#allocation7 + $0x404] sm:$0xf]  ;;  %v12219_v62 = vld [vmem:[#allocation7 + $0x610] sm:$0xf0]  ;;  %v11666_v48 = vor.u32 %v13318_v55, %v11665_v41  ;;  %v11601_v40 = vld [vmem:[#allocation7 + $0x128] sm:$0xf] }
 0x5c7   :  { %v11966_v16 = vor.u32 %v13391_v53, %v11963_v60  ;;  %v11777_v53 = vld [vmem:[#allocation7 + $0x288] sm:$0xf]  ;;  %v13346_v60 = vld [vmem:[#allocation7 + $0x294] sm:$0xf0]  ;;  %v11602_v39 = vor.u32 %v13302_v34, %v11601_v40  ;;  %v12427_v40 = vld [vmem:[#allocation7 + $0x7b0] sm:$0xf0] }
 0x5c8   :  { %7993 = vmatpush.bf16.msrb.mxu1 %v12158_v8  ;;  %v11851_v8 = vld [vmem:[#allocation7 + $0x330] sm:$0xf0]  ;;  %v11729_v13 = vld [vmem:[#allocation7 + $0x228] sm:$0xf] }
 0x5c9   :  { %7969 = vmatpush.bf16.msra.mxu3 %v11870_v3  ;;  %v11854_v26 = vor.u32 %v13363_v32, %v11851_v8  ;;  %v11522_v3 = vor.u32 %v13282_v51, %v11521_v50  ;;  %v11761_v8 = vld [vmem:[#allocation7 + $0x268] sm:$0xf]  ;;  %v13422_v50 = vld [vmem:[#allocation7 + $0x4f4] sm:$0xf0] }
 0x5ca   :  { %8006 = vmatpush.bf16.msrb.mxu2 %v12286_v33  ;;  %7981 = vmatpush.bf16.msrb.mxu0 %v12014_v38  ;;  %v13294_v33 = vld [vmem:[#allocation7 + $0xf4] sm:$0xf0]  ;;  %v12222_v38 = vor.u32 %v13455_v15, %v12219_v62  ;;  %v6203_v42 = vpop.f32.mrf.mxu3  ;;  %v11778_v15 = vor.u32 %v13346_v60, %v11777_v53  ;;  %v11585_v41 = vld [vmem:[#allocation7 + $0x108] sm:$0xf] }
 0x5cb   :  { %v11570_v23 = vor.u32 %v13294_v33, %v11569_v63  ;;  %v13278_v62 = vld [vmem:[#allocation7 + $0x74] sm:$0xf0]  ;;  %v11633_v63 = vld [vmem:[#allocation7 + $0x168] sm:$0xf] }
 0x5cc   :  { %7994 = vmatpush.bf16.msrb.mxu1 %v12142_v6  ;;  %v13290_v6 = vld [vmem:[#allocation7 + $0xd4] sm:$0xf0]  ;;  %v11634_v44 = vor.u32 %v13310_v1, %v11633_v63  ;;  %v12033_v34 = vld [vmem:[#allocation7 + $0x488] sm:$0xf] }
 0x5cd   :  { %7970 = vmatpush.bf16.msra.mxu3 %v11854_v26  ;;  %v11554_v56 = vor.u32 %v13290_v6, %v11553_v14  ;;  %v13342_v33 = vld [vmem:[#allocation7 + $0x274] sm:$0xf0]  ;;  %v11617_v26 = vld [vmem:[#allocation7 + $0x148] sm:$0xf] }
 0x5ce   :  { %8007 = vmatpush.bf16.msrb.mxu2 %v12270_v17  ;;  %7982 = vmatpush.bf16.msrb.mxu0 %v11998_v49  ;;  %v11826_v17 = vor.u32 %v13358_v29, %v11825_v9  ;;  %v11682_v49 = vor.u32 %v13322_v20, %v11681_v7  ;;  %v11762_v9 = vor.u32 %v13342_v33, %v11761_v8  ;;  %v13274_v29 = vld [vmem:[#allocation7 + $0x54] sm:$0xf0]  ;;  %v11473_v7 = vld [vmem:[#allocation7 + $0x28] sm:$0xf] }
 0x5cf   :  { %v11490_v6 = vor.u32 %v13274_v29, %v11489_v24  ;;  %v12193_v8 = vld [vmem:[#allocation7 + $0x5c8] sm:$0xf]  ;;  %v13450_v33 = vld [vmem:[#allocation7 + $0x5d4] sm:$0xf0]  ;;  %v12443_v29 = vld [vmem:[#allocation7 + $0x7d0] sm:$0xf0] }
 0x5d0   :  { %7995 = vmatpush.bf16.msrb.mxu1 %v12126_v46  ;;  %v6165_v46 = vadd.f32 %v13985_v11, %v6152_v31  ;;  %v13270_v31 = vld [vmem:[#allocation7 + $0x34] sm:$0xf0] }
 0x5d1   :  { %7971 = vmatpush.bf16.msra.mxu3 %v11838_v18  ;;  %v13334_v18 = vld [vmem:[#allocation7 + $0x234] sm:$0xf0] }
 0x5d2   :  { %8008 = vmatpush.bf16.msrb.mxu2 %v12254_v0  ;;  %7983 = vmatpush.bf16.msrb.mxu0 %v11982_v52  ;;  %v11793_v0 = vld [vmem:[#allocation7 + $0x2a8] sm:$0xf]  ;;  %v13314_v52 = vld [vmem:[#allocation7 + $0x194] sm:$0xf0]  ;;  %v6178_v11 = vadd.f32 %v13987_v5, %v6165_v46  ;;  %v11730_v55 = vor.u32 %v13334_v18, %v11729_v13 }
 0x5d3   :  { %v11794_v35 = vor.u32 %v13350_v47, %v11793_v0  ;;  %v13298_v46 = vld [vmem:[#allocation7 + $0x114] sm:$0xf0]  ;;  %v11713_v0 = vld [vmem:[#allocation7 + $0x208] sm:$0xf] }
 0x5d4   :  { %7996 = vmatpush.bf16.msrb.mxu1 %v12110_v57  ;;  %v11650_v57 = vor.u32 %v13314_v52, %v11649_v61  ;;  %v6191_v32 = vadd.f32 %v13990_v27, %v6178_v11  ;;  %v13330_v47 = vld [vmem:[#allocation7 + $0x214] sm:$0xf0]  ;;  %v12337_v52 = vld [vmem:[#allocation7 + $0x6e8] sm:$0xf] }
 0x5d5   :  { %v13454_v61 = vld [vmem:[#allocation7 + $0x5f4] sm:$0xf0] }
 0x5d6   :  { %8009 = vmatpush.bf16.msrb.mxu2 %v12238_v21  ;;  %7984 = vmatpush.bf16.msrb.mxu0 %v11966_v16  ;;  %v6216_v30 = vpop.f32.mrf.mxu0  ;;  %v11505_v21 = vld [vmem:[#allocation7 + $0x68] sm:$0xf]  ;;  %v6204_v2 = vadd.f32 %v6203_v42, %v6191_v32  ;;  %v6205_v16 = vpop.f32.mrf.mxu3  ;;  %v13486_v11 = vld [vmem:[#allocation7 + $0x6f4] sm:$0xf0] }
 0x5d7   :  { %v11506_v5 = vor.u32 %v13278_v62, %v11505_v21  ;;  %v12209_v42 = vld [vmem:[#allocation7 + $0x5e8] sm:$0xf]  ;;  %v13515_v21 = vld [vmem:[#allocation7 + $0x7e4] sm:$0xf]  ;;  %v12338_v1 = vor.u32 %v13486_v11, %v12337_v52  ;;  %v13418_v32 = vld [vmem:[#allocation7 + $0x4d4] sm:$0xf0] }
 0x5d8   :  { %7997 = vmatpush.bf16.msrb.mxu1 %v12094_v12  ;;  %v6229_v59 = vpop.f32.mrf.mxu1  ;;  %v13306_v12 = vld [vmem:[#allocation7 + $0x154] sm:$0xf0]  ;;  %v6217_v14 = vadd.f32 %v6216_v30, %v6204_v2  ;;  %v11586_v30 = vor.u32 %v13298_v46, %v11585_v41  ;;  %v12210_v63 = vor.u32 %v13454_v61, %v12209_v42  ;;  %v12321_v2 = vld [vmem:[#allocation7 + $0x6c8] sm:$0xf] }
 0x5d9   :  { %7985 = vmatmul.bf16.vlgmr.msrb.gmra.mxu0 %v13964_v37  ;;  %v13474_v41 = vld [vmem:[#allocation7 + $0x694] sm:$0xf0]  ;;  %v12145_v61 = vld [vmem:[#allocation7 + $0x568] sm:$0xf] }
 0x5da   :  { %8010 = vmatpush.bf16.msrb.mxu2 %v12222_v38  ;;  %8029 = vmatpush.bf16.msra.mxu0 %v11570_v23  ;;  %v11745_v38 = vld [vmem:[#allocation7 + $0x248] sm:$0xf]  ;;  %v13338_v23 = vld [vmem:[#allocation7 + $0x254] sm:$0xf0] }
 0x5db   :  { %7998 = vmatmul.bf16.vlgmr.msrb.gmra.mxu1 %v13966_v4  ;;  %v11746_v45 = vor.u32 %v13338_v23, %v11745_v38  ;;  %v13414_v23 = vld [vmem:[#allocation7 + $0x4b4] sm:$0xf0] }
 0x5dc   :  { %8042 = vmatpush.bf16.msra.mxu1 %v11698_v28  ;;  %v13438_v11 = vld [vmem:[#allocation7 + $0x574] sm:$0xf0] }
 0x5dd   :  { %8011 = vmatmul.bf16.vlgmr.msrb.gmra.mxu2 %v13962_v36 }
 0x5de   :  { %8055 = vmatpush.bf16.msra.mxu2 %v11826_v17  ;;  %8030 = vmatpush.bf16.msra.mxu0 %v11554_v56  ;;  %v6218_v27 = vpop.f32.mrf.mxu0  ;;  %v11618_v17 = vor.u32 %v13306_v12, %v11617_v26  ;;  %v6230_v56 = vadd.f32 %v6229_v59, %v6217_v14  ;;  %v12459_v59 = vld [vmem:[#allocation7 + $0x7f0] sm:$0xf0]  ;;  %v12049_v26 = vld [vmem:[#allocation7 + $0x4a8] sm:$0xf]  ;;  %v12194_v12 = vor.u32 %v13450_v33, %v12193_v8  ;;  %v13446_v14 = vld [vmem:[#allocation7 + $0x5b4] sm:$0xf0] }
 0x5df   :  { %v12462_v24 = vor.u32 %v13515_v21, %v12459_v59  ;;  %v13499_v21 = vld [vmem:[#allocation7 + $0x764] sm:$0xf]  ;;  %v12395_v59 = vld [vmem:[#allocation7 + $0x770] sm:$0xf0]  ;;  %v13434_v8 = vld [vmem:[#allocation7 + $0x554] sm:$0xf0] }
 0x5e0   :  { %8043 = vmatpush.bf16.msra.mxu1 %v11682_v49  ;;  %v6242_v28 = vpop.f32.mrf.mxu2  ;;  %v6231_v20 = vpop.f32.mrf.mxu1  ;;  %v11474_v49 = vor.u32 %v13270_v31, %v11473_v7  ;;  %v14006_v7 = vld [vmem:[#allocation8] sm:$0xf]  ;;  %v13507_v31 = vld [vmem:[#allocation7 + $0x7a4] sm:$0xf]  ;;  %v12257_v33 = vld [vmem:[#allocation7 + $0x648] sm:$0xf] }
 0x5e2   :  { %8056 = vmatpush.bf16.msra.mxu2 %v11810_v54  ;;  %8031 = vmatpush.bf16.msra.mxu0 %v11538_v19  ;;  %v11457_v54 = vld [vmem:[#allocation7 + $0x8] sm:$0xf]  ;;  %v6243_v19 = vadd.f32 %v6242_v28, %v6230_v56  ;;  %v6533_v56 = vperm.slane %v14006_v7, 0 }
 0x5e3   :  { %v11458_v60 = vor.u32 %v13266_v43, %v11457_v54  ;;  %v12177_v28 = vld [vmem:[#allocation7 + $0x5a8] sm:$0xf]  ;;  %v13442_v54 = vld [vmem:[#allocation7 + $0x594] sm:$0xf0] }
 0x5e4   :  { %8044 = vmatpush.bf16.msra.mxu1 %v11666_v48  ;;  %v12081_v48 = vld [vmem:[#allocation7 + $0x4e8] sm:$0xf]  ;;  %v12178_v13 = vor.u32 %v13446_v14, %v12177_v28 }
 0x5e5   :  { %v12289_v43 = vld [vmem:[#allocation7 + $0x688] sm:$0xf] }
 0x5e6   :  { %8057 = vmatpush.bf16.msra.mxu2 %v11794_v35  ;;  %8032 = vmatpush.bf16.msra.mxu0 %v11522_v3  ;;  %v6255_v35 = vpop.f32.mrf.mxu3  ;;  %v11714_v3 = vor.u32 %v13330_v47, %v11713_v0  ;;  %v13503_v0 = vld [vmem:[#allocation7 + $0x784] sm:$0xf]  ;;  %v12411_v47 = vld [vmem:[#allocation7 + $0x790] sm:$0xf0]  ;;  %v12290_v42 = vor.u32 %v13474_v41, %v12289_v43  ;;  %v12097_v41 = vld [vmem:[#allocation7 + $0x508] sm:$0xf] }
 0x5e7   :  { %v6256_v53 = vadd.f32 %v6255_v35, %v6243_v19  ;;  %v12017_v35 = vld [vmem:[#allocation7 + $0x468] sm:$0xf] }
 0x5e8   :  { %8045 = vmatpush.bf16.msra.mxu1 %v11650_v57  ;;  %v6244_v51 = vpop.f32.mrf.mxu2  ;;  %v12082_v57 = vor.u32 %v13422_v50, %v12081_v48 }
 0x5e9   :  { %v6266_v62 = vmax.f32 %v6256_v53, 0.0  ;;  %v13406_v51 = vld [vmem:[#allocation7 + $0x474] sm:$0xf0]  ;;  %v12273_v53 = vld [vmem:[#allocation7 + $0x668] sm:$0xf] }
 0x5ea   :  { %8058 = vmatpush.bf16.msra.mxu2 %v11778_v15  ;;  %8033 = vmatpush.bf16.msra.mxu0 %v11506_v5  ;;  %v12065_v15 = vld [vmem:[#allocation7 + $0x4c8] sm:$0xf]  ;;  %v13482_v5 = vld [vmem:[#allocation7 + $0x6d4] sm:$0xf0] }
 0x5eb   :  { %v12066_v16 = vor.u32 %v13418_v32, %v12065_v15  ;;  %v12322_v38 = vor.u32 %v13482_v5, %v12321_v2  ;;  %v12146_v15 = vor.u32 %v13438_v11, %v12145_v61  ;;  %v12129_v32 = vld [vmem:[#allocation7 + $0x548] sm:$0xf]  ;;  %v13466_v2 = vld [vmem:[#allocation7 + $0x654] sm:$0xf0]  ;;  %v12398_v5 = vor.u32 %v13499_v21, %v12395_v59  ;;  %v11827_v11 = vld [vmem:[#allocation7 + $0x2f8] sm:$0xf0] }
 0x5ec   :  { %8046 = vmatpush.bf16.msra.mxu1 %v11634_v44  ;;  %v14002_v44 = vpack.c.bf16 %v6266_v62, %v6266_v62  ;;  %v12130_v28 = vor.u32 %v13434_v8, %v12129_v32  ;;  %v12258_v14 = vor.u32 %v13466_v2, %v12257_v33  ;;  %v13390_v21 = vld [vmem:[#allocation7 + $0x3f4] sm:$0xf0]  ;;  %v11555_v32 = vld [vmem:[#allocation7 + $0xd8] sm:$0xf0]  ;;  %v13320_v8 = vld [vmem:[#allocation7 + $0x1cc] sm:$0xf] }
 0x5ed   :  { %v11683_v33 = vld [vmem:[#allocation7 + $0x1d8] sm:$0xf0] }
 0x5ee   :  { %8059 = vmatpush.bf16.msra.mxu2 %v11762_v9  ;;  %8034 = vmatpush.bf16.msra.mxu0 %v11490_v6  ;;  %v13511_v9 = vld [vmem:[#allocation7 + $0x7c4] sm:$0xf]  ;;  %v6257_v27 = vpop.f32.mrf.mxu3  ;;  %v12305_v6 = vld [vmem:[#allocation7 + $0x6a8] sm:$0xf] }
 0x5ef   :  { %7920 = vmatmul.bf16.vlgmr.msrb.gmra.mxu3 %v14002_v44  ;;  %v12446_v20 = vor.u32 %v13511_v9, %v12443_v29  ;;  %v13495_v29 = vld [vmem:[#allocation7 + $0x744] sm:$0xf]  ;;  %v11985_v27 = vld [vmem:[#allocation7 + $0x428] sm:$0xf] }
 0x5f0   :  { %8047 = vmatpush.bf16.msra.mxu1 %v11618_v17  ;;  %v13478_v17 = vld [vmem:[#allocation7 + $0x6b4] sm:$0xf0]  ;;  %8016 = vmatpush.bf16.msrb.mxu3 %v12462_v24 }
 0x5f1   :  { %v12306_v18 = vor.u32 %v13478_v17, %v12305_v6  ;;  %v13398_v6 = vld [vmem:[#allocation7 + $0x434] sm:$0xf0]  ;;  %v12113_v17 = vld [vmem:[#allocation7 + $0x528] sm:$0xf] }
 0x5f2   :  { %8060 = vmatpush.bf16.msra.mxu2 %v11746_v45  ;;  %8035 = vmatpush.bf16.msra.mxu0 %v11474_v49  ;;  %v12050_v45 = vor.u32 %v13414_v23, %v12049_v26  ;;  %v13410_v49 = vld [vmem:[#allocation7 + $0x494] sm:$0xf0]  ;;  %v12379_v26 = vld [vmem:[#allocation7 + $0x750] sm:$0xf0] }
 0x5f3   :  { %v12034_v46 = vor.u32 %v13410_v49, %v12033_v34  ;;  %v12382_v34 = vor.u32 %v13495_v29, %v12379_v26  ;;  %v11969_v49 = vld [vmem:[#allocation7 + $0x408] sm:$0xf]  ;;  %v11686_v26 = vor.u32 %v13320_v8, %v11683_v33  ;;  %v13336_v8 = vld [vmem:[#allocation7 + $0x24c] sm:$0xf]  ;;  %v11747_v33 = vld [vmem:[#allocation7 + $0x258] sm:$0xf0] }
 0x5f4   :  { %8048 = vmatpush.bf16.msra.mxu1 %v11602_v39  ;;  %v12161_v39 = vld [vmem:[#allocation7 + $0x588] sm:$0xf]  ;;  %8017 = vmatpush.bf16.msrb.mxu3 %v12446_v20  ;;  %v13430_v20 = vld [vmem:[#allocation7 + $0x534] sm:$0xf0] }
 0x5f5   :  { %v12162_v50 = vor.u32 %v13442_v54, %v12161_v39  ;;  %v13394_v39 = vld [vmem:[#allocation7 + $0x414] sm:$0xf0]  ;;  %v12114_v54 = vor.u32 %v13430_v20, %v12113_v17  ;;  %v11795_v17 = vld [vmem:[#allocation7 + $0x2b8] sm:$0xf0]  ;;  %v11921_v20 = vld [vmem:[#allocation7 + $0x3a8] sm:$0xf] }
 0x5f6   :  { %8061 = vmatpush.bf16.msra.mxu2 %v11730_v55  ;;  %8036 = vmatpush.bf16.msra.mxu0 %v11458_v60  ;;  %v12430_v55 = vor.u32 %v13507_v31, %v12427_v40  ;;  %v7830_v19 = vpop.f32.mrf.mxu0  ;;  %v13470_v60 = vld [vmem:[#allocation7 + $0x674] sm:$0xf0] }
 0x5f7   :  { %v7831_v52 = vadd.f32 %v7830_v19, %v6533_v56  ;;  %v12274_v62 = vor.u32 %v13470_v60, %v12273_v53  ;;  %v13462_v31 = vld [vmem:[#allocation7 + $0x634] sm:$0xf0]  ;;  %v12363_v56 = vld [vmem:[#allocation7 + $0x730] sm:$0xf0]  ;;  %v11571_v19 = vld [vmem:[#allocation7 + $0xf8] sm:$0xf0] }
 0x5f8   :  { %8049 = vmatpush.bf16.msra.mxu1 %v11586_v30  ;;  %v7843_v48 = vpop.f32.mrf.mxu1  ;;  %8018 = vmatpush.bf16.msrb.mxu3 %v12430_v55  ;;  %v12414_v30 = vor.u32 %v13503_v0, %v12411_v47  ;;  %v13426_v55 = vld [vmem:[#allocation7 + $0x514] sm:$0xf0]  ;;  %v13292_v47 = vld [vmem:[#allocation7 + $0xec] sm:$0xf]  ;;  %v13487_v53 = vld [vmem:[#allocation7 + $0x704] sm:$0xf] }
 0x5f9   :  { %8037 = vmatmul.bf16.vlgmr.msra.gmra.mxu0 %v13946_v22  ;;  %v13458_v0 = vld [vmem:[#allocation7 + $0x614] sm:$0xf0]  ;;  %v12347_v60 = vld [vmem:[#allocation7 + $0x710] sm:$0xf0]  ;;  %v11574_v59 = vor.u32 %v13292_v47, %v11571_v19 }
 0x5fa   :  { %8062 = vmatpush.bf16.msra.mxu2 %v11714_v3  ;;  %8081 = vmatpush.bf16.msrb.mxu0 %v12082_v57  ;;  %v7844_v3 = vadd.f32 %v7843_v48, %v7831_v52  ;;  %v12018_v57 = vor.u32 %v13406_v51, %v12017_v35  ;;  %v13356_v35 = vld [vmem:[#allocation7 + $0x2ec] sm:$0xf]  ;;  %v11970_v52 = vor.u32 %v13394_v39, %v11969_v49  ;;  %v11651_v39 = vld [vmem:[#allocation7 + $0x198] sm:$0xf0] }
 0x5fb   :  { %8050 = vmatmul.bf16.vlgmr.msra.gmra.mxu1 %v13948_v25  ;;  %v13312_v49 = vld [vmem:[#allocation7 + $0x18c] sm:$0xf] }
 0x5fc   :  { %8094 = vmatpush.bf16.msrb.mxu1 %v12210_v63  ;;  %v12001_v63 = vld [vmem:[#allocation7 + $0x448] sm:$0xf]  ;;  %8019 = vmatpush.bf16.msrb.mxu3 %v12414_v30  ;;  %v12098_v30 = vor.u32 %v13426_v55, %v12097_v41  ;;  %v11779_v41 = vld [vmem:[#allocation7 + $0x298] sm:$0xf0]  ;;  %v11654_v19 = vor.u32 %v13312_v49, %v11651_v39  ;;  %v13296_v49 = vld [vmem:[#allocation7 + $0x10c] sm:$0xf] }
 0x5fd   :  { %8063 = vmatmul.bf16.vlgmr.msra.gmra.mxu2 %v13950_v10  ;;  %v11905_v55 = vld [vmem:[#allocation7 + $0x388] sm:$0xf] }
 0x5fe   :  { %8107 = vmatpush.bf16.msrb.mxu2 %v12338_v1  ;;  %8082 = vmatpush.bf16.msrb.mxu0 %v12066_v16  ;;  %v13402_v1 = vld [vmem:[#allocation7 + $0x454] sm:$0xf0] }
 0x5ff   :  { %v12002_v9 = vor.u32 %v13402_v1, %v12001_v63  ;;  %7972 = vmatmul.bf16.vlgmr.msra.gmra.mxu3 %v13952_v58  ;;  %v11830_v63 = vor.u32 %v13356_v35, %v11827_v11  ;;  %v12350_v1 = vor.u32 %v13487_v53, %v12347_v60  ;;  %v13340_v53 = vld [vmem:[#allocation7 + $0x26c] sm:$0xf]  ;;  %v11763_v60 = vld [vmem:[#allocation7 + $0x278] sm:$0xf0] }
 0x600   :  { %8095 = vmatpush.bf16.msrb.mxu1 %v12194_v12  ;;  %v7856_v24 = vpop.f32.mrf.mxu2  ;;  %v7845_v23 = vpop.f32.mrf.mxu1  ;;  %8020 = vmatpush.bf16.msrb.mxu3 %v12398_v5  ;;  %v13352_v5 = vld [vmem:[#allocation7 + $0x2cc] sm:$0xf] }
 0x601   :  { %v7857_v12 = vadd.f32 %v7856_v24, %v7844_v3  ;;  %v11811_v24 = vld [vmem:[#allocation7 + $0x2d8] sm:$0xf0] }
 0x602   :  { %8108 = vmatpush.bf16.msrb.mxu2 %v12322_v38  ;;  %8083 = vmatpush.bf16.msrb.mxu0 %v12050_v45  ;;  %v7869_v16 = vpop.f32.mrf.mxu3  ;;  %v7832_v38 = vpop.f32.mrf.mxu0  ;;  %v12241_v45 = vld [vmem:[#allocation7 + $0x628] sm:$0xf]  ;;  %v11539_v23 = vld [vmem:[#allocation7 + $0xb8] sm:$0xf0] }
 0x603   :  { %v14012_v40 = vadd.f32 %v7869_v16, %v7857_v12  ;;  %v12242_v43 = vor.u32 %v13462_v31, %v12241_v45  ;;  %v11937_v16 = vld [vmem:[#allocation7 + $0x3c8] sm:$0xf]  ;;  %v13284_v12 = vld [vmem:[#allocation7 + $0xac] sm:$0xf]  ;;  %v11814_v38 = vor.u32 %v13352_v5, %v11811_v24  ;;  %v13382_v45 = vld [vmem:[#allocation7 + $0x3b4] sm:$0xf0] }
 0x604   :  { %8096 = vmatpush.bf16.msrb.mxu1 %v12178_v13  ;;  %v13491_v13 = vld [vmem:[#allocation7 + $0x724] sm:$0xf]  ;;  %8021 = vmatpush.bf16.msrb.mxu3 %v12382_v34  ;;  %v11542_v31 = vor.u32 %v13284_v12, %v11539_v23  ;;  %v11873_v5 = vld [vmem:[#allocation7 + $0x348] sm:$0xf]  ;;  %v13370_v24 = vld [vmem:[#allocation7 + $0x354] sm:$0xf0]  ;;  %v11750_v23 = vor.u32 %v13336_v8, %v11747_v33 }
 0x605   :  { %v12366_v48 = vor.u32 %v13491_v13, %v12363_v56  ;;  %v13280_v13 = vld [vmem:[#allocation7 + $0x8c] sm:$0xf]  ;;  %v11523_v56 = vld [vmem:[#allocation7 + $0x98] sm:$0xf0]  ;;  %v12449_v33 = vld [vmem:[#allocation7 + $0x7c8] sm:$0xf] }
 0x606   :  { %8109 = vmatpush.bf16.msrb.mxu2 %v12306_v18  ;;  %8084 = vmatpush.bf16.msrb.mxu0 %v12034_v46  ;;  %v11986_v18 = vor.u32 %v13398_v6, %v11985_v27  ;;  %v12225_v46 = vld [vmem:[#allocation7 + $0x608] sm:$0xf]  ;;  %v13348_v6 = vld [vmem:[#allocation7 + $0x2ac] sm:$0xf]  ;;  %v11526_v47 = vor.u32 %v13280_v13, %v11523_v56  ;;  %v11459_v56 = vld [vmem:[#allocation7 + $0x18] sm:$0xf0] }
 0x607   :  { %v12226_v3 = vor.u32 %v13458_v0, %v12225_v46  ;;  %v13378_v46 = vld [vmem:[#allocation7 + $0x394] sm:$0xf0]  ;;  %v13268_v12 = vld [vmem:[#allocation7 + $0x2c] sm:$0xf] }
 0x608   :  { %8097 = vmatpush.bf16.msrb.mxu1 %v12162_v50  ;;  %v13324_v50 = vld [vmem:[#allocation7 + $0x1ec] sm:$0xf]  ;;  %v7858_v51 = vpop.f32.mrf.mxu2  ;;  %8022 = vmatpush.bf16.msrb.mxu3 %v12366_v48  ;;  %v11906_v11 = vor.u32 %v13378_v46, %v11905_v55 }
 0x609   :  { %v13276_v48 = vld [vmem:[#allocation7 + $0x6c] sm:$0xf]  ;;  %v11507_v51 = vld [vmem:[#allocation7 + $0x78] sm:$0xf0] }
 0x60a   :  { %8110 = vmatpush.bf16.msrb.mxu2 %v12290_v42  ;;  %8085 = vmatpush.bf16.msrb.mxu0 %v12018_v57  ;;  %v11699_v42 = vld [vmem:[#allocation7 + $0x1f8] sm:$0xf0]  ;;  %v7871_v61 = vpop.f32.mrf.mxu3  ;;  %v11953_v57 = vld [vmem:[#allocation7 + $0x3e8] sm:$0xf]  ;;  %v13420_v46 = vld [vmem:[#allocation7 + $0x4ec] sm:$0xf] }
 0x60b   :  { %v11954_v2 = vor.u32 %v13390_v21, %v11953_v57  ;;  %v13308_v61 = vld [vmem:[#allocation7 + $0x16c] sm:$0xf]  ;;  %v13374_v57 = vld [vmem:[#allocation7 + $0x374] sm:$0xf0]  ;;  %v11510_v21 = vor.u32 %v13276_v48, %v11507_v51  ;;  %v12211_v48 = vld [vmem:[#allocation7 + $0x5f8] sm:$0xf0] }
 0x60c   :  { %8098 = vmatpush.bf16.msrb.mxu1 %v12146_v15  ;;  %v11702_v15 = vor.u32 %v13324_v50, %v11699_v42  ;;  %8023 = vmatpush.bf16.msrb.mxu3 %v12350_v1  ;;  %v11619_v1 = vld [vmem:[#allocation7 + $0x158] sm:$0xf0] }
 0x60e   :  { %8111 = vmatpush.bf16.msrb.mxu2 %v12274_v62  ;;  %8086 = vmatpush.bf16.msrb.mxu0 %v12002_v9  ;;  %v13288_v62 = vld [vmem:[#allocation7 + $0xcc] sm:$0xf]  ;;  %v13386_v9 = vld [vmem:[#allocation7 + $0x3d4] sm:$0xf0] }
 0x60f   :  { %v11558_v29 = vor.u32 %v13288_v62, %v11555_v32  ;;  %v11938_v27 = vor.u32 %v13386_v9, %v11937_v16  ;;  %8024 = vmatmul.bf16.vlgmr.msrb.gmra.mxu3 %v14002_v44  ;;  %v11766_v62 = vor.u32 %v13340_v53, %v11763_v60  ;;  %v12465_v60 = vld [vmem:[#allocation7 + $0x7e8] sm:$0xf] }
 0x610   :  { %8099 = vmatpush.bf16.msrb.mxu1 %v12130_v28  ;;  %v13316_v28 = vld [vmem:[#allocation7 + $0x1ac] sm:$0xf]  ;;  %8068 = vmatpush.bf16.msra.mxu3 %v11954_v2 }
 0x612   :  { %8112 = vmatpush.bf16.msrb.mxu2 %v12258_v14  ;;  %8087 = vmatpush.bf16.msrb.mxu0 %v11986_v18  ;;  %v11667_v14 = vld [vmem:[#allocation7 + $0x1b8] sm:$0xf0]  ;;  %v11798_v18 = vor.u32 %v13348_v6, %v11795_v17  ;;  %v11874_v6 = vor.u32 %v13370_v24, %v11873_v5  ;;  %v13332_v17 = vld [vmem:[#allocation7 + $0x22c] sm:$0xf] }
 0x613   :  { %v11670_v34 = vor.u32 %v13316_v28, %v11667_v14  ;;  %v11475_v28 = vld [vmem:[#allocation7 + $0x38] sm:$0xf0]  ;;  %v13300_v14 = vld [vmem:[#allocation7 + $0x12c] sm:$0xf] }
 0x614   :  { %8100 = vmatpush.bf16.msrb.mxu1 %v12114_v54  ;;  %8069 = vmatpush.bf16.msra.mxu3 %v11938_v27  ;;  %v11922_v54 = vor.u32 %v13382_v45, %v11921_v20  ;;  %v11603_v27 = vld [vmem:[#allocation7 + $0x138] sm:$0xf0]  ;;  %v11857_v45 = vld [vmem:[#allocation7 + $0x328] sm:$0xf]  ;;  %v13412_v24 = vld [vmem:[#allocation7 + $0x4ac] sm:$0xf] }
 0x615   :  { %v11731_v20 = vld [vmem:[#allocation7 + $0x238] sm:$0xf0]  ;;  %v11606_v13 = vor.u32 %v13300_v14, %v11603_v27  ;;  %v12433_v27 = vld [vmem:[#allocation7 + $0x7a8] sm:$0xf] }
 0x616   :  { %8113 = vmatpush.bf16.msrb.mxu2 %v12242_v43  ;;  %8088 = vmatpush.bf16.msrb.mxu0 %v11970_v52  ;;  %v13344_v43 = vld [vmem:[#allocation7 + $0x28c] sm:$0xf]  ;;  %v7882_v0 = vpop.f32.mrf.mxu0  ;;  %v11635_v52 = vld [vmem:[#allocation7 + $0x178] sm:$0xf0]  ;;  %v11734_v39 = vor.u32 %v13332_v17, %v11731_v20 }
 0x617   :  { %v7883_v50 = vadd.f32 %v7882_v0, %v14012_v40  ;;  %v11782_v35 = vor.u32 %v13344_v43, %v11779_v41  ;;  %v11491_v40 = vld [vmem:[#allocation7 + $0x58] sm:$0xf0]  ;;  %v13328_v43 = vld [vmem:[#allocation7 + $0x20c] sm:$0xf] }
 0x618   :  { %8101 = vmatpush.bf16.msrb.mxu1 %v12098_v30  ;;  %v7895_v42 = vpop.f32.mrf.mxu1  ;;  %8070 = vmatpush.bf16.msra.mxu3 %v11922_v54  ;;  %v11587_v54 = vld [vmem:[#allocation7 + $0x118] sm:$0xf0] }
 0x619   :  { %8089 = vmatmul.bf16.vlgmr.msrb.gmra.mxu0 %v13964_v37  ;;  %v7896_v30 = vadd.f32 %v7895_v42, %v7883_v50  ;;  %v11715_v41 = vld [vmem:[#allocation7 + $0x218] sm:$0xf0]  ;;  %v13484_v50 = vld [vmem:[#allocation7 + $0x6ec] sm:$0xf]  ;;  %v11590_v51 = vor.u32 %v13296_v49, %v11587_v54  ;;  %v12417_v49 = vld [vmem:[#allocation7 + $0x788] sm:$0xf] }
 0x61a   :  { %8114 = vmatpush.bf16.msrb.mxu2 %v12226_v3  ;;  %8133 = vmatpush.bf16.msra.mxu0 %v11574_v59  ;;  %v11889_v3 = vld [vmem:[#allocation7 + $0x368] sm:$0xf]  ;;  %v11638_v59 = vor.u32 %v13308_v61, %v11635_v52  ;;  %v12083_v0 = vld [vmem:[#allocation7 + $0x4f8] sm:$0xf0]  ;;  %v13362_v52 = vld [vmem:[#allocation7 + $0x314] sm:$0xf0] }
 0x61b   :  { %8102 = vmatmul.bf16.vlgmr.msrb.gmra.mxu1 %v13966_v4  ;;  %v11890_v32 = vor.u32 %v13374_v57, %v11889_v3  ;;  %v12339_v42 = vld [vmem:[#allocation7 + $0x6f8] sm:$0xf0]  ;;  %v11841_v61 = vld [vmem:[#allocation7 + $0x308] sm:$0xf]  ;;  %v12086_v53 = vor.u32 %v13420_v46, %v12083_v0 }
 0x61c   :  { %8146 = vmatpush.bf16.msra.mxu1 %v11702_v15  ;;  %v13272_v15 = vld [vmem:[#allocation7 + $0x4c] sm:$0xf]  ;;  %8071 = vmatpush.bf16.msra.mxu3 %v11906_v11  ;;  %v11718_v11 = vor.u32 %v13328_v43, %v11715_v41  ;;  %v12342_v57 = vor.u32 %v13484_v50, %v12339_v42  ;;  %v12035_v20 = vld [vmem:[#allocation7 + $0x498] sm:$0xf0] }
 0x61d   :  { %8115 = vmatmul.bf16.vlgmr.msrb.gmra.mxu2 %v13962_v36  ;;  %v12019_v46 = vld [vmem:[#allocation7 + $0x478] sm:$0xf0]  ;;  %v13468_v42 = vld [vmem:[#allocation7 + $0x66c] sm:$0xf] }
 0x61e   :  { %8159 = vmatpush.bf16.msra.mxu2 %v11830_v63  ;;  %8134 = vmatpush.bf16.msra.mxu0 %v11558_v29  ;;  %v13304_v63 = vld [vmem:[#allocation7 + $0x14c] sm:$0xf]  ;;  %v7884_v9 = vpop.f32.mrf.mxu0  ;;  %v11494_v29 = vor.u32 %v13272_v15, %v11491_v40  ;;  %v11842_v15 = vor.u32 %v13362_v52, %v11841_v61  ;;  %v12195_v40 = vld [vmem:[#allocation7 + $0x5d8] sm:$0xf0]  ;;  %v12401_v52 = vld [vmem:[#allocation7 + $0x768] sm:$0xf] }
 0x61f   :  { %v12051_v9 = vld [vmem:[#allocation7 + $0x4b8] sm:$0xf0] }
 0x620   :  { %8147 = vmatpush.bf16.msra.mxu1 %v11686_v26  ;;  %v7908_v2 = vpop.f32.mrf.mxu2  ;;  %v11622_v26 = vor.u32 %v13304_v63, %v11619_v1  ;;  %8072 = vmatpush.bf16.msra.mxu3 %v11890_v32  ;;  %v13480_v1 = vld [vmem:[#allocation7 + $0x6cc] sm:$0xf]  ;;  %v12323_v32 = vld [vmem:[#allocation7 + $0x6d8] sm:$0xf0]  ;;  %v12054_v14 = vor.u32 %v13412_v24, %v12051_v9 }
 0x621   :  { %v14019_v16 = vadd.f32 %v7908_v2, %v7896_v30  ;;  %v13518_v30 = vld [vmem:[#allocation7 + $0x7f4] sm:$0xf0]  ;;  %v13396_v24 = vld [vmem:[#allocation7 + $0x42c] sm:$0xf]  ;;  %v11987_v9 = vld [vmem:[#allocation7 + $0x438] sm:$0xf0] }
 0x622   :  { %8160 = vmatpush.bf16.msra.mxu2 %v11814_v38  ;;  %8135 = vmatpush.bf16.msra.mxu0 %v11542_v31  ;;  %v7897_v38 = vpop.f32.mrf.mxu1  ;;  %v13366_v31 = vld [vmem:[#allocation7 + $0x334] sm:$0xf0]  ;;  %v12466_v63 = vor.u32 %v13518_v30, %v12465_v60  ;;  %v13400_v60 = vld [vmem:[#allocation7 + $0x44c] sm:$0xf]  ;;  %v12003_v30 = vld [vmem:[#allocation7 + $0x458] sm:$0xf0] }
 0x623   :  { %v11858_v55 = vor.u32 %v13366_v31, %v11857_v45  ;;  %v13514_v2 = vld [vmem:[#allocation7 + $0x7d4] sm:$0xf0]  ;;  %v6534_v31 = vperm.slane %v14006_v7, 1 }
 0x624   :  { %8148 = vmatpush.bf16.msra.mxu1 %v11670_v34  ;;  %v11478_v34 = vor.u32 %v13268_v12, %v11475_v28  ;;  %8073 = vmatpush.bf16.msra.mxu3 %v11874_v6  ;;  %v12179_v12 = vld [vmem:[#allocation7 + $0x5b8] sm:$0xf0]  ;;  %v12450_v38 = vor.u32 %v13514_v2, %v12449_v33  ;;  %v13510_v6 = vld [vmem:[#allocation7 + $0x7b4] sm:$0xf0] }
 0x625   :  { %v12307_v28 = vld [vmem:[#allocation7 + $0x6b8] sm:$0xf0] }
 0x626   :  { %8161 = vmatpush.bf16.msra.mxu2 %v11798_v18  ;;  %8136 = vmatpush.bf16.msra.mxu0 %v11526_v47  ;;  %v13264_v18 = vld [vmem:[#allocation7 + $0xc] sm:$0xf] }
 0x627   :  { %v13452_v47 = vld [vmem:[#allocation7 + $0x5ec] sm:$0xf] }
 0x628   :  { %8149 = vmatpush.bf16.msra.mxu1 %v11654_v19  ;;  %v7910_v19 = vpop.f32.mrf.mxu2  ;;  %8074 = vmatpush.bf16.msra.mxu3 %v11858_v55  ;;  %v12214_v3 = vor.u32 %v13452_v47, %v12211_v48  ;;  %v13404_v55 = vld [vmem:[#allocation7 + $0x46c] sm:$0xf]  ;;  %v12147_v48 = vld [vmem:[#allocation7 + $0x578] sm:$0xf0] }
 0x629   :  { %v13436_v19 = vld [vmem:[#allocation7 + $0x56c] sm:$0xf]  ;;  %v12022_v61 = vor.u32 %v13404_v55, %v12019_v46 }
 0x62a   :  { %8162 = vmatpush.bf16.msra.mxu2 %v11782_v35  ;;  %8137 = vmatpush.bf16.msra.mxu0 %v11510_v21  ;;  %v11462_v35 = vor.u32 %v13264_v18, %v11459_v56  ;;  %v13416_v21 = vld [vmem:[#allocation7 + $0x4cc] sm:$0xf] }
 0x62b   :  { %v13472_v18 = vld [vmem:[#allocation7 + $0x68c] sm:$0xf] }
 0x62c   :  { %8150 = vmatpush.bf16.msra.mxu1 %v11638_v59  ;;  %v12067_v59 = vld [vmem:[#allocation7 + $0x4d8] sm:$0xf0]  ;;  %8075 = vmatpush.bf16.msra.mxu3 %v11842_v15  ;;  %v13464_v15 = vld [vmem:[#allocation7 + $0x64c] sm:$0xf] }
 0x62d   :  { %v12070_v8 = vor.u32 %v13416_v21, %v12067_v59  ;;  %v12131_v21 = vld [vmem:[#allocation7 + $0x558] sm:$0xf0] }
 0x62e   :  { %8163 = vmatpush.bf16.msra.mxu2 %v11766_v62  ;;  %8138 = vmatpush.bf16.msra.mxu0 %v11494_v29  ;;  %v13448_v62 = vld [vmem:[#allocation7 + $0x5cc] sm:$0xf]  ;;  %v12326_v29 = vor.u32 %v13480_v1, %v12323_v32  ;;  %v12385_v1 = vld [vmem:[#allocation7 + $0x748] sm:$0xf]  ;;  %v13498_v32 = vld [vmem:[#allocation7 + $0x754] sm:$0xf0] }
 0x62f   :  { %v12198_v5 = vor.u32 %v13448_v62, %v12195_v40  ;;  %8076 = vmatmul.bf16.vlgmr.msra.gmra.mxu3 %v13952_v58  ;;  %v12259_v62 = vld [vmem:[#allocation7 + $0x658] sm:$0xf0] }
 0x630   :  { %8151 = vmatpush.bf16.msra.mxu1 %v11622_v26  ;;  %v13444_v26 = vld [vmem:[#allocation7 + $0x5ac] sm:$0xf]  ;;  %8120 = vmatpush.bf16.msrb.mxu3 %v12466_v63  ;;  %v12006_v63 = vor.u32 %v13400_v60, %v12003_v30  ;;  %v11891_v60 = vld [vmem:[#allocation7 + $0x378] sm:$0xf0] }
 0x631   :  { %v12182_v17 = vor.u32 %v13444_v26, %v12179_v12  ;;  %v13428_v26 = vld [vmem:[#allocation7 + $0x52c] sm:$0xf]  ;;  %v12115_v12 = vld [vmem:[#allocation7 + $0x538] sm:$0xf0] }
 0x632   :  { %8164 = vmatpush.bf16.msra.mxu2 %v11750_v23  ;;  %8139 = vmatpush.bf16.msra.mxu0 %v11478_v34  ;;  %v13476_v23 = vld [vmem:[#allocation7 + $0x6ac] sm:$0xf]  ;;  %v12163_v34 = vld [vmem:[#allocation7 + $0x598] sm:$0xf0] }
 0x633   :  { %v12310_v45 = vor.u32 %v13476_v23, %v12307_v28  ;;  %v13460_v23 = vld [vmem:[#allocation7 + $0x62c] sm:$0xf]  ;;  %v12243_v28 = vld [vmem:[#allocation7 + $0x638] sm:$0xf0] }
 0x634   :  { %8152 = vmatpush.bf16.msra.mxu1 %v11606_v13  ;;  %8121 = vmatpush.bf16.msrb.mxu3 %v12450_v38  ;;  %v12434_v13 = vor.u32 %v13510_v6, %v12433_v27  ;;  %v12386_v38 = vor.u32 %v13498_v32, %v12385_v1  ;;  %v12369_v27 = vld [vmem:[#allocation7 + $0x728] sm:$0xf]  ;;  %v13494_v6 = vld [vmem:[#allocation7 + $0x734] sm:$0xf0]  ;;  %v13360_v1 = vld [vmem:[#allocation7 + $0x30c] sm:$0xf] }
 0x635   :  { %v11843_v32 = vld [vmem:[#allocation7 + $0x318] sm:$0xf0] }
 0x636   :  { %8165 = vmatpush.bf16.msra.mxu2 %v11734_v39  ;;  %8140 = vmatpush.bf16.msra.mxu0 %v11462_v35  ;;  %v13506_v39 = vld [vmem:[#allocation7 + $0x794] sm:$0xf0]  ;;  %v7934_v54 = vpop.f32.mrf.mxu0  ;;  %v12275_v35 = vld [vmem:[#allocation7 + $0x678] sm:$0xf0] }
 0x637   :  { %v7935_v0 = vadd.f32 %v7934_v54, %v6534_v31  ;;  %v12418_v50 = vor.u32 %v13506_v39, %v12417_v49  ;;  %v13424_v31 = vld [vmem:[#allocation7 + $0x50c] sm:$0xf]  ;;  %v12353_v49 = vld [vmem:[#allocation7 + $0x708] sm:$0xf]  ;;  %v13490_v39 = vld [vmem:[#allocation7 + $0x714] sm:$0xf0] }
 0x638   :  { %8153 = vmatpush.bf16.msra.mxu1 %v11590_v51  ;;  %v7947_v43 = vpop.f32.mrf.mxu1  ;;  %8122 = vmatpush.bf16.msrb.mxu3 %v12434_v13  ;;  %v13456_v13 = vld [vmem:[#allocation7 + $0x60c] sm:$0xf]  ;;  %v12354_v46 = vor.u32 %v13490_v39, %v12353_v49 }
 0x639   :  { %8141 = vmatmul.bf16.vlgmr.msra.gmra.mxu0 %v13946_v22  ;;  %v13408_v22 = vld [vmem:[#allocation7 + $0x48c] sm:$0xf]  ;;  %v7948_v51 = vadd.f32 %v7947_v43, %v7935_v0 }
 0x63a   :  { %8166 = vmatpush.bf16.msra.mxu2 %v11718_v11  ;;  %8185 = vmatpush.bf16.msrb.mxu0 %v12086_v53  ;;  %v12038_v56 = vor.u32 %v13408_v22, %v12035_v20  ;;  %v13502_v11 = vld [vmem:[#allocation7 + $0x774] sm:$0xf0]  ;;  %v12150_v53 = vor.u32 %v13436_v19, %v12147_v48  ;;  %v13392_v22 = vld [vmem:[#allocation7 + $0x40c] sm:$0xf]  ;;  %v11971_v20 = vld [vmem:[#allocation7 + $0x418] sm:$0xf0] }
 0x63b   :  { %8154 = vmatmul.bf16.vlgmr.msra.gmra.mxu1 %v13948_v25  ;;  %v13440_v25 = vld [vmem:[#allocation7 + $0x58c] sm:$0xf]  ;;  %v12402_v59 = vor.u32 %v13502_v11, %v12401_v52  ;;  %v11939_v19 = vld [vmem:[#allocation7 + $0x3d8] sm:$0xf0] }
 0x63c   :  { %8198 = vmatpush.bf16.msrb.mxu1 %v12214_v3  ;;  %v12166_v41 = vor.u32 %v13440_v25, %v12163_v34  ;;  %v12278_v3 = vor.u32 %v13468_v42, %v12275_v35  ;;  %8123 = vmatpush.bf16.msrb.mxu3 %v12418_v50  ;;  %v12099_v25 = vld [vmem:[#allocation7 + $0x518] sm:$0xf0]  ;;  %v12370_v34 = vor.u32 %v13494_v6, %v12369_v27  ;;  %v13388_v43 = vld [vmem:[#allocation7 + $0x3ec] sm:$0xf] }
 0x63d   :  { %8167 = vmatmul.bf16.vlgmr.msra.gmra.mxu2 %v13950_v10  ;;  %v12291_v10 = vld [vmem:[#allocation7 + $0x698] sm:$0xf0]  ;;  %v12102_v54 = vor.u32 %v13424_v31, %v12099_v25  ;;  %v13380_v50 = vld [vmem:[#allocation7 + $0x3ac] sm:$0xf] }
 0x63e   :  { %8211 = vmatpush.bf16.msrb.mxu2 %v12342_v57  ;;  %8186 = vmatpush.bf16.msrb.mxu0 %v12070_v8  ;;  %v12294_v47 = vor.u32 %v13472_v18, %v12291_v10  ;;  %v13432_v57 = vld [vmem:[#allocation7 + $0x54c] sm:$0xf]  ;;  %v7936_v33 = vpop.f32.mrf.mxu0  ;;  %v12227_v18 = vld [vmem:[#allocation7 + $0x618] sm:$0xf0] }
 0x63f   :  { %v12230_v55 = vor.u32 %v13456_v13, %v12227_v18  ;;  %v11923_v42 = vld [vmem:[#allocation7 + $0x3b8] sm:$0xf0]  ;;  %v13516_v33 = vld [vmem:[#allocation7 + $0x7ec] sm:$0xf] }
 0x640   :  { %8199 = vmatpush.bf16.msrb.mxu1 %v12198_v5  ;;  %v7960_v40 = vpop.f32.mrf.mxu2  ;;  %v7949_v2 = vpop.f32.mrf.mxu1  ;;  %v12134_v5 = vor.u32 %v13432_v57, %v12131_v21  ;;  %8124 = vmatpush.bf16.msrb.mxu3 %v12402_v59  ;;  %v11926_v35 = vor.u32 %v13380_v50, %v11923_v42  ;;  %v12419_v27 = vld [vmem:[#allocation7 + $0x798] sm:$0xf0]  ;;  %v13496_v18 = vld [vmem:[#allocation7 + $0x74c] sm:$0xf] }
 0x641   :  { %v14026_v8 = vadd.f32 %v7960_v40, %v7948_v51  ;;  %v13376_v51 = vld [vmem:[#allocation7 + $0x38c] sm:$0xf]  ;;  %v12467_v2 = vld [vmem:[#allocation7 + $0x7f8] sm:$0xf0] }
 0x642   :  { %8212 = vmatpush.bf16.msrb.mxu2 %v12326_v29  ;;  %8187 = vmatpush.bf16.msrb.mxu0 %v12054_v14  ;;  %v12262_v29 = vor.u32 %v13464_v15, %v12259_v62  ;;  %v11990_v14 = vor.u32 %v13396_v24, %v11987_v9  ;;  %v13364_v15 = vld [vmem:[#allocation7 + $0x32c] sm:$0xf]  ;;  %v11859_v62 = vld [vmem:[#allocation7 + $0x338] sm:$0xf0]  ;;  %v12470_v24 = vor.u32 %v13516_v33, %v12467_v2 }
 0x643   :  { %v11862_v40 = vor.u32 %v13364_v15, %v11859_v62  ;;  %v13512_v9 = vld [vmem:[#allocation7 + $0x7cc] sm:$0xf]  ;;  %v12403_v31 = vld [vmem:[#allocation7 + $0x778] sm:$0xf0] }
 0x644   :  { %8200 = vmatpush.bf16.msrb.mxu1 %v12182_v17  ;;  %v12118_v17 = vor.u32 %v13428_v26, %v12115_v12  ;;  %8125 = vmatpush.bf16.msrb.mxu3 %v12386_v38  ;;  %v13508_v12 = vld [vmem:[#allocation7 + $0x7ac] sm:$0xf]  ;;  %v12435_v38 = vld [vmem:[#allocation7 + $0x7b8] sm:$0xf0] }
 0x646   :  { %8213 = vmatpush.bf16.msrb.mxu2 %v12310_v45  ;;  %8188 = vmatpush.bf16.msrb.mxu0 %v12038_v56  ;;  %v12246_v45 = vor.u32 %v13460_v23, %v12243_v28  ;;  %v11974_v56 = vor.u32 %v13392_v22, %v11971_v20  ;;  %v12438_v23 = vor.u32 %v13508_v12, %v12435_v38  ;;  %v6535_v28 = vperm.slane %v14006_v7, 2 }
 0x648   :  { %8201 = vmatpush.bf16.msrb.mxu1 %v12166_v41  ;;  %v7962_v10 = vpop.f32.mrf.mxu2  ;;  %v11955_v41 = vld [vmem:[#allocation7 + $0x3f8] sm:$0xf0]  ;;  %8126 = vmatpush.bf16.msrb.mxu3 %v12370_v34 }
 0x649   :  { %v11958_v0 = vor.u32 %v13388_v43, %v11955_v41  ;;  %v12387_v10 = vld [vmem:[#allocation7 + $0x758] sm:$0xf0]  ;;  %v13492_v41 = vld [vmem:[#allocation7 + $0x72c] sm:$0xf] }
 0x64a   :  { %8214 = vmatpush.bf16.msrb.mxu2 %v12294_v47  ;;  %8189 = vmatpush.bf16.msrb.mxu0 %v12022_v61  ;;  %v13384_v47 = vld [vmem:[#allocation7 + $0x3cc] sm:$0xf]  ;;  %v11907_v61 = vld [vmem:[#allocation7 + $0x398] sm:$0xf0]  ;;  %v12390_v43 = vor.u32 %v13496_v18, %v12387_v10 }
 0x64b   :  { %v11942_v48 = vor.u32 %v13384_v47, %v11939_v19  ;;  %v13488_v47 = vld [vmem:[#allocation7 + $0x70c] sm:$0xf]  ;;  %v12355_v19 = vld [vmem:[#allocation7 + $0x718] sm:$0xf0] }
 0x64c   :  { %8202 = vmatpush.bf16.msrb.mxu1 %v12150_v53  ;;  %8127 = vmatpush.bf16.msrb.mxu3 %v12354_v46  ;;  %v13372_v53 = vld [vmem:[#allocation7 + $0x36c] sm:$0xf]  ;;  %v12358_v50 = vor.u32 %v13488_v47, %v12355_v19 }
 0x64e   :  { %8215 = vmatpush.bf16.msrb.mxu2 %v12278_v3  ;;  %8190 = vmatpush.bf16.msrb.mxu0 %v12006_v63  ;;  %v11875_v3 = vld [vmem:[#allocation7 + $0x358] sm:$0xf0] }
 0x64f   :  { %8128 = vmatmul.bf16.vlgmr.msrb.gmra.mxu3 %v14002_v44 }
 0x650   :  { %8203 = vmatpush.bf16.msrb.mxu1 %v12134_v5  ;;  %8172 = vmatpush.bf16.msra.mxu3 %v11958_v0  ;;  %v11846_v5 = vor.u32 %v13360_v1, %v11843_v32 }
 0x652   :  { %8216 = vmatpush.bf16.msrb.mxu2 %v12262_v29  ;;  %8191 = vmatpush.bf16.msrb.mxu0 %v11990_v14  ;;  %v12451_v29 = vld [vmem:[#allocation7 + $0x7d8] sm:$0xf0]  ;;  %v13504_v14 = vld [vmem:[#allocation7 + $0x78c] sm:$0xf] }
 0x653   :  { %v12454_v26 = vor.u32 %v13512_v9, %v12451_v29  ;;  %v12422_v20 = vor.u32 %v13504_v14, %v12419_v27 }
 0x654   :  { %8204 = vmatpush.bf16.msrb.mxu1 %v12118_v17  ;;  %8173 = vmatpush.bf16.msra.mxu3 %v11942_v48 }
 0x656   :  { %8217 = vmatpush.bf16.msrb.mxu2 %v12246_v45  ;;  %8192 = vmatpush.bf16.msrb.mxu0 %v11974_v56  ;;  %v14032_v52 = vpop.f32.mrf.mxu0  ;;  %v13500_v45 = vld [vmem:[#allocation7 + $0x76c] sm:$0xf] }
 0x657   :  { %v12406_v34 = vor.u32 %v13500_v45, %v12403_v31 }
 0x658   :  { %8205 = vmatpush.bf16.msrb.mxu1 %v12102_v54  ;;  %v14034_v11 = vpop.f32.mrf.mxu1  ;;  %8174 = vmatpush.bf16.msra.mxu3 %v11926_v35 }
 0x659   :  { %8193 = vmatmul.bf16.vlgmr.msrb.gmra.mxu0 %v13964_v37  ;;  %v11910_v37 = vor.u32 %v13376_v51, %v11907_v61 }
 0x65a   :  { %8218 = vmatpush.bf16.msrb.mxu2 %v12230_v55  ;;  %v12371_v55 = vld [vmem:[#allocation7 + $0x738] sm:$0xf0] }
 0x65b   :  { %8206 = vmatmul.bf16.vlgmr.msrb.gmra.mxu1 %v13966_v4  ;;  %v11894_v4 = vor.u32 %v13372_v53, %v11891_v60  ;;  %v12374_v46 = vor.u32 %v13492_v41, %v12371_v55 }
 0x65c   :  { %8175 = vmatpush.bf16.msra.mxu3 %v11910_v37 }
 0x65d   :  { %8219 = vmatmul.bf16.vlgmr.msrb.gmra.mxu2 %v13962_v36  ;;  %v13368_v36 = vld [vmem:[#allocation7 + $0x34c] sm:$0xf] }
 0x65e   :  { %v7988_v57 = vpop.f32.mrf.mxu0  ;;  %v11878_v59 = vor.u32 %v13368_v36, %v11875_v3 }
 0x660   :  { %v14036_v30 = vpop.f32.mrf.mxu2  ;;  %v8001_v21 = vpop.f32.mrf.mxu1  ;;  %8176 = vmatpush.bf16.msra.mxu3 %v11894_v4 }
 0x664   :  { %8177 = vmatpush.bf16.msra.mxu3 %v11878_v59 }
 0x668   :  { %v8014_v63 = vpop.f32.mrf.mxu2  ;;  %8178 = vmatpush.bf16.msra.mxu3 %v11862_v40 }
 0x66c   :  { %8179 = vmatpush.bf16.msra.mxu3 %v11846_v5 }
 0x66f   :  { %8180 = vmatmul.bf16.vlgmr.msra.gmra.mxu3 %v13952_v58 }
 0x670   :  { %8224 = vmatpush.bf16.msrb.mxu3 %v12470_v24 }
 0x672   :  { %v7921_v13 = vpop.f32.mrf.mxu3 }
 0x673   :  { %v7922_v58 = vadd.f32 %v7921_v13, %v14019_v16 }
 0x674   :  { %8225 = vmatpush.bf16.msrb.mxu3 %v12454_v26 }
 0x676   :  { %v8038_v6 = vpop.f32.mrf.mxu0 }
 0x677   :  { %v8039_v17 = vadd.f32 %v8038_v6, %v6535_v28 }
 0x678   :  { %8226 = vmatpush.bf16.msrb.mxu3 %v12438_v23  ;;  %v8051_v22 = vpop.f32.mrf.mxu1 }
 0x679   :  { %v8052_v25 = vadd.f32 %v8051_v22, %v8039_v17 }
 0x67a   :  { %v7923_v0 = vpop.f32.mrf.mxu3 }
 0x67c   :  { %8227 = vmatpush.bf16.msrb.mxu3 %v12422_v20 }
 0x67e   :  { %v8040_v49 = vpop.f32.mrf.mxu0 }
 0x680   :  { %v8064_v56 = vpop.f32.mrf.mxu2  ;;  %8228 = vmatpush.bf16.msrb.mxu3 %v12406_v34  ;;  %v8053_v54 = vpop.f32.mrf.mxu1 }
 0x681   :  { %v8065_v39 = vadd.f32 %v8064_v56, %v8052_v25 }
 0x682   :  { %v7973_v42 = vpop.f32.mrf.mxu3 }
 0x683   :  { %v7974_v16 = vadd.f32 %v7973_v42, %v14026_v8 }
 0x684   :  { %8229 = vmatpush.bf16.msrb.mxu3 %v12390_v43 }
 0x685   :  { %v7987_v35 = vadd.f32 %v14032_v52, %v7974_v16 }
 0x687   :  { %v8000_v51 = vadd.f32 %v14034_v11, %v7987_v35 }
 0x688   :  { %v8066_v48 = vpop.f32.mrf.mxu2  ;;  %8230 = vmatpush.bf16.msrb.mxu3 %v12374_v46 }
 0x689   :  { %v8013_v61 = vadd.f32 %v14036_v30, %v8000_v51 }
 0x68a   :  { %v7975_v53 = vpop.f32.mrf.mxu3 }
 0x68c   :  { %8231 = vmatpush.bf16.msrb.mxu3 %v12358_v50 }
 0x68f   :  { %8232 = vmatmul.bf16.vlgmr.msrb.gmra.mxu3 %v14002_v44  ;;  %v6536_v44 = vperm.slane %v14006_v7, 3 }
 0x692   :  { %v8025_v57 = vpop.f32.mrf.mxu3 }
 0x693   :  { %v8026_v21 = vadd.f32 %v8025_v57, %v8013_v61 }
 0x695   :  { %v8241_v59 = vrot.slane %v8026_v21, 6 }
 0x696   :  { %v8090_v37 = vpop.f32.mrf.mxu0 }
 0x697   :  { %v8245_v15 = vsel %vm8244_vm1, %v7922_v58, %v8241_v59 }
 0x698   :  { %v8103_v60 = vpop.f32.mrf.mxu1 }
 0x69a   :  { %v8027_v62 = vpop.f32.mrf.mxu3 }
 0x69e   :  { %v8092_v36 = vpop.f32.mrf.mxu0 }
 0x6a0   :  { %v8116_v4 = vpop.f32.mrf.mxu2  ;;  %v8105_v3 = vpop.f32.mrf.mxu1 }
 0x6a8   :  { %v8118_v8 = vpop.f32.mrf.mxu2 }
 0x6b2   :  { %v8077_v33 = vpop.f32.mrf.mxu3 }
 0x6b3   :  { %v8078_v5 = vadd.f32 %v8077_v33, %v8065_v39 }
 0x6b5   :  { %v8091_v24 = vadd.f32 %v8090_v37, %v8078_v5 }
 0x6b6   :  { %v8142_v52 = vpop.f32.mrf.mxu0 }
 0x6b7   :  { %v8143_v40 = vadd.f32 %v8142_v52, %v6536_v44  ;;  %v8104_v9 = vadd.f32 %v8103_v60, %v8091_v24 }
 0x6b8   :  { %v8155_v11 = vpop.f32.mrf.mxu1 }
 0x6b9   :  { %v8156_v63 = vadd.f32 %v8155_v11, %v8143_v40  ;;  %v8117_v26 = vadd.f32 %v8116_v4, %v8104_v9 }
 0x6ba   :  { %v8079_v12 = vpop.f32.mrf.mxu3 }
 0x6be   :  { %v8144_v1 = vpop.f32.mrf.mxu0 }
 0x6c0   :  { %v8168_v30 = vpop.f32.mrf.mxu2  ;;  %v8157_v2 = vpop.f32.mrf.mxu1 }
 0x6c1   :  { %v8169_v32 = vadd.f32 %v8168_v30, %v8156_v63 }
 0x6c8   :  { %v8170_v29 = vpop.f32.mrf.mxu2 }
 0x6d2   :  { %v8129_v7 = vpop.f32.mrf.mxu3 }
 0x6d3   :  { %v8130_v34 = vadd.f32 %v8129_v7, %v8117_v26 }
 0x6d5   :  { %v8242_v58 = vrot.slane %v8130_v34, 4 }
 0x6d6   :  { %v8194_v38 = vpop.f32.mrf.mxu0 }
 0x6d8   :  { %v8207_v23 = vpop.f32.mrf.mxu1 }
 0x6da   :  { %v8131_v17 = vpop.f32.mrf.mxu3 }
 0x6de   :  { %v8196_v14 = vpop.f32.mrf.mxu0 }
 0x6e0   :  { %v8220_v28 = vpop.f32.mrf.mxu2  ;;  %v8209_v27 = vpop.f32.mrf.mxu1 }
 0x6e8   :  { %v8222_v6 = vpop.f32.mrf.mxu2 }
 0x6f2   :  { %v8181_v22 = vpop.f32.mrf.mxu3 }
 0x6f3   :  { %v8182_v45 = vadd.f32 %v8181_v22, %v8169_v32 }
 0x6f5   :  { %v8195_v31 = vadd.f32 %v8194_v38, %v8182_v45 }
 0x6f7   :  { %v8208_v25 = vadd.f32 %v8207_v23, %v8195_v31 }
 0x6f9   :  { %v8221_v13 = vadd.f32 %v8220_v28, %v8208_v25 }
 0x6fa   :  { %v8183_v20 = vpop.f32.mrf.mxu3 }
 0x712   :  { %v8233_v18 = vpop.f32.mrf.mxu3 }
 0x713   :  { %v8234_v10 = vadd.f32 %v8233_v18, %v8221_v13 }
 0x715   :  { %v8243_v56 = vrot.slane %v8234_v10, 2 }
 0x717   :  { %v8247_v49 = vsel %vm8246_vm2, %v8242_v58, %v8243_v56 }
 0x718   :  { %v8249_v39 = vsel %vm8248_vm3, %v8245_v15, %v8247_v49 }
 0x719   :  { %8251 = vst [vmem:[#allocation10] sm:$0xff] %v8249_v39 }
 0x71a   :  { %v8235_v54 = vpop.f32.mrf.mxu3  ;;  %8262 = dma.vmem_to_hbm [thread:$0]  %s8258_s21, 128, %s8260_s24, [#allocation4]  }
 0x71b   :  { %13657 = dma.done.wait [#allocation4], 128  }
 0x71c   :  { %13658 = vsyncadd [#allocation4], 4294967168 }
 0x71d   :  { %8267 = vsyncpa [#allocation3], 1 }
 0x71e   :  { %8268 = vsyncpa [#allocation6], 1 }
 0x71f   :  { %8269 = vsyncpa [#allocation9], 1 }
 0x720   :  { %8270 = vsyncpa [#allocation4], 1 }

</bundles_post_ra>
